<compile_context>
chip_gen: v6e
topology: v6e:2x2x1
jax: 0.10.0
libtpu: 0.0.40
codegen_flags: <defaults>
</compile_context>

<pallas_src>
import functools

import jax
import jax.numpy as jnp
from jax.experimental import pallas as pl
from jax.experimental.pallas import tpu as pltpu

LANES = 128


def _round_up(n, m):
    return (n + m - 1) // m * m


def _pick_batch_tile(batch, max_tile=32):
    """Batch-tile size: multiple of 8 (sublanes), >=2 grid steps when batch allows
    (v7x has 2 TensorCores), capped so per-step VMEM stays well under scoped limits."""
    if batch <= 8:
        return 8
    return min(max_tile, _round_up((batch + 1) // 2, 8))


# --------------------------------------------------- weight transforms (JAX) ----

def _conv_toeplitz(w_oihw, in_w, out_w):
    """Width-axis Toeplitz expansion of a conv weight, split by output-column parity.

    Returns (TE, TO), each (k, in_w*Cin, (out_w//2)*Cout) bf16 with
      TE[di, w*Cin+ci, j*Cout+co] = w[co, ci, di, w - 2*j]      if 0 <= w-2*j < k
      TO[di, w*Cin+ci, j*Cout+co] = w[co, ci, di, w - (2*j+1)]  if 0 <= w-(2*j+1) < k
    so the conv along W (plus the width half of the 2x2 max-pool) becomes, per kernel
    row di, two MXU matmuls against a row-shifted slab of the input; the pool is then
    an elementwise max of the two results.
    """
    Cout, Cin, k, _ = w_oihw.shape
    wk = jnp.transpose(w_oihw.astype(jnp.float32), (2, 3, 1, 0))      # (di, dj, ci, co)
    n = out_w // 2

    def one(parity):
        ow = 2 * jnp.arange(n) + parity                               # (n,)
        w_idx = jnp.arange(in_w)
        dj = w_idx[:, None] - ow[None, :]                             # (in_w, n)
        valid = (dj >= 0) & (dj < k)
        t = wk[:, jnp.clip(dj, 0, k - 1), :, :]                       # (k, in_w, n, ci, co)
        t = jnp.where(valid[None, :, :, None, None], t, 0.0)
        t = jnp.transpose(t, (0, 1, 3, 2, 4))                         # (k, in_w, ci, n, co)
        return t.reshape(k, in_w * Cin, n * Cout).astype(jnp.bfloat16)

    return one(0), one(1)


def _fc1_slabs(w_fc1):
    """Permute fc1 weights (PyTorch flatten order c*16 + h2*4 + w2) into 4 per-h2
    slabs whose row order (w2*64 + c) matches the kernel's conv2 activation layout,
    so the flatten/transpose disappears from the kernel."""
    f = w_fc1.shape[1]
    w = w_fc1.reshape(64, 4, 4, f)            # (c, h2, w2, F)
    w = jnp.transpose(w, (1, 2, 0, 3))        # (h2, w2, c, F)
    return w.reshape(4, 4 * 64, f).astype(jnp.bfloat16)


# ------------------------------------------------------------------- kernel ----

def _cnn_fused_kernel(x_ref, t1e_ref, t1o_ref, b1_ref,
                      t2e_ref, t2o_ref, b2_ref,
                      w1_ref, bf1_ref, w2_ref, bf2_ref,
                      o_ref, *, tb, num_classes):
    f32 = jnp.float32

    # ---- conv1 (5x5, 1->32) + 2x2 max-pool + ReLU -----------------------------
    # x_ref:   (28, tb, 32) bf16, [h, b, w]   (w zero-padded 28->32)
    # t1?_ref: (5, 32, 384) bf16, [di, w, ow2*32 + co]
    acc_e = jnp.zeros((24 * tb, 12 * 32), f32)
    acc_o = jnp.zeros((24 * tb, 12 * 32), f32)
    for di in range(5):
        lhs = x_ref[di:di + 24, :, :].reshape(24 * tb, 32)            # rows = (oh, b)
        acc_e = acc_e + jnp.dot(lhs, t1e_ref[di], preferred_element_type=f32)
        acc_o = acc_o + jnp.dot(lhs, t1o_ref[di], preferred_element_type=f32)
    m = jnp.maximum(acc_e, acc_o).reshape(12, 2 * tb, 12 * 32)        # pool over ow
    m = jnp.maximum(m[:, :tb, :], m[:, tb:, :])                       # pool over oh
    a1 = jnp.maximum(m + b1_ref[...], 0.0).astype(jnp.bfloat16)       # (12, tb, 384)

    # ---- conv2 (5x5, 32->64) + 2x2 max-pool + ReLU ----------------------------
    # a1 lanes (= w1*32 + ci) are exactly the K index of t2?_ref.
    acc_e = jnp.zeros((8 * tb, 4 * 64), f32)
    acc_o = jnp.zeros((8 * tb, 4 * 64), f32)
    for di in range(5):
        lhs = a1[di:di + 8, :, :].reshape(8 * tb, 12 * 32)            # rows = (oh, b)
        acc_e = acc_e + jnp.dot(lhs, t2e_ref[di], preferred_element_type=f32)
        acc_o = acc_o + jnp.dot(lhs, t2o_ref[di], preferred_element_type=f32)
    m = jnp.maximum(acc_e, acc_o).reshape(4, 2 * tb, 4 * 64)
    m = jnp.maximum(m[:, :tb, :], m[:, tb:, :])
    a2 = jnp.maximum(m + b2_ref[...], 0.0).astype(jnp.bfloat16)       # (4, tb, 256)

    # ---- fc1 (1024 -> 128) + ReLU ---------------------------------------------
    h = jnp.zeros((tb, 128), f32)
    for p in range(4):                                                # p = pooled row h2
        h = h + jnp.dot(a2[p], w1_ref[p], preferred_element_type=f32)
    h = jnp.maximum(h + bf1_ref[...], 0.0).astype(jnp.bfloat16)

    # ---- fc2 (+ padded lanes) + log_softmax -----------------------------------
    logits = jnp.dot(h, w2_ref[...], preferred_element_type=f32) + bf2_ref[...]
    col = jax.lax.broadcasted_iota(jnp.int32, logits.shape, 1)
    logits = jnp.where(col < num_classes, logits, jnp.float32(-1e30))
    mx = jnp.max(logits, axis=1, keepdims=True)
    s = logits - mx
    lse = jnp.log(jnp.sum(jnp.exp(s), axis=1, keepdims=True))
    o_ref[...] = s - lse


# ------------------------------------------------------------------ wrapper ----

def cnn_forward(params, x_nchw):
    """CNN forward: x (B, 1, 28, 28) -> (B, num_classes) log-probabilities."""
    num_classes = params["w_fc2"].shape[1]
    B = x_nchw.shape[0]
    tb = _pick_batch_tile(B)
    nt = pl.cdiv(B, tb)
    b_pad = nt * tb
    ncp = _round_up(max(num_classes, LANES), LANES)

    # Input -> [h, b, w] with W zero-padded 28 -> 32 (16-aligned bf16 K dim).
    x = x_nchw.reshape(B, 28, 28).astype(jnp.bfloat16)
    x = jnp.transpose(x, (1, 0, 2))
    x = jnp.pad(x, ((0, 0), (0, b_pad - B), (0, 4)))                  # (28, b_pad, 32)

    # One-time weight transforms (tiny, pure JAX).
    t1e, t1o = _conv_toeplitz(params["w_conv1"], 32, 24)              # (5, 32, 384)
    t2e, t2o = _conv_toeplitz(params["w_conv2"], 12, 8)               # (5, 384, 256)
    b1 = jnp.tile(params["b_conv1"].astype(jnp.float32), 12).reshape(1, 384)
    b2 = jnp.tile(params["b_conv2"].astype(jnp.float32), 4).reshape(1, 256)
    w1p = _fc1_slabs(params["w_fc1"])                                 # (4, 256, 128)
    bf1 = params["b_fc1"].astype(jnp.float32).reshape(1, 128)
    w2p = jnp.pad(params["w_fc2"].astype(jnp.bfloat16),
                  ((0, 0), (0, ncp - num_classes)))                   # (128, ncp)
    bf2 = jnp.pad(params["b_fc2"].astype(jnp.float32).reshape(1, -1),
                  ((0, 0), (0, ncp - num_classes)))                   # (1, ncp)

    def const(shape):
        return pl.BlockSpec(shape, lambda i: (0,) * len(shape))

    flops = 2 * b_pad * (24 * 24 * 25 * 32 + 8 * 8 * 800 * 64 + 1024 * 128 + 128 * ncp)
    w_bytes = 2 * (t1e.size + t1o.size + t2e.size + t2o.size + w1p.size + w2p.size) \
        + 4 * (b1.size + b2.size + bf1.size + bf2.size)
    cost = pl.CostEstimate(flops=flops,
                           transcendentals=b_pad * (ncp + 1),
                           bytes_accessed=x.size * 2 + b_pad * ncp * 4 + w_bytes)

    out = pl.pallas_call(
        functools.partial(_cnn_fused_kernel, tb=tb, num_classes=num_classes),
        out_shape=jax.ShapeDtypeStruct((b_pad, ncp), jnp.float32),
        grid=(nt,),
        in_specs=[
            pl.BlockSpec((28, tb, 32), lambda i: (0, i, 0)),          # input tile
            const((5, 32, 384)), const((5, 32, 384)), const((1, 384)),    # conv1
            const((5, 384, 256)), const((5, 384, 256)), const((1, 256)),  # conv2
            const((4, 256, 128)), const((1, 128)),                        # fc1
            const((128, ncp)), const((1, ncp)),                           # fc2
        ],
        out_specs=pl.BlockSpec((tb, ncp), lambda i: (i, 0)),
        compiler_params=pltpu.CompilerParams(
            dimension_semantics=("parallel",),
            vmem_limit_bytes=32 * 1024 * 1024),
        cost_estimate=cost,
    )(x, t1e, t1o, b1, t2e, t2o, b2, w1p, bf1, w2p, bf2)
    return out[:B, :num_classes]


# -------------------------------------------------------- reference & params ----

def _reference_forward(params, x_nchw):
    """Pure-JAX (XLA) f32 reference of the PyTorch forward, for validation."""
    def conv(x, w, b):
        y = jax.lax.conv_general_dilated(
            x, w, window_strides=(1, 1), padding="VALID",
            dimension_numbers=("NCHW", "OIHW", "NCHW"))
        return y + b[None, :, None, None]

    def pool2(x):
        b, c, h, w = x.shape
        return x.reshape(b, c, h // 2, 2, w // 2, 2).max(axis=(3, 5))

    a = jax.nn.relu(pool2(conv(x_nchw, params["w_conv1"], params["b_conv1"])))
    a = jax.nn.relu(pool2(conv(a, params["w_conv2"], params["b_conv2"])))
    f = a.reshape(a.shape[0], -1)                       # PyTorch (C,H,W) flatten
    h = jax.nn.relu(f @ params["w_fc1"] + params["b_fc1"])
    logits = h @ params["w_fc2"] + params["b_fc2"]
    return jax.nn.log_softmax(logits, axis=1)


def init_params(key, num_classes):
    ks = jax.random.split(key, 8)
    return {
        "w_conv1": jax.random.normal(ks[0], (32, 1, 5, 5), jnp.float32) * 0.1,
        "b_conv1": jax.random.normal(ks[1], (32,), jnp.float32) * 0.01,
        "w_conv2": jax.random.normal(ks[2], (64, 32, 5, 5), jnp.float32) * 0.05,
        "b_conv2": jax.random.normal(ks[3], (64,), jnp.float32) * 0.01,
        "w_fc1": jax.random.normal(ks[4], (1024, 128), jnp.float32) * 0.03,
        "b_fc1": jax.random.normal(ks[5], (128,), jnp.float32) * 0.01,
        "w_fc2": jax.random.normal(ks[6], (128, num_classes), jnp.float32) * 0.1,
        "b_fc2": jax.random.normal(ks[7], (num_classes,), jnp.float32) * 0.01,
    }


if __name__ == "__main__":
    num_classes = 10
    key = jax.random.PRNGKey(0)
    pkey, xkey = jax.random.split(key)
    params = init_params(pkey, num_classes)
    x = jax.random.normal(xkey, (2, 1, 28, 28), jnp.float32)

    out = jax.jit(cnn_forward)(params, x)
    jax.block_until_ready(out)

    assert out.shape == (2, num_classes)
    assert bool(jnp.all(jnp.isfinite(out)))
    # rows of log_softmax must sum (in prob space) to ~1
    assert bool(jnp.allclose(jnp.sum(jnp.exp(out), axis=1), 1.0, atol=1e-4))
    # agree with a pure-JAX f32 reference (bf16 MXU operands -> loose tolerance)
    ref = _reference_forward(params, x)
    err = float(jnp.max(jnp.abs(out - ref)))
    assert err < 0.5, f"mismatch vs reference: max |diff| = {err}"
    print("KERNEL_OK")
</pallas_src>

<mosaic_0001>
module attributes {stable_mosaic.version = 11 : i64} {
  func.func @_cnn_fused_kernel(%arg0: i32, %arg1: memref<28x8x32xbf16, #tpu.memory_space<vmem>>, %arg2: memref<5x32x384xbf16, #tpu.memory_space<vmem>>, %arg3: memref<5x32x384xbf16, #tpu.memory_space<vmem>>, %arg4: memref<1x384xf32, #tpu.memory_space<vmem>>, %arg5: memref<5x384x256xbf16, #tpu.memory_space<vmem>>, %arg6: memref<5x384x256xbf16, #tpu.memory_space<vmem>>, %arg7: memref<1x256xf32, #tpu.memory_space<vmem>>, %arg8: memref<4x256x128xbf16, #tpu.memory_space<vmem>>, %arg9: memref<1x128xf32, #tpu.memory_space<vmem>>, %arg10: memref<128x128xbf16, #tpu.memory_space<vmem>>, %arg11: memref<1x128xf32, #tpu.memory_space<vmem>>, %arg12: memref<8x128xf32, #tpu.memory_space<vmem>>) attributes {dimension_semantics = [#tpu.dimension_semantics<parallel>], iteration_bounds = array<i64: 1>, scalar_prefetch = 0 : i64, scratch_operands = 0 : i64, tpu.core_type = #tpu.core_type<tc>, window_params = [{transform_indices = @transform_0, window_bounds = array<i64: 28, 8, 32>}, {pipeline_mode = #tpu.pipeline_mode<synchronous>, transform_indices = @transform_1, window_bounds = array<i64: 5, 32, 384>}, {pipeline_mode = #tpu.pipeline_mode<synchronous>, transform_indices = @transform_2, window_bounds = array<i64: 5, 32, 384>}, {pipeline_mode = #tpu.pipeline_mode<synchronous>, transform_indices = @transform_3, window_bounds = array<i64: 1, 384>}, {pipeline_mode = #tpu.pipeline_mode<synchronous>, transform_indices = @transform_4, window_bounds = array<i64: 5, 384, 256>}, {pipeline_mode = #tpu.pipeline_mode<synchronous>, transform_indices = @transform_5, window_bounds = array<i64: 5, 384, 256>}, {pipeline_mode = #tpu.pipeline_mode<synchronous>, transform_indices = @transform_6, window_bounds = array<i64: 1, 256>}, {pipeline_mode = #tpu.pipeline_mode<synchronous>, transform_indices = @transform_7, window_bounds = array<i64: 4, 256, 128>}, {pipeline_mode = #tpu.pipeline_mode<synchronous>, transform_indices = @transform_8, window_bounds = array<i64: 1, 128>}, {pipeline_mode = #tpu.pipeline_mode<synchronous>, transform_indices = @transform_9, window_bounds = array<i64: 128, 128>}, {pipeline_mode = #tpu.pipeline_mode<synchronous>, transform_indices = @transform_10, window_bounds = array<i64: 1, 128>}, {transform_indices = @transform_11, window_bounds = array<i64: 8, 128>}]} {
    %cst = arith.constant 0.000000e+00 : f32
    %0 = vector.broadcast %cst : f32 to vector<192x384xf32>
    %cst_0 = arith.constant 0.000000e+00 : f32
    %1 = vector.broadcast %cst_0 : f32 to vector<192x384xf32>
    %c0 = arith.constant 0 : index
    %c0_1 = arith.constant 0 : index
    %c0_2 = arith.constant 0 : index
    %2 = vector.load %arg1[%c0, %c0_1, %c0_2] : memref<28x8x32xbf16, #tpu.memory_space<vmem>>, vector<24x8x32xbf16>
    %3 = vector.shape_cast %2 : vector<24x8x32xbf16> to vector<192x32xbf16>
    %c0_3 = arith.constant 0 : index
    %c0_4 = arith.constant 0 : index
    %c0_5 = arith.constant 0 : index
    %4 = vector.load %arg2[%c0_3, %c0_4, %c0_5] : memref<5x32x384xbf16, #tpu.memory_space<vmem>>, vector<1x32x384xbf16>
    %5 = vector.shape_cast %4 : vector<1x32x384xbf16> to vector<32x384xbf16>
    %cst_6 = arith.constant dense<0.000000e+00> : vector<192x384xf32>
    %6 = tpu.matmul %3, %5, %cst_6 {dimension_numbers = #tpu.dot_dimension_numbers<[1], [0], [0], [1], [0, 0, 1, 1], [], []>} : vector<192x32xbf16>, vector<32x384xbf16>, vector<192x384xf32> -> vector<192x384xf32>
    %7 = arith.addf %0, %6 : vector<192x384xf32>
    %c0_7 = arith.constant 0 : index
    %c0_8 = arith.constant 0 : index
    %c0_9 = arith.constant 0 : index
    %8 = vector.load %arg3[%c0_7, %c0_8, %c0_9] : memref<5x32x384xbf16, #tpu.memory_space<vmem>>, vector<1x32x384xbf16>
    %9 = vector.shape_cast %8 : vector<1x32x384xbf16> to vector<32x384xbf16>
    %cst_10 = arith.constant dense<0.000000e+00> : vector<192x384xf32>
    %10 = tpu.matmul %3, %9, %cst_10 {dimension_numbers = #tpu.dot_dimension_numbers<[1], [0], [0], [1], [0, 0, 1, 1], [], []>} : vector<192x32xbf16>, vector<32x384xbf16>, vector<192x384xf32> -> vector<192x384xf32>
    %11 = arith.addf %1, %10 : vector<192x384xf32>
    %c1 = arith.constant 1 : index
    %c0_11 = arith.constant 0 : index
    %c0_12 = arith.constant 0 : index
    %12 = vector.load %arg1[%c1, %c0_11, %c0_12] : memref<28x8x32xbf16, #tpu.memory_space<vmem>>, vector<24x8x32xbf16>
    %13 = vector.shape_cast %12 : vector<24x8x32xbf16> to vector<192x32xbf16>
    %c1_13 = arith.constant 1 : index
    %c0_14 = arith.constant 0 : index
    %c0_15 = arith.constant 0 : index
    %14 = vector.load %arg2[%c1_13, %c0_14, %c0_15] : memref<5x32x384xbf16, #tpu.memory_space<vmem>>, vector<1x32x384xbf16>
    %15 = vector.shape_cast %14 : vector<1x32x384xbf16> to vector<32x384xbf16>
    %cst_16 = arith.constant dense<0.000000e+00> : vector<192x384xf32>
    %16 = tpu.matmul %13, %15, %cst_16 {dimension_numbers = #tpu.dot_dimension_numbers<[1], [0], [0], [1], [0, 0, 1, 1], [], []>} : vector<192x32xbf16>, vector<32x384xbf16>, vector<192x384xf32> -> vector<192x384xf32>
    %17 = arith.addf %7, %16 : vector<192x384xf32>
    %c1_17 = arith.constant 1 : index
    %c0_18 = arith.constant 0 : index
    %c0_19 = arith.constant 0 : index
    %18 = vector.load %arg3[%c1_17, %c0_18, %c0_19] : memref<5x32x384xbf16, #tpu.memory_space<vmem>>, vector<1x32x384xbf16>
    %19 = vector.shape_cast %18 : vector<1x32x384xbf16> to vector<32x384xbf16>
    %cst_20 = arith.constant dense<0.000000e+00> : vector<192x384xf32>
    %20 = tpu.matmul %13, %19, %cst_20 {dimension_numbers = #tpu.dot_dimension_numbers<[1], [0], [0], [1], [0, 0, 1, 1], [], []>} : vector<192x32xbf16>, vector<32x384xbf16>, vector<192x384xf32> -> vector<192x384xf32>
    %21 = arith.addf %11, %20 : vector<192x384xf32>
    %c2 = arith.constant 2 : index
    %c0_21 = arith.constant 0 : index
    %c0_22 = arith.constant 0 : index
    %22 = vector.load %arg1[%c2, %c0_21, %c0_22] : memref<28x8x32xbf16, #tpu.memory_space<vmem>>, vector<24x8x32xbf16>
    %23 = vector.shape_cast %22 : vector<24x8x32xbf16> to vector<192x32xbf16>
    %c2_23 = arith.constant 2 : index
    %c0_24 = arith.constant 0 : index
    %c0_25 = arith.constant 0 : index
    %24 = vector.load %arg2[%c2_23, %c0_24, %c0_25] : memref<5x32x384xbf16, #tpu.memory_space<vmem>>, vector<1x32x384xbf16>
    %25 = vector.shape_cast %24 : vector<1x32x384xbf16> to vector<32x384xbf16>
    %cst_26 = arith.constant dense<0.000000e+00> : vector<192x384xf32>
    %26 = tpu.matmul %23, %25, %cst_26 {dimension_numbers = #tpu.dot_dimension_numbers<[1], [0], [0], [1], [0, 0, 1, 1], [], []>} : vector<192x32xbf16>, vector<32x384xbf16>, vector<192x384xf32> -> vector<192x384xf32>
    %27 = arith.addf %17, %26 : vector<192x384xf32>
    %c2_27 = arith.constant 2 : index
    %c0_28 = arith.constant 0 : index
    %c0_29 = arith.constant 0 : index
    %28 = vector.load %arg3[%c2_27, %c0_28, %c0_29] : memref<5x32x384xbf16, #tpu.memory_space<vmem>>, vector<1x32x384xbf16>
    %29 = vector.shape_cast %28 : vector<1x32x384xbf16> to vector<32x384xbf16>
    %cst_30 = arith.constant dense<0.000000e+00> : vector<192x384xf32>
    %30 = tpu.matmul %23, %29, %cst_30 {dimension_numbers = #tpu.dot_dimension_numbers<[1], [0], [0], [1], [0, 0, 1, 1], [], []>} : vector<192x32xbf16>, vector<32x384xbf16>, vector<192x384xf32> -> vector<192x384xf32>
    %31 = arith.addf %21, %30 : vector<192x384xf32>
    %c3 = arith.constant 3 : index
    %c0_31 = arith.constant 0 : index
    %c0_32 = arith.constant 0 : index
    %32 = vector.load %arg1[%c3, %c0_31, %c0_32] : memref<28x8x32xbf16, #tpu.memory_space<vmem>>, vector<24x8x32xbf16>
    %33 = vector.shape_cast %32 : vector<24x8x32xbf16> to vector<192x32xbf16>
    %c3_33 = arith.constant 3 : index
    %c0_34 = arith.constant 0 : index
    %c0_35 = arith.constant 0 : index
    %34 = vector.load %arg2[%c3_33, %c0_34, %c0_35] : memref<5x32x384xbf16, #tpu.memory_space<vmem>>, vector<1x32x384xbf16>
    %35 = vector.shape_cast %34 : vector<1x32x384xbf16> to vector<32x384xbf16>
    %cst_36 = arith.constant dense<0.000000e+00> : vector<192x384xf32>
    %36 = tpu.matmul %33, %35, %cst_36 {dimension_numbers = #tpu.dot_dimension_numbers<[1], [0], [0], [1], [0, 0, 1, 1], [], []>} : vector<192x32xbf16>, vector<32x384xbf16>, vector<192x384xf32> -> vector<192x384xf32>
    %37 = arith.addf %27, %36 : vector<192x384xf32>
    %c3_37 = arith.constant 3 : index
    %c0_38 = arith.constant 0 : index
    %c0_39 = arith.constant 0 : index
    %38 = vector.load %arg3[%c3_37, %c0_38, %c0_39] : memref<5x32x384xbf16, #tpu.memory_space<vmem>>, vector<1x32x384xbf16>
    %39 = vector.shape_cast %38 : vector<1x32x384xbf16> to vector<32x384xbf16>
    %cst_40 = arith.constant dense<0.000000e+00> : vector<192x384xf32>
    %40 = tpu.matmul %33, %39, %cst_40 {dimension_numbers = #tpu.dot_dimension_numbers<[1], [0], [0], [1], [0, 0, 1, 1], [], []>} : vector<192x32xbf16>, vector<32x384xbf16>, vector<192x384xf32> -> vector<192x384xf32>
    %41 = arith.addf %31, %40 : vector<192x384xf32>
    %c4 = arith.constant 4 : index
    %c0_41 = arith.constant 0 : index
    %c0_42 = arith.constant 0 : index
    %42 = vector.load %arg1[%c4, %c0_41, %c0_42] : memref<28x8x32xbf16, #tpu.memory_space<vmem>>, vector<24x8x32xbf16>
    %43 = vector.shape_cast %42 : vector<24x8x32xbf16> to vector<192x32xbf16>
    %c4_43 = arith.constant 4 : index
    %c0_44 = arith.constant 0 : index
    %c0_45 = arith.constant 0 : index
    %44 = vector.load %arg2[%c4_43, %c0_44, %c0_45] : memref<5x32x384xbf16, #tpu.memory_space<vmem>>, vector<1x32x384xbf16>
    %45 = vector.shape_cast %44 : vector<1x32x384xbf16> to vector<32x384xbf16>
    %cst_46 = arith.constant dense<0.000000e+00> : vector<192x384xf32>
    %46 = tpu.matmul %43, %45, %cst_46 {dimension_numbers = #tpu.dot_dimension_numbers<[1], [0], [0], [1], [0, 0, 1, 1], [], []>} : vector<192x32xbf16>, vector<32x384xbf16>, vector<192x384xf32> -> vector<192x384xf32>
    %47 = arith.addf %37, %46 : vector<192x384xf32>
    %c4_47 = arith.constant 4 : index
    %c0_48 = arith.constant 0 : index
    %c0_49 = arith.constant 0 : index
    %48 = vector.load %arg3[%c4_47, %c0_48, %c0_49] : memref<5x32x384xbf16, #tpu.memory_space<vmem>>, vector<1x32x384xbf16>
    %49 = vector.shape_cast %48 : vector<1x32x384xbf16> to vector<32x384xbf16>
    %cst_50 = arith.constant dense<0.000000e+00> : vector<192x384xf32>
    %50 = tpu.matmul %43, %49, %cst_50 {dimension_numbers = #tpu.dot_dimension_numbers<[1], [0], [0], [1], [0, 0, 1, 1], [], []>} : vector<192x32xbf16>, vector<32x384xbf16>, vector<192x384xf32> -> vector<192x384xf32>
    %51 = arith.addf %41, %50 : vector<192x384xf32>
    %52 = arith.maximumf %47, %51 : vector<192x384xf32>
    %53 = vector.shape_cast %52 : vector<192x384xf32> to vector<12x16x384xf32>
    %54 = vector.extract_strided_slice %53 {offsets = [0, 0, 0], sizes = [12, 8, 384], strides = [1, 1, 1]} : vector<12x16x384xf32> to vector<12x8x384xf32>
    %55 = vector.extract_strided_slice %53 {offsets = [0, 8, 0], sizes = [12, 8, 384], strides = [1, 1, 1]} : vector<12x16x384xf32> to vector<12x8x384xf32>
    %56 = arith.maximumf %54, %55 : vector<12x8x384xf32>
    %c0_51 = arith.constant 0 : index
    %c0_52 = arith.constant 0 : index
    %57 = vector.load %arg4[%c0_51, %c0_52] : memref<1x384xf32, #tpu.memory_space<vmem>>, vector<1x384xf32>
    %58 = vector.shape_cast %57 : vector<1x384xf32> to vector<1x1x384xf32>
    %59 = vector.broadcast %58 : vector<1x1x384xf32> to vector<12x8x384xf32>
    %60 = arith.addf %56, %59 : vector<12x8x384xf32>
    %cst_53 = arith.constant 0.000000e+00 : f32
    %61 = vector.broadcast %cst_53 : f32 to vector<12x8x384xf32>
    %62 = arith.maximumf %60, %61 : vector<12x8x384xf32>
    %63 = arith.truncf %62 : vector<12x8x384xf32> to vector<12x8x384xbf16>
    %cst_54 = arith.constant 0.000000e+00 : f32
    %64 = vector.broadcast %cst_54 : f32 to vector<64x256xf32>
    %cst_55 = arith.constant 0.000000e+00 : f32
    %65 = vector.broadcast %cst_55 : f32 to vector<64x256xf32>
    %66 = vector.extract_strided_slice %63 {offsets = [0, 0, 0], sizes = [8, 8, 384], strides = [1, 1, 1]} : vector<12x8x384xbf16> to vector<8x8x384xbf16>
    %67 = vector.shape_cast %66 : vector<8x8x384xbf16> to vector<64x384xbf16>
    %c0_56 = arith.constant 0 : index
    %c0_57 = arith.constant 0 : index
    %c0_58 = arith.constant 0 : index
    %68 = vector.load %arg5[%c0_56, %c0_57, %c0_58] : memref<5x384x256xbf16, #tpu.memory_space<vmem>>, vector<1x384x256xbf16>
    %69 = vector.shape_cast %68 : vector<1x384x256xbf16> to vector<384x256xbf16>
    %cst_59 = arith.constant dense<0.000000e+00> : vector<64x256xf32>
    %70 = tpu.matmul %67, %69, %cst_59 {dimension_numbers = #tpu.dot_dimension_numbers<[1], [0], [0], [1], [0, 0, 1, 1], [], []>} : vector<64x384xbf16>, vector<384x256xbf16>, vector<64x256xf32> -> vector<64x256xf32>
    %71 = arith.addf %64, %70 : vector<64x256xf32>
    %c0_60 = arith.constant 0 : index
    %c0_61 = arith.constant 0 : index
    %c0_62 = arith.constant 0 : index
    %72 = vector.load %arg6[%c0_60, %c0_61, %c0_62] : memref<5x384x256xbf16, #tpu.memory_space<vmem>>, vector<1x384x256xbf16>
    %73 = vector.shape_cast %72 : vector<1x384x256xbf16> to vector<384x256xbf16>
    %cst_63 = arith.constant dense<0.000000e+00> : vector<64x256xf32>
    %74 = tpu.matmul %67, %73, %cst_63 {dimension_numbers = #tpu.dot_dimension_numbers<[1], [0], [0], [1], [0, 0, 1, 1], [], []>} : vector<64x384xbf16>, vector<384x256xbf16>, vector<64x256xf32> -> vector<64x256xf32>
    %75 = arith.addf %65, %74 : vector<64x256xf32>
    %76 = vector.extract_strided_slice %63 {offsets = [1, 0, 0], sizes = [8, 8, 384], strides = [1, 1, 1]} : vector<12x8x384xbf16> to vector<8x8x384xbf16>
    %77 = vector.shape_cast %76 : vector<8x8x384xbf16> to vector<64x384xbf16>
    %c1_64 = arith.constant 1 : index
    %c0_65 = arith.constant 0 : index
    %c0_66 = arith.constant 0 : index
    %78 = vector.load %arg5[%c1_64, %c0_65, %c0_66] : memref<5x384x256xbf16, #tpu.memory_space<vmem>>, vector<1x384x256xbf16>
    %79 = vector.shape_cast %78 : vector<1x384x256xbf16> to vector<384x256xbf16>
    %cst_67 = arith.constant dense<0.000000e+00> : vector<64x256xf32>
    %80 = tpu.matmul %77, %79, %cst_67 {dimension_numbers = #tpu.dot_dimension_numbers<[1], [0], [0], [1], [0, 0, 1, 1], [], []>} : vector<64x384xbf16>, vector<384x256xbf16>, vector<64x256xf32> -> vector<64x256xf32>
    %81 = arith.addf %71, %80 : vector<64x256xf32>
    %c1_68 = arith.constant 1 : index
    %c0_69 = arith.constant 0 : index
    %c0_70 = arith.constant 0 : index
    %82 = vector.load %arg6[%c1_68, %c0_69, %c0_70] : memref<5x384x256xbf16, #tpu.memory_space<vmem>>, vector<1x384x256xbf16>
    %83 = vector.shape_cast %82 : vector<1x384x256xbf16> to vector<384x256xbf16>
    %cst_71 = arith.constant dense<0.000000e+00> : vector<64x256xf32>
    %84 = tpu.matmul %77, %83, %cst_71 {dimension_numbers = #tpu.dot_dimension_numbers<[1], [0], [0], [1], [0, 0, 1, 1], [], []>} : vector<64x384xbf16>, vector<384x256xbf16>, vector<64x256xf32> -> vector<64x256xf32>
    %85 = arith.addf %75, %84 : vector<64x256xf32>
    %86 = vector.extract_strided_slice %63 {offsets = [2, 0, 0], sizes = [8, 8, 384], strides = [1, 1, 1]} : vector<12x8x384xbf16> to vector<8x8x384xbf16>
    %87 = vector.shape_cast %86 : vector<8x8x384xbf16> to vector<64x384xbf16>
    %c2_72 = arith.constant 2 : index
    %c0_73 = arith.constant 0 : index
    %c0_74 = arith.constant 0 : index
    %88 = vector.load %arg5[%c2_72, %c0_73, %c0_74] : memref<5x384x256xbf16, #tpu.memory_space<vmem>>, vector<1x384x256xbf16>
    %89 = vector.shape_cast %88 : vector<1x384x256xbf16> to vector<384x256xbf16>
    %cst_75 = arith.constant dense<0.000000e+00> : vector<64x256xf32>
    %90 = tpu.matmul %87, %89, %cst_75 {dimension_numbers = #tpu.dot_dimension_numbers<[1], [0], [0], [1], [0, 0, 1, 1], [], []>} : vector<64x384xbf16>, vector<384x256xbf16>, vector<64x256xf32> -> vector<64x256xf32>
    %91 = arith.addf %81, %90 : vector<64x256xf32>
    %c2_76 = arith.constant 2 : index
    %c0_77 = arith.constant 0 : index
    %c0_78 = arith.constant 0 : index
    %92 = vector.load %arg6[%c2_76, %c0_77, %c0_78] : memref<5x384x256xbf16, #tpu.memory_space<vmem>>, vector<1x384x256xbf16>
    %93 = vector.shape_cast %92 : vector<1x384x256xbf16> to vector<384x256xbf16>
    %cst_79 = arith.constant dense<0.000000e+00> : vector<64x256xf32>
    %94 = tpu.matmul %87, %93, %cst_79 {dimension_numbers = #tpu.dot_dimension_numbers<[1], [0], [0], [1], [0, 0, 1, 1], [], []>} : vector<64x384xbf16>, vector<384x256xbf16>, vector<64x256xf32> -> vector<64x256xf32>
    %95 = arith.addf %85, %94 : vector<64x256xf32>
    %96 = vector.extract_strided_slice %63 {offsets = [3, 0, 0], sizes = [8, 8, 384], strides = [1, 1, 1]} : vector<12x8x384xbf16> to vector<8x8x384xbf16>
    %97 = vector.shape_cast %96 : vector<8x8x384xbf16> to vector<64x384xbf16>
    %c3_80 = arith.constant 3 : index
    %c0_81 = arith.constant 0 : index
    %c0_82 = arith.constant 0 : index
    %98 = vector.load %arg5[%c3_80, %c0_81, %c0_82] : memref<5x384x256xbf16, #tpu.memory_space<vmem>>, vector<1x384x256xbf16>
    %99 = vector.shape_cast %98 : vector<1x384x256xbf16> to vector<384x256xbf16>
    %cst_83 = arith.constant dense<0.000000e+00> : vector<64x256xf32>
    %100 = tpu.matmul %97, %99, %cst_83 {dimension_numbers = #tpu.dot_dimension_numbers<[1], [0], [0], [1], [0, 0, 1, 1], [], []>} : vector<64x384xbf16>, vector<384x256xbf16>, vector<64x256xf32> -> vector<64x256xf32>
    %101 = arith.addf %91, %100 : vector<64x256xf32>
    %c3_84 = arith.constant 3 : index
    %c0_85 = arith.constant 0 : index
    %c0_86 = arith.constant 0 : index
    %102 = vector.load %arg6[%c3_84, %c0_85, %c0_86] : memref<5x384x256xbf16, #tpu.memory_space<vmem>>, vector<1x384x256xbf16>
    %103 = vector.shape_cast %102 : vector<1x384x256xbf16> to vector<384x256xbf16>
    %cst_87 = arith.constant dense<0.000000e+00> : vector<64x256xf32>
    %104 = tpu.matmul %97, %103, %cst_87 {dimension_numbers = #tpu.dot_dimension_numbers<[1], [0], [0], [1], [0, 0, 1, 1], [], []>} : vector<64x384xbf16>, vector<384x256xbf16>, vector<64x256xf32> -> vector<64x256xf32>
    %105 = arith.addf %95, %104 : vector<64x256xf32>
    %106 = vector.extract_strided_slice %63 {offsets = [4, 0, 0], sizes = [8, 8, 384], strides = [1, 1, 1]} : vector<12x8x384xbf16> to vector<8x8x384xbf16>
    %107 = vector.shape_cast %106 : vector<8x8x384xbf16> to vector<64x384xbf16>
    %c4_88 = arith.constant 4 : index
    %c0_89 = arith.constant 0 : index
    %c0_90 = arith.constant 0 : index
    %108 = vector.load %arg5[%c4_88, %c0_89, %c0_90] : memref<5x384x256xbf16, #tpu.memory_space<vmem>>, vector<1x384x256xbf16>
    %109 = vector.shape_cast %108 : vector<1x384x256xbf16> to vector<384x256xbf16>
    %cst_91 = arith.constant dense<0.000000e+00> : vector<64x256xf32>
    %110 = tpu.matmul %107, %109, %cst_91 {dimension_numbers = #tpu.dot_dimension_numbers<[1], [0], [0], [1], [0, 0, 1, 1], [], []>} : vector<64x384xbf16>, vector<384x256xbf16>, vector<64x256xf32> -> vector<64x256xf32>
    %111 = arith.addf %101, %110 : vector<64x256xf32>
    %c4_92 = arith.constant 4 : index
    %c0_93 = arith.constant 0 : index
    %c0_94 = arith.constant 0 : index
    %112 = vector.load %arg6[%c4_92, %c0_93, %c0_94] : memref<5x384x256xbf16, #tpu.memory_space<vmem>>, vector<1x384x256xbf16>
    %113 = vector.shape_cast %112 : vector<1x384x256xbf16> to vector<384x256xbf16>
    %cst_95 = arith.constant dense<0.000000e+00> : vector<64x256xf32>
    %114 = tpu.matmul %107, %113, %cst_95 {dimension_numbers = #tpu.dot_dimension_numbers<[1], [0], [0], [1], [0, 0, 1, 1], [], []>} : vector<64x384xbf16>, vector<384x256xbf16>, vector<64x256xf32> -> vector<64x256xf32>
    %115 = arith.addf %105, %114 : vector<64x256xf32>
    %116 = arith.maximumf %111, %115 : vector<64x256xf32>
    %117 = vector.shape_cast %116 : vector<64x256xf32> to vector<4x16x256xf32>
    %118 = vector.extract_strided_slice %117 {offsets = [0, 0, 0], sizes = [4, 8, 256], strides = [1, 1, 1]} : vector<4x16x256xf32> to vector<4x8x256xf32>
    %119 = vector.extract_strided_slice %117 {offsets = [0, 8, 0], sizes = [4, 8, 256], strides = [1, 1, 1]} : vector<4x16x256xf32> to vector<4x8x256xf32>
    %120 = arith.maximumf %118, %119 : vector<4x8x256xf32>
    %c0_96 = arith.constant 0 : index
    %c0_97 = arith.constant 0 : index
    %121 = vector.load %arg7[%c0_96, %c0_97] : memref<1x256xf32, #tpu.memory_space<vmem>>, vector<1x256xf32>
    %122 = vector.shape_cast %121 : vector<1x256xf32> to vector<1x1x256xf32>
    %123 = vector.broadcast %122 : vector<1x1x256xf32> to vector<4x8x256xf32>
    %124 = arith.addf %120, %123 : vector<4x8x256xf32>
    %cst_98 = arith.constant 0.000000e+00 : f32
    %125 = vector.broadcast %cst_98 : f32 to vector<4x8x256xf32>
    %126 = arith.maximumf %124, %125 : vector<4x8x256xf32>
    %127 = arith.truncf %126 : vector<4x8x256xf32> to vector<4x8x256xbf16>
    %cst_99 = arith.constant 0.000000e+00 : f32
    %128 = vector.broadcast %cst_99 : f32 to vector<8x128xf32>
    %129 = vector.extract_strided_slice %127 {offsets = [0, 0, 0], sizes = [1, 8, 256], strides = [1, 1, 1]} : vector<4x8x256xbf16> to vector<1x8x256xbf16>
    %130 = vector.shape_cast %129 : vector<1x8x256xbf16> to vector<8x256xbf16>
    %c0_100 = arith.constant 0 : index
    %c0_101 = arith.constant 0 : index
    %c0_102 = arith.constant 0 : index
    %131 = vector.load %arg8[%c0_100, %c0_101, %c0_102] : memref<4x256x128xbf16, #tpu.memory_space<vmem>>, vector<1x256x128xbf16>
    %132 = vector.shape_cast %131 : vector<1x256x128xbf16> to vector<256x128xbf16>
    %cst_103 = arith.constant dense<0.000000e+00> : vector<8x128xf32>
    %133 = tpu.matmul %130, %132, %cst_103 {dimension_numbers = #tpu.dot_dimension_numbers<[1], [0], [0], [1], [0, 0, 1, 1], [], []>} : vector<8x256xbf16>, vector<256x128xbf16>, vector<8x128xf32> -> vector<8x128xf32>
    %134 = arith.addf %128, %133 : vector<8x128xf32>
    %135 = vector.extract_strided_slice %127 {offsets = [1, 0, 0], sizes = [1, 8, 256], strides = [1, 1, 1]} : vector<4x8x256xbf16> to vector<1x8x256xbf16>
    %136 = vector.shape_cast %135 : vector<1x8x256xbf16> to vector<8x256xbf16>
    %c1_104 = arith.constant 1 : index
    %c0_105 = arith.constant 0 : index
    %c0_106 = arith.constant 0 : index
    %137 = vector.load %arg8[%c1_104, %c0_105, %c0_106] : memref<4x256x128xbf16, #tpu.memory_space<vmem>>, vector<1x256x128xbf16>
    %138 = vector.shape_cast %137 : vector<1x256x128xbf16> to vector<256x128xbf16>
    %cst_107 = arith.constant dense<0.000000e+00> : vector<8x128xf32>
    %139 = tpu.matmul %136, %138, %cst_107 {dimension_numbers = #tpu.dot_dimension_numbers<[1], [0], [0], [1], [0, 0, 1, 1], [], []>} : vector<8x256xbf16>, vector<256x128xbf16>, vector<8x128xf32> -> vector<8x128xf32>
    %140 = arith.addf %134, %139 : vector<8x128xf32>
    %141 = vector.extract_strided_slice %127 {offsets = [2, 0, 0], sizes = [1, 8, 256], strides = [1, 1, 1]} : vector<4x8x256xbf16> to vector<1x8x256xbf16>
    %142 = vector.shape_cast %141 : vector<1x8x256xbf16> to vector<8x256xbf16>
    %c2_108 = arith.constant 2 : index
    %c0_109 = arith.constant 0 : index
    %c0_110 = arith.constant 0 : index
    %143 = vector.load %arg8[%c2_108, %c0_109, %c0_110] : memref<4x256x128xbf16, #tpu.memory_space<vmem>>, vector<1x256x128xbf16>
    %144 = vector.shape_cast %143 : vector<1x256x128xbf16> to vector<256x128xbf16>
    %cst_111 = arith.constant dense<0.000000e+00> : vector<8x128xf32>
    %145 = tpu.matmul %142, %144, %cst_111 {dimension_numbers = #tpu.dot_dimension_numbers<[1], [0], [0], [1], [0, 0, 1, 1], [], []>} : vector<8x256xbf16>, vector<256x128xbf16>, vector<8x128xf32> -> vector<8x128xf32>
    %146 = arith.addf %140, %145 : vector<8x128xf32>
    %147 = vector.extract_strided_slice %127 {offsets = [3, 0, 0], sizes = [1, 8, 256], strides = [1, 1, 1]} : vector<4x8x256xbf16> to vector<1x8x256xbf16>
    %148 = vector.shape_cast %147 : vector<1x8x256xbf16> to vector<8x256xbf16>
    %c3_112 = arith.constant 3 : index
    %c0_113 = arith.constant 0 : index
    %c0_114 = arith.constant 0 : index
    %149 = vector.load %arg8[%c3_112, %c0_113, %c0_114] : memref<4x256x128xbf16, #tpu.memory_space<vmem>>, vector<1x256x128xbf16>
    %150 = vector.shape_cast %149 : vector<1x256x128xbf16> to vector<256x128xbf16>
    %cst_115 = arith.constant dense<0.000000e+00> : vector<8x128xf32>
    %151 = tpu.matmul %148, %150, %cst_115 {dimension_numbers = #tpu.dot_dimension_numbers<[1], [0], [0], [1], [0, 0, 1, 1], [], []>} : vector<8x256xbf16>, vector<256x128xbf16>, vector<8x128xf32> -> vector<8x128xf32>
    %152 = arith.addf %146, %151 : vector<8x128xf32>
    %c0_116 = arith.constant 0 : index
    %c0_117 = arith.constant 0 : index
    %153 = vector.load %arg9[%c0_116, %c0_117] : memref<1x128xf32, #tpu.memory_space<vmem>>, vector<1x128xf32>
    %154 = vector.broadcast %153 : vector<1x128xf32> to vector<8x128xf32>
    %155 = arith.addf %152, %154 : vector<8x128xf32>
    %cst_118 = arith.constant 0.000000e+00 : f32
    %156 = vector.broadcast %cst_118 : f32 to vector<8x128xf32>
    %157 = arith.maximumf %155, %156 : vector<8x128xf32>
    %158 = arith.truncf %157 : vector<8x128xf32> to vector<8x128xbf16>
    %c0_119 = arith.constant 0 : index
    %c0_120 = arith.constant 0 : index
    %159 = vector.load %arg10[%c0_119, %c0_120] : memref<128x128xbf16, #tpu.memory_space<vmem>>, vector<128x128xbf16>
    %cst_121 = arith.constant dense<0.000000e+00> : vector<8x128xf32>
    %160 = tpu.matmul %158, %159, %cst_121 {dimension_numbers = #tpu.dot_dimension_numbers<[1], [0], [0], [1], [0, 0, 1, 1], [], []>} : vector<8x128xbf16>, vector<128x128xbf16>, vector<8x128xf32> -> vector<8x128xf32>
    %c0_122 = arith.constant 0 : index
    %c0_123 = arith.constant 0 : index
    %161 = vector.load %arg11[%c0_122, %c0_123] : memref<1x128xf32, #tpu.memory_space<vmem>>, vector<1x128xf32>
    %162 = vector.broadcast %161 : vector<1x128xf32> to vector<8x128xf32>
    %163 = arith.addf %160, %162 : vector<8x128xf32>
    %164 = tpu.iota {dimensions = array<i32: 1>} : vector<8x128xi32>
    %c10_i32 = arith.constant 10 : i32
    %165 = vector.broadcast %c10_i32 : i32 to vector<8x128xi32>
    %166 = arith.cmpi slt, %164, %165 : vector<8x128xi32>
    %cst_124 = arith.constant -1.000000e+30 : f32
    %167 = vector.broadcast %cst_124 : f32 to vector<8x128xf32>
    %168 = arith.select %166, %163, %167 : vector<8x128xi1>, vector<8x128xf32>
    %cst_125 = arith.constant dense<0xFF800000> : vector<8xf32>
    %169 = vector.multi_reduction <maximumf>, %168, %cst_125 [1] : vector<8x128xf32> to vector<8xf32>
    %170 = vector.shape_cast %169 : vector<8xf32> to vector<8x1xf32>
    %171 = vector.broadcast %170 : vector<8x1xf32> to vector<8x128xf32>
    %172 = arith.subf %168, %171 : vector<8x128xf32>
    %173 = math.exp %172 : vector<8x128xf32>
    %cst_126 = arith.constant dense<0.000000e+00> : vector<8xf32>
    %174 = vector.multi_reduction <add>, %173, %cst_126 [1] : vector<8x128xf32> to vector<8xf32>
    %175 = vector.shape_cast %174 : vector<8xf32> to vector<8x1xf32>
    %176 = math.log %175 : vector<8x1xf32>
    %177 = vector.broadcast %176 : vector<8x1xf32> to vector<8x128xf32>
    %178 = arith.subf %172, %177 : vector<8x128xf32>
    %c0_127 = arith.constant 0 : index
    %c0_128 = arith.constant 0 : index
    %179 = vector.load %arg12[%c0_127, %c0_128] : memref<8x128xf32, #tpu.memory_space<vmem>>, vector<8x128xf32>
    tpu.vector_store %arg12[%c0_127, %c0_128], %178 {strides = array<i32>} : memref<8x128xf32, #tpu.memory_space<vmem>>, vector<8x128xf32>,
    return
  }
  func.func @transform_0(%arg0: i32) -> (i32, i32, i32) {
    %c0_i32 = arith.constant 0 : i32
    %c0_i32_0 = arith.constant 0 : i32
    %c0_i32_1 = arith.constant 0 : i32
    return %c0_i32, %arg0, %c0_i32_0 : i32, i32, i32
  }
  func.func @transform_1(%arg0: i32) -> (i32, i32, i32) {
    %c0_i32 = arith.constant 0 : i32
    %c0_i32_0 = arith.constant 0 : i32
    %c0_i32_1 = arith.constant 0 : i32
    %c0_i32_2 = arith.constant 0 : i32
    return %c0_i32, %c0_i32_0, %c0_i32_1 : i32, i32, i32
  }
  func.func @transform_2(%arg0: i32) -> (i32, i32, i32) {
    %c0_i32 = arith.constant 0 : i32
    %c0_i32_0 = arith.constant 0 : i32
    %c0_i32_1 = arith.constant 0 : i32
    %c0_i32_2 = arith.constant 0 : i32
    return %c0_i32, %c0_i32_0, %c0_i32_1 : i32, i32, i32
  }
  func.func @transform_3(%arg0: i32) -> (i32, i32) {
    %c0_i32 = arith.constant 0 : i32
    %c0_i32_0 = arith.constant 0 : i32
    %c0_i32_1 = arith.constant 0 : i32
    return %c0_i32, %c0_i32_0 : i32, i32
  }
  func.func @transform_4(%arg0: i32) -> (i32, i32, i32) {
    %c0_i32 = arith.constant 0 : i32
    %c0_i32_0 = arith.constant 0 : i32
    %c0_i32_1 = arith.constant 0 : i32
    %c0_i32_2 = arith.constant 0 : i32
    return %c0_i32, %c0_i32_0, %c0_i32_1 : i32, i32, i32
  }
  func.func @transform_5(%arg0: i32) -> (i32, i32, i32) {
    %c0_i32 = arith.constant 0 : i32
    %c0_i32_0 = arith.constant 0 : i32
    %c0_i32_1 = arith.constant 0 : i32
    %c0_i32_2 = arith.constant 0 : i32
    return %c0_i32, %c0_i32_0, %c0_i32_1 : i32, i32, i32
  }
  func.func @transform_6(%arg0: i32) -> (i32, i32) {
    %c0_i32 = arith.constant 0 : i32
    %c0_i32_0 = arith.constant 0 : i32
    %c0_i32_1 = arith.constant 0 : i32
    return %c0_i32, %c0_i32_0 : i32, i32
  }
  func.func @transform_7(%arg0: i32) -> (i32, i32, i32) {
    %c0_i32 = arith.constant 0 : i32
    %c0_i32_0 = arith.constant 0 : i32
    %c0_i32_1 = arith.constant 0 : i32
    %c0_i32_2 = arith.constant 0 : i32
    return %c0_i32, %c0_i32_0, %c0_i32_1 : i32, i32, i32
  }
  func.func @transform_8(%arg0: i32) -> (i32, i32) {
    %c0_i32 = arith.constant 0 : i32
    %c0_i32_0 = arith.constant 0 : i32
    %c0_i32_1 = arith.constant 0 : i32
    return %c0_i32, %c0_i32_0 : i32, i32
  }
  func.func @transform_9(%arg0: i32) -> (i32, i32) {
    %c0_i32 = arith.constant 0 : i32
    %c0_i32_0 = arith.constant 0 : i32
    %c0_i32_1 = arith.constant 0 : i32
    return %c0_i32, %c0_i32_0 : i32, i32
  }
  func.func @transform_10(%arg0: i32) -> (i32, i32) {
    %c0_i32 = arith.constant 0 : i32
    %c0_i32_0 = arith.constant 0 : i32
    %c0_i32_1 = arith.constant 0 : i32
    return %c0_i32, %c0_i32_0 : i32, i32
  }
  func.func @transform_11(%arg0: i32) -> (i32, i32) {
    %c0_i32 = arith.constant 0 : i32
    %c0_i32_0 = arith.constant 0 : i32
    return %arg0, %c0_i32 : i32, i32
  }
}

</mosaic_0001>

<bundles_post_ra>
// kernel: tile.13
= control target key start
LH: loop header
LB: loop body
LE: loop exit
PB: predicated region body
PF: predicated region fallthrough
CT: control target
= control target key end

     0   :  { %s28_s0 = inlined_call_operand.vmem [shape: f32[32], index: 0, kind: input, shape index: {}]   ;;  %s29_s1 = inlined_call_operand.vmem [shape: f32[12,32], index: 1, kind: output, shape index: {}]  }
   0x1   :  { %v4_v0 = vld [vmem:[%s28_s0] ss:$0 sm:$0xff] }
   0x2   :  { %5 = vst [vmem:[%s29_s1] sm:$0xff] %v4_v0  ;;  %8 = vst [vmem:[%s29_s1 + $0x8] sm:$0xff] %v4_v0 }

// kernel: tile.14
= control target key start
LH: loop header
LB: loop body
LE: loop exit
PB: predicated region body
PF: predicated region fallthrough
CT: control target
= control target key end

     0   :  { %s53_s8 = smov 96   ;;  %vm3_vm0 = vcmask 261120   ;;  %s55_s15 = smov 64   ;;  %vm9_vm1 = vcmask 1048320   ;;  %vm15_vm2 = vcmask 785920   ;;  %vm21_vm3 = vcmask 523520   ;;  %s87_s0 = inlined_call_operand.vmem [shape: f32[12,32], index: 0, kind: input, shape index: {}]   ;;  %s88_s1 = inlined_call_operand.vmem [shape: f32[1,384], index: 1, kind: output, shape index: {}]  }
   0x1   :  { %v45_v0 = vld [vmem:[%s87_s0 + $0x3] ss:$4 sm:$0x7]   ;;  %v46_v1 = vld [vmem:[%s87_s0 + $0x2] ss:$4 sm:$0x7]  }
   0x2   :  { %7 = vrot.lane.b32.xlu0 %v45_v0, %s53_s8  ;;  %v47_v2 = vld [vmem:[%s87_s0 + $0x1] ss:$4 sm:$0x7]   ;;  %v2_v3 = vld [vmem:[%s87_s0] ss:$4 sm:$0x7]  }
   0x3   :  { %s54_s0 = smov 32   ;;  %4 = vst.msk [vmem:[#allocation0] ss:$8 sm:$0x7] %vm3_vm0, %v2_v3  }
   0x4   :  { %19 = vrot.lane.b32.xlu1 %v47_v2, %s54_s0 }
   0x6   :  { %13 = vrot.lane.b32.xlu0 %v46_v1, %s55_s15 }
  0x74   :  { %v8_v4 = vpop.permute.xlu0 %7  }
  0x75   :  { %10 = vst.msk [vmem:[#allocation0] ss:$8 sm:$0x7] %vm9_vm1, %v8_v4  }
  0x76   :  { %v20_v5 = vpop.permute.xlu1 %19  }
  0x78   :  { %v14_v6 = vpop.permute.xlu0 %13  }
  0x79   :  { %16 = vst.msk [vmem:[#allocation0] ss:$8 sm:$0x7] %vm15_vm2, %v14_v6  }
  0x7a   :  { %22 = vst.msk [vmem:[#allocation0] ss:$8 sm:$0x7] %vm21_vm3, %v20_v5  }
  0x81   :  { %v27_v7 = vld [vmem:[#allocation0] sm:$0x1]  ;;  %v32_v8 = vld [vmem:[#allocation0 + $0x8] sm:$0x1]  ;;  %v38_v9 = vld [vmem:[#allocation0 + $0x10] sm:$0x1] }
  0x82   :  { %30 = vst [vmem:[%s88_s1] sm:$0x1] %v27_v7  ;;  %48 = vst [vmem:[%s88_s1 + $0x1] sm:$0x1] %v32_v8 }
  0x83   :  { %49 = vst [vmem:[%s88_s1 + $0x2] sm:$0x1] %v38_v9 }

// kernel: tile.18
= control target key start
LH: loop header
LB: loop body
LE: loop exit
PB: predicated region body
PF: predicated region fallthrough
CT: control target
= control target key end

     0   :  { %s22_s0 = inlined_call_operand.vmem [shape: f32[64], index: 0, kind: input, shape index: {}]   ;;  %s23_s1 = inlined_call_operand.vmem [shape: f32[4,64], index: 1, kind: output, shape index: {}]  }
   0x1   :  { %v4_v0 = vld [vmem:[%s22_s0] ss:$0 sm:$0xff] }
   0x2   :  { %5 = vst [vmem:[%s23_s1] sm:$0xf] %v4_v0 }

// kernel: tile.19
= control target key start
LH: loop header
LB: loop body
LE: loop exit
PB: predicated region body
PF: predicated region fallthrough
CT: control target
= control target key end

     0   :  { %s7_s8 = smov 3  ;;  %vm9_vm0 = vcmask 523264   ;;  %s34_s9 = smov 64   ;;  %vm16_vm1 = vcmask 1048064   ;;  %s54_s0 = inlined_call_operand.vmem [shape: f32[4,64], index: 0, kind: input, shape index: {}]   ;;  %s55_s1 = inlined_call_operand.vmem [shape: f32[1,256], index: 1, kind: output, shape index: {}]  }
   0x1   :  { %v5_v0 = vld [vmem:[%s54_s0] sm:$0xf]  ;;  %s12_s0 = smov 3 }
   0x2   :  { %6 = vst [vmem:[#allocation1] sm:$0xf] %v5_v0 }
   0x9   :  { %v13_v1 = vld [vmem:[#allocation1 + $0x1] ss:$2 sm:%s12_s0]   ;;  %v8_v2 = vld [vmem:[#allocation1] ss:$2 sm:%s7_s8]  }
   0xa   :  { %14 = vrot.lane.b32.xlu0 %v13_v1, %s34_s9  ;;  %10 = vst.msk [vmem:[#allocation0] ss:$8 sm:$0x3] %vm9_vm0, %v8_v2  }
  0x7c   :  { %v15_v3 = vpop.permute.xlu0 %14  }
  0x7d   :  { %17 = vst.msk [vmem:[#allocation0] ss:$8 sm:$0x3] %vm16_vm1, %v15_v3  }
  0x84   :  { %v22_v4 = vld [vmem:[#allocation0] sm:$0x1]  ;;  %v27_v5 = vld [vmem:[#allocation0 + $0x8] sm:$0x1] }
  0x85   :  { %25 = vst [vmem:[%s55_s1] sm:$0x1] %v22_v4  ;;  %32 = vst [vmem:[%s55_s1 + $0x1] sm:$0x1] %v27_v5 }

// kernel: cnn_forward.1
= control target key start
LH: loop header
LB: loop body
LE: loop exit
PB: predicated region body
PF: predicated region fallthrough
CT: control target
= control target key end

     0   :  { %v19095_v1 = vmov 0   ;;  %vm205_vm0 = vcmask 261120   ;;  %vm13094_vm1 = vmmov 0   ;;  %s19083_s1 = inlined_call_operand.vmem [shape: bf16[5,32,384], index: 1, kind: input, shape index: {}]   ;;  %s19084_s0 = inlined_call_operand.vmem [shape: bf16[28,8,32], index: 0, kind: input, shape index: {}]   ;;  %s19085_s2 = inlined_call_operand.vmem [shape: bf16[5,32,384], index: 2, kind: input, shape index: {}]   ;;  %s19086_s4 = inlined_call_operand.vmem [shape: bf16[5,384,256], index: 4, kind: input, shape index: {}]   ;;  %s19087_s5 = inlined_call_operand.vmem [shape: bf16[5,384,256], index: 5, kind: input, shape index: {}]   ;;  %s19088_s3 = inlined_call_operand.vmem [shape: f32[1,384], index: 3, kind: input, shape index: {}]   ;;  %s19089_s7 = inlined_call_operand.vmem [shape: bf16[4,256,128], index: 7, kind: input, shape index: {}]   ;;  %s19090_s6 = inlined_call_operand.vmem [shape: f32[1,256], index: 6, kind: input, shape index: {}]   ;;  %s19091_s9 = inlined_call_operand.vmem [shape: bf16[128,128], index: 9, kind: input, shape index: {}]   ;;  %s19092_s8 = inlined_call_operand.vmem [shape: f32[1,128], index: 8, kind: input, shape index: {}]   ;;  %s19093_s10 = inlined_call_operand.vmem [shape: f32[1,128], index: 10, kind: input, shape index: {}]   ;;  %s19094_s11 = inlined_call_operand.vmem [shape: f32[8,128], index: 11, kind: output, shape index: {}]  }
   0x1   :  { %v12156_v0 = vld [vmem:[%s19083_s1 + $0x4c] ss:$12 sps:$4 sm:$0xff]   ;;  %274 = vmatprep.mubr.bf16.mxu0 %v19095_v1  ;;  %v12158_v2 = vld [vmem:[%s19083_s1 + $0x50] ss:$12 sps:$4 sm:$0xff]   ;;  %v12159_v3 = vld [vmem:[%s19083_s1 + $0x48] ss:$12 sps:$4 sm:$0xff]  }
   0x2   :  { %254 = vmatprep.subr.bf16.mxu0 %v12156_v0  ;;  %11853 = vmatprep.subr.bf16.mxu1 %v12158_v2  ;;  %v12160_v4 = vld [vmem:[%s19083_s1 + $0x34] ss:$12 sps:$4 sm:$0xff]   ;;  %v12162_v5 = vld [vmem:[%s19083_s1 + $0x38] ss:$12 sps:$4 sm:$0xff]   ;;  %v12163_v6 = vld [vmem:[%s19083_s1 + $0x30] ss:$12 sps:$4 sm:$0xff]  }
   0x3   :  { %255 = vmatpush1.bf16.msra.mxu0 %v12159_v3  ;;  %11854 = vmatpush3.bf16.msra.mxu1 %v12158_v2  ;;  %v13177_v7 = vld [vmem:[%s19084_s0 + $0x4] sm:$0xff]   ;;  %v13182_v8 = vld [vmem:[%s19084_s0 + $0xc] sm:$0xff]   ;;  %v13192_v10 = vld [vmem:[%s19084_s0 + $0x14] sm:$0xff]  }
   0x4   :  { %256 = vmatprep.subr.bf16.mxu0 %v12160_v4  ;;  %11855 = vmatprep.subr.bf16.mxu1 %v12162_v5  ;;  %v12166_v9 = vld [vmem:[%s19083_s1 + $0x20] ss:$12 sps:$4 sm:$0xff]   ;;  %v13209_v12 = vld [vmem:[%s19084_s0 + $0x24] sm:$0xff]   ;;  %v13241_v19 = vld [vmem:[%s19084_s0 + $0x34] sm:$0xff]  }
   0x5   :  { %11857 = vmatprep.mubr.msk.bf16.mxu1 %vm205_vm0, %v13177_v7  ;;  %v13204_v11 = vld [vmem:[%s19084_s0 + $0x1c] sm:$0xff]   ;;  %v12177_v13 = vld [vmem:[%s19083_s1 + $0x18] ss:$12 sps:$4 sm:$0xff]   ;;  %v12184_v17 = vld [vmem:[%s19083_s1 + $0x8] ss:$12 sps:$4 sm:$0xff]  }
   0x6   :  { %v12179_v14 = vld [vmem:[%s19083_s1 + $0x1c] ss:$12 sps:$4 sm:$0xff]   ;;  %v12182_v15 = vld [vmem:[%s19083_s1 + $0x4] ss:$12 sps:$4 sm:$0xff]   ;;  %v12180_v16 = vld [vmem:[%s19083_s1] ss:$12 sps:$4 sm:$0xff]  }
   0x7   :  { %257 = vmatpush1.bf16.msra.mxu0 %v12163_v6  ;;  %11856 = vmatpush3.bf16.msra.mxu1 %v12162_v5  ;;  %v13236_v18 = vld [vmem:[%s19084_s0 + $0x2c] sm:$0xff]   ;;  %v13259_v22 = vld [vmem:[%s19084_s0 + $0x3c] sm:$0xff]   ;;  %v13264_v23 = vld [vmem:[%s19084_s0 + $0x44] sm:$0xff]  }
   0x8   :  { %11881 = vmatprep.subr.bf16.mxu0 %v12166_v9  ;;  %664 = vmatprep.subr.bf16.mxu1 %v12179_v14  ;;  %v12190_v20 = vld [vmem:[%s19085_s2 + $0x50] ss:$12 sps:$4 sm:$0xff]   ;;  %v12194_v21 = vld [vmem:[%s19085_s2 + $0x4c] ss:$12 sps:$4 sm:$0xff]   ;;  %v13304_v27 = vld [vmem:[%s19084_s0] sm:$0xff]  }
   0x9   :  { %v13276_v24 = vld [vmem:[%s19084_s0 + $0x4c] sm:$0xff]   ;;  %v13281_v25 = vld [vmem:[%s19084_s0 + $0x54] sm:$0xff]   ;;  %v13293_v26 = vld [vmem:[%s19084_s0 + $0x5c] sm:$0xff]  }
   0xa   :  { %10046 = vmatmul.mubr.msk.bf16.vlgmr.msra.gmra.mxu0 %vm205_vm0, %v13177_v7  ;;  %11858 = vmatmul.mubr.msk.bf16.vlgmr.msra.gmra.mxu1 %vm205_vm0, %v13182_v8  ;;  %v12203_v28 = vld [vmem:[%s19085_s2 + $0x38] ss:$12 sps:$4 sm:$0xff]   ;;  %v13318_v29 = vld [vmem:[%s19084_s0 + $0x8] sm:$0xff]   ;;  %v13332_v31 = vld [vmem:[%s19084_s0 + $0x10] sm:$0xff]  }
   0xb   :  { %11882 = vmatpush3.bf16.msra.mxu0 %v12166_v9  ;;  %284 = vmatprep.mubr.bf16.mxu0 %v19095_v1  ;;  %v12207_v30 = vld [vmem:[%s19085_s2 + $0x1c] ss:$12 sps:$4 sm:$0xff]   ;;  %v13354_v33 = vld [vmem:[%s19084_s0 + $0x20] sm:$0xff]   ;;  %v13377_v35 = vld [vmem:[%s19084_s0 + $0x30] sm:$0xff]  }
   0xc   :  { %11861 = vmatprep.mubr.msk.bf16.mxu1 %vm205_vm0, %v13192_v10  ;;  %665 = vmatpush1.bf16.msra.mxu1 %v12177_v13  ;;  %v13343_v32 = vld [vmem:[%s19084_s0 + $0x18] sm:$0xff]   ;;  %v13365_v34 = vld [vmem:[%s19084_s0 + $0x28] sm:$0xff]   ;;  %v12200_v37 = vld [vmem:[%s19085_s2 + $0x34] ss:$12 sps:$4 sm:$0xff]  }
   0xd   :  { %666 = vmatprep.subr.bf16.mxu1 %v12182_v15  ;;  %11883 = vmatprep.subr.bf16.mxu0 %v12184_v17  ;;  %v12192_v36 = vld [vmem:[%s19085_s2 + $0x48] ss:$12 sps:$4 sm:$0xff]   ;;  %v12198_v38 = vld [vmem:[%s19085_s2 + $0x30] ss:$12 sps:$4 sm:$0xff]   ;;  %v12204_v39 = vld [vmem:[%s19085_s2 + $0x20] ss:$12 sps:$4 sm:$0xff]  }
   0xe   :  { %v13401_v40 = vld [vmem:[%s19084_s0 + $0x38] sm:$0xff]   ;;  %v13413_v41 = vld [vmem:[%s19084_s0 + $0x40] sm:$0xff]   ;;  %v13425_v42 = vld [vmem:[%s19084_s0 + $0x48] sm:$0xff]  }
   0xf   :  { %11884 = vmatpush3.bf16.msra.mxu0 %v12184_v17  ;;  %v13437_v43 = vld [vmem:[%s19084_s0 + $0x50] sm:$0xff]   ;;  %v13449_v44 = vld [vmem:[%s19084_s0 + $0x58] sm:$0xff]   ;;  %v12208_v48 = vld [vmem:[%s19085_s2] ss:$12 sps:$4 sm:$0xff]  }
  0x10   :  { %667 = vmatpush1.bf16.msra.mxu1 %v12180_v16  ;;  %987 = vmatprep.subr.bf16.mxu0 %v12194_v21  ;;  %v12205_v45 = vld [vmem:[%s19085_s2 + $0x18] ss:$12 sps:$4 sm:$0xff]   ;;  %v12211_v47 = vld [vmem:[%s19085_s2 + $0x8] ss:$12 sps:$4 sm:$0xff]   ;;  %v12212_v50 = vld [vmem:[%s19083_s1 + $0x80] ss:$12 sps:$4 sm:$0xff]  }
  0x11   :  { %11909 = vmatprep.subr.bf16.mxu1 %v12190_v20  ;;  %v12210_v46 = vld [vmem:[%s19085_s2 + $0x4] ss:$12 sps:$4 sm:$0xff]   ;;  %v12215_v49 = vld [vmem:[%s19083_s1 + $0x7c] ss:$12 sps:$4 sm:$0xff]  }
  0x12   :  { %10047 = vmatmul.mubr.msk.bf16.gmra.mxu0 %vm205_vm0, %v13182_v8  ;;  %11862 = vmatmul.mubr.msk.bf16.gmra.mxu1 %vm205_vm0, %v13204_v11  ;;  %v12219_v51 = vld [vmem:[%s19083_s1 + $0x68] ss:$12 sps:$4 sm:$0xff]  }
  0x13   :  { %294 = vmatprep.mubr.bf16.mxu0 %v19095_v1  ;;  %11865 = vmatprep.mubr.msk.bf16.mxu1 %vm205_vm0, %v13209_v12  ;;  %v12235_v60 = vld [vmem:[%s19085_s2 + $0x7c] ss:$12 sps:$4 sm:$0xff]  }
  0x1a   :  { %10048 = vmatmul.mubr.msk.bf16.gmra.mxu0 %vm205_vm0, %v13192_v10  ;;  %11866 = vmatmul.mubr.msk.bf16.gmra.mxu1 %vm205_vm0, %v13236_v18 }
  0x1b   :  { %304 = vmatprep.mubr.bf16.mxu0 %v19095_v1  ;;  %11869 = vmatprep.mubr.msk.bf16.mxu1 %vm205_vm0, %v13241_v19 }
  0x22   :  { %10049 = vmatmul.mubr.msk.bf16.gmra.mxu0 %vm205_vm0, %v13204_v11  ;;  %11870 = vmatmul.mubr.msk.bf16.gmra.mxu1 %vm205_vm0, %v13259_v22 }
  0x23   :  { %314 = vmatprep.mubr.bf16.mxu0 %v19095_v1  ;;  %11873 = vmatprep.mubr.msk.bf16.mxu1 %vm205_vm0, %v13264_v23 }
  0x2a   :  { %10050 = vmatmul.mubr.msk.bf16.gmra.mxu0 %vm205_vm0, %v13209_v12  ;;  %11874 = vmatmul.mubr.msk.bf16.gmra.mxu1 %vm205_vm0, %v13276_v24 }
  0x2b   :  { %324 = vmatprep.mubr.bf16.mxu0 %v19095_v1  ;;  %11877 = vmatprep.mubr.msk.bf16.mxu1 %vm205_vm0, %v13281_v25 }
  0x32   :  { %10051 = vmatmul.mubr.msk.bf16.gmra.mxu0 %vm205_vm0, %v13236_v18  ;;  %11878 = vmatmul.mubr.msk.bf16.gmra.mxu1 %vm205_vm0, %v13293_v26 }
  0x33   :  { %334 = vmatprep.mubr.bf16.mxu0 %v19095_v1  ;;  %684 = vmatprep.mubr.bf16.mxu1 %v19095_v1 }
  0x3a   :  { %10052 = vmatmul.mubr.msk.bf16.gmra.mxu0 %vm205_vm0, %v13241_v19  ;;  %10088 = vmatmul.mubr.msk.bf16.vlgmr.msra.gmra.mxu1 %vm205_vm0, %v13304_v27 }
  0x3b   :  { %344 = vmatprep.mubr.bf16.mxu0 %v19095_v1  ;;  %694 = vmatprep.mubr.bf16.mxu1 %v19095_v1 }
  0x3c   :  { %11910 = vmatpush3.bf16.msra.mxu1 %v12190_v20 }
  0x3d   :  { %11911 = vmatprep.subr.bf16.mxu1 %v12203_v28 }
  0x40   :  { %11912 = vmatpush3.bf16.msra.mxu1 %v12203_v28 }
  0x41   :  { %1301 = vmatprep.subr.bf16.mxu1 %v12207_v30 }
  0x42   :  { %10053 = vmatmul.mubr.msk.bf16.gmra.mxu0 %vm205_vm0, %v13259_v22  ;;  %10089 = vmatmul.mubr.msk.bf16.gmra.mxu1 %vm205_vm0, %v13318_v29 }
  0x43   :  { %354 = vmatprep.mubr.bf16.mxu0 %v19095_v1  ;;  %704 = vmatprep.mubr.bf16.mxu1 %v19095_v1 }
  0x4a   :  { %10054 = vmatmul.mubr.msk.bf16.gmra.mxu0 %vm205_vm0, %v13264_v23  ;;  %10090 = vmatmul.mubr.msk.bf16.gmra.mxu1 %vm205_vm0, %v13332_v31 }
  0x4b   :  { %364 = vmatprep.mubr.bf16.mxu0 %v19095_v1  ;;  %714 = vmatprep.mubr.bf16.mxu1 %v19095_v1 }
  0x52   :  { %10055 = vmatmul.mubr.msk.bf16.gmra.mxu0 %vm205_vm0, %v13276_v24  ;;  %10091 = vmatmul.mubr.msk.bf16.gmra.mxu1 %vm205_vm0, %v13343_v32 }
  0x53   :  { %374 = vmatprep.mubr.bf16.mxu0 %v19095_v1  ;;  %724 = vmatprep.mubr.bf16.mxu1 %v19095_v1 }
  0x5a   :  { %10056 = vmatmul.mubr.msk.bf16.gmra.mxu0 %vm205_vm0, %v13281_v25  ;;  %10092 = vmatmul.mubr.msk.bf16.gmra.mxu1 %vm205_vm0, %v13354_v33 }
  0x5b   :  { %384 = vmatprep.mubr.bf16.mxu0 %v19095_v1  ;;  %734 = vmatprep.mubr.bf16.mxu1 %v19095_v1 }
  0x62   :  { %10057 = vmatmul.mubr.msk.bf16.gmra.mxu0 %vm205_vm0, %v13293_v26  ;;  %10093 = vmatmul.mubr.msk.bf16.gmra.mxu1 %vm205_vm0, %v13365_v34 }
  0x63   :  { %744 = vmatprep.mubr.bf16.mxu1 %v19095_v1  ;;  %11885 = vmatprep.mubr.msk.bf16.mxu0 %vm205_vm0, %v13304_v27 }
  0x6a   :  { %10094 = vmatmul.mubr.msk.bf16.gmra.mxu1 %vm205_vm0, %v13377_v35  ;;  %11886 = vmatmul.mubr.msk.bf16.vlgmr.msra.gmra.mxu0 %vm205_vm0, %v13318_v29 }
  0x6b   :  { %988 = vmatpush1.bf16.msra.mxu0 %v12192_v36  ;;  %754 = vmatprep.mubr.bf16.mxu1 %v19095_v1 }
  0x6c   :  { %11889 = vmatprep.mubr.msk.bf16.mxu0 %vm205_vm0, %v13332_v31  ;;  %989 = vmatprep.subr.bf16.mxu0 %v12200_v37 }
  0x6f   :  { %990 = vmatpush1.bf16.msra.mxu0 %v12198_v38 }
  0x70   :  { %11937 = vmatprep.subr.bf16.mxu0 %v12204_v39 }
  0x72   :  { %10095 = vmatmul.mubr.msk.bf16.gmra.mxu1 %vm205_vm0, %v13401_v40  ;;  %11890 = vmatmul.mubr.msk.bf16.gmra.mxu0 %vm205_vm0, %v13343_v32 }
  0x73   :  { %764 = vmatprep.mubr.bf16.mxu1 %v19095_v1  ;;  %11893 = vmatprep.mubr.msk.bf16.mxu0 %vm205_vm0, %v13354_v33 }
  0x7a   :  { %10096 = vmatmul.mubr.msk.bf16.gmra.mxu1 %vm205_vm0, %v13413_v41  ;;  %11894 = vmatmul.mubr.msk.bf16.gmra.mxu0 %vm205_vm0, %v13365_v34 }
  0x7b   :  { %774 = vmatprep.mubr.bf16.mxu1 %v19095_v1  ;;  %11897 = vmatprep.mubr.msk.bf16.mxu0 %vm205_vm0, %v13377_v35 }
  0x82   :  { %10097 = vmatmul.mubr.msk.bf16.gmra.mxu1 %vm205_vm0, %v13425_v42  ;;  %11898 = vmatmul.mubr.msk.bf16.gmra.mxu0 %vm205_vm0, %v13401_v40 }
  0x83   :  { %784 = vmatprep.mubr.bf16.mxu1 %v19095_v1  ;;  %11901 = vmatprep.mubr.msk.bf16.mxu0 %vm205_vm0, %v13413_v41 }
  0x8a   :  { %10098 = vmatmul.mubr.msk.bf16.gmra.mxu1 %vm205_vm0, %v13437_v43  ;;  %11902 = vmatmul.mubr.msk.bf16.gmra.mxu0 %vm205_vm0, %v13425_v42 }
  0x8b   :  { %794 = vmatprep.mubr.bf16.mxu1 %v19095_v1  ;;  %11905 = vmatprep.mubr.msk.bf16.mxu0 %vm205_vm0, %v13437_v43 }
  0x92   :  { %10099 = vmatmul.mubr.msk.bf16.gmra.mxu1 %vm205_vm0, %v13449_v44  ;;  %11906 = vmatmul.mubr.msk.bf16.gmra.mxu0 %vm205_vm0, %v13449_v44 }
  0x93   :  { %1007 = vmatprep.mubr.bf16.mxu0 %v19095_v1  ;;  %11913 = vmatprep.mubr.msk.bf16.mxu1 %vm205_vm0, %v13177_v7 }
  0x9a   :  { %10126 = vmatmul.mubr.msk.bf16.vlgmr.msra.gmra.mxu0 %vm205_vm0, %v13177_v7  ;;  %11914 = vmatmul.mubr.msk.bf16.vlgmr.msra.gmra.mxu1 %vm205_vm0, %v13182_v8 }
  0x9b   :  { %11938 = vmatpush3.bf16.msra.mxu0 %v12204_v39  ;;  %1017 = vmatprep.mubr.bf16.mxu0 %v19095_v1 }
  0x9c   :  { %11917 = vmatprep.mubr.msk.bf16.mxu1 %vm205_vm0, %v13192_v10  ;;  %1302 = vmatpush1.bf16.msra.mxu1 %v12205_v45 }
  0x9d   :  { %1303 = vmatprep.subr.bf16.mxu1 %v12210_v46  ;;  %11939 = vmatprep.subr.bf16.mxu0 %v12211_v47 }
  0x9f   :  { %11940 = vmatpush3.bf16.msra.mxu0 %v12211_v47 }
  0xa0   :  { %1304 = vmatpush1.bf16.msra.mxu1 %v12208_v48  ;;  %1745 = vmatprep.subr.bf16.mxu0 %v12215_v49 }
  0xa1   :  { %11965 = vmatprep.subr.bf16.mxu1 %v12212_v50 }
  0xa2   :  { %10127 = vmatmul.mubr.msk.bf16.gmra.mxu0 %vm205_vm0, %v13182_v8  ;;  %11918 = vmatmul.mubr.msk.bf16.gmra.mxu1 %vm205_vm0, %v13204_v11 }
  0xa3   :  { %1027 = vmatprep.mubr.bf16.mxu0 %v19095_v1  ;;  %11921 = vmatprep.mubr.msk.bf16.mxu1 %vm205_vm0, %v13209_v12 }
  0xaa   :  { %10128 = vmatmul.mubr.msk.bf16.gmra.mxu0 %vm205_vm0, %v13192_v10  ;;  %11922 = vmatmul.mubr.msk.bf16.gmra.mxu1 %vm205_vm0, %v13236_v18 }
  0xab   :  { %1037 = vmatprep.mubr.bf16.mxu0 %v19095_v1  ;;  %11925 = vmatprep.mubr.msk.bf16.mxu1 %vm205_vm0, %v13241_v19 }
  0xb2   :  { %10129 = vmatmul.mubr.msk.bf16.gmra.mxu0 %vm205_vm0, %v13204_v11  ;;  %11926 = vmatmul.mubr.msk.bf16.gmra.mxu1 %vm205_vm0, %v13259_v22 }
  0xb3   :  { %1047 = vmatprep.mubr.bf16.mxu0 %v19095_v1  ;;  %11929 = vmatprep.mubr.msk.bf16.mxu1 %vm205_vm0, %v13264_v23 }
  0xba   :  { %10130 = vmatmul.mubr.msk.bf16.gmra.mxu0 %vm205_vm0, %v13209_v12  ;;  %11930 = vmatmul.mubr.msk.bf16.gmra.mxu1 %vm205_vm0, %v13276_v24 }
  0xbb   :  { %1057 = vmatprep.mubr.bf16.mxu0 %v19095_v1  ;;  %11933 = vmatprep.mubr.msk.bf16.mxu1 %vm205_vm0, %v13281_v25 }
  0xc2   :  { %10131 = vmatmul.mubr.msk.bf16.gmra.mxu0 %vm205_vm0, %v13236_v18  ;;  %11934 = vmatmul.mubr.msk.bf16.gmra.mxu1 %vm205_vm0, %v13293_v26 }
  0xc3   :  { %1067 = vmatprep.mubr.bf16.mxu0 %v19095_v1  ;;  %1321 = vmatprep.mubr.bf16.mxu1 %v19095_v1 }
  0xca   :  { %v13520_v52 = vpop.f32.mrf.mxu0  ;;  %v13522_v53 = vpop.f32.mrf.mxu1  ;;  %10132 = vmatmul.mubr.msk.bf16.gmra.mxu0 %vm205_vm0, %v13241_v19  ;;  %10156 = vmatmul.mubr.msk.bf16.vlgmr.msra.gmra.mxu1 %vm205_vm0, %v13304_v27 }
  0xcb   :  { %1077 = vmatprep.mubr.bf16.mxu0 %v19095_v1  ;;  %1331 = vmatprep.mubr.bf16.mxu1 %v19095_v1 }
  0xcc   :  { %v13530_v54 = vpop.f32.mrf.mxu0  ;;  %v13532_v55 = vpop.f32.mrf.mxu1  ;;  %11966 = vmatpush3.bf16.msra.mxu1 %v12212_v50 }
  0xcd   :  { %11967 = vmatprep.subr.bf16.mxu1 %v12219_v51 }
  0xce   :  { %v13534_v56 = vpop.f32.mrf.mxu0  ;;  %v13536_v57 = vpop.f32.mrf.mxu1 }
  0xd0   :  { %v13538_v58 = vpop.f32.mrf.mxu0  ;;  %v13540_v59 = vpop.f32.mrf.mxu1  ;;  %11968 = vmatpush3.bf16.msra.mxu1 %v12219_v51 }
  0xd1   :  { %2140 = vmatprep.subr.bf16.mxu1 %v12235_v60 }
  0xd2   :  { %v13545_v61 = vpop.f32.mrf.mxu0  ;;  %v13547_v62 = vpop.f32.mrf.mxu1  ;;  %10133 = vmatmul.mubr.msk.bf16.gmra.mxu0 %vm205_vm0, %v13259_v22  ;;  %10157 = vmatmul.mubr.msk.bf16.gmra.mxu1 %vm205_vm0, %v13318_v29 }
  0xd3   :  { %1087 = vmatprep.mubr.bf16.mxu0 %v19095_v1  ;;  %1341 = vmatprep.mubr.bf16.mxu1 %v19095_v1 }
  0xd4   :  { %v13555_v63 = vpop.f32.mrf.mxu0  ;;  %v13557_v0 = vpop.f32.mrf.mxu1 }
  0xd6   :  { %v13559_v2 = vpop.f32.mrf.mxu0  ;;  %v13561_v3 = vpop.f32.mrf.mxu1 }
  0xd7   :  { %19108 = vst [vmem:[#allocation2_spill] sm:$0xff] %v13561_v3 }
  0xd8   :  { %v13563_v4 = vpop.f32.mrf.mxu0  ;;  %v13565_v5 = vpop.f32.mrf.mxu1 }
  0xd9   :  { %19109 = vst [vmem:[#allocation3_spill] sm:$0xff] %v13565_v5 }
  0xda   :  { %v13567_v6 = vpop.f32.mrf.mxu0  ;;  %v13569_v7 = vpop.f32.mrf.mxu1  ;;  %10134 = vmatmul.mubr.msk.bf16.gmra.mxu0 %vm205_vm0, %v13264_v23  ;;  %10158 = vmatmul.mubr.msk.bf16.gmra.mxu1 %vm205_vm0, %v13332_v31 }
  0xdb   :  { %19110 = vst [vmem:[#allocation4_spill] sm:$0xff] %v13569_v7  ;;  %1097 = vmatprep.mubr.bf16.mxu0 %v19095_v1  ;;  %1351 = vmatprep.mubr.bf16.mxu1 %v19095_v1 }
  0xdc   :  { %v13577_v8 = vpop.f32.mrf.mxu0  ;;  %v13579_v9 = vpop.f32.mrf.mxu1 }
  0xdd   :  { %19111 = vst [vmem:[#allocation5_spill] sm:$0xff] %v13579_v9 }
  0xde   :  { %v13581_v10 = vpop.f32.mrf.mxu0  ;;  %v13583_v11 = vpop.f32.mrf.mxu1 }
  0xdf   :  { %19112 = vst [vmem:[#allocation6_spill] sm:$0xff] %v13583_v11 }
  0xe0   :  { %v13585_v12 = vpop.f32.mrf.mxu0  ;;  %v13587_v13 = vpop.f32.mrf.mxu1 }
  0xe1   :  { %19113 = vst [vmem:[#allocation7_spill] sm:$0xff] %v13587_v13 }
  0xe2   :  { %v13589_v14 = vpop.f32.mrf.mxu0  ;;  %v13591_v15 = vpop.f32.mrf.mxu1  ;;  %10135 = vmatmul.mubr.msk.bf16.gmra.mxu0 %vm205_vm0, %v13276_v24  ;;  %10159 = vmatmul.mubr.msk.bf16.gmra.mxu1 %vm205_vm0, %v13343_v32 }
  0xe3   :  { %19114 = vst [vmem:[#allocation8_spill] sm:$0xff] %v13591_v15  ;;  %1107 = vmatprep.mubr.bf16.mxu0 %v19095_v1  ;;  %1361 = vmatprep.mubr.bf16.mxu1 %v19095_v1 }
  0xe4   :  { %v13599_v16 = vpop.f32.mrf.mxu0  ;;  %v13601_v17 = vpop.f32.mrf.mxu1 }
  0xe5   :  { %19115 = vst [vmem:[#allocation9_spill] sm:$0xff] %v13601_v17 }
  0xe6   :  { %v13603_v18 = vpop.f32.mrf.mxu0  ;;  %v13605_v19 = vpop.f32.mrf.mxu1 }
  0xe7   :  { %19116 = vst [vmem:[#allocation10_spill] sm:$0xff] %v13605_v19 }
  0xe8   :  { %v13607_v20 = vpop.f32.mrf.mxu0  ;;  %v13609_v21 = vpop.f32.mrf.mxu1 }
  0xe9   :  { %19117 = vst [vmem:[#allocation11_spill] sm:$0xff] %v13609_v21 }
  0xea   :  { %v13611_v22 = vpop.f32.mrf.mxu0  ;;  %v13613_v23 = vpop.f32.mrf.mxu1  ;;  %10136 = vmatmul.mubr.msk.bf16.gmra.mxu0 %vm205_vm0, %v13281_v25  ;;  %10160 = vmatmul.mubr.msk.bf16.gmra.mxu1 %vm205_vm0, %v13354_v33 }
  0xeb   :  { %19118 = vst [vmem:[#allocation12_spill] sm:$0xff] %v13613_v23  ;;  %1117 = vmatprep.mubr.bf16.mxu0 %v19095_v1  ;;  %1371 = vmatprep.mubr.bf16.mxu1 %v19095_v1 }
  0xec   :  { %v13621_v24 = vpop.f32.mrf.mxu0  ;;  %v13623_v28 = vpop.f32.mrf.mxu1 }
  0xed   :  { %19119 = vst [vmem:[#allocation13_spill] sm:$0xff] %v13623_v28 }
  0xee   :  { %v13625_v30 = vpop.f32.mrf.mxu0  ;;  %v13627_v36 = vpop.f32.mrf.mxu1 }
  0xef   :  { %19120 = vst [vmem:[#allocation14_spill] sm:$0xff] %v13627_v36 }
  0xf0   :  { %v13629_v37 = vpop.f32.mrf.mxu0  ;;  %v13631_v38 = vpop.f32.mrf.mxu1 }
  0xf1   :  { %19121 = vst [vmem:[#allocation15_spill] sm:$0xff] %v13631_v38 }
  0xf2   :  { %v13633_v25 = vpop.f32.mrf.mxu0  ;;  %v13635_v39 = vpop.f32.mrf.mxu1  ;;  %10137 = vmatmul.mubr.msk.bf16.gmra.mxu0 %vm205_vm0, %v13293_v26  ;;  %10161 = vmatmul.mubr.msk.bf16.gmra.mxu1 %vm205_vm0, %v13365_v34  ;;  %v12213_v26 = vld [vmem:[%s19083_s1 + $0x78] ss:$12 sps:$4 sm:$0xff]  }
  0xf3   :  { %19122 = vst [vmem:[#allocation16_spill] sm:$0xff] %v13635_v39  ;;  %1381 = vmatprep.mubr.bf16.mxu1 %v19095_v1  ;;  %11941 = vmatprep.mubr.msk.bf16.mxu0 %vm205_vm0, %v13304_v27  ;;  %v12218_v27 = vld [vmem:[%s19083_s1 + $0x64] ss:$12 sps:$4 sm:$0xff]  }
  0xf4   :  { %v13644_v45 = vpop.f32.mrf.mxu0  ;;  %v13646_v46 = vpop.f32.mrf.mxu1 }
  0xf5   :  { %19123 = vst [vmem:[#allocation17_spill] sm:$0xff] %v13646_v46 }
  0xf6   :  { %v13648_v47 = vpop.f32.mrf.mxu0  ;;  %v13650_v48 = vpop.f32.mrf.mxu1 }
  0xf7   :  { %19124 = vst [vmem:[#allocation18_spill] sm:$0xff] %v13650_v48  ;;  %v19126_v48 = vmov 0  }
  0xf8   :  { %v13655_v49 = vpop.f32.mrf.mxu0  ;;  %v13657_v50 = vpop.f32.mrf.mxu1 }
  0xf9   :  { %19125 = vst [vmem:[#allocation19_spill] sm:$0xff] %v13657_v50  ;;  %v12216_v50 = vld [vmem:[%s19083_s1 + $0x60] ss:$12 sps:$4 sm:$0xff]  }
  0xfa   :  { %v13662_v51 = vpop.f32.mrf.mxu0  ;;  %v686_v60 = vpop.f32.mrf.mxu1  ;;  %10162 = vmatmul.mubr.msk.bf16.gmra.mxu1 %vm205_vm0, %v13377_v35  ;;  %11942 = vmatmul.mubr.msk.bf16.vlgmr.msra.gmra.mxu0 %vm205_vm0, %v13318_v29  ;;  %v13682_v29 = vld [vmem:[%s19085_s2 + $0x80] ss:$12 sps:$4 sm:$0xff]  }
  0xfb   :  { %v13669_v1 = vadd.f32 %v686_v60, %v13520_v52  ;;  %1746 = vmatpush1.bf16.msra.mxu0 %v12213_v26  ;;  %1391 = vmatprep.mubr.bf16.mxu1 %v19126_v48 }
  0xfc   :  { %v13675_v46 = vpop.f32.mrf.mxu0  ;;  %v688_v39 = vpop.f32.mrf.mxu1  ;;  %11945 = vmatprep.mubr.msk.bf16.mxu0 %vm205_vm0, %v13332_v31  ;;  %1747 = vmatprep.subr.bf16.mxu0 %v12218_v27 }
  0xfd   :  { %v13685_v52 = vadd.f32 %v688_v39, %v13530_v54 }
  0xfe   :  { %v13687_v26 = vpop.f32.mrf.mxu0  ;;  %v690_v60 = vpop.f32.mrf.mxu1 }
  0xff   :  { %v13690_v38 = vadd.f32 %v690_v60, %v13534_v56  ;;  %1748 = vmatpush1.bf16.msra.mxu0 %v12216_v50 }
 0x100   :  { %v13692_v36 = vpop.f32.mrf.mxu0  ;;  %v692_v28 = vpop.f32.mrf.mxu1  ;;  %11993 = vmatprep.subr.bf16.mxu0 %v13682_v29 }
 0x101   :  { %v13696_v31 = vadd.f32 %v692_v28, %v13538_v58 }
 0x102   :  { %v13698_v27 = vpop.f32.mrf.mxu0  ;;  %v696_v23 = vpop.f32.mrf.mxu1  ;;  %10163 = vmatmul.mubr.msk.bf16.gmra.mxu1 %vm205_vm0, %v13401_v40  ;;  %11946 = vmatmul.mubr.msk.bf16.gmra.mxu0 %vm205_vm0, %v13343_v32 }
 0x103   :  { %v13705_v54 = vadd.f32 %v696_v23, %v13545_v61  ;;  %1401 = vmatprep.mubr.bf16.mxu1 %v19126_v48  ;;  %11949 = vmatprep.mubr.msk.bf16.mxu0 %vm205_vm0, %v13354_v33 }
 0x104   :  { %v13710_v56 = vpop.f32.mrf.mxu0  ;;  %v698_v58 = vpop.f32.mrf.mxu1 }
 0x105   :  { %v13713_v28 = vadd.f32 %v698_v58, %v13555_v63 }
 0x106   :  { %v13715_v39 = vpop.f32.mrf.mxu0  ;;  %v700_v50 = vpop.f32.mrf.mxu1 }
 0x107   :  { %19127 = vst [vmem:[#allocation20_spill] sm:$0xff] %v13713_v28  ;;  %v13718_v60 = vadd.f32 %v700_v50, %v13559_v2 }
 0x108   :  { %v13720_v32 = vpop.f32.mrf.mxu0  ;;  %v702_v61 = vpop.f32.mrf.mxu1 }
 0x109   :  { %19128 = vst [vmem:[#allocation21_spill] sm:$0xff] %v13718_v60  ;;  %v13723_v23 = vadd.f32 %v702_v61, %v13563_v4 }
 0x10a   :  { %v13725_v21 = vpop.f32.mrf.mxu0  ;;  %v706_v33 = vpop.f32.mrf.mxu1  ;;  %10164 = vmatmul.mubr.msk.bf16.gmra.mxu1 %vm205_vm0, %v13413_v41  ;;  %11950 = vmatmul.mubr.msk.bf16.gmra.mxu0 %vm205_vm0, %v13365_v34 }
 0x10b   :  { %19129 = vst [vmem:[#allocation22_spill] sm:$0xff] %v13723_v23  ;;  %v13732_v63 = vadd.f32 %v706_v33, %v13567_v6  ;;  %1411 = vmatprep.mubr.bf16.mxu1 %v19126_v48  ;;  %11953 = vmatprep.mubr.msk.bf16.mxu0 %vm205_vm0, %v13377_v35 }
 0x10c   :  { %v13737_v2 = vpop.f32.mrf.mxu0  ;;  %v708_v4 = vpop.f32.mrf.mxu1 }
 0x10d   :  { %19130 = vst [vmem:[#allocation23_spill] sm:$0xff] %v13732_v63  ;;  %v13740_v58 = vadd.f32 %v708_v4, %v13577_v8 }
 0x10e   :  { %v13742_v50 = vpop.f32.mrf.mxu0  ;;  %v710_v61 = vpop.f32.mrf.mxu1 }
 0x10f   :  { %19131 = vst [vmem:[#allocation24_spill] sm:$0xff] %v13740_v58  ;;  %v13745_v19 = vadd.f32 %v710_v61, %v13581_v10 }
 0x110   :  { %v13747_v34 = vpop.f32.mrf.mxu0  ;;  %v712_v6 = vpop.f32.mrf.mxu1 }
 0x111   :  { %19132 = vst [vmem:[#allocation25_spill] sm:$0xff] %v13745_v19  ;;  %v13750_v33 = vadd.f32 %v712_v6, %v13585_v12 }
 0x112   :  { %v13752_v17 = vpop.f32.mrf.mxu0  ;;  %v716_v35 = vpop.f32.mrf.mxu1  ;;  %10165 = vmatmul.mubr.msk.bf16.gmra.mxu1 %vm205_vm0, %v13425_v42  ;;  %11954 = vmatmul.mubr.msk.bf16.gmra.mxu0 %vm205_vm0, %v13401_v40 }
 0x113   :  { %19133 = vst [vmem:[#allocation26_spill] sm:$0xff] %v13750_v33  ;;  %v13759_v8 = vadd.f32 %v716_v35, %v13589_v14  ;;  %1421 = vmatprep.mubr.bf16.mxu1 %v19126_v48  ;;  %11957 = vmatprep.mubr.msk.bf16.mxu0 %vm205_vm0, %v13413_v41 }
 0x114   :  { %v13764_v10 = vpop.f32.mrf.mxu0  ;;  %v718_v12 = vpop.f32.mrf.mxu1 }
 0x115   :  { %19134 = vst [vmem:[#allocation27_spill] sm:$0xff] %v13759_v8  ;;  %v13767_v4 = vadd.f32 %v718_v12, %v13599_v16 }
 0x116   :  { %v13769_v61 = vpop.f32.mrf.mxu0  ;;  %v720_v6 = vpop.f32.mrf.mxu1 }
 0x117   :  { %19135 = vst [vmem:[#allocation28_spill] sm:$0xff] %v13767_v4  ;;  %v13772_v33 = vadd.f32 %v720_v6, %v13603_v18 }
 0x118   :  { %v13774_v40 = vpop.f32.mrf.mxu0  ;;  %v722_v14 = vpop.f32.mrf.mxu1 }
 0x119   :  { %19136 = vst [vmem:[#allocation29_spill] sm:$0xff] %v13772_v33  ;;  %v13777_v35 = vadd.f32 %v722_v14, %v13607_v20  ;;  %v13891_v33 = vld [vmem:[%s19084_s0 + $0x20] sm:$0xff]  }
 0x11a   :  { %v13779_v8 = vpop.f32.mrf.mxu0  ;;  %v726_v41 = vpop.f32.mrf.mxu1  ;;  %10166 = vmatmul.mubr.msk.bf16.gmra.mxu1 %vm205_vm0, %v13437_v43  ;;  %11958 = vmatmul.mubr.msk.bf16.gmra.mxu0 %vm205_vm0, %v13425_v42  ;;  %v13804_v42 = vld [vmem:[%s19084_s0 + $0x8] sm:$0xff]  }
 0x11b   :  { %19137 = vst [vmem:[#allocation30_spill] sm:$0xff] %v13777_v35  ;;  %v13786_v16 = vadd.f32 %v726_v41, %v13611_v22  ;;  %1431 = vmatprep.mubr.bf16.mxu1 %v19126_v48  ;;  %11961 = vmatprep.mubr.msk.bf16.mxu0 %vm205_vm0, %v13437_v43 }
 0x11c   :  { %v13791_v18 = vpop.f32.mrf.mxu0  ;;  %v728_v20 = vpop.f32.mrf.mxu1 }
 0x11d   :  { %19138 = vst [vmem:[#allocation31_spill] sm:$0xff] %v13786_v16  ;;  %v13794_v12 = vadd.f32 %v728_v20, %v13621_v24 }
 0x11e   :  { %v13796_v6 = vpop.f32.mrf.mxu0  ;;  %v730_v14 = vpop.f32.mrf.mxu1 }
 0x11f   :  { %19139 = vst [vmem:[#allocation32_spill] sm:$0xff] %v13794_v12  ;;  %v13799_v35 = vadd.f32 %v730_v14, %v13625_v30  ;;  %v12236_v12 = vld [vmem:[%s19085_s2 + $0x60] ss:$12 sps:$4 sm:$0xff]  }
 0x120   :  { %v13806_v22 = vpop.f32.mrf.mxu0  ;;  %v732_v43 = vpop.f32.mrf.mxu1 }
 0x121   :  { %19140 = vst [vmem:[#allocation33_spill] sm:$0xff] %v13799_v35  ;;  %v13809_v41 = vadd.f32 %v732_v43, %v13629_v37  ;;  %v13843_v35 = vld [vmem:[%s19084_s0 + $0x18] sm:$0xff]  }
 0x122   :  { %v13811_v16 = vpop.f32.mrf.mxu0  ;;  %v736_v24 = vpop.f32.mrf.mxu1  ;;  %10167 = vmatmul.mubr.msk.bf16.gmra.mxu1 %vm205_vm0, %v13449_v44  ;;  %11962 = vmatmul.mubr.msk.bf16.gmra.mxu0 %vm205_vm0, %v13449_v44  ;;  %v13833_v44 = vld [vmem:[%s19084_s0 + $0x10] sm:$0xff]  }
 0x123   :  { %19141 = vst [vmem:[#allocation34_spill] sm:$0xff] %v13809_v41  ;;  %v13818_v30 = vadd.f32 %v736_v24, %v13633_v25  ;;  %1765 = vmatprep.mubr.bf16.mxu0 %v19126_v48  ;;  %11969 = vmatprep.mubr.msk.bf16.mxu1 %vm205_vm0, %v13804_v42 }
 0x124   :  { %v13823_v20 = vpop.f32.mrf.mxu0  ;;  %v738_v37 = vpop.f32.mrf.mxu1 }
 0x125   :  { %19142 = vst [vmem:[#allocation35_spill] sm:$0xff] %v13818_v30  ;;  %v13826_v14 = vadd.f32 %v738_v37, %v13644_v45  ;;  %v12233_v45 = vld [vmem:[%s19085_s2 + $0x78] ss:$12 sps:$4 sm:$0xff]  }
 0x126   :  { %v13828_v43 = vpop.f32.mrf.mxu0  ;;  %v740_v41 = vpop.f32.mrf.mxu1 }
 0x127   :  { %19143 = vst [vmem:[#allocation36_spill] sm:$0xff] %v13826_v14  ;;  %v13836_v25 = vadd.f32 %v740_v41, %v13648_v47  ;;  %v12238_v47 = vld [vmem:[%s19085_s2 + $0x64] ss:$12 sps:$4 sm:$0xff]   ;;  %v12239_v41 = vld [vmem:[%s19085_s2 + $0x68] ss:$12 sps:$4 sm:$0xff]  }
 0x128   :  { %v13838_v24 = vpop.f32.mrf.mxu0  ;;  %v742_v30 = vpop.f32.mrf.mxu1 }
 0x129   :  { %19144 = vst [vmem:[#allocation37_spill] sm:$0xff] %v13836_v25  ;;  %v13849_v37 = vadd.f32 %v742_v30, %v13655_v49 }
 0x12a   :  { %v746_v25 = vpop.f32.mrf.mxu1  ;;  %v13857_v14 = vpop.f32.mrf.mxu0  ;;  %10230 = vmatmul.mubr.msk.bf16.vlgmr.msra.gmra.mxu0 %vm205_vm0, %v13804_v42  ;;  %11970 = vmatmul.mubr.msk.bf16.vlgmr.msra.gmra.mxu1 %vm205_vm0, %v13833_v44 }
 0x12b   :  { %19145 = vst [vmem:[#allocation38_spill] sm:$0xff] %v13849_v37  ;;  %v13864_v49 = vadd.f32 %v746_v25, %v13662_v51  ;;  %11994 = vmatpush3.bf16.msra.mxu0 %v13682_v29  ;;  %1775 = vmatprep.mubr.bf16.mxu0 %v19126_v48  ;;  %v12243_v51 = vld [vmem:[%s19083_s1 + $0xac] ss:$12 sps:$4 sm:$0xff]   ;;  %v13884_v29 = vld [vmem:[%s19083_s1 + $0xb0] ss:$12 sps:$4 sm:$0xff]  }
 0x12c   :  { %v748_v30 = vpop.f32.mrf.mxu1  ;;  %v13868_v37 = vpop.f32.mrf.mxu0  ;;  %11973 = vmatprep.mubr.msk.bf16.mxu1 %vm205_vm0, %v13843_v35  ;;  %2141 = vmatpush1.bf16.msra.mxu1 %v12233_v45 }
 0x12d   :  { %19146 = vst [vmem:[#allocation39_spill] sm:$0xff] %v13864_v49  ;;  %v13879_v25 = vadd.f32 %v748_v30, %v13675_v46  ;;  %2142 = vmatprep.subr.bf16.mxu1 %v12238_v47  ;;  %11995 = vmatprep.subr.bf16.mxu0 %v12239_v41  ;;  %v13899_v46 = vld [vmem:[%s19084_s0 + $0x28] sm:$0xff]  }
 0x12e   :  { %v750_v49 = vpop.f32.mrf.mxu1  ;;  %v13886_v45 = vpop.f32.mrf.mxu0 }
 0x12f   :  { %19147 = vst [vmem:[#allocation40_spill] sm:$0xff] %v13879_v25  ;;  %v13894_v4 = vadd.f32 %v750_v49, %v13687_v26  ;;  %11996 = vmatpush3.bf16.msra.mxu0 %v12239_v41 }
 0x130   :  { %v752_v47 = vpop.f32.mrf.mxu1  ;;  %v13901_v30 = vpop.f32.mrf.mxu0  ;;  %2143 = vmatpush1.bf16.msra.mxu1 %v12236_v12  ;;  %2656 = vmatprep.subr.bf16.mxu0 %v12243_v51 }
 0x131   :  { %19148 = vst [vmem:[#allocation41_spill] sm:$0xff] %v13894_v4  ;;  %v13904_v25 = vadd.f32 %v752_v47, %v13692_v36  ;;  %12021 = vmatprep.subr.bf16.mxu1 %v13884_v29  ;;  %v13929_v47 = vld [vmem:[%s19084_s0 + $0x30] sm:$0xff]   ;;  %v13966_v4 = vld [vmem:[%s19084_s0 + $0x40] sm:$0xff]  }
 0x132   :  { %v756_v15 = vpop.f32.mrf.mxu1  ;;  %v13907_v19 = vpop.f32.mrf.mxu0  ;;  %10231 = vmatmul.mubr.msk.bf16.gmra.mxu0 %vm205_vm0, %v13833_v44  ;;  %11974 = vmatmul.mubr.msk.bf16.gmra.mxu1 %vm205_vm0, %v13891_v33 }
 0x133   :  { %19149 = vst [vmem:[#allocation42_spill] sm:$0xff] %v13904_v25  ;;  %v13914_v26 = vadd.f32 %v756_v15, %v13698_v27  ;;  %1785 = vmatprep.mubr.bf16.mxu0 %v19126_v48  ;;  %11977 = vmatprep.mubr.msk.bf16.mxu1 %vm205_vm0, %v13899_v46  ;;  %v13937_v27 = vld [vmem:[%s19084_s0 + $0x38] sm:$0xff]  }
 0x134   :  { %v758_v36 = vpop.f32.mrf.mxu1  ;;  %v13919_v12 = vpop.f32.mrf.mxu0 }
 0x135   :  { %19150 = vst [vmem:[#allocation43_spill] sm:$0xff] %v13914_v26  ;;  %v13922_v41 = vadd.f32 %v758_v36, %v13710_v56 }
 0x136   :  { %v760_v49 = vpop.f32.mrf.mxu1  ;;  %v13924_v51 = vpop.f32.mrf.mxu0 }
 0x137   :  { %19151 = vst [vmem:[#allocation44_spill] sm:$0xff] %v13922_v41  ;;  %19152 = vst [vmem:[#allocation45_spill] sm:$0xff] %v13924_v51  ;;  %v13932_v15 = vadd.f32 %v760_v49, %v13715_v39 }
 0x138   :  { %v762_v26 = vpop.f32.mrf.mxu1  ;;  %v13939_v25 = vpop.f32.mrf.mxu0 }
 0x139   :  { %19153 = vst [vmem:[#allocation46_spill] sm:$0xff] %v13932_v15  ;;  %19154 = vst [vmem:[#allocation47_spill] sm:$0xff] %v13939_v25  ;;  %v13942_v56 = vadd.f32 %v762_v26, %v13720_v32 }
 0x13a   :  { %v766_v36 = vpop.f32.mrf.mxu1  ;;  %v13944_v41 = vpop.f32.mrf.mxu0  ;;  %10232 = vmatmul.mubr.msk.bf16.gmra.mxu0 %vm205_vm0, %v13843_v35  ;;  %11978 = vmatmul.mubr.msk.bf16.gmra.mxu1 %vm205_vm0, %v13929_v47 }
 0x13b   :  { %19155 = vst [vmem:[#allocation48_spill] sm:$0xff] %v13942_v56  ;;  %19156 = vst [vmem:[#allocation49_spill] sm:$0xff] %v13944_v41  ;;  %v13951_v39 = vadd.f32 %v766_v36, %v13725_v21  ;;  %1795 = vmatprep.mubr.bf16.mxu0 %v19126_v48  ;;  %11981 = vmatprep.mubr.msk.bf16.mxu1 %vm205_vm0, %v13937_v27  ;;  %v13974_v36 = vld [vmem:[%s19084_s0 + $0x48] sm:$0xff]  }
 0x13c   :  { %v768_v49 = vpop.f32.mrf.mxu1  ;;  %v13956_v32 = vpop.f32.mrf.mxu0 }
 0x13d   :  { %19157 = vst [vmem:[#allocation50_spill] sm:$0xff] %v13951_v39  ;;  %19158 = vst [vmem:[#allocation51_spill] sm:$0xff] %v13956_v32  ;;  %v13959_v26 = vadd.f32 %v768_v49, %v13737_v2 }
 0x13e   :  { %v770_v56 = vpop.f32.mrf.mxu1  ;;  %v13961_v15 = vpop.f32.mrf.mxu0 }
 0x13f   :  { %19159 = vst [vmem:[#allocation52_spill] sm:$0xff] %v13959_v26  ;;  %19160 = vst [vmem:[#allocation53_spill] sm:$0xff] %v13961_v15  ;;  %v13969_v21 = vadd.f32 %v770_v56, %v13742_v50 }
 0x140   :  { %v772_v39 = vpop.f32.mrf.mxu1  ;;  %v13976_v13 = vpop.f32.mrf.mxu0 }
 0x141   :  { %19161 = vst [vmem:[#allocation54_spill] sm:$0xff] %v13969_v21  ;;  %19162 = vst [vmem:[#allocation55_spill] sm:$0xff] %v13976_v13  ;;  %v13979_v2 = vadd.f32 %v772_v39, %v13747_v34 }
 0x142   :  { %v776_v49 = vpop.f32.mrf.mxu1  ;;  %v13981_v26 = vpop.f32.mrf.mxu0  ;;  %10233 = vmatmul.mubr.msk.bf16.gmra.mxu0 %vm205_vm0, %v13891_v33  ;;  %11982 = vmatmul.mubr.msk.bf16.gmra.mxu1 %vm205_vm0, %v13966_v4 }
 0x143   :  { %19163 = vst [vmem:[#allocation56_spill] sm:$0xff] %v13979_v2  ;;  %19164 = vst [vmem:[#allocation57_spill] sm:$0xff] %v13981_v26  ;;  %v13988_v50 = vadd.f32 %v776_v49, %v13752_v17  ;;  %1805 = vmatprep.mubr.bf16.mxu0 %v19126_v48  ;;  %11985 = vmatprep.mubr.msk.bf16.mxu1 %vm205_vm0, %v13974_v36  ;;  %v14003_v26 = vld [vmem:[%s19084_s0 + $0x50] sm:$0xff]   ;;  %v14011_v49 = vld [vmem:[%s19084_s0 + $0x58] sm:$0xff]  }
 0x144   :  { %v778_v56 = vpop.f32.mrf.mxu1  ;;  %v13993_v34 = vpop.f32.mrf.mxu0 }
 0x145   :  { %19165 = vst [vmem:[#allocation58_spill] sm:$0xff] %v13988_v50  ;;  %19166 = vst [vmem:[#allocation59_spill] sm:$0xff] %v13993_v34  ;;  %v13996_v39 = vadd.f32 %v778_v56, %v13764_v10 }
 0x146   :  { %v780_v2 = vpop.f32.mrf.mxu1  ;;  %v13998_v21 = vpop.f32.mrf.mxu0 }
 0x147   :  { %19167 = vst [vmem:[#allocation60_spill] sm:$0xff] %v13996_v39  ;;  %19168 = vst [vmem:[#allocation61_spill] sm:$0xff] %v13998_v21  ;;  %v14006_v17 = vadd.f32 %v780_v2, %v13769_v61 }
 0x148   :  { %v782_v50 = vpop.f32.mrf.mxu1  ;;  %v14013_v34 = vpop.f32.mrf.mxu0 }
 0x149   :  { %19169 = vst [vmem:[#allocation62_spill] sm:$0xff] %v14006_v17  ;;  %19170 = vst [vmem:[#allocation63_spill] sm:$0xff] %v14013_v34  ;;  %v14016_v10 = vadd.f32 %v782_v50, %v13774_v40 }
 0x14a   :  { %v786_v56 = vpop.f32.mrf.mxu1  ;;  %v14018_v39 = vpop.f32.mrf.mxu0  ;;  %10234 = vmatmul.mubr.msk.bf16.gmra.mxu0 %vm205_vm0, %v13899_v46  ;;  %11986 = vmatmul.mubr.msk.bf16.gmra.mxu1 %vm205_vm0, %v14003_v26 }
 0x14b   :  { %19171 = vst [vmem:[#allocation64_spill] sm:$0xff] %v14016_v10  ;;  %19172 = vst [vmem:[#allocation65_spill] sm:$0xff] %v14018_v39  ;;  %v14025_v61 = vadd.f32 %v786_v56, %v13779_v8  ;;  %1815 = vmatprep.mubr.bf16.mxu0 %v19126_v48  ;;  %11989 = vmatprep.mubr.msk.bf16.mxu1 %vm205_vm0, %v14011_v49  ;;  %v14040_v39 = vld [vmem:[%s19084_s0 + $0x60] sm:$0xff]  }
 0x14c   :  { %v788_v2 = vpop.f32.mrf.mxu1  ;;  %v14030_v40 = vpop.f32.mrf.mxu0 }
 0x14d   :  { %19173 = vst [vmem:[#allocation66_spill] sm:$0xff] %v14025_v61  ;;  %19174 = vst [vmem:[#allocation67_spill] sm:$0xff] %v14030_v40  ;;  %v14033_v50 = vadd.f32 %v788_v2, %v13791_v18 }
 0x14e   :  { %v790_v10 = vpop.f32.mrf.mxu1  ;;  %v14035_v17 = vpop.f32.mrf.mxu0 }
 0x14f   :  { %19175 = vst [vmem:[#allocation68_spill] sm:$0xff] %v14033_v50  ;;  %19176 = vst [vmem:[#allocation69_spill] sm:$0xff] %v14035_v17  ;;  %v14043_v8 = vadd.f32 %v790_v10, %v13796_v6 }
 0x150   :  { %v792_v56 = vpop.f32.mrf.mxu1  ;;  %v14045_v61 = vpop.f32.mrf.mxu0 }
 0x151   :  { %19177 = vst [vmem:[#allocation70_spill] sm:$0xff] %v14043_v8  ;;  %19178 = vst [vmem:[#allocation71_spill] sm:$0xff] %v14045_v61  ;;  %v14048_v34 = vadd.f32 %v792_v56, %v13806_v22 }
 0x152   :  { %v796_v40 = vpop.f32.mrf.mxu1  ;;  %v14050_v18 = vpop.f32.mrf.mxu0  ;;  %10235 = vmatmul.mubr.msk.bf16.gmra.mxu0 %vm205_vm0, %v13929_v47  ;;  %11990 = vmatmul.mubr.msk.bf16.gmra.mxu1 %vm205_vm0, %v14040_v39 }
 0x153   :  { %19179 = vst [vmem:[#allocation72_spill] sm:$0xff] %v14048_v34  ;;  %19180 = vst [vmem:[#allocation73_spill] sm:$0xff] %v14050_v18  ;;  %v14057_v2 = vadd.f32 %v796_v40, %v13811_v16  ;;  %1825 = vmatprep.mubr.bf16.mxu0 %v19126_v48  ;;  %2160 = vmatprep.mubr.bf16.mxu1 %v19126_v48  ;;  %v12247_v40 = vld [vmem:[%s19083_s1 + $0x98] ss:$12 sps:$4 sm:$0xff]  }
 0x154   :  { %v798_v6 = vpop.f32.mrf.mxu1  ;;  %v14061_v10 = vpop.f32.mrf.mxu0 }
 0x155   :  { %19181 = vst [vmem:[#allocation74_spill] sm:$0xff] %v14057_v2  ;;  %19182 = vst [vmem:[#allocation75_spill] sm:$0xff] %v14061_v10  ;;  %v14064_v22 = vadd.f32 %v798_v6, %v13823_v20 }
 0x156   :  { %v800_v56 = vpop.f32.mrf.mxu1  ;;  %v14066_v34 = vpop.f32.mrf.mxu0 }
 0x157   :  { %19183 = vst [vmem:[#allocation76_spill] sm:$0xff] %v14064_v22  ;;  %19184 = vst [vmem:[#allocation77_spill] sm:$0xff] %v14066_v34  ;;  %v14069_v8 = vadd.f32 %v800_v56, %v13828_v43 }
 0x158   :  { %v802_v50 = vpop.f32.mrf.mxu1  ;;  %v14071_v18 = vpop.f32.mrf.mxu0 }
 0x159   :  { %19185 = vst [vmem:[#allocation78_spill] sm:$0xff] %v14069_v8  ;;  %19186 = vst [vmem:[#allocation79_spill] sm:$0xff] %v14071_v18  ;;  %v14074_v16 = vadd.f32 %v802_v50, %v13838_v24 }
 0x15a   :  { %v14079_v2 = vpop.f32.mrf.mxu0  ;;  %v14081_v20 = vpop.f32.mrf.mxu1  ;;  %10236 = vmatmul.mubr.msk.bf16.gmra.mxu0 %vm205_vm0, %v13937_v27  ;;  %10268 = vmatmul.mubr.msk.bf16.vlgmr.msra.gmra.mxu1 %vm205_vm0, %v13804_v42 }
 0x15b   :  { %19187 = vst [vmem:[#allocation80_spill] sm:$0xff] %v14074_v16  ;;  %19188 = vst [vmem:[#allocation81_spill] sm:$0xff] %v14081_v20  ;;  %1835 = vmatprep.mubr.bf16.mxu0 %v19126_v48  ;;  %2170 = vmatprep.mubr.bf16.mxu1 %v19126_v48  ;;  %v12263_v20 = vld [vmem:[%s19085_s2 + $0xac] ss:$12 sps:$4 sm:$0xff]  }
 0x15c   :  { %v14089_v43 = vpop.f32.mrf.mxu0  ;;  %v14091_v24 = vpop.f32.mrf.mxu1  ;;  %12022 = vmatpush3.bf16.msra.mxu1 %v13884_v29 }
 0x15d   :  { %19189 = vst [vmem:[#allocation82_spill] sm:$0xff] %v14091_v24  ;;  %12023 = vmatprep.subr.bf16.mxu1 %v12247_v40 }
 0x15e   :  { %v14094_v50 = vpop.f32.mrf.mxu0  ;;  %v14096_v6 = vpop.f32.mrf.mxu1 }
 0x15f   :  { %19190 = vst [vmem:[#allocation83_spill] sm:$0xff] %v14096_v6 }
 0x160   :  { %v14098_v56 = vpop.f32.mrf.mxu0  ;;  %v14100_v16 = vpop.f32.mrf.mxu1  ;;  %12024 = vmatpush3.bf16.msra.mxu1 %v12247_v40 }
 0x161   :  { %19191 = vst [vmem:[#allocation84_spill] sm:$0xff] %v14100_v16  ;;  %3051 = vmatprep.subr.bf16.mxu1 %v12263_v20 }
 0x162   :  { %v14105_v8 = vpop.f32.mrf.mxu0  ;;  %v14107_v22 = vpop.f32.mrf.mxu1  ;;  %10237 = vmatmul.mubr.msk.bf16.gmra.mxu0 %vm205_vm0, %v13966_v4  ;;  %10269 = vmatmul.mubr.msk.bf16.gmra.mxu1 %vm205_vm0, %v13833_v44 }
 0x163   :  { %19192 = vst [vmem:[#allocation85_spill] sm:$0xff] %v14107_v22  ;;  %1845 = vmatprep.mubr.bf16.mxu0 %v19126_v48  ;;  %2180 = vmatprep.mubr.bf16.mxu1 %v19126_v48 }
 0x164   :  { %v14115_v29 = vpop.f32.mrf.mxu0  ;;  %v14117_v40 = vpop.f32.mrf.mxu1 }
 0x165   :  { %19193 = vst [vmem:[#allocation86_spill] sm:$0xff] %v14117_v40 }
 0x166   :  { %v14119_v16 = vpop.f32.mrf.mxu0  ;;  %v14121_v6 = vpop.f32.mrf.mxu1 }
 0x167   :  { %19194 = vst [vmem:[#allocation87_spill] sm:$0xff] %v14121_v6 }
 0x168   :  { %v14123_v22 = vpop.f32.mrf.mxu0  ;;  %v14125_v24 = vpop.f32.mrf.mxu1 }
 0x169   :  { %19195 = vst [vmem:[#allocation88_spill] sm:$0xff] %v14125_v24 }
 0x16a   :  { %v14127_v18 = vpop.f32.mrf.mxu0  ;;  %v14129_v34 = vpop.f32.mrf.mxu1  ;;  %10238 = vmatmul.mubr.msk.bf16.gmra.mxu0 %vm205_vm0, %v13974_v36  ;;  %10270 = vmatmul.mubr.msk.bf16.gmra.mxu1 %vm205_vm0, %v13843_v35 }
 0x16b   :  { %19196 = vst [vmem:[#allocation89_spill] sm:$0xff] %v14129_v34  ;;  %1855 = vmatprep.mubr.bf16.mxu0 %v19126_v48  ;;  %2190 = vmatprep.mubr.bf16.mxu1 %v19126_v48 }
 0x16c   :  { %v14137_v20 = vpop.f32.mrf.mxu0  ;;  %v14139_v6 = vpop.f32.mrf.mxu1 }
 0x16d   :  { %19197 = vst [vmem:[#allocation90_spill] sm:$0xff] %v14139_v6 }
 0x16e   :  { %v14141_v40 = vpop.f32.mrf.mxu0  ;;  %v14143_v24 = vpop.f32.mrf.mxu1 }
 0x16f   :  { %19198 = vst [vmem:[#allocation91_spill] sm:$0xff] %v14143_v24 }
 0x170   :  { %v14145_v10 = vpop.f32.mrf.mxu0  ;;  %v14147_v34 = vpop.f32.mrf.mxu1 }
 0x171   :  { %19199 = vst [vmem:[#allocation92_spill] sm:$0xff] %v14147_v34 }
 0x172   :  { %v14149_v61 = vpop.f32.mrf.mxu0  ;;  %v14151_v17 = vpop.f32.mrf.mxu1  ;;  %10239 = vmatmul.mubr.msk.bf16.gmra.mxu0 %vm205_vm0, %v14003_v26  ;;  %10271 = vmatmul.mubr.msk.bf16.gmra.mxu1 %vm205_vm0, %v13891_v33 }
 0x173   :  { %19200 = vst [vmem:[#allocation93_spill] sm:$0xff] %v14151_v17  ;;  %1865 = vmatprep.mubr.bf16.mxu0 %v19126_v48  ;;  %2200 = vmatprep.mubr.bf16.mxu1 %v19126_v48 }
 0x174   :  { %v14159_v6 = vpop.f32.mrf.mxu0  ;;  %v14161_v24 = vpop.f32.mrf.mxu1 }
 0x175   :  { %19201 = vst [vmem:[#allocation94_spill] sm:$0xff] %v14161_v24 }
 0x176   :  { %v14163_v21 = vpop.f32.mrf.mxu0  ;;  %v14165_v34 = vpop.f32.mrf.mxu1 }
 0x177   :  { %19202 = vst [vmem:[#allocation95_spill] sm:$0xff] %v14165_v34 }
 0x178   :  { %v14167_v13 = vpop.f32.mrf.mxu0  ;;  %v14169_v17 = vpop.f32.mrf.mxu1 }
 0x179   :  { %19203 = vst [vmem:[#allocation96_spill] sm:$0xff] %v14169_v17 }
 0x17a   :  { %v14171_v58 = vpop.f32.mrf.mxu0  ;;  %v14173_v15 = vpop.f32.mrf.mxu1  ;;  %10240 = vmatmul.mubr.msk.bf16.gmra.mxu0 %vm205_vm0, %v14011_v49  ;;  %10272 = vmatmul.mubr.msk.bf16.gmra.mxu1 %vm205_vm0, %v13899_v46 }
 0x17b   :  { %19204 = vst [vmem:[#allocation97_spill] sm:$0xff] %v14173_v15  ;;  %1875 = vmatprep.mubr.bf16.mxu0 %v19126_v48  ;;  %2210 = vmatprep.mubr.bf16.mxu1 %v19126_v48 }
 0x17c   :  { %v14181_v24 = vpop.f32.mrf.mxu0  ;;  %v14183_v34 = vpop.f32.mrf.mxu1 }
 0x17d   :  { %19205 = vst [vmem:[#allocation98_spill] sm:$0xff] %v14183_v34 }
 0x17e   :  { %v14185_v11 = vpop.f32.mrf.mxu0  ;;  %v14187_v17 = vpop.f32.mrf.mxu1 }
 0x17f   :  { %19206 = vst [vmem:[#allocation99_spill] sm:$0xff] %v14187_v17 }
 0x180   :  { %v14189_v63 = vpop.f32.mrf.mxu0  ;;  %v14191_v15 = vpop.f32.mrf.mxu1 }
 0x181   :  { %19207 = vst [vmem:[#allocation100_spill] sm:$0xff] %v14191_v15 }
 0x182   :  { %v14193_v32 = vpop.f32.mrf.mxu0  ;;  %v14195_v9 = vpop.f32.mrf.mxu1  ;;  %10241 = vmatmul.mubr.msk.bf16.gmra.mxu0 %vm205_vm0, %v14040_v39  ;;  %10273 = vmatmul.mubr.msk.bf16.gmra.mxu1 %vm205_vm0, %v13929_v47 }
 0x183   :  { %19208 = vst [vmem:[#allocation101_spill] sm:$0xff] %v14195_v9  ;;  %2220 = vmatprep.mubr.bf16.mxu1 %v19126_v48  ;;  %11997 = vmatprep.mubr.msk.bf16.mxu0 %vm205_vm0, %v13804_v42  ;;  %v12241_v9 = vld [vmem:[%s19083_s1 + $0xa8] ss:$12 sps:$4 sm:$0xff]  }
 0x184   :  { %v14204_v17 = vpop.f32.mrf.mxu0  ;;  %v14206_v34 = vpop.f32.mrf.mxu1  ;;  %v12246_v42 = vld [vmem:[%s19083_s1 + $0x94] ss:$12 sps:$4 sm:$0xff]  }
 0x185   :  { %19209 = vst [vmem:[#allocation102_spill] sm:$0xff] %v14206_v34 }
 0x186   :  { %v14208_v15 = vpop.f32.mrf.mxu0  ;;  %v14210_v23 = vpop.f32.mrf.mxu1 }
 0x187   :  { %19210 = vst [vmem:[#allocation103_spill] sm:$0xff] %v14210_v23 }
 0x188   :  { %v14215_v41 = vpop.f32.mrf.mxu0  ;;  %v14217_v7 = vpop.f32.mrf.mxu1 }
 0x189   :  { %19211 = vst [vmem:[#allocation104_spill] sm:$0xff] %v14217_v7  ;;  %v12244_v7 = vld [vmem:[%s19083_s1 + $0x90] ss:$12 sps:$4 sm:$0xff]  }
 0x18a   :  { %v14222_v60 = vpop.f32.mrf.mxu0  ;;  %v1323_v25 = vpop.f32.mrf.mxu1  ;;  %10274 = vmatmul.mubr.msk.bf16.gmra.mxu1 %vm205_vm0, %v13937_v27  ;;  %11998 = vmatmul.mubr.msk.bf16.vlgmr.msra.gmra.mxu0 %vm205_vm0, %v13833_v44  ;;  %v14242_v44 = vld [vmem:[%s19085_s2 + $0xb0] ss:$12 sps:$4 sm:$0xff]  }
 0x18b   :  { %v14229_v23 = vadd.f32 %v1323_v25, %v14079_v2  ;;  %2657 = vmatpush1.bf16.msra.mxu0 %v12241_v9  ;;  %2230 = vmatprep.mubr.bf16.mxu1 %v19126_v48 }
 0x18c   :  { %v14235_v34 = vpop.f32.mrf.mxu0  ;;  %v1325_v5 = vpop.f32.mrf.mxu1  ;;  %12001 = vmatprep.mubr.msk.bf16.mxu0 %vm205_vm0, %v13843_v35  ;;  %2658 = vmatprep.subr.bf16.mxu0 %v12246_v42 }
 0x18d   :  { %19212 = vst [vmem:[#allocation105_spill] sm:$0xff] %v14229_v23  ;;  %v14245_v9 = vadd.f32 %v1325_v5, %v14089_v43 }
 0x18e   :  { %v14247_v25 = vpop.f32.mrf.mxu0  ;;  %v1327_v2 = vpop.f32.mrf.mxu1 }
 0x18f   :  { %v14250_v23 = vadd.f32 %v1327_v2, %v14094_v50  ;;  %2659 = vmatpush1.bf16.msra.mxu0 %v12244_v7 }
 0x190   :  { %v14252_v28 = vpop.f32.mrf.mxu0  ;;  %v1329_v51 = vpop.f32.mrf.mxu1  ;;  %12049 = vmatprep.subr.bf16.mxu0 %v14242_v44 }
 0x191   :  { %v14256_v35 = vadd.f32 %v1329_v51, %v14098_v56 }
 0x192   :  { %v14258_v42 = vpop.f32.mrf.mxu0  ;;  %v1333_v3 = vpop.f32.mrf.mxu1  ;;  %10275 = vmatmul.mubr.msk.bf16.gmra.mxu1 %vm205_vm0, %v13966_v4  ;;  %12002 = vmatmul.mubr.msk.bf16.gmra.mxu0 %vm205_vm0, %v13891_v33 }
 0x193   :  { %v14265_v5 = vadd.f32 %v1333_v3, %v14105_v8  ;;  %2240 = vmatprep.mubr.bf16.mxu1 %v19126_v48  ;;  %12005 = vmatprep.mubr.msk.bf16.mxu0 %vm205_vm0, %v13899_v46 }
 0x194   :  { %v14270_v7 = vpop.f32.mrf.mxu0  ;;  %v1335_v51 = vpop.f32.mrf.mxu1 }
 0x195   :  { %19213 = vst [vmem:[#allocation106_spill] sm:$0xff] %v14265_v5  ;;  %v14273_v43 = vadd.f32 %v1335_v51, %v14115_v29 }
 0x196   :  { %v14275_v50 = vpop.f32.mrf.mxu0  ;;  %v1337_v56 = vpop.f32.mrf.mxu1 }
 0x197   :  { %v14278_v2 = vadd.f32 %v1337_v56, %v14119_v16 }
 0x198   :  { %v14280_v33 = vpop.f32.mrf.mxu0  ;;  %v1339_v3 = vpop.f32.mrf.mxu1 }
 0x199   :  { %v14283_v8 = vadd.f32 %v1339_v3, %v14123_v22 }
 0x19a   :  { %v14285_v5 = vpop.f32.mrf.mxu0  ;;  %v1343_v46 = vpop.f32.mrf.mxu1  ;;  %10276 = vmatmul.mubr.msk.bf16.gmra.mxu1 %vm205_vm0, %v13974_v36  ;;  %12006 = vmatmul.mubr.msk.bf16.gmra.mxu0 %vm205_vm0, %v13929_v47 }
 0x19b   :  { %19214 = vst [vmem:[#allocation107_spill] sm:$0xff] %v14283_v8  ;;  %v14292_v29 = vadd.f32 %v1343_v46, %v14127_v18  ;;  %2250 = vmatprep.mubr.bf16.mxu1 %v19126_v48  ;;  %12009 = vmatprep.mubr.msk.bf16.mxu0 %vm205_vm0, %v13937_v27 }
 0x19c   :  { %v14297_v16 = vpop.f32.mrf.mxu0  ;;  %v1345_v22 = vpop.f32.mrf.mxu1 }
 0x19d   :  { %19215 = vst [vmem:[#allocation108_spill] sm:$0xff] %v14292_v29  ;;  %v14300_v51 = vadd.f32 %v1345_v22, %v14137_v20 }
 0x19e   :  { %v14302_v56 = vpop.f32.mrf.mxu0  ;;  %v1347_v3 = vpop.f32.mrf.mxu1 }
 0x19f   :  { %v14305_v8 = vadd.f32 %v1347_v3, %v14141_v40 }
 0x1a0   :  { %v14307_v47 = vpop.f32.mrf.mxu0  ;;  %v1349_v18 = vpop.f32.mrf.mxu1 }
 0x1a1   :  { %v14310_v46 = vadd.f32 %v1349_v18, %v14145_v10 }
 0x1a2   :  { %v14312_v29 = vpop.f32.mrf.mxu0  ;;  %v1353_v27 = vpop.f32.mrf.mxu1  ;;  %10277 = vmatmul.mubr.msk.bf16.gmra.mxu1 %vm205_vm0, %v14003_v26  ;;  %12010 = vmatmul.mubr.msk.bf16.gmra.mxu0 %vm205_vm0, %v13966_v4 }
 0x1a3   :  { %19216 = vst [vmem:[#allocation109_spill] sm:$0xff] %v14310_v46  ;;  %v14319_v20 = vadd.f32 %v1353_v27, %v14149_v61  ;;  %2260 = vmatprep.mubr.bf16.mxu1 %v19126_v48  ;;  %12013 = vmatprep.mubr.msk.bf16.mxu0 %vm205_vm0, %v13974_v36 }
 0x1a4   :  { %v14324_v40 = vpop.f32.mrf.mxu0  ;;  %v1355_v10 = vpop.f32.mrf.mxu1 }
 0x1a5   :  { %19217 = vst [vmem:[#allocation110_spill] sm:$0xff] %v14319_v20  ;;  %v14327_v22 = vadd.f32 %v1355_v10, %v14159_v6 }
 0x1a6   :  { %v14329_v3 = vpop.f32.mrf.mxu0  ;;  %v1357_v18 = vpop.f32.mrf.mxu1 }
 0x1a7   :  { %v14332_v46 = vadd.f32 %v1357_v18, %v14163_v21 }
 0x1a8   :  { %v14334_v4 = vpop.f32.mrf.mxu0  ;;  %v1359_v61 = vpop.f32.mrf.mxu1 }
 0x1a9   :  { %19218 = vst [vmem:[#allocation111_spill] sm:$0xff] %v14332_v46  ;;  %v14337_v27 = vadd.f32 %v1359_v61, %v14167_v13 }
 0x1aa   :  { %v14339_v20 = vpop.f32.mrf.mxu0  ;;  %v1363_v36 = vpop.f32.mrf.mxu1  ;;  %10278 = vmatmul.mubr.msk.bf16.gmra.mxu1 %vm205_vm0, %v14011_v49  ;;  %12014 = vmatmul.mubr.msk.bf16.gmra.mxu0 %vm205_vm0, %v14003_v26 }
 0x1ab   :  { %19219 = vst [vmem:[#allocation112_spill] sm:$0xff] %v14337_v27  ;;  %v14346_v6 = vadd.f32 %v1363_v36, %v14171_v58  ;;  %2270 = vmatprep.mubr.bf16.mxu1 %v19126_v48  ;;  %12017 = vmatprep.mubr.msk.bf16.mxu0 %vm205_vm0, %v14011_v49  ;;  %v14364_v58 = vld [vmem:[%s19084_s0 + $0xc] sm:$0xff]  }
 0x1ac   :  { %v14351_v21 = vpop.f32.mrf.mxu0  ;;  %v1365_v13 = vpop.f32.mrf.mxu1 }
 0x1ad   :  { %19220 = vst [vmem:[#allocation113_spill] sm:$0xff] %v14346_v6  ;;  %v14354_v10 = vadd.f32 %v1365_v13, %v14181_v24 }
 0x1ae   :  { %v14356_v18 = vpop.f32.mrf.mxu0  ;;  %v1367_v61 = vpop.f32.mrf.mxu1 }
 0x1af   :  { %19221 = vst [vmem:[#allocation114_spill] sm:$0xff] %v14354_v10  ;;  %v14359_v27 = vadd.f32 %v1367_v61, %v14185_v11 }
 0x1b0   :  { %v14366_v26 = vpop.f32.mrf.mxu0  ;;  %v1369_v49 = vpop.f32.mrf.mxu1 }
 0x1b1   :  { %19222 = vst [vmem:[#allocation115_spill] sm:$0xff] %v14359_v27  ;;  %v14369_v36 = vadd.f32 %v1369_v49, %v14189_v63  ;;  %v14403_v27 = vld [vmem:[%s19084_s0 + $0x1c] sm:$0xff]  }
 0x1b2   :  { %v14371_v6 = vpop.f32.mrf.mxu0  ;;  %v1373_v24 = vpop.f32.mrf.mxu1  ;;  %10279 = vmatmul.mubr.msk.bf16.gmra.mxu1 %vm205_vm0, %v14040_v39  ;;  %12018 = vmatmul.mubr.msk.bf16.gmra.mxu0 %vm205_vm0, %v14040_v39  ;;  %v14393_v39 = vld [vmem:[%s19084_s0 + $0x14] sm:$0xff]  }
 0x1b3   :  { %19223 = vst [vmem:[#allocation116_spill] sm:$0xff] %v14369_v36  ;;  %v14378_v11 = vadd.f32 %v1373_v24, %v14193_v32  ;;  %2676 = vmatprep.mubr.bf16.mxu0 %v19126_v48  ;;  %12025 = vmatprep.mubr.msk.bf16.mxu1 %vm205_vm0, %v14364_v58 }
 0x1b4   :  { %v14383_v13 = vpop.f32.mrf.mxu0  ;;  %v1375_v63 = vpop.f32.mrf.mxu1 }
 0x1b5   :  { %19224 = vst [vmem:[#allocation117_spill] sm:$0xff] %v14378_v11  ;;  %v14386_v61 = vadd.f32 %v1375_v63, %v14204_v17  ;;  %v12261_v17 = vld [vmem:[%s19085_s2 + $0xa8] ss:$12 sps:$4 sm:$0xff]  }
 0x1b6   :  { %v14388_v49 = vpop.f32.mrf.mxu0  ;;  %v1377_v36 = vpop.f32.mrf.mxu1 }
 0x1b7   :  { %19225 = vst [vmem:[#allocation118_spill] sm:$0xff] %v14386_v61  ;;  %v14396_v32 = vadd.f32 %v1377_v36, %v14208_v15  ;;  %v12266_v15 = vld [vmem:[%s19085_s2 + $0x94] ss:$12 sps:$4 sm:$0xff]   ;;  %v12267_v36 = vld [vmem:[%s19085_s2 + $0x98] ss:$12 sps:$4 sm:$0xff]  }
 0x1b8   :  { %v14398_v24 = vpop.f32.mrf.mxu0  ;;  %v1379_v11 = vpop.f32.mrf.mxu1 }
 0x1b9   :  { %19226 = vst [vmem:[#allocation119_spill] sm:$0xff] %v14396_v32  ;;  %v14409_v63 = vadd.f32 %v1379_v11, %v14215_v41 }
 0x1ba   :  { %v1383_v32 = vpop.f32.mrf.mxu1  ;;  %v14417_v61 = vpop.f32.mrf.mxu0  ;;  %10342 = vmatmul.mubr.msk.bf16.vlgmr.msra.gmra.mxu0 %vm205_vm0, %v14364_v58  ;;  %12026 = vmatmul.mubr.msk.bf16.vlgmr.msra.gmra.mxu1 %vm205_vm0, %v14393_v39 }
 0x1bb   :  { %19227 = vst [vmem:[#allocation120_spill] sm:$0xff] %v14409_v63  ;;  %19228 = vst [vmem:[#allocation121_spill] sm:$0xff] %v14417_v61  ;;  %v14424_v41 = vadd.f32 %v1383_v32, %v14222_v60  ;;  %12050 = vmatpush3.bf16.msra.mxu0 %v14242_v44  ;;  %2686 = vmatprep.mubr.bf16.mxu0 %v19126_v48  ;;  %v12264_v61 = vld [vmem:[%s19085_s2 + $0x90] ss:$12 sps:$4 sm:$0xff]   ;;  %v14444_v44 = vld [vmem:[%s19083_s1 + $0xe0] ss:$12 sps:$4 sm:$0xff]  }
 0x1bc   :  { %v1385_v11 = vpop.f32.mrf.mxu1  ;;  %v14428_v63 = vpop.f32.mrf.mxu0  ;;  %12029 = vmatprep.mubr.msk.bf16.mxu1 %vm205_vm0, %v14403_v27  ;;  %3052 = vmatpush1.bf16.msra.mxu1 %v12261_v17  ;;  %v12271_v60 = vld [vmem:[%s19083_s1 + $0xdc] ss:$12 sps:$4 sm:$0xff]  }
 0x1bd   :  { %19229 = vst [vmem:[#allocation122_spill] sm:$0xff] %v14424_v41  ;;  %19230 = vst [vmem:[#allocation123_spill] sm:$0xff] %v14428_v63  ;;  %v14439_v32 = vadd.f32 %v1385_v11, %v14235_v34  ;;  %3053 = vmatprep.subr.bf16.mxu1 %v12266_v15  ;;  %12051 = vmatprep.subr.bf16.mxu0 %v12267_v36  ;;  %v14451_v63 = vld [vmem:[%s19084_s0 + $0x24] sm:$0xff]   ;;  %v14459_v34 = vld [vmem:[%s19084_s0 + $0x2c] sm:$0xff]  }
 0x1be   :  { %v1387_v41 = vpop.f32.mrf.mxu1  ;;  %v14446_v17 = vpop.f32.mrf.mxu0 }
 0x1bf   :  { %19231 = vst [vmem:[#allocation124_spill] sm:$0xff] %v14439_v32  ;;  %19232 = vst [vmem:[#allocation125_spill] sm:$0xff] %v14446_v17  ;;  %v14454_v10 = vadd.f32 %v1387_v41, %v14247_v25  ;;  %12052 = vmatpush3.bf16.msra.mxu0 %v12267_v36 }
 0x1c0   :  { %v1389_v15 = vpop.f32.mrf.mxu1  ;;  %v14461_v11 = vpop.f32.mrf.mxu0  ;;  %3054 = vmatpush1.bf16.msra.mxu1 %v12264_v61  ;;  %3567 = vmatprep.subr.bf16.mxu0 %v12271_v60 }
 0x1c1   :  { %v14464_v32 = vadd.f32 %v1389_v15, %v14252_v28  ;;  %12077 = vmatprep.subr.bf16.mxu1 %v14444_v44  ;;  %v14489_v15 = vld [vmem:[%s19084_s0 + $0x34] sm:$0xff]  }
 0x1c2   :  { %v1393_v17 = vpop.f32.mrf.mxu1  ;;  %v14467_v46 = vpop.f32.mrf.mxu0  ;;  %10343 = vmatmul.mubr.msk.bf16.gmra.mxu0 %vm205_vm0, %v14393_v39  ;;  %12030 = vmatmul.mubr.msk.bf16.gmra.mxu1 %vm205_vm0, %v14451_v63 }
 0x1c3   :  { %v14474_v25 = vadd.f32 %v1393_v17, %v14258_v42  ;;  %2696 = vmatprep.mubr.bf16.mxu0 %v19126_v48  ;;  %12033 = vmatprep.mubr.msk.bf16.mxu1 %vm205_vm0, %v14459_v34  ;;  %v14497_v17 = vld [vmem:[%s19084_s0 + $0x3c] sm:$0xff]  }
 0x1c4   :  { %v1395_v28 = vpop.f32.mrf.mxu1  ;;  %v14479_v61 = vpop.f32.mrf.mxu0 }
 0x1c5   :  { %19233 = vst [vmem:[#allocation126_spill] sm:$0xff] %v14474_v25  ;;  %19234 = vst [vmem:[#allocation127_spill] sm:$0xff] %v14479_v61  ;;  %v14482_v36 = vadd.f32 %v1395_v28, %v14270_v7 }
 0x1c6   :  { %v1397_v41 = vpop.f32.mrf.mxu1  ;;  %v14484_v60 = vpop.f32.mrf.mxu0 }
 0x1c7   :  { %19235 = vst [vmem:[#allocation128_spill] sm:$0xff] %v14482_v36  ;;  %v14492_v42 = vadd.f32 %v1397_v41, %v14275_v50 }
 0x1c8   :  { %v1399_v25 = vpop.f32.mrf.mxu1  ;;  %v14499_v61 = vpop.f32.mrf.mxu0 }
 0x1c9   :  { %19236 = vst [vmem:[#allocation129_spill] sm:$0xff] %v14492_v42  ;;  %v14502_v7 = vadd.f32 %v1399_v25, %v14280_v33  ;;  %v14526_v42 = vld [vmem:[%s19084_s0 + $0x44] sm:$0xff]  }
 0x1ca   :  { %v1403_v28 = vpop.f32.mrf.mxu1  ;;  %v14504_v36 = vpop.f32.mrf.mxu0  ;;  %10344 = vmatmul.mubr.msk.bf16.gmra.mxu0 %vm205_vm0, %v14403_v27  ;;  %12034 = vmatmul.mubr.msk.bf16.gmra.mxu1 %vm205_vm0, %v14489_v15 }
 0x1cb   :  { %19237 = vst [vmem:[#allocation130_spill] sm:$0xff] %v14502_v7  ;;  %19238 = vst [vmem:[#allocation131_spill] sm:$0xff] %v14504_v36  ;;  %v14511_v50 = vadd.f32 %v1403_v28, %v14285_v5  ;;  %2706 = vmatprep.mubr.bf16.mxu0 %v19126_v48  ;;  %12037 = vmatprep.mubr.msk.bf16.mxu1 %vm205_vm0, %v14497_v17  ;;  %v14534_v28 = vld [vmem:[%s19084_s0 + $0x4c] sm:$0xff]  }
 0x1cc   :  { %v1405_v41 = vpop.f32.mrf.mxu1  ;;  %v14516_v33 = vpop.f32.mrf.mxu0 }
 0x1cd   :  { %19239 = vst [vmem:[#allocation132_spill] sm:$0xff] %v14511_v50  ;;  %19240 = vst [vmem:[#allocation133_spill] sm:$0xff] %v14516_v33  ;;  %v14519_v25 = vadd.f32 %v1405_v41, %v14297_v16 }
 0x1ce   :  { %v1407_v7 = vpop.f32.mrf.mxu1  ;;  %v14521_v36 = vpop.f32.mrf.mxu0 }
 0x1cf   :  { %19241 = vst [vmem:[#allocation134_spill] sm:$0xff] %v14519_v25  ;;  %v14529_v5 = vadd.f32 %v1407_v7, %v14302_v56 }
 0x1d0   :  { %v1409_v50 = vpop.f32.mrf.mxu1  ;;  %v14536_v33 = vpop.f32.mrf.mxu0 }
 0x1d1   :  { %19242 = vst [vmem:[#allocation135_spill] sm:$0xff] %v14529_v5  ;;  %v14539_v16 = vadd.f32 %v1409_v50, %v14307_v47  ;;  %v14563_v5 = vld [vmem:[%s19084_s0 + $0x54] sm:$0xff]  }
 0x1d2   :  { %v1413_v41 = vpop.f32.mrf.mxu1  ;;  %v14541_v25 = vpop.f32.mrf.mxu0  ;;  %10345 = vmatmul.mubr.msk.bf16.gmra.mxu0 %vm205_vm0, %v14451_v63  ;;  %12038 = vmatmul.mubr.msk.bf16.gmra.mxu1 %vm205_vm0, %v14526_v42 }
 0x1d3   :  { %19243 = vst [vmem:[#allocation136_spill] sm:$0xff] %v14539_v16  ;;  %19244 = vst [vmem:[#allocation137_spill] sm:$0xff] %v14541_v25  ;;  %v14548_v56 = vadd.f32 %v1413_v41, %v14312_v29  ;;  %2716 = vmatprep.mubr.bf16.mxu0 %v19126_v48  ;;  %12041 = vmatprep.mubr.msk.bf16.mxu1 %vm205_vm0, %v14534_v28  ;;  %v14571_v41 = vld [vmem:[%s19084_s0 + $0x5c] sm:$0xff]  }
 0x1d4   :  { %v1415_v7 = vpop.f32.mrf.mxu1  ;;  %v14553_v47 = vpop.f32.mrf.mxu0 }
 0x1d5   :  { %19245 = vst [vmem:[#allocation138_spill] sm:$0xff] %v14548_v56  ;;  %19246 = vst [vmem:[#allocation139_spill] sm:$0xff] %v14553_v47  ;;  %v14556_v50 = vadd.f32 %v1415_v7, %v14324_v40 }
 0x1d6   :  { %v1417_v16 = vpop.f32.mrf.mxu1  ;;  %v14558_v25 = vpop.f32.mrf.mxu0 }
 0x1d7   :  { %19247 = vst [vmem:[#allocation140_spill] sm:$0xff] %v14556_v50  ;;  %v14566_v29 = vadd.f32 %v1417_v16, %v14329_v3 }
 0x1d8   :  { %v1419_v56 = vpop.f32.mrf.mxu1  ;;  %v14573_v47 = vpop.f32.mrf.mxu0 }
 0x1d9   :  { %19248 = vst [vmem:[#allocation141_spill] sm:$0xff] %v14566_v29  ;;  %19249 = vst [vmem:[#allocation142_spill] sm:$0xff] %v14573_v47  ;;  %v14576_v40 = vadd.f32 %v1419_v56, %v14334_v4  ;;  %v14600_v29 = vld [vmem:[%s19084_s0 + $0x64] sm:$0xff]  }
 0x1da   :  { %v1423_v7 = vpop.f32.mrf.mxu1  ;;  %v14578_v50 = vpop.f32.mrf.mxu0  ;;  %10346 = vmatmul.mubr.msk.bf16.gmra.mxu0 %vm205_vm0, %v14459_v34  ;;  %12042 = vmatmul.mubr.msk.bf16.gmra.mxu1 %vm205_vm0, %v14563_v5 }
 0x1db   :  { %19250 = vst [vmem:[#allocation143_spill] sm:$0xff] %v14576_v40  ;;  %19251 = vst [vmem:[#allocation144_spill] sm:$0xff] %v14578_v50  ;;  %v14585_v3 = vadd.f32 %v1423_v7, %v14339_v20  ;;  %2726 = vmatprep.mubr.bf16.mxu0 %v19126_v48  ;;  %12045 = vmatprep.mubr.msk.bf16.mxu1 %vm205_vm0, %v14571_v41 }
 0x1dc   :  { %v1425_v16 = vpop.f32.mrf.mxu1  ;;  %v14590_v4 = vpop.f32.mrf.mxu0 }
 0x1dd   :  { %19252 = vst [vmem:[#allocation145_spill] sm:$0xff] %v14585_v3  ;;  %19253 = vst [vmem:[#allocation146_spill] sm:$0xff] %v14590_v4  ;;  %v14593_v56 = vadd.f32 %v1425_v16, %v14351_v21 }
 0x1de   :  { %v1427_v40 = vpop.f32.mrf.mxu1  ;;  %v14595_v50 = vpop.f32.mrf.mxu0 }
 0x1df   :  { %v14603_v20 = vadd.f32 %v1427_v40, %v14356_v18 }
 0x1e0   :  { %v1429_v7 = vpop.f32.mrf.mxu1  ;;  %v14605_v3 = vpop.f32.mrf.mxu0 }
 0x1e1   :  { %19254 = vst [vmem:[#allocation147_spill] sm:$0xff] %v14603_v20  ;;  %19255 = vst [vmem:[#allocation148_spill] sm:$0xff] %v14605_v3  ;;  %v14608_v47 = vadd.f32 %v1429_v7, %v14366_v26 }
 0x1e2   :  { %v1433_v4 = vpop.f32.mrf.mxu1  ;;  %v14610_v21 = vpop.f32.mrf.mxu0  ;;  %10347 = vmatmul.mubr.msk.bf16.gmra.mxu0 %vm205_vm0, %v14489_v15  ;;  %12046 = vmatmul.mubr.msk.bf16.gmra.mxu1 %vm205_vm0, %v14600_v29 }
 0x1e3   :  { %19256 = vst [vmem:[#allocation149_spill] sm:$0xff] %v14608_v47  ;;  %19257 = vst [vmem:[#allocation150_spill] sm:$0xff] %v14610_v21  ;;  %v14617_v16 = vadd.f32 %v1433_v4, %v14371_v6  ;;  %2736 = vmatprep.mubr.bf16.mxu0 %v19126_v48  ;;  %3071 = vmatprep.mubr.bf16.mxu1 %v19126_v48  ;;  %v848_v6 = vadd.f32 %v13857_v14, %v13522_v53 }
 0x1e4   :  { %v1435_v18 = vpop.f32.mrf.mxu1  ;;  %v14621_v40 = vpop.f32.mrf.mxu0 }
 0x1e5   :  { %v14624_v26 = vadd.f32 %v1435_v18, %v14383_v13  ;;  %v12275_v13 = vld [vmem:[%s19083_s1 + $0xc8] ss:$12 sps:$4 sm:$0xff]  }
 0x1e6   :  { %v1437_v7 = vpop.f32.mrf.mxu1  ;;  %v14626_v47 = vpop.f32.mrf.mxu0 }
 0x1e7   :  { %19258 = vst [vmem:[#allocation151_spill] sm:$0xff] %v14624_v26  ;;  %v14629_v21 = vadd.f32 %v1437_v7, %v14388_v49  ;;  %v840_v49 = vadd.f32 %v13868_v37, %v13532_v55  ;;  %v851_v7 = vadd.f32 %v13886_v45, %v13536_v57  ;;  %v12291_v57 = vld [vmem:[%s19085_s2 + $0xdc] ss:$12 sps:$4 sm:$0xff]  }
 0x1e8   :  { %v1439_v20 = vpop.f32.mrf.mxu1  ;;  %v14631_v3 = vpop.f32.mrf.mxu0 }
 0x1e9   :  { %v14636_v4 = vadd.f32 %v1439_v20, %v14398_v24 }
 0x1ea   :  { %v1767_v18 = vpop.f32.mrf.mxu0  ;;  %v11971_v26 = vpop.f32.mrf.mxu1  ;;  %10348 = vmatmul.mubr.msk.bf16.gmra.mxu0 %vm205_vm0, %v14497_v17  ;;  %10380 = vmatmul.mubr.msk.bf16.vlgmr.msra.gmra.mxu1 %vm205_vm0, %v14364_v58 }
 0x1eb   :  { %19259 = vst [vmem:[#allocation152_spill] sm:$0xff] %v14636_v4  ;;  %v14648_v53 = vadd.f32 %v1767_v18, %v13669_v1  ;;  %v14650_v14 = vadd.f32 %v11971_v26, %v848_v6  ;;  %2746 = vmatprep.mubr.bf16.mxu0 %v19126_v48  ;;  %3081 = vmatprep.mubr.bf16.mxu1 %v19126_v48 }
 0x1ec   :  { %v1769_v24 = vpop.f32.mrf.mxu0  ;;  %v1920_v20 = vpop.f32.mrf.mxu1  ;;  %12078 = vmatpush3.bf16.msra.mxu1 %v14444_v44  ;;  %v843_v26 = vadd.f32 %v13901_v30, %v13540_v59  ;;  %v856_v30 = vadd.f32 %v13919_v12, %v13557_v0  ;;  %v19269_v12 = vld [vmem:[#allocation3_spill] sm:$0xff] }
 0x1ed   :  { %19260 = vst [vmem:[#allocation153_spill] sm:$0xff] %v14650_v14  ;;  %v14658_v4 = vadd.f32 %v1769_v24, %v13685_v52  ;;  %v14660_v55 = vadd.f32 %v1920_v20, %v840_v49  ;;  %12079 = vmatprep.subr.bf16.mxu1 %v12275_v13  ;;  %v864_v52 = vadd.f32 %v13907_v19, %v13547_v62  ;;  %v19265_v24 = vld [vmem:[#allocation45_spill] sm:$0xff] }
 0x1ee   :  { %v1771_v1 = vpop.f32.mrf.mxu0  ;;  %v11972_v37 = vpop.f32.mrf.mxu1 }
 0x1ef   :  { %v14665_v6 = vadd.f32 %v1771_v1, %v13690_v38  ;;  %v14667_v18 = vadd.f32 %v11972_v37, %v851_v7  ;;  %v19266_v7 = vld [vmem:[#allocation20_spill] sm:$0xff] }
 0x1f0   :  { %v1773_v44 = vpop.f32.mrf.mxu0  ;;  %v1923_v14 = vpop.f32.mrf.mxu1  ;;  %12080 = vmatpush3.bf16.msra.mxu1 %v12275_v13 }
 0x1f1   :  { %v14675_v45 = vadd.f32 %v1773_v44, %v13696_v31  ;;  %v14677_v49 = vadd.f32 %v1923_v14, %v843_v26  ;;  %3962 = vmatprep.subr.bf16.mxu1 %v12291_v57  ;;  %v19264_v14 = vld [vmem:[#allocation2_spill] sm:$0xff]  ;;  %v19270_v26 = vld [vmem:[#allocation47_spill] sm:$0xff] }
 0x1f2   :  { %v1777_v59 = vpop.f32.mrf.mxu0  ;;  %v11975_v38 = vpop.f32.mrf.mxu1  ;;  %10349 = vmatmul.mubr.msk.bf16.gmra.mxu0 %vm205_vm0, %v14526_v42  ;;  %10381 = vmatmul.mubr.msk.bf16.gmra.mxu1 %vm205_vm0, %v14393_v39  ;;  %v867_v20 = vadd.f32 %v19265_v24, %v19264_v14  ;;  %v859_v44 = vadd.f32 %v19270_v26, %v19269_v12  ;;  %v19276_v24 = vld [vmem:[#allocation22_spill] sm:$0xff]  ;;  %v19281_v12 = vld [vmem:[#allocation23_spill] sm:$0xff] }
 0x1f3   :  { %19261 = vst [vmem:[#allocation154_spill] sm:$0xff] %v14677_v49  ;;  %v14686_v13 = vadd.f32 %v1777_v59, %v13705_v54  ;;  %v14688_v62 = vadd.f32 %v11975_v38, %v864_v52  ;;  %2756 = vmatprep.mubr.bf16.mxu0 %v19126_v48  ;;  %3091 = vmatprep.mubr.bf16.mxu1 %v19126_v48  ;;  %v19271_v52 = vld [vmem:[#allocation21_spill] sm:$0xff] }
 0x1f4   :  { %v1779_v19 = vpop.f32.mrf.mxu0  ;;  %v1936_v31 = vpop.f32.mrf.mxu1  ;;  %v19275_v49 = vld [vmem:[#allocation49_spill] sm:$0xff] }
 0x1f5   :  { %19262 = vst [vmem:[#allocation155_spill] sm:$0xff] %v14686_v13  ;;  %19263 = vst [vmem:[#allocation156_spill] sm:$0xff] %v14688_v62  ;;  %v14695_v1 = vadd.f32 %v1779_v19, %v19266_v7  ;;  %v14697_v37 = vadd.f32 %v1936_v31, %v856_v30  ;;  %v19274_v13 = vld [vmem:[#allocation4_spill] sm:$0xff] }
 0x1f6   :  { %v1781_v0 = vpop.f32.mrf.mxu0  ;;  %v11976_v54 = vpop.f32.mrf.mxu1  ;;  %v880_v14 = vadd.f32 %v19275_v49, %v19274_v13 }
 0x1f7   :  { %19267 = vst [vmem:[#allocation2_spill] sm:$0xff] %v14695_v1  ;;  %19268 = vst [vmem:[#allocation45_spill] sm:$0xff] %v14697_v37  ;;  %v14702_v59 = vadd.f32 %v1781_v0, %v19271_v52  ;;  %v14704_v38 = vadd.f32 %v11976_v54, %v867_v20  ;;  %v19279_v20 = vld [vmem:[#allocation5_spill] sm:$0xff]  ;;  %v19280_v0 = vld [vmem:[#allocation51_spill] sm:$0xff] }
 0x1f8   :  { %v1783_v62 = vpop.f32.mrf.mxu0  ;;  %v1939_v57 = vpop.f32.mrf.mxu1  ;;  %v872_v54 = vadd.f32 %v19280_v0, %v19279_v20  ;;  %v19285_v52 = vld [vmem:[#allocation53_spill] sm:$0xff]  ;;  %v19294_v37 = vld [vmem:[#allocation8_spill] sm:$0xff] }
 0x1f9   :  { %19272 = vst [vmem:[#allocation20_spill] sm:$0xff] %v14702_v59  ;;  %19273 = vst [vmem:[#allocation3_spill] sm:$0xff] %v14704_v38  ;;  %v14709_v19 = vadd.f32 %v1783_v62, %v19276_v24  ;;  %v14711_v30 = vadd.f32 %v1939_v57, %v859_v44  ;;  %v19284_v44 = vld [vmem:[#allocation6_spill] sm:$0xff]  ;;  %v19286_v24 = vld [vmem:[#allocation24_spill] sm:$0xff] }
 0x1fa   :  { %v1787_v31 = vpop.f32.mrf.mxu0  ;;  %v11979_v7 = vpop.f32.mrf.mxu1  ;;  %10350 = vmatmul.mubr.msk.bf16.gmra.mxu0 %vm205_vm0, %v14534_v28  ;;  %10382 = vmatmul.mubr.msk.bf16.gmra.mxu1 %vm205_vm0, %v14403_v27  ;;  %v883_v57 = vadd.f32 %v19285_v52, %v19284_v44  ;;  %v19295_v1 = vld [vmem:[#allocation57_spill] sm:$0xff]  ;;  %v19296_v52 = vld [vmem:[#allocation26_spill] sm:$0xff] }
 0x1fb   :  { %19277 = vst [vmem:[#allocation47_spill] sm:$0xff] %v14709_v19  ;;  %19278 = vst [vmem:[#allocation21_spill] sm:$0xff] %v14711_v30  ;;  %v14720_v26 = vadd.f32 %v1787_v31, %v19281_v12  ;;  %v14722_v49 = vadd.f32 %v11979_v7, %v880_v14  ;;  %2766 = vmatprep.mubr.bf16.mxu0 %v19126_v48  ;;  %3101 = vmatprep.mubr.bf16.mxu1 %v19126_v48  ;;  %v19289_v31 = vld [vmem:[#allocation7_spill] sm:$0xff]  ;;  %v19291_v7 = vld [vmem:[#allocation25_spill] sm:$0xff] }
 0x1fc   :  { %v1789_v13 = vpop.f32.mrf.mxu0  ;;  %v1952_v62 = vpop.f32.mrf.mxu1  ;;  %v19290_v12 = vld [vmem:[#allocation55_spill] sm:$0xff]  ;;  %v896_v44 = vadd.f32 %v19295_v1, %v19294_v37 }
 0x1fd   :  { %19282 = vst [vmem:[#allocation4_spill] sm:$0xff] %v14720_v26  ;;  %19283 = vst [vmem:[#allocation49_spill] sm:$0xff] %v14722_v49  ;;  %v14729_v30 = vadd.f32 %v1789_v13, %v19286_v24  ;;  %v14731_v19 = vadd.f32 %v1952_v62, %v872_v54  ;;  %v875_v14 = vadd.f32 %v19290_v12, %v19289_v31  ;;  %v19301_v31 = vld [vmem:[#allocation27_spill] sm:$0xff] }
 0x1fe   :  { %v1791_v20 = vpop.f32.mrf.mxu0  ;;  %v11980_v0 = vpop.f32.mrf.mxu1 }
 0x1ff   :  { %19287 = vst [vmem:[#allocation22_spill] sm:$0xff] %v14729_v30  ;;  %19288 = vst [vmem:[#allocation5_spill] sm:$0xff] %v14731_v19  ;;  %v14736_v49 = vadd.f32 %v1791_v20, %v19291_v7  ;;  %v14738_v26 = vadd.f32 %v11980_v0, %v883_v57  ;;  %v19299_v57 = vld [vmem:[#allocation9_spill] sm:$0xff]  ;;  %v19300_v20 = vld [vmem:[#allocation59_spill] sm:$0xff] }
 0x200   :  { %v1793_v38 = vpop.f32.mrf.mxu0  ;;  %v1955_v59 = vpop.f32.mrf.mxu1  ;;  %v888_v0 = vadd.f32 %v19300_v20, %v19299_v57  ;;  %v19314_v19 = vld [vmem:[#allocation12_spill] sm:$0xff]  ;;  %v19315_v30 = vld [vmem:[#allocation65_spill] sm:$0xff] }
 0x201   :  { %19292 = vst [vmem:[#allocation51_spill] sm:$0xff] %v14736_v49  ;;  %19293 = vst [vmem:[#allocation23_spill] sm:$0xff] %v14738_v26  ;;  %v14743_v13 = vadd.f32 %v1793_v38, %v19296_v52  ;;  %v14745_v54 = vadd.f32 %v1955_v59, %v875_v14  ;;  %v19304_v38 = vld [vmem:[#allocation10_spill] sm:$0xff]  ;;  %v19305_v14 = vld [vmem:[#allocation61_spill] sm:$0xff] }
 0x202   :  { %v1797_v62 = vpop.f32.mrf.mxu0  ;;  %v11983_v24 = vpop.f32.mrf.mxu1  ;;  %10351 = vmatmul.mubr.msk.bf16.gmra.mxu0 %vm205_vm0, %v14563_v5  ;;  %10383 = vmatmul.mubr.msk.bf16.gmra.mxu1 %vm205_vm0, %v14451_v63  ;;  %v899_v7 = vadd.f32 %v19305_v14, %v19304_v38  ;;  %v19306_v52 = vld [vmem:[#allocation28_spill] sm:$0xff]  ;;  %v912_v38 = vadd.f32 %v19315_v30, %v19314_v19  ;;  %v19316_v14 = vld [vmem:[#allocation30_spill] sm:$0xff] }
 0x203   :  { %19297 = vst [vmem:[#allocation6_spill] sm:$0xff] %v14743_v13  ;;  %19298 = vst [vmem:[#allocation53_spill] sm:$0xff] %v14745_v54  ;;  %v14754_v12 = vadd.f32 %v1797_v62, %v19301_v31  ;;  %v14756_v1 = vadd.f32 %v11983_v24, %v896_v44  ;;  %2776 = vmatprep.mubr.bf16.mxu0 %v19126_v48  ;;  %3111 = vmatprep.mubr.bf16.mxu1 %v19126_v48  ;;  %v19309_v62 = vld [vmem:[#allocation11_spill] sm:$0xff]  ;;  %v19311_v24 = vld [vmem:[#allocation29_spill] sm:$0xff] }
 0x204   :  { %v1799_v37 = vpop.f32.mrf.mxu0  ;;  %v1968_v59 = vpop.f32.mrf.mxu1  ;;  %v19310_v31 = vld [vmem:[#allocation63_spill] sm:$0xff] }
 0x205   :  { %19302 = vst [vmem:[#allocation24_spill] sm:$0xff] %v14754_v12  ;;  %19303 = vst [vmem:[#allocation7_spill] sm:$0xff] %v14756_v1  ;;  %v14763_v54 = vadd.f32 %v1799_v37, %v19306_v52  ;;  %v14765_v13 = vadd.f32 %v1968_v59, %v888_v0  ;;  %v891_v44 = vadd.f32 %v19310_v31, %v19309_v62  ;;  %v19321_v62 = vld [vmem:[#allocation31_spill] sm:$0xff] }
 0x206   :  { %v1801_v57 = vpop.f32.mrf.mxu0  ;;  %v11984_v20 = vpop.f32.mrf.mxu1 }
 0x207   :  { %19307 = vst [vmem:[#allocation55_spill] sm:$0xff] %v14763_v54  ;;  %19308 = vst [vmem:[#allocation25_spill] sm:$0xff] %v14765_v13  ;;  %v14770_v1 = vadd.f32 %v1801_v57, %v19311_v24  ;;  %v14772_v12 = vadd.f32 %v11984_v20, %v899_v7  ;;  %v19319_v7 = vld [vmem:[#allocation13_spill] sm:$0xff]  ;;  %v19320_v57 = vld [vmem:[#allocation67_spill] sm:$0xff] }
 0x208   :  { %v1803_v26 = vpop.f32.mrf.mxu0  ;;  %v1971_v49 = vpop.f32.mrf.mxu1  ;;  %v904_v20 = vadd.f32 %v19320_v57, %v19319_v7  ;;  %v19330_v13 = vld [vmem:[#allocation16_spill] sm:$0xff]  ;;  %v19331_v54 = vld [vmem:[#allocation73_spill] sm:$0xff] }
 0x209   :  { %19312 = vst [vmem:[#allocation8_spill] sm:$0xff] %v14770_v1  ;;  %19313 = vst [vmem:[#allocation57_spill] sm:$0xff] %v14772_v12  ;;  %v14777_v37 = vadd.f32 %v1803_v26, %v19316_v14  ;;  %v14779_v0 = vadd.f32 %v1971_v49, %v891_v44  ;;  %v19324_v49 = vld [vmem:[#allocation14_spill] sm:$0xff]  ;;  %v19325_v44 = vld [vmem:[#allocation69_spill] sm:$0xff] }
 0x20a   :  { %v1807_v59 = vpop.f32.mrf.mxu0  ;;  %v11987_v52 = vpop.f32.mrf.mxu1  ;;  %10352 = vmatmul.mubr.msk.bf16.gmra.mxu0 %vm205_vm0, %v14571_v41  ;;  %10384 = vmatmul.mubr.msk.bf16.gmra.mxu1 %vm205_vm0, %v14459_v34  ;;  %v915_v24 = vadd.f32 %v19325_v44, %v19324_v49  ;;  %v19326_v14 = vld [vmem:[#allocation32_spill] sm:$0xff]  ;;  %v928_v49 = vadd.f32 %v19331_v54, %v19330_v13  ;;  %v19332_v44 = vld [vmem:[#allocation34_spill] sm:$0xff] }
 0x20b   :  { %19317 = vst [vmem:[#allocation26_spill] sm:$0xff] %v14777_v37  ;;  %19318 = vst [vmem:[#allocation9_spill] sm:$0xff] %v14779_v0  ;;  %v14788_v31 = vadd.f32 %v1807_v59, %v19321_v62  ;;  %v14790_v19 = vadd.f32 %v11987_v52, %v912_v38  ;;  %2786 = vmatprep.mubr.bf16.mxu0 %v19126_v48  ;;  %3121 = vmatprep.mubr.bf16.mxu1 %v19126_v48  ;;  %v19327_v59 = vld [vmem:[#allocation15_spill] sm:$0xff]  ;;  %v19329_v52 = vld [vmem:[#allocation33_spill] sm:$0xff] }
 0x20c   :  { %v1809_v30 = vpop.f32.mrf.mxu0  ;;  %v1984_v26 = vpop.f32.mrf.mxu1  ;;  %v19328_v62 = vld [vmem:[#allocation71_spill] sm:$0xff] }
 0x20d   :  { %19322 = vst [vmem:[#allocation59_spill] sm:$0xff] %v14788_v31  ;;  %19323 = vst [vmem:[#allocation27_spill] sm:$0xff] %v14790_v19  ;;  %v14797_v0 = vadd.f32 %v1809_v30, %v19326_v14  ;;  %v14799_v37 = vadd.f32 %v1984_v26, %v904_v20  ;;  %v907_v38 = vadd.f32 %v19328_v62, %v19327_v59  ;;  %v19337_v59 = vld [vmem:[#allocation35_spill] sm:$0xff] }
 0x20e   :  { %v1811_v7 = vpop.f32.mrf.mxu0  ;;  %v11988_v57 = vpop.f32.mrf.mxu1 }
 0x20f   :  { %v14804_v19 = vadd.f32 %v1811_v7, %v19329_v52  ;;  %v14806_v31 = vadd.f32 %v11988_v57, %v915_v24  ;;  %v19335_v24 = vld [vmem:[#allocation17_spill] sm:$0xff]  ;;  %v19336_v7 = vld [vmem:[#allocation75_spill] sm:$0xff] }
 0x210   :  { %v1813_v12 = vpop.f32.mrf.mxu0  ;;  %v1987_v1 = vpop.f32.mrf.mxu1  ;;  %v920_v57 = vadd.f32 %v19336_v7, %v19335_v24  ;;  %v19343_v7 = vld [vmem:[#allocation19_spill] sm:$0xff] }
 0x211   :  { %v14811_v30 = vadd.f32 %v1813_v12, %v19332_v44  ;;  %v14813_v20 = vadd.f32 %v1987_v1, %v907_v38  ;;  %v19340_v1 = vld [vmem:[#allocation18_spill] sm:$0xff]  ;;  %v19341_v38 = vld [vmem:[#allocation77_spill] sm:$0xff]  ;;  %v19342_v44 = vld [vmem:[#allocation36_spill] sm:$0xff] }
 0x212   :  { %v1817_v26 = vpop.f32.mrf.mxu0  ;;  %v11991_v14 = vpop.f32.mrf.mxu1  ;;  %10353 = vmatmul.mubr.msk.bf16.gmra.mxu0 %vm205_vm0, %v14600_v29  ;;  %10385 = vmatmul.mubr.msk.bf16.gmra.mxu1 %vm205_vm0, %v14489_v15  ;;  %v931_v52 = vadd.f32 %v19341_v38, %v19340_v1 }
 0x213   :  { %19333 = vst [vmem:[#allocation10_spill] sm:$0xff] %v14811_v30  ;;  %19334 = vst [vmem:[#allocation61_spill] sm:$0xff] %v14813_v20  ;;  %v14822_v62 = vadd.f32 %v1817_v26, %v19337_v59  ;;  %v14824_v13 = vadd.f32 %v11991_v14, %v928_v49  ;;  %3131 = vmatprep.mubr.bf16.mxu1 %v19126_v48  ;;  %12053 = vmatprep.mubr.msk.bf16.mxu0 %vm205_vm0, %v14364_v58  ;;  %v19344_v49 = vld [vmem:[#allocation79_spill] sm:$0xff]  ;;  %v19345_v59 = vld [vmem:[#allocation37_spill] sm:$0xff] }
 0x214   :  { %v1819_v54 = vpop.f32.mrf.mxu0  ;;  %v2000_v12 = vpop.f32.mrf.mxu1  ;;  %v923_v14 = vadd.f32 %v19344_v49, %v19343_v7  ;;  %v12269_v58 = vld [vmem:[%s19083_s1 + $0xd8] ss:$12 sps:$4 sm:$0xff]  }
 0x215   :  { %19338 = vst [vmem:[#allocation28_spill] sm:$0xff] %v14822_v62  ;;  %19339 = vst [vmem:[#allocation11_spill] sm:$0xff] %v14824_v13  ;;  %v14832_v20 = vadd.f32 %v1819_v54, %v19342_v44  ;;  %v14834_v30 = vadd.f32 %v2000_v12, %v920_v57  ;;  %v12274_v57 = vld [vmem:[%s19083_s1 + $0xc4] ss:$12 sps:$4 sm:$0xff]   ;;  %v19351_v49 = vld [vmem:[#allocation105_spill] sm:$0xff] }
 0x216   :  { %v1821_v24 = vpop.f32.mrf.mxu0  ;;  %v11992_v26 = vpop.f32.mrf.mxu1  ;;  %v19346_v54 = vld [vmem:[#allocation38_spill] sm:$0xff] }
 0x217   :  { %v14839_v13 = vadd.f32 %v1821_v24, %v19345_v59  ;;  %v14841_v62 = vadd.f32 %v11992_v26, %v931_v52  ;;  %v19349_v52 = vld [vmem:[#allocation39_spill] sm:$0xff] }
 0x218   :  { %v1823_v1 = vpop.f32.mrf.mxu0  ;;  %v2003_v38 = vpop.f32.mrf.mxu1 }
 0x219   :  { %v14850_v12 = vadd.f32 %v1823_v1, %v19346_v54  ;;  %v14852_v44 = vadd.f32 %v2003_v38, %v923_v14  ;;  %v12272_v14 = vld [vmem:[%s19083_s1 + $0xc0] ss:$12 sps:$4 sm:$0xff]   ;;  %v19353_v54 = vld [vmem:[#allocation40_spill] sm:$0xff] }
 0x21a   :  { %v1827_v7 = vpop.f32.mrf.mxu0  ;;  %v2162_v24 = vpop.f32.mrf.mxu1  ;;  %10386 = vmatmul.mubr.msk.bf16.gmra.mxu1 %vm205_vm0, %v14497_v17  ;;  %12054 = vmatmul.mubr.msk.bf16.vlgmr.msra.gmra.mxu0 %vm205_vm0, %v14393_v39  ;;  %v14873_v39 = vld [vmem:[%s19085_s2 + $0xe0] ss:$12 sps:$4 sm:$0xff]  }
 0x21b   :  { %19347 = vst [vmem:[#allocation63_spill] sm:$0xff] %v14850_v12  ;;  %19348 = vst [vmem:[#allocation29_spill] sm:$0xff] %v14852_v44  ;;  %v14859_v26 = vadd.f32 %v1827_v7, %v19349_v52  ;;  %v14862_v59 = vadd.f32 %v2162_v24, %v19351_v49  ;;  %3568 = vmatpush1.bf16.msra.mxu0 %v12269_v58  ;;  %3141 = vmatprep.mubr.bf16.mxu1 %v19126_v48  ;;  %v19354_v49 = vld [vmem:[#allocation41_spill] sm:$0xff]  ;;  %v19355_v44 = vld [vmem:[#allocation42_spill] sm:$0xff] }
 0x21c   :  { %v1829_v1 = vpop.f32.mrf.mxu0  ;;  %v2164_v38 = vpop.f32.mrf.mxu1  ;;  %12057 = vmatprep.mubr.msk.bf16.mxu0 %vm205_vm0, %v14403_v27  ;;  %3569 = vmatprep.subr.bf16.mxu0 %v12274_v57 }
 0x21d   :  { %19350 = vst [vmem:[#allocation12_spill] sm:$0xff] %v14859_v26  ;;  %19352 = vst [vmem:[#allocation65_spill] sm:$0xff] %v14862_v59  ;;  %v14876_v7 = vadd.f32 %v1829_v1, %v19353_v54  ;;  %v14879_v58 = vadd.f32 %v2164_v38, %v14245_v9  ;;  %v19360_v54 = vld [vmem:[#allocation106_spill] sm:$0xff] }
 0x21e   :  { %v1831_v24 = vpop.f32.mrf.mxu0  ;;  %v2166_v52 = vpop.f32.mrf.mxu1 }
 0x21f   :  { %v14882_v59 = vadd.f32 %v1831_v24, %v19354_v49  ;;  %v14885_v26 = vadd.f32 %v2166_v52, %v14250_v23  ;;  %3570 = vmatpush1.bf16.msra.mxu0 %v12272_v14  ;;  %v19358_v23 = vld [vmem:[#allocation43_spill] sm:$0xff]  ;;  %v19362_v52 = vld [vmem:[#allocation44_spill] sm:$0xff] }
 0x220   :  { %v1833_v27 = vpop.f32.mrf.mxu0  ;;  %v2168_v57 = vpop.f32.mrf.mxu1  ;;  %12105 = vmatprep.subr.bf16.mxu0 %v14873_v39 }
 0x221   :  { %v14889_v12 = vadd.f32 %v1833_v27, %v19355_v44  ;;  %v14892_v1 = vadd.f32 %v2168_v57, %v14256_v35 }
 0x222   :  { %v1837_v9 = vpop.f32.mrf.mxu0  ;;  %v2172_v38 = vpop.f32.mrf.mxu1  ;;  %10387 = vmatmul.mubr.msk.bf16.gmra.mxu1 %vm205_vm0, %v14526_v42  ;;  %12058 = vmatmul.mubr.msk.bf16.gmra.mxu0 %vm205_vm0, %v14451_v63 }
 0x223   :  { %19356 = vst [vmem:[#allocation30_spill] sm:$0xff] %v14889_v12  ;;  %19357 = vst [vmem:[#allocation13_spill] sm:$0xff] %v14892_v1  ;;  %v14899_v14 = vadd.f32 %v1837_v9, %v19358_v23  ;;  %v14902_v24 = vadd.f32 %v2172_v38, %v19360_v54  ;;  %3151 = vmatprep.mubr.bf16.mxu1 %v19126_v48  ;;  %12061 = vmatprep.mubr.msk.bf16.mxu0 %vm205_vm0, %v14459_v34  ;;  %v19363_v9 = vld [vmem:[#allocation46_spill] sm:$0xff]  ;;  %v19366_v1 = vld [vmem:[#allocation107_spill] sm:$0xff] }
 0x224   :  { %v1839_v35 = vpop.f32.mrf.mxu0  ;;  %v2174_v44 = vpop.f32.mrf.mxu1 }
 0x225   :  { %19359 = vst [vmem:[#allocation67_spill] sm:$0xff] %v14899_v14  ;;  %19361 = vst [vmem:[#allocation31_spill] sm:$0xff] %v14902_v24  ;;  %v14908_v49 = vadd.f32 %v1839_v35, %v19362_v52  ;;  %v14911_v27 = vadd.f32 %v2174_v44, %v14273_v43  ;;  %v19364_v14 = vld [vmem:[#allocation48_spill] sm:$0xff]  ;;  %v19368_v43 = vld [vmem:[#allocation50_spill] sm:$0xff] }
 0x226   :  { %v1841_v63 = vpop.f32.mrf.mxu0  ;;  %v2176_v57 = vpop.f32.mrf.mxu1 }
 0x227   :  { %v14914_v23 = vadd.f32 %v1841_v63, %v19363_v9  ;;  %v14917_v38 = vadd.f32 %v2176_v57, %v14278_v2  ;;  %v19370_v2 = vld [vmem:[#allocation108_spill] sm:$0xff] }
 0x228   :  { %v1843_v54 = vpop.f32.mrf.mxu0  ;;  %v2178_v24 = vpop.f32.mrf.mxu1 }
 0x229   :  { %v14920_v34 = vadd.f32 %v1843_v54, %v19364_v14  ;;  %v14923_v12 = vadd.f32 %v2178_v24, %v19366_v1  ;;  %v19372_v24 = vld [vmem:[#allocation52_spill] sm:$0xff] }
 0x22a   :  { %v1847_v35 = vpop.f32.mrf.mxu0  ;;  %v2182_v52 = vpop.f32.mrf.mxu1  ;;  %10388 = vmatmul.mubr.msk.bf16.gmra.mxu1 %vm205_vm0, %v14534_v28  ;;  %12062 = vmatmul.mubr.msk.bf16.gmra.mxu0 %vm205_vm0, %v14489_v15 }
 0x22b   :  { %19365 = vst [vmem:[#allocation14_spill] sm:$0xff] %v14920_v34  ;;  %19367 = vst [vmem:[#allocation69_spill] sm:$0xff] %v14923_v12  ;;  %v14930_v44 = vadd.f32 %v1847_v35, %v19368_v43  ;;  %v14933_v63 = vadd.f32 %v2182_v52, %v19370_v2  ;;  %3161 = vmatprep.mubr.bf16.mxu1 %v19126_v48  ;;  %12065 = vmatprep.mubr.msk.bf16.mxu0 %vm205_vm0, %v14497_v17  ;;  %v19373_v35 = vld [vmem:[#allocation54_spill] sm:$0xff]  ;;  %v19377_v12 = vld [vmem:[#allocation109_spill] sm:$0xff] }
 0x22c   :  { %v1849_v1 = vpop.f32.mrf.mxu0  ;;  %v2184_v14 = vpop.f32.mrf.mxu1 }
 0x22d   :  { %19369 = vst [vmem:[#allocation32_spill] sm:$0xff] %v14930_v44  ;;  %19371 = vst [vmem:[#allocation15_spill] sm:$0xff] %v14933_v63  ;;  %v14939_v57 = vadd.f32 %v1849_v1, %v19372_v24  ;;  %v14942_v9 = vadd.f32 %v2184_v14, %v14300_v51  ;;  %v19375_v44 = vld [vmem:[#allocation56_spill] sm:$0xff]  ;;  %v19379_v51 = vld [vmem:[#allocation58_spill] sm:$0xff] }
 0x22e   :  { %v1851_v15 = vpop.f32.mrf.mxu0  ;;  %v2186_v54 = vpop.f32.mrf.mxu1 }
 0x22f   :  { %v14945_v43 = vadd.f32 %v1851_v15, %v19373_v35  ;;  %v14948_v52 = vadd.f32 %v2186_v54, %v14305_v8  ;;  %v19381_v8 = vld [vmem:[#allocation110_spill] sm:$0xff] }
 0x230   :  { %v1853_v2 = vpop.f32.mrf.mxu0  ;;  %v2188_v63 = vpop.f32.mrf.mxu1 }
 0x231   :  { %19374 = vst [vmem:[#allocation71_spill] sm:$0xff] %v14948_v52  ;;  %v14951_v17 = vadd.f32 %v1853_v2, %v19375_v44  ;;  %v14954_v34 = vadd.f32 %v2188_v63, %v19377_v12  ;;  %v19383_v63 = vld [vmem:[#allocation60_spill] sm:$0xff] }
 0x232   :  { %v1857_v1 = vpop.f32.mrf.mxu0  ;;  %v2192_v24 = vpop.f32.mrf.mxu1  ;;  %10389 = vmatmul.mubr.msk.bf16.gmra.mxu1 %vm205_vm0, %v14563_v5  ;;  %12066 = vmatmul.mubr.msk.bf16.gmra.mxu0 %vm205_vm0, %v14526_v42 }
 0x233   :  { %19376 = vst [vmem:[#allocation33_spill] sm:$0xff] %v14951_v17  ;;  %19378 = vst [vmem:[#allocation16_spill] sm:$0xff] %v14954_v34  ;;  %v14961_v14 = vadd.f32 %v1857_v1, %v19379_v51  ;;  %v14964_v15 = vadd.f32 %v2192_v24, %v19381_v8  ;;  %3171 = vmatprep.mubr.bf16.mxu1 %v19126_v48  ;;  %12069 = vmatprep.mubr.msk.bf16.mxu0 %vm205_vm0, %v14534_v28  ;;  %v19385_v1 = vld [vmem:[#allocation62_spill] sm:$0xff]  ;;  %v19387_v24 = vld [vmem:[#allocation111_spill] sm:$0xff] }
 0x234   :  { %v1859_v12 = vpop.f32.mrf.mxu0  ;;  %v2194_v44 = vpop.f32.mrf.mxu1 }
 0x235   :  { %19380 = vst [vmem:[#allocation73_spill] sm:$0xff] %v14961_v14  ;;  %19382 = vst [vmem:[#allocation34_spill] sm:$0xff] %v14964_v15  ;;  %v14970_v54 = vadd.f32 %v1859_v12, %v19383_v63  ;;  %v14973_v35 = vadd.f32 %v2194_v44, %v14327_v22  ;;  %v19389_v15 = vld [vmem:[#allocation64_spill] sm:$0xff]  ;;  %v19393_v22 = vld [vmem:[#allocation66_spill] sm:$0xff] }
 0x236   :  { %v1861_v42 = vpop.f32.mrf.mxu0  ;;  %v2196_v2 = vpop.f32.mrf.mxu1  ;;  %v19391_v14 = vld [vmem:[#allocation112_spill] sm:$0xff] }
 0x237   :  { %19384 = vst [vmem:[#allocation17_spill] sm:$0xff] %v14973_v35  ;;  %v14976_v51 = vadd.f32 %v1861_v42, %v19385_v1  ;;  %v14979_v8 = vadd.f32 %v2196_v2, %v19387_v24  ;;  %v19395_v42 = vld [vmem:[#allocation113_spill] sm:$0xff]  ;;  %v19399_v1 = vld [vmem:[#allocation114_spill] sm:$0xff] }
 0x238   :  { %v1863_v17 = vpop.f32.mrf.mxu0  ;;  %v2198_v34 = vpop.f32.mrf.mxu1 }
 0x239   :  { %19386 = vst [vmem:[#allocation75_spill] sm:$0xff] %v14976_v51  ;;  %19388 = vst [vmem:[#allocation35_spill] sm:$0xff] %v14979_v8  ;;  %v14982_v28 = vadd.f32 %v1863_v17, %v19389_v15  ;;  %v14985_v52 = vadd.f32 %v2198_v34, %v19391_v14  ;;  %v19397_v14 = vld [vmem:[#allocation68_spill] sm:$0xff]  ;;  %v12292_v8 = vld [vmem:[%s19085_s2 + $0xc0] ss:$12 sps:$4 sm:$0xff]  }
 0x23a   :  { %v1867_v12 = vpop.f32.mrf.mxu0  ;;  %v2202_v63 = vpop.f32.mrf.mxu1  ;;  %10390 = vmatmul.mubr.msk.bf16.gmra.mxu1 %vm205_vm0, %v14571_v41  ;;  %12070 = vmatmul.mubr.msk.bf16.gmra.mxu0 %vm205_vm0, %v14563_v5 }
 0x23b   :  { %19390 = vst [vmem:[#allocation18_spill] sm:$0xff] %v14982_v28  ;;  %19392 = vst [vmem:[#allocation77_spill] sm:$0xff] %v14985_v52  ;;  %v14992_v44 = vadd.f32 %v1867_v12, %v19393_v22  ;;  %v14995_v2 = vadd.f32 %v2202_v63, %v19395_v42  ;;  %3181 = vmatprep.mubr.bf16.mxu1 %v19126_v48  ;;  %12073 = vmatprep.mubr.msk.bf16.mxu0 %vm205_vm0, %v14571_v41  ;;  %v19401_v12 = vld [vmem:[#allocation70_spill] sm:$0xff]  ;;  %v19403_v63 = vld [vmem:[#allocation115_spill] sm:$0xff] }
 0x23c   :  { %v1869_v34 = vpop.f32.mrf.mxu0  ;;  %v2204_v17 = vpop.f32.mrf.mxu1  ;;  %v15015_v41 = vld [vmem:[%s19084_s0 + $0x10] sm:$0xff]  }
 0x23d   :  { %19394 = vst [vmem:[#allocation36_spill] sm:$0xff] %v14992_v44  ;;  %19396 = vst [vmem:[#allocation19_spill] sm:$0xff] %v14995_v2  ;;  %v15001_v15 = vadd.f32 %v1869_v34, %v19397_v14  ;;  %v15004_v24 = vadd.f32 %v2204_v17, %v19399_v1  ;;  %v19405_v34 = vld [vmem:[#allocation72_spill] sm:$0xff] }
 0x23e   :  { %v1871_v5 = vpop.f32.mrf.mxu0  ;;  %v2206_v52 = vpop.f32.mrf.mxu1  ;;  %v19407_v17 = vld [vmem:[#allocation116_spill] sm:$0xff] }
 0x23f   :  { %19398 = vst [vmem:[#allocation79_spill] sm:$0xff] %v15001_v15  ;;  %19400 = vst [vmem:[#allocation37_spill] sm:$0xff] %v15004_v24  ;;  %v15007_v22 = vadd.f32 %v1871_v5, %v19401_v12  ;;  %v15010_v42 = vadd.f32 %v2206_v52, %v19403_v63  ;;  %v19409_v52 = vld [vmem:[#allocation74_spill] sm:$0xff]  ;;  %v19411_v12 = vld [vmem:[#allocation117_spill] sm:$0xff] }
 0x240   :  { %v1873_v28 = vpop.f32.mrf.mxu0  ;;  %v2208_v2 = vpop.f32.mrf.mxu1 }
 0x241   :  { %19402 = vst [vmem:[#allocation38_spill] sm:$0xff] %v15007_v22  ;;  %19404 = vst [vmem:[#allocation39_spill] sm:$0xff] %v15010_v42  ;;  %v15018_v14 = vadd.f32 %v1873_v28, %v19405_v34  ;;  %v15021_v1 = vadd.f32 %v2208_v2, %v19407_v17  ;;  %v19413_v34 = vld [vmem:[#allocation76_spill] sm:$0xff] }
 0x242   :  { %v1877_v24 = vpop.f32.mrf.mxu0  ;;  %v2212_v15 = vpop.f32.mrf.mxu1  ;;  %10391 = vmatmul.mubr.msk.bf16.gmra.mxu1 %vm205_vm0, %v14600_v29  ;;  %12074 = vmatmul.mubr.msk.bf16.gmra.mxu0 %vm205_vm0, %v14600_v29 }
 0x243   :  { %19406 = vst [vmem:[#allocation105_spill] sm:$0xff] %v15018_v14  ;;  %19408 = vst [vmem:[#allocation40_spill] sm:$0xff] %v15021_v1  ;;  %v15028_v5 = vadd.f32 %v1877_v24, %v19409_v52  ;;  %v15031_v63 = vadd.f32 %v2212_v15, %v19411_v12  ;;  %3587 = vmatprep.mubr.bf16.mxu0 %v19126_v48  ;;  %12081 = vmatprep.mubr.msk.bf16.mxu1 %vm205_vm0, %v15015_v41  ;;  %v19415_v1 = vld [vmem:[#allocation118_spill] sm:$0xff]  ;;  %v15045_v15 = vld [vmem:[%s19084_s0 + $0x18] sm:$0xff]  }
 0x244   :  { %v1879_v28 = vpop.f32.mrf.mxu0  ;;  %v2214_v2 = vpop.f32.mrf.mxu1  ;;  %v19417_v24 = vld [vmem:[#allocation78_spill] sm:$0xff]  ;;  %v19419_v12 = vld [vmem:[#allocation119_spill] sm:$0xff] }
 0x245   :  { %19410 = vst [vmem:[#allocation41_spill] sm:$0xff] %v15028_v5  ;;  %19412 = vst [vmem:[#allocation42_spill] sm:$0xff] %v15031_v63  ;;  %v15037_v17 = vadd.f32 %v1879_v28, %v19413_v34  ;;  %v15040_v14 = vadd.f32 %v2214_v2, %v19415_v1  ;;  %v15056_v1 = vld [vmem:[%s19084_s0 + $0x20] sm:$0xff]   ;;  %v19421_v2 = vld [vmem:[#allocation81_spill] sm:$0xff] }
 0x246   :  { %v1881_v29 = vpop.f32.mrf.mxu0  ;;  %v2216_v42 = vpop.f32.mrf.mxu1  ;;  %v12289_v28 = vld [vmem:[%s19085_s2 + $0xd8] ss:$12 sps:$4 sm:$0xff]  }
 0x247   :  { %19414 = vst [vmem:[#allocation43_spill] sm:$0xff] %v15037_v17  ;;  %19416 = vst [vmem:[#allocation106_spill] sm:$0xff] %v15040_v14  ;;  %v15048_v52 = vadd.f32 %v1881_v29, %v19417_v24  ;;  %v15051_v63 = vadd.f32 %v2216_v42, %v19419_v12  ;;  %v19422_v34 = vld [vmem:[#allocation121_spill] sm:$0xff]  ;;  %v19423_v17 = vld [vmem:[#allocation80_spill] sm:$0xff] }
 0x248   :  { %v1883_v5 = vpop.f32.mrf.mxu0  ;;  %v2218_v22 = vpop.f32.mrf.mxu1  ;;  %v1485_v14 = vadd.f32 %v19422_v34, %v19421_v2  ;;  %v19425_v24 = vld [vmem:[#allocation120_spill] sm:$0xff]  ;;  %v19429_v2 = vld [vmem:[#allocation122_spill] sm:$0xff] }
 0x249   :  { %19418 = vst [vmem:[#allocation44_spill] sm:$0xff] %v15048_v52  ;;  %19420 = vst [vmem:[#allocation46_spill] sm:$0xff] %v15051_v63  ;;  %v15064_v29 = vadd.f32 %v1883_v5, %v19423_v17  ;;  %v15067_v42 = vadd.f32 %v2218_v22, %v19425_v24  ;;  %v12294_v12 = vld [vmem:[%s19085_s2 + $0xc4] ss:$12 sps:$4 sm:$0xff]   ;;  %v12295_v63 = vld [vmem:[%s19085_s2 + $0xc8] ss:$12 sps:$4 sm:$0xff]  }
 0x24a   :  { %v2222_v52 = vpop.f32.mrf.mxu1  ;;  %v11999_v44 = vpop.f32.mrf.mxu0  ;;  %10454 = vmatmul.mubr.msk.bf16.vlgmr.msra.gmra.mxu0 %vm205_vm0, %v15015_v41  ;;  %12082 = vmatmul.mubr.msk.bf16.vlgmr.msra.gmra.mxu1 %vm205_vm0, %v15045_v15  ;;  %v19427_v5 = vld [vmem:[#allocation82_spill] sm:$0xff]  ;;  %v19428_v17 = vld [vmem:[#allocation123_spill] sm:$0xff] }
 0x24b   :  { %19424 = vst [vmem:[#allocation48_spill] sm:$0xff] %v15064_v29  ;;  %19426 = vst [vmem:[#allocation107_spill] sm:$0xff] %v15067_v42  ;;  %v1477_v22 = vadd.f32 %v19428_v17, %v19427_v5  ;;  %v15082_v34 = vadd.f32 %v2222_v52, %v19429_v2  ;;  %v15084_v24 = vadd.f32 %v11999_v44, %v1485_v14  ;;  %12106 = vmatpush3.bf16.msra.mxu0 %v14873_v39  ;;  %v19432_v5 = vld [vmem:[#allocation83_spill] sm:$0xff]  ;;  %v19433_v17 = vld [vmem:[#allocation125_spill] sm:$0xff] }
 0x24c   :  { %3597 = vmatprep.mubr.bf16.mxu0 %v19126_v48  ;;  %v2224_v42 = vpop.f32.mrf.mxu1  ;;  %v2315_v29 = vpop.f32.mrf.mxu0  ;;  %12085 = vmatprep.mubr.msk.bf16.mxu1 %vm205_vm0, %v15056_v1  ;;  %v1488_v52 = vadd.f32 %v19433_v17, %v19432_v5  ;;  %v19434_v2 = vld [vmem:[#allocation124_spill] sm:$0xff] }
 0x24d   :  { %19430 = vst [vmem:[#allocation50_spill] sm:$0xff] %v15082_v34  ;;  %19431 = vst [vmem:[#allocation108_spill] sm:$0xff] %v15084_v24  ;;  %3963 = vmatpush1.bf16.msra.mxu1 %v12289_v28  ;;  %v15096_v44 = vadd.f32 %v2224_v42, %v19434_v2  ;;  %v15098_v14 = vadd.f32 %v2315_v29, %v1477_v22  ;;  %12107 = vmatprep.subr.bf16.mxu0 %v12295_v63  ;;  %v15103_v28 = vld [vmem:[%s19084_s0 + $0x28] sm:$0xff]   ;;  %v19436_v34 = vld [vmem:[#allocation84_spill] sm:$0xff] }
 0x24e   :  { %3964 = vmatprep.subr.bf16.mxu1 %v12294_v12  ;;  %v2226_v39 = vpop.f32.mrf.mxu1  ;;  %v12000_v24 = vpop.f32.mrf.mxu0  ;;  %v1480_v51 = vadd.f32 %v14461_v11, %v19436_v34  ;;  %v15115_v29 = vld [vmem:[%s19084_s0 + $0x30] sm:$0xff]   ;;  %v19439_v22 = vld [vmem:[#allocation85_spill] sm:$0xff] }
 0x24f   :  { %19435 = vst [vmem:[#allocation52_spill] sm:$0xff] %v15098_v14  ;;  %v15108_v35 = vadd.f32 %v2226_v39, %v14454_v10  ;;  %v15110_v5 = vadd.f32 %v12000_v24, %v1488_v52  ;;  %12108 = vmatpush3.bf16.msra.mxu0 %v12295_v63  ;;  %v1501_v17 = vadd.f32 %v14467_v46, %v19439_v22  ;;  %v19442_v63 = vld [vmem:[#allocation86_spill] sm:$0xff]  ;;  %v19443_v24 = vld [vmem:[#allocation127_spill] sm:$0xff]  ;;  %v19448_v22 = vld [vmem:[#allocation128_spill] sm:$0xff] }
 0x250   :  { %v2228_v42 = vpop.f32.mrf.mxu1  ;;  %v2318_v12 = vpop.f32.mrf.mxu0  ;;  %v1493_v52 = vadd.f32 %v19443_v24, %v19442_v63 }
 0x251   :  { %19437 = vst [vmem:[#allocation54_spill] sm:$0xff] %v15108_v35  ;;  %19438 = vst [vmem:[#allocation56_spill] sm:$0xff] %v15110_v5  ;;  %3965 = vmatpush1.bf16.msra.mxu1 %v12292_v8  ;;  %v15120_v2 = vadd.f32 %v2228_v42, %v14464_v32  ;;  %v15122_v11 = vadd.f32 %v2318_v12, %v1480_v51  ;;  %v19444_v8 = vld [vmem:[#allocation126_spill] sm:$0xff]  ;;  %v19447_v42 = vld [vmem:[#allocation87_spill] sm:$0xff] }
 0x252   :  { %v2232_v10 = vpop.f32.mrf.mxu1  ;;  %v12003_v34 = vpop.f32.mrf.mxu0  ;;  %10455 = vmatmul.mubr.msk.bf16.gmra.mxu0 %vm205_vm0, %v15045_v15  ;;  %12086 = vmatmul.mubr.msk.bf16.gmra.mxu1 %vm205_vm0, %v15103_v28  ;;  %v1504_v12 = vadd.f32 %v14484_v60, %v19447_v42  ;;  %v15160_v60 = vld [vmem:[%s19084_s0 + $0x40] sm:$0xff]   ;;  %v19456_v42 = vld [vmem:[#allocation131_spill] sm:$0xff] }
 0x253   :  { %19440 = vst [vmem:[#allocation109_spill] sm:$0xff] %v15120_v2  ;;  %19441 = vst [vmem:[#allocation58_spill] sm:$0xff] %v15122_v11  ;;  %v15131_v39 = vadd.f32 %v2232_v10, %v19444_v8  ;;  %v15133_v46 = vadd.f32 %v12003_v34, %v1501_v17  ;;  %3607 = vmatprep.mubr.bf16.mxu0 %v19126_v48  ;;  %12089 = vmatprep.mubr.msk.bf16.mxu1 %vm205_vm0, %v15115_v29  ;;  %v15148_v17 = vld [vmem:[%s19084_s0 + $0x38] sm:$0xff]   ;;  %v19451_v34 = vld [vmem:[#allocation88_spill] sm:$0xff] }
 0x254   :  { %v2234_v32 = vpop.f32.mrf.mxu1  ;;  %v2331_v51 = vpop.f32.mrf.mxu0  ;;  %v1496_v24 = vadd.f32 %v14499_v61, %v19451_v34  ;;  %v19452_v8 = vld [vmem:[#allocation129_spill] sm:$0xff] }
 0x255   :  { %19445 = vst [vmem:[#allocation110_spill] sm:$0xff] %v15131_v39  ;;  %19446 = vst [vmem:[#allocation60_spill] sm:$0xff] %v15133_v46  ;;  %v15141_v11 = vadd.f32 %v2234_v32, %v19448_v22  ;;  %v15143_v2 = vadd.f32 %v2331_v51, %v1493_v52  ;;  %v19455_v51 = vld [vmem:[#allocation89_spill] sm:$0xff] }
 0x256   :  { %v2236_v63 = vpop.f32.mrf.mxu1  ;;  %v12004_v10 = vpop.f32.mrf.mxu0  ;;  %v1517_v22 = vadd.f32 %v19456_v42, %v19455_v51  ;;  %v19466_v42 = vld [vmem:[#allocation134_spill] sm:$0xff] }
 0x257   :  { %19449 = vst [vmem:[#allocation62_spill] sm:$0xff] %v15141_v11  ;;  %19450 = vst [vmem:[#allocation111_spill] sm:$0xff] %v15143_v2  ;;  %v15153_v46 = vadd.f32 %v2236_v63, %v19452_v8  ;;  %v15155_v39 = vadd.f32 %v12004_v10, %v1504_v12  ;;  %v19457_v2 = vld [vmem:[#allocation130_spill] sm:$0xff]  ;;  %v19461_v10 = vld [vmem:[#allocation133_spill] sm:$0xff] }
 0x258   :  { %v2238_v52 = vpop.f32.mrf.mxu1  ;;  %v2334_v32 = vpop.f32.mrf.mxu0  ;;  %v19460_v12 = vld [vmem:[#allocation90_spill] sm:$0xff]  ;;  %v19462_v8 = vld [vmem:[#allocation132_spill] sm:$0xff] }
 0x259   :  { %19453 = vst [vmem:[#allocation64_spill] sm:$0xff] %v15153_v46  ;;  %19454 = vst [vmem:[#allocation112_spill] sm:$0xff] %v15155_v39  ;;  %v15165_v11 = vadd.f32 %v2238_v52, %v19457_v2  ;;  %v15167_v5 = vadd.f32 %v2334_v32, %v1496_v24  ;;  %v1509_v34 = vadd.f32 %v19461_v10, %v19460_v12  ;;  %v19465_v52 = vld [vmem:[#allocation91_spill] sm:$0xff] }
 0x25a   :  { %v2242_v61 = vpop.f32.mrf.mxu1  ;;  %v12007_v63 = vpop.f32.mrf.mxu0  ;;  %10456 = vmatmul.mubr.msk.bf16.gmra.mxu0 %vm205_vm0, %v15056_v1  ;;  %12090 = vmatmul.mubr.msk.bf16.gmra.mxu1 %vm205_vm0, %v15148_v17  ;;  %v1520_v32 = vadd.f32 %v14521_v36, %v19465_v52  ;;  %v15205_v36 = vld [vmem:[%s19084_s0 + $0x50] sm:$0xff]   ;;  %v19474_v52 = vld [vmem:[#allocation137_spill] sm:$0xff] }
 0x25b   :  { %19458 = vst [vmem:[#allocation66_spill] sm:$0xff] %v15165_v11  ;;  %19459 = vst [vmem:[#allocation113_spill] sm:$0xff] %v15167_v5  ;;  %v15176_v39 = vadd.f32 %v2242_v61, %v19462_v8  ;;  %v15178_v51 = vadd.f32 %v12007_v63, %v1517_v22  ;;  %3617 = vmatprep.mubr.bf16.mxu0 %v19126_v48  ;;  %12093 = vmatprep.mubr.msk.bf16.mxu1 %vm205_vm0, %v15160_v60  ;;  %v15193_v22 = vld [vmem:[%s19084_s0 + $0x48] sm:$0xff]   ;;  %v19469_v63 = vld [vmem:[#allocation92_spill] sm:$0xff] }
 0x25c   :  { %v2244_v2 = vpop.f32.mrf.mxu1  ;;  %v2347_v24 = vpop.f32.mrf.mxu0  ;;  %v1512_v10 = vadd.f32 %v14536_v33, %v19469_v63  ;;  %v19470_v8 = vld [vmem:[#allocation135_spill] sm:$0xff] }
 0x25d   :  { %19463 = vst [vmem:[#allocation68_spill] sm:$0xff] %v15176_v39  ;;  %19464 = vst [vmem:[#allocation114_spill] sm:$0xff] %v15178_v51  ;;  %v15186_v5 = vadd.f32 %v2244_v2, %v19466_v42  ;;  %v15188_v11 = vadd.f32 %v2347_v24, %v1509_v34  ;;  %v19473_v24 = vld [vmem:[#allocation93_spill] sm:$0xff] }
 0x25e   :  { %v2246_v12 = vpop.f32.mrf.mxu1  ;;  %v12008_v61 = vpop.f32.mrf.mxu0  ;;  %v1533_v42 = vadd.f32 %v19474_v52, %v19473_v24  ;;  %v19484_v52 = vld [vmem:[#allocation140_spill] sm:$0xff] }
 0x25f   :  { %19467 = vst [vmem:[#allocation70_spill] sm:$0xff] %v15186_v5  ;;  %19468 = vst [vmem:[#allocation115_spill] sm:$0xff] %v15188_v11  ;;  %v15198_v51 = vadd.f32 %v2246_v12, %v19470_v8  ;;  %v15200_v39 = vadd.f32 %v12008_v61, %v1520_v32  ;;  %v19475_v11 = vld [vmem:[#allocation136_spill] sm:$0xff]  ;;  %v19478_v32 = vld [vmem:[#allocation94_spill] sm:$0xff] }
 0x260   :  { %v2248_v34 = vpop.f32.mrf.mxu1  ;;  %v2350_v2 = vpop.f32.mrf.mxu0  ;;  %v19479_v61 = vld [vmem:[#allocation139_spill] sm:$0xff]  ;;  %v19480_v8 = vld [vmem:[#allocation138_spill] sm:$0xff] }
 0x261   :  { %19471 = vst [vmem:[#allocation72_spill] sm:$0xff] %v15198_v51  ;;  %19472 = vst [vmem:[#allocation116_spill] sm:$0xff] %v15200_v39  ;;  %v15210_v5 = vadd.f32 %v2248_v34, %v19475_v11  ;;  %v15212_v46 = vadd.f32 %v2350_v2, %v1512_v10  ;;  %v1525_v63 = vadd.f32 %v19479_v61, %v19478_v32  ;;  %v19483_v34 = vld [vmem:[#allocation95_spill] sm:$0xff]  ;;  %v19488_v61 = vld [vmem:[#allocation142_spill] sm:$0xff] }
 0x262   :  { %v2252_v33 = vpop.f32.mrf.mxu1  ;;  %v12011_v12 = vpop.f32.mrf.mxu0  ;;  %10457 = vmatmul.mubr.msk.bf16.gmra.mxu0 %vm205_vm0, %v15103_v28  ;;  %12094 = vmatmul.mubr.msk.bf16.gmra.mxu1 %vm205_vm0, %v15193_v22  ;;  %v1536_v2 = vadd.f32 %v14558_v25, %v19483_v34  ;;  %v15250_v25 = vld [vmem:[%s19084_s0 + $0x60] sm:$0xff]   ;;  %v19493_v34 = vld [vmem:[#allocation144_spill] sm:$0xff] }
 0x263   :  { %19476 = vst [vmem:[#allocation74_spill] sm:$0xff] %v15210_v5  ;;  %19477 = vst [vmem:[#allocation117_spill] sm:$0xff] %v15212_v46  ;;  %v15221_v39 = vadd.f32 %v2252_v33, %v19480_v8  ;;  %v15223_v24 = vadd.f32 %v12011_v12, %v1533_v42  ;;  %3627 = vmatprep.mubr.bf16.mxu0 %v19126_v48  ;;  %12097 = vmatprep.mubr.msk.bf16.mxu1 %vm205_vm0, %v15205_v36  ;;  %v15238_v42 = vld [vmem:[%s19084_s0 + $0x58] sm:$0xff]   ;;  %v19487_v12 = vld [vmem:[#allocation96_spill] sm:$0xff] }
 0x264   :  { %v2254_v11 = vpop.f32.mrf.mxu1  ;;  %v2363_v10 = vpop.f32.mrf.mxu0  ;;  %v1528_v8 = vadd.f32 %v19488_v61, %v19487_v12  ;;  %v19499_v61 = vld [vmem:[#allocation145_spill] sm:$0xff] }
 0x265   :  { %19481 = vst [vmem:[#allocation76_spill] sm:$0xff] %v15221_v39  ;;  %19482 = vst [vmem:[#allocation118_spill] sm:$0xff] %v15223_v24  ;;  %v15231_v46 = vadd.f32 %v2254_v11, %v19484_v52  ;;  %v15233_v5 = vadd.f32 %v2363_v10, %v1525_v63  ;;  %v19489_v24 = vld [vmem:[#allocation141_spill] sm:$0xff] }
 0x266   :  { %v2256_v32 = vpop.f32.mrf.mxu1  ;;  %v12012_v33 = vpop.f32.mrf.mxu0  ;;  %v19492_v10 = vld [vmem:[#allocation97_spill] sm:$0xff] }
 0x267   :  { %19485 = vst [vmem:[#allocation78_spill] sm:$0xff] %v15231_v46  ;;  %19486 = vst [vmem:[#allocation119_spill] sm:$0xff] %v15233_v5  ;;  %v15243_v39 = vadd.f32 %v2256_v32, %v19489_v24  ;;  %v15245_v51 = vadd.f32 %v12012_v33, %v1536_v2  ;;  %v1549_v52 = vadd.f32 %v19493_v34, %v19492_v10  ;;  %v19494_v5 = vld [vmem:[#allocation143_spill] sm:$0xff]  ;;  %v19497_v2 = vld [vmem:[#allocation98_spill] sm:$0xff] }
 0x268   :  { %v2258_v63 = vpop.f32.mrf.mxu1  ;;  %v2366_v11 = vpop.f32.mrf.mxu0  ;;  %v19498_v32 = vld [vmem:[#allocation146_spill] sm:$0xff] }
 0x269   :  { %19490 = vst [vmem:[#allocation81_spill] sm:$0xff] %v15243_v39  ;;  %19491 = vst [vmem:[#allocation121_spill] sm:$0xff] %v15245_v51  ;;  %v15255_v46 = vadd.f32 %v2258_v63, %v19494_v5  ;;  %v15257_v35 = vadd.f32 %v2366_v11, %v1528_v8  ;;  %v1541_v33 = vadd.f32 %v19498_v32, %v19497_v2  ;;  %v19502_v63 = vld [vmem:[#allocation99_spill] sm:$0xff]  ;;  %v19506_v32 = vld [vmem:[#allocation148_spill] sm:$0xff] }
 0x26a   :  { %v2262_v12 = vpop.f32.mrf.mxu1  ;;  %v12015_v24 = vpop.f32.mrf.mxu0  ;;  %10458 = vmatmul.mubr.msk.bf16.gmra.mxu0 %vm205_vm0, %v15115_v29  ;;  %12098 = vmatmul.mubr.msk.bf16.gmra.mxu1 %vm205_vm0, %v15238_v42  ;;  %v1552_v11 = vadd.f32 %v14595_v50, %v19502_v63  ;;  %v19510_v63 = vld [vmem:[#allocation149_spill] sm:$0xff] }
 0x26b   :  { %19495 = vst [vmem:[#allocation80_spill] sm:$0xff] %v15255_v46  ;;  %19496 = vst [vmem:[#allocation120_spill] sm:$0xff] %v15257_v35  ;;  %v15266_v51 = vadd.f32 %v2262_v12, %v19499_v61  ;;  %v15268_v10 = vadd.f32 %v12015_v24, %v1549_v52  ;;  %3637 = vmatprep.mubr.bf16.mxu0 %v19126_v48  ;;  %12101 = vmatprep.mubr.msk.bf16.mxu1 %vm205_vm0, %v15250_v25  ;;  %v15283_v52 = vld [vmem:[%s19084_s0 + $0x68] sm:$0xff]   ;;  %v19505_v24 = vld [vmem:[#allocation100_spill] sm:$0xff] }
 0x26c   :  { %v2264_v5 = vpop.f32.mrf.mxu1  ;;  %v2379_v8 = vpop.f32.mrf.mxu0  ;;  %v1544_v61 = vadd.f32 %v19506_v32, %v19505_v24  ;;  %v19507_v46 = vld [vmem:[#allocation147_spill] sm:$0xff] }
 0x26d   :  { %19500 = vst [vmem:[#allocation82_spill] sm:$0xff] %v15266_v51  ;;  %19501 = vst [vmem:[#allocation123_spill] sm:$0xff] %v15268_v10  ;;  %v15276_v34 = vadd.f32 %v2264_v5, %v14593_v56  ;;  %v15278_v35 = vadd.f32 %v2379_v8, %v1541_v33  ;;  %v19508_v5 = vld [vmem:[#allocation101_spill] sm:$0xff]  ;;  %v19509_v33 = vld [vmem:[#allocation150_spill] sm:$0xff] }
 0x26e   :  { %v2266_v2 = vpop.f32.mrf.mxu1  ;;  %v12016_v12 = vpop.f32.mrf.mxu0  ;;  %v1565_v8 = vadd.f32 %v19509_v33, %v19508_v5 }
 0x26f   :  { %19503 = vst [vmem:[#allocation122_spill] sm:$0xff] %v15276_v34  ;;  %19504 = vst [vmem:[#allocation83_spill] sm:$0xff] %v15278_v35  ;;  %v15288_v10 = vadd.f32 %v2266_v2, %v19507_v46  ;;  %v15290_v51 = vadd.f32 %v12016_v12, %v1552_v11  ;;  %v19513_v46 = vld [vmem:[#allocation102_spill] sm:$0xff] }
 0x270   :  { %v2268_v50 = vpop.f32.mrf.mxu1  ;;  %v2382_v56 = vpop.f32.mrf.mxu0  ;;  %v1557_v11 = vadd.f32 %v14621_v40, %v19513_v46 }
 0x271   :  { %v15295_v35 = vadd.f32 %v2268_v50, %v19510_v63  ;;  %v15297_v34 = vadd.f32 %v2382_v56, %v1544_v61  ;;  %v19515_v61 = vld [vmem:[#allocation103_spill] sm:$0xff] }
 0x272   :  { %v2272_v39 = vpop.f32.mrf.mxu1  ;;  %v12019_v14 = vpop.f32.mrf.mxu0  ;;  %10459 = vmatmul.mubr.msk.bf16.gmra.mxu0 %vm205_vm0, %v15148_v17  ;;  %12102 = vmatmul.mubr.msk.bf16.gmra.mxu1 %vm205_vm0, %v15283_v52  ;;  %v1568_v50 = vadd.f32 %v14626_v47, %v19515_v61  ;;  %v19516_v56 = vld [vmem:[#allocation151_spill] sm:$0xff] }
 0x273   :  { %19511 = vst [vmem:[#allocation125_spill] sm:$0xff] %v15295_v35  ;;  %19512 = vst [vmem:[#allocation124_spill] sm:$0xff] %v15297_v34  ;;  %v15306_v2 = vadd.f32 %v2272_v39, %v14617_v16  ;;  %v15308_v12 = vadd.f32 %v12019_v14, %v1565_v8  ;;  %3647 = vmatprep.mubr.bf16.mxu0 %v19126_v48  ;;  %3982 = vmatprep.mubr.bf16.mxu1 %v19126_v48  ;;  %v19517_v16 = vld [vmem:[#allocation104_spill] sm:$0xff] }
 0x274   :  { %v2274_v24 = vpop.f32.mrf.mxu1  ;;  %v2395_v32 = vpop.f32.mrf.mxu0  ;;  %v1560_v14 = vadd.f32 %v14631_v3, %v19517_v16  ;;  %v19518_v35 = vld [vmem:[#allocation152_spill] sm:$0xff] }
 0x275   :  { %19514 = vst [vmem:[#allocation84_spill] sm:$0xff] %v15308_v12  ;;  %v15315_v5 = vadd.f32 %v2274_v24, %v19516_v56  ;;  %v15317_v33 = vadd.f32 %v2395_v32, %v1557_v11 }
 0x276   :  { %v2276_v40 = vpop.f32.mrf.mxu1  ;;  %v12020_v63 = vpop.f32.mrf.mxu0 }
 0x277   :  { %v15322_v39 = vadd.f32 %v2276_v40, %v14629_v21  ;;  %v15324_v8 = vadd.f32 %v12020_v63, %v1568_v50  ;;  %v19521_v21 = vld [vmem:[#allocation153_spill] sm:$0xff] }
 0x278   :  { %v2278_v46 = vpop.f32.mrf.mxu1  ;;  %v2398_v34 = vpop.f32.mrf.mxu0 }
 0x279   :  { %v15327_v12 = vadd.f32 %v2278_v46, %v19518_v35  ;;  %v15329_v47 = vadd.f32 %v2398_v34, %v1560_v14 }
 0x27a   :  { %v2678_v24 = vpop.f32.mrf.mxu0  ;;  %v12027_v11 = vpop.f32.mrf.mxu1  ;;  %10460 = vmatmul.mubr.msk.bf16.gmra.mxu0 %vm205_vm0, %v15160_v60  ;;  %10492 = vmatmul.mubr.msk.bf16.vlgmr.msra.gmra.mxu1 %vm205_vm0, %v15015_v41 }
 0x27b   :  { %19519 = vst [vmem:[#allocation85_spill] sm:$0xff] %v15327_v12  ;;  %19520 = vst [vmem:[#allocation86_spill] sm:$0xff] %v15329_v47  ;;  %v15336_v3 = vadd.f32 %v2678_v24, %v14648_v53  ;;  %v15339_v32 = vadd.f32 %v12027_v11, %v19521_v21  ;;  %3657 = vmatprep.mubr.bf16.mxu0 %v19126_v48  ;;  %3992 = vmatprep.mubr.bf16.mxu1 %v19126_v48  ;;  %v19524_v24 = vld [vmem:[#allocation154_spill] sm:$0xff]  ;;  %v19534_v47 = vld [vmem:[#allocation20_spill] sm:$0xff] }
 0x27c   :  { %v2680_v35 = vpop.f32.mrf.mxu0  ;;  %v2831_v34 = vpop.f32.mrf.mxu1 }
 0x27d   :  { %v15344_v61 = vadd.f32 %v2680_v35, %v14658_v4  ;;  %v15347_v50 = vadd.f32 %v2831_v34, %v14660_v55  ;;  %v19526_v55 = vld [vmem:[#allocation155_spill] sm:$0xff] }
 0x27e   :  { %v2682_v56 = vpop.f32.mrf.mxu0  ;;  %v12028_v40 = vpop.f32.mrf.mxu1 }
 0x27f   :  { %v15350_v53 = vadd.f32 %v2682_v56, %v14665_v6  ;;  %v15353_v63 = vadd.f32 %v12028_v40, %v14667_v18  ;;  %v19528_v18 = vld [vmem:[#allocation156_spill] sm:$0xff]  ;;  %v19530_v56 = vld [vmem:[#allocation2_spill] sm:$0xff] }
 0x280   :  { %v2684_v16 = vpop.f32.mrf.mxu0  ;;  %v2834_v14 = vpop.f32.mrf.mxu1 }
 0x281   :  { %19522 = vst [vmem:[#allocation127_spill] sm:$0xff] %v15353_v63  ;;  %v15356_v46 = vadd.f32 %v2684_v16, %v14675_v45  ;;  %v15359_v11 = vadd.f32 %v2834_v14, %v19524_v24  ;;  %v19532_v16 = vld [vmem:[#allocation45_spill] sm:$0xff] }
 0x282   :  { %v2688_v4 = vpop.f32.mrf.mxu0  ;;  %v12031_v21 = vpop.f32.mrf.mxu1  ;;  %10461 = vmatmul.mubr.msk.bf16.gmra.mxu0 %vm205_vm0, %v15193_v22  ;;  %10493 = vmatmul.mubr.msk.bf16.gmra.mxu1 %vm205_vm0, %v15045_v15 }
 0x283   :  { %19523 = vst [vmem:[#allocation126_spill] sm:$0xff] %v15356_v46  ;;  %19525 = vst [vmem:[#allocation87_spill] sm:$0xff] %v15359_v11  ;;  %v15366_v6 = vadd.f32 %v2688_v4, %v19526_v55  ;;  %v15369_v35 = vadd.f32 %v12031_v21, %v19528_v18  ;;  %3667 = vmatprep.mubr.bf16.mxu0 %v19126_v48  ;;  %4002 = vmatprep.mubr.bf16.mxu1 %v19126_v48  ;;  %v19536_v55 = vld [vmem:[#allocation3_spill] sm:$0xff] }
 0x284   :  { %v2690_v45 = vpop.f32.mrf.mxu0  ;;  %v2847_v34 = vpop.f32.mrf.mxu1  ;;  %v19538_v46 = vld [vmem:[#allocation47_spill] sm:$0xff] }
 0x285   :  { %19527 = vst [vmem:[#allocation128_spill] sm:$0xff] %v15366_v6  ;;  %19529 = vst [vmem:[#allocation88_spill] sm:$0xff] %v15369_v35  ;;  %v15374_v40 = vadd.f32 %v2690_v45, %v19530_v56  ;;  %v15377_v14 = vadd.f32 %v2847_v34, %v19532_v16  ;;  %v19540_v6 = vld [vmem:[#allocation21_spill] sm:$0xff] }
 0x286   :  { %v2692_v24 = vpop.f32.mrf.mxu0  ;;  %v12032_v11 = vpop.f32.mrf.mxu1 }
 0x287   :  { %19531 = vst [vmem:[#allocation129_spill] sm:$0xff] %v15374_v40  ;;  %19533 = vst [vmem:[#allocation89_spill] sm:$0xff] %v15377_v14  ;;  %v15380_v4 = vadd.f32 %v2692_v24, %v19534_v47  ;;  %v15383_v21 = vadd.f32 %v12032_v11, %v19536_v55  ;;  %v19542_v47 = vld [vmem:[#allocation4_spill] sm:$0xff]  ;;  %v19544_v11 = vld [vmem:[#allocation49_spill] sm:$0xff] }
 0x288   :  { %v2694_v18 = vpop.f32.mrf.mxu0  ;;  %v2850_v12 = vpop.f32.mrf.mxu1  ;;  %v19548_v55 = vld [vmem:[#allocation5_spill] sm:$0xff]  ;;  %v19554_v40 = vld [vmem:[#allocation6_spill] sm:$0xff] }
 0x289   :  { %19535 = vst [vmem:[#allocation131_spill] sm:$0xff] %v15380_v4  ;;  %19537 = vst [vmem:[#allocation130_spill] sm:$0xff] %v15383_v21  ;;  %v15386_v35 = vadd.f32 %v2694_v18, %v19538_v46  ;;  %v15389_v63 = vadd.f32 %v2850_v12, %v19540_v6  ;;  %v19546_v6 = vld [vmem:[#allocation22_spill] sm:$0xff]  ;;  %v19550_v4 = vld [vmem:[#allocation51_spill] sm:$0xff] }
 0x28a   :  { %v2698_v45 = vpop.f32.mrf.mxu0  ;;  %v12035_v56 = vpop.f32.mrf.mxu1  ;;  %10462 = vmatmul.mubr.msk.bf16.gmra.mxu0 %vm205_vm0, %v15205_v36  ;;  %10494 = vmatmul.mubr.msk.bf16.gmra.mxu1 %vm205_vm0, %v15056_v1  ;;  %v19556_v21 = vld [vmem:[#allocation53_spill] sm:$0xff] }
 0x28b   :  { %19539 = vst [vmem:[#allocation90_spill] sm:$0xff] %v15386_v35  ;;  %19541 = vst [vmem:[#allocation133_spill] sm:$0xff] %v15389_v63  ;;  %v15396_v34 = vadd.f32 %v2698_v45, %v19542_v47  ;;  %v15399_v16 = vadd.f32 %v12035_v56, %v19544_v11  ;;  %3677 = vmatprep.mubr.bf16.mxu0 %v19126_v48  ;;  %4012 = vmatprep.mubr.bf16.mxu1 %v19126_v48  ;;  %v19552_v47 = vld [vmem:[#allocation23_spill] sm:$0xff] }
 0x28c   :  { %v2700_v12 = vpop.f32.mrf.mxu0  ;;  %v2863_v46 = vpop.f32.mrf.mxu1 }
 0x28d   :  { %19543 = vst [vmem:[#allocation132_spill] sm:$0xff] %v15396_v34  ;;  %19545 = vst [vmem:[#allocation91_spill] sm:$0xff] %v15399_v16  ;;  %v15404_v24 = vadd.f32 %v2700_v12, %v19546_v6  ;;  %v15407_v18 = vadd.f32 %v2863_v46, %v19548_v55 }
 0x28e   :  { %v2702_v63 = vpop.f32.mrf.mxu0  ;;  %v12036_v35 = vpop.f32.mrf.mxu1 }
 0x28f   :  { %19547 = vst [vmem:[#allocation134_spill] sm:$0xff] %v15404_v24  ;;  %19549 = vst [vmem:[#allocation92_spill] sm:$0xff] %v15407_v18  ;;  %v15410_v45 = vadd.f32 %v2702_v63, %v19550_v4  ;;  %v15413_v56 = vadd.f32 %v12036_v35, %v19552_v47  ;;  %v19558_v63 = vld [vmem:[#allocation24_spill] sm:$0xff]  ;;  %v19560_v35 = vld [vmem:[#allocation7_spill] sm:$0xff] }
 0x290   :  { %v2704_v11 = vpop.f32.mrf.mxu0  ;;  %v2866_v34 = vpop.f32.mrf.mxu1  ;;  %v19563_v47 = vld [vmem:[#allocation25_spill] sm:$0xff] }
 0x291   :  { %19551 = vst [vmem:[#allocation135_spill] sm:$0xff] %v15410_v45  ;;  %19553 = vst [vmem:[#allocation93_spill] sm:$0xff] %v15413_v56  ;;  %v15416_v16 = vadd.f32 %v2704_v11, %v19554_v40  ;;  %v15419_v14 = vadd.f32 %v2866_v34, %v19556_v21  ;;  %v19562_v34 = vld [vmem:[#allocation55_spill] sm:$0xff]  ;;  %v19564_v45 = vld [vmem:[#allocation8_spill] sm:$0xff] }
 0x292   :  { %v2708_v12 = vpop.f32.mrf.mxu0  ;;  %v12039_v6 = vpop.f32.mrf.mxu1  ;;  %10463 = vmatmul.mubr.msk.bf16.gmra.mxu0 %vm205_vm0, %v15238_v42  ;;  %10495 = vmatmul.mubr.msk.bf16.gmra.mxu1 %vm205_vm0, %v15103_v28  ;;  %v19568_v56 = vld [vmem:[#allocation9_spill] sm:$0xff] }
 0x293   :  { %19555 = vst [vmem:[#allocation137_spill] sm:$0xff] %v15416_v16  ;;  %19557 = vst [vmem:[#allocation136_spill] sm:$0xff] %v15419_v14  ;;  %v15426_v4 = vadd.f32 %v2708_v12, %v19558_v63  ;;  %v15429_v46 = vadd.f32 %v12039_v6, %v19560_v35  ;;  %3687 = vmatprep.mubr.bf16.mxu0 %v19126_v48  ;;  %4022 = vmatprep.mubr.bf16.mxu1 %v19126_v48  ;;  %v19565_v63 = vld [vmem:[#allocation57_spill] sm:$0xff] }
 0x294   :  { %v2710_v40 = vpop.f32.mrf.mxu0  ;;  %v2879_v21 = vpop.f32.mrf.mxu1 }
 0x295   :  { %19559 = vst [vmem:[#allocation94_spill] sm:$0xff] %v15426_v4  ;;  %19561 = vst [vmem:[#allocation139_spill] sm:$0xff] %v15429_v46  ;;  %v15434_v55 = vadd.f32 %v2710_v40, %v19562_v34  ;;  %v15437_v11 = vadd.f32 %v2879_v21, %v19563_v47  ;;  %v19566_v46 = vld [vmem:[#allocation26_spill] sm:$0xff] }
 0x296   :  { %v2712_v14 = vpop.f32.mrf.mxu0  ;;  %v12040_v16 = vpop.f32.mrf.mxu1 }
 0x297   :  { %v15440_v12 = vadd.f32 %v2712_v14, %v19564_v45  ;;  %v15443_v6 = vadd.f32 %v12040_v16, %v19565_v63  ;;  %v19570_v14 = vld [vmem:[#allocation59_spill] sm:$0xff] }
 0x298   :  { %v2714_v35 = vpop.f32.mrf.mxu0  ;;  %v2882_v24 = vpop.f32.mrf.mxu1  ;;  %v19572_v16 = vld [vmem:[#allocation27_spill] sm:$0xff] }
 0x299   :  { %v15446_v4 = vadd.f32 %v2714_v35, %v19566_v46  ;;  %v15449_v18 = vadd.f32 %v2882_v24, %v19568_v56  ;;  %v12298_v46 = vld [vmem:[%s19086_s4 + $0x1f4] ss:$8 sps:$4 sm:$0xff]   ;;  %v12296_v35 = vld [vmem:[%s19086_s4 + $0x1f0] ss:$8 sps:$4 sm:$0xff]  }
 0x29a   :  { %v2718_v40 = vpop.f32.mrf.mxu0  ;;  %v12043_v34 = vpop.f32.mrf.mxu1  ;;  %10464 = vmatmul.mubr.msk.bf16.gmra.mxu0 %vm205_vm0, %v15250_v25  ;;  %10496 = vmatmul.mubr.msk.bf16.gmra.mxu1 %vm205_vm0, %v15115_v29 }
 0x29b   :  { %19567 = vst [vmem:[#allocation138_spill] sm:$0xff] %v15446_v4  ;;  %19569 = vst [vmem:[#allocation95_spill] sm:$0xff] %v15449_v18  ;;  %v15456_v45 = vadd.f32 %v2718_v40, %v19570_v14  ;;  %v15459_v21 = vadd.f32 %v12043_v34, %v19572_v16  ;;  %3697 = vmatprep.mubr.bf16.mxu0 %v19126_v48  ;;  %4032 = vmatprep.mubr.bf16.mxu1 %v19126_v48  ;;  %v19646_v4 = vld [vmem:[#allocation52_spill] sm:$0xff] }
 0x29c   :  { %v2720_v24 = vpop.f32.mrf.mxu0  ;;  %v2895_v56 = vpop.f32.mrf.mxu1  ;;  %5000 = vmatprep.subr.bf16.mxu1 %v12298_v46 }
 0x29d   :  { %19571 = vst [vmem:[#allocation140_spill] sm:$0xff] %v15456_v45  ;;  %v15467_v47 = vadd.f32 %v2720_v24, %v14797_v0  ;;  %v15470_v63 = vadd.f32 %v2895_v56, %v14799_v37  ;;  %5001 = vmatpush1.bf16.msra.mxu1 %v12296_v35  ;;  %v12301_v37 = vld [vmem:[%s19086_s4 + $0x1e4] ss:$8 sps:$4 sm:$0xff]   ;;  %v19579_v35 = vld [vmem:[#allocation28_spill] sm:$0xff] }
 0x29e   :  { %v2722_v40 = vpop.f32.mrf.mxu0  ;;  %v12044_v34 = vpop.f32.mrf.mxu1  ;;  %v19575_v24 = vld [vmem:[#allocation10_spill] sm:$0xff]  ;;  %5002 = vmatprep.subr.bf16.mxu1 %v12301_v37 }
 0x29f   :  { %19573 = vst [vmem:[#allocation96_spill] sm:$0xff] %v15467_v47  ;;  %v15476_v14 = vadd.f32 %v2722_v40, %v14804_v19  ;;  %v15479_v16 = vadd.f32 %v12044_v34, %v14806_v31  ;;  %v19577_v47 = vld [vmem:[#allocation61_spill] sm:$0xff]  ;;  %v12299_v19 = vld [vmem:[%s19086_s4 + $0x1e0] ss:$8 sps:$4 sm:$0xff]  }
 0x2a0   :  { %v2724_v18 = vpop.f32.mrf.mxu0  ;;  %v2898_v0 = vpop.f32.mrf.mxu1 }
 0x2a1   :  { %19574 = vst [vmem:[#allocation142_spill] sm:$0xff] %v15476_v14  ;;  %v15485_v56 = vadd.f32 %v2724_v18, %v19575_v24  ;;  %v15488_v45 = vadd.f32 %v2898_v0, %v19577_v47  ;;  %v19580_v18 = vld [vmem:[#allocation11_spill] sm:$0xff]  ;;  %v12304_v24 = vld [vmem:[%s19086_s4 + $0x1d4] ss:$8 sps:$4 sm:$0xff]   ;;  %5003 = vmatpush1.bf16.msra.mxu1 %v12299_v19 }
 0x2a2   :  { %v2728_v46 = vpop.f32.mrf.mxu0  ;;  %v12047_v31 = vpop.f32.mrf.mxu1  ;;  %10465 = vmatmul.mubr.msk.bf16.gmra.mxu0 %vm205_vm0, %v15283_v52  ;;  %10497 = vmatmul.mubr.msk.bf16.gmra.mxu1 %vm205_vm0, %v15148_v17  ;;  %v19583_v19 = vld [vmem:[#allocation63_spill] sm:$0xff] }
 0x2a3   :  { %19576 = vst [vmem:[#allocation141_spill] sm:$0xff] %v15485_v56  ;;  %19578 = vst [vmem:[#allocation97_spill] sm:$0xff] %v15488_v45  ;;  %v15498_v40 = vadd.f32 %v2728_v46, %v19579_v35  ;;  %v15501_v34 = vadd.f32 %v12047_v31, %v19580_v18  ;;  %4042 = vmatprep.mubr.bf16.mxu1 %v19126_v48  ;;  %12109 = vmatprep.mubr.msk.bf16.mxu0 %vm205_vm0, %v15015_v41  ;;  %v12302_v31 = vld [vmem:[%s19086_s4 + $0x1d0] ss:$8 sps:$4 sm:$0xff]  }
 0x2a4   :  { %v2730_v47 = vpop.f32.mrf.mxu0  ;;  %v2911_v0 = vpop.f32.mrf.mxu1  ;;  %5004 = vmatprep.subr.bf16.mxu1 %v12304_v24 }
 0x2a5   :  { %v15510_v45 = vadd.f32 %v2730_v47, %v14832_v20  ;;  %v15513_v46 = vadd.f32 %v2911_v0, %v14834_v30  ;;  %v12307_v30 = vld [vmem:[%s19086_s4 + $0x1c4] ss:$8 sps:$4 sm:$0xff]   ;;  %v19585_v0 = vld [vmem:[#allocation29_spill] sm:$0xff]  ;;  %5005 = vmatpush1.bf16.msra.mxu1 %v12302_v31 }
 0x2a6   :  { %v2732_v35 = vpop.f32.mrf.mxu0  ;;  %v12048_v41 = vpop.f32.mrf.mxu1  ;;  %5006 = vmatprep.subr.bf16.mxu1 %v12307_v30 }
 0x2a7   :  { %19581 = vst [vmem:[#allocation144_spill] sm:$0xff] %v15510_v45  ;;  %v15519_v37 = vadd.f32 %v2732_v35, %v14839_v13  ;;  %v15522_v18 = vadd.f32 %v12048_v41, %v14841_v62  ;;  %v12305_v13 = vld [vmem:[%s19086_s4 + $0x1c0] ss:$8 sps:$4 sm:$0xff]   ;;  %v19587_v35 = vld [vmem:[#allocation12_spill] sm:$0xff] }
 0x2a8   :  { %v2734_v56 = vpop.f32.mrf.mxu0  ;;  %v2914_v20 = vpop.f32.mrf.mxu1 }
 0x2a9   :  { %19582 = vst [vmem:[#allocation143_spill] sm:$0xff] %v15519_v37  ;;  %v15528_v47 = vadd.f32 %v2734_v56, %v19583_v19  ;;  %v15531_v45 = vadd.f32 %v2914_v20, %v19585_v0  ;;  %v19589_v56 = vld [vmem:[#allocation65_spill] sm:$0xff]  ;;  %5007 = vmatpush1.bf16.msra.mxu1 %v12305_v13  ;;  %v19592_v13 = vld [vmem:[#allocation30_spill] sm:$0xff] }
 0x2aa   :  { %v2738_v24 = vpop.f32.mrf.mxu0  ;;  %v3073_v62 = vpop.f32.mrf.mxu1  ;;  %10498 = vmatmul.mubr.msk.bf16.gmra.mxu1 %vm205_vm0, %v15160_v60  ;;  %12110 = vmatmul.mubr.msk.bf16.vlgmr.msra.gmra.mxu0 %vm205_vm0, %v15045_v15  ;;  %v12310_v0 = vld [vmem:[%s19086_s4 + $0x1b4] ss:$8 sps:$4 sm:$0xff]  }
 0x2ab   :  { %19584 = vst [vmem:[#allocation98_spill] sm:$0xff] %v15528_v47  ;;  %19586 = vst [vmem:[#allocation146_spill] sm:$0xff] %v15531_v45  ;;  %v15541_v41 = vadd.f32 %v2738_v24, %v19587_v35  ;;  %v15544_v19 = vadd.f32 %v3073_v62, %v19589_v56  ;;  %4052 = vmatprep.mubr.bf16.mxu1 %v19126_v48  ;;  %12113 = vmatprep.mubr.msk.bf16.mxu0 %vm205_vm0, %v15056_v1  ;;  %v12308_v62 = vld [vmem:[%s19086_s4 + $0x1b0] ss:$8 sps:$4 sm:$0xff]   ;;  %v19618_v47 = vld [vmem:[#allocation79_spill] sm:$0xff] }
 0x2ac   :  { %v2740_v31 = vpop.f32.mrf.mxu0  ;;  %v3075_v20 = vpop.f32.mrf.mxu1  ;;  %5008 = vmatprep.subr.bf16.mxu1 %v12310_v0  ;;  %v19620_v37 = vld [vmem:[#allocation37_spill] sm:$0xff] }
 0x2ad   :  { %19588 = vst [vmem:[#allocation145_spill] sm:$0xff] %v15541_v41  ;;  %v15553_v15 = vadd.f32 %v2740_v31, %v14876_v7  ;;  %v15556_v24 = vadd.f32 %v3075_v20, %v14879_v58  ;;  %v12313_v58 = vld [vmem:[%s19086_s4 + $0x1a4] ss:$8 sps:$4 sm:$0xff]   ;;  %v19594_v20 = vld [vmem:[#allocation13_spill] sm:$0xff]  ;;  %5009 = vmatpush1.bf16.msra.mxu1 %v12308_v62 }
 0x2ae   :  { %v2742_v35 = vpop.f32.mrf.mxu0  ;;  %v3077_v1 = vpop.f32.mrf.mxu1  ;;  %5010 = vmatprep.subr.bf16.mxu1 %v12313_v58 }
 0x2af   :  { %19590 = vst [vmem:[#allocation99_spill] sm:$0xff] %v15553_v15  ;;  %v15562_v30 = vadd.f32 %v2742_v35, %v14882_v59  ;;  %v15565_v56 = vadd.f32 %v3077_v1, %v14885_v26  ;;  %v12311_v59 = vld [vmem:[%s19086_s4 + $0x1a0] ss:$8 sps:$4 sm:$0xff]  }
 0x2b0   :  { %v2744_v41 = vpop.f32.mrf.mxu0  ;;  %v3079_v7 = vpop.f32.mrf.mxu1  ;;  %v19595_v35 = vld [vmem:[#allocation67_spill] sm:$0xff] }
 0x2b1   :  { %19591 = vst [vmem:[#allocation100_spill] sm:$0xff] %v15562_v30  ;;  %v15571_v31 = vadd.f32 %v2744_v41, %v19592_v13  ;;  %v15574_v15 = vadd.f32 %v3079_v7, %v19594_v20  ;;  %v19596_v41 = vld [vmem:[#allocation31_spill] sm:$0xff]  ;;  %v12316_v20 = vld [vmem:[%s19086_s4 + $0x194] ss:$8 sps:$4 sm:$0xff]   ;;  %5011 = vmatpush1.bf16.msra.mxu1 %v12311_v59  ;;  %v19599_v59 = vld [vmem:[#allocation14_spill] sm:$0xff] }
 0x2b2   :  { %v2748_v0 = vpop.f32.mrf.mxu0  ;;  %v3083_v26 = vpop.f32.mrf.mxu1  ;;  %10499 = vmatmul.mubr.msk.bf16.gmra.mxu1 %vm205_vm0, %v15193_v22  ;;  %12114 = vmatmul.mubr.msk.bf16.gmra.mxu0 %vm205_vm0, %v15103_v28 }
 0x2b3   :  { %19593 = vst [vmem:[#allocation148_spill] sm:$0xff] %v15571_v31  ;;  %v15584_v1 = vadd.f32 %v2748_v0, %v19595_v35  ;;  %v15587_v13 = vadd.f32 %v3083_v26, %v19596_v41  ;;  %4062 = vmatprep.mubr.bf16.mxu1 %v19126_v48  ;;  %12117 = vmatprep.mubr.msk.bf16.mxu0 %vm205_vm0, %v15115_v29  ;;  %v12314_v26 = vld [vmem:[%s19086_s4 + $0x190] ss:$8 sps:$4 sm:$0xff]  }
 0x2b4   :  { %v2750_v62 = vpop.f32.mrf.mxu0  ;;  %v3085_v7 = vpop.f32.mrf.mxu1  ;;  %5012 = vmatprep.subr.bf16.mxu1 %v12316_v20 }
 0x2b5   :  { %v15596_v28 = vadd.f32 %v2750_v62, %v14908_v49  ;;  %v15599_v0 = vadd.f32 %v3085_v7, %v14911_v27  ;;  %v12319_v27 = vld [vmem:[%s19086_s4 + $0x184] ss:$8 sps:$4 sm:$0xff]   ;;  %v19601_v7 = vld [vmem:[#allocation69_spill] sm:$0xff]  ;;  %5013 = vmatpush1.bf16.msra.mxu1 %v12314_v26 }
 0x2b6   :  { %v2752_v35 = vpop.f32.mrf.mxu0  ;;  %v3087_v29 = vpop.f32.mrf.mxu1  ;;  %5014 = vmatprep.subr.bf16.mxu1 %v12319_v27 }
 0x2b7   :  { %19597 = vst [vmem:[#allocation147_spill] sm:$0xff] %v15596_v28  ;;  %v15605_v58 = vadd.f32 %v2752_v35, %v14914_v23  ;;  %v15608_v41 = vadd.f32 %v3087_v29, %v14917_v38  ;;  %v12317_v23 = vld [vmem:[%s19086_s4 + $0x180] ss:$8 sps:$4 sm:$0xff]   ;;  %v19602_v35 = vld [vmem:[#allocation32_spill] sm:$0xff] }
 0x2b8   :  { %v2754_v31 = vpop.f32.mrf.mxu0  ;;  %v3089_v49 = vpop.f32.mrf.mxu1 }
 0x2b9   :  { %19598 = vst [vmem:[#allocation101_spill] sm:$0xff] %v15605_v58  ;;  %v15614_v62 = vadd.f32 %v2754_v31, %v19599_v59  ;;  %v15617_v28 = vadd.f32 %v3089_v49, %v19601_v7  ;;  %v19604_v31 = vld [vmem:[#allocation15_spill] sm:$0xff]  ;;  %v12322_v7 = vld [vmem:[%s19086_s4 + $0x274] ss:$8 sps:$4 sm:$0xff]   ;;  %5015 = vmatpush1.bf16.msra.mxu1 %v12317_v23 }
 0x2ba   :  { %v2758_v20 = vpop.f32.mrf.mxu0  ;;  %v3093_v38 = vpop.f32.mrf.mxu1  ;;  %10500 = vmatmul.mubr.msk.bf16.gmra.mxu1 %vm205_vm0, %v15205_v36  ;;  %12118 = vmatmul.mubr.msk.bf16.gmra.mxu0 %vm205_vm0, %v15148_v17  ;;  %v12323_v23 = vld [vmem:[%s19086_s4 + $0x260] ss:$8 sps:$4 sm:$0xff]  }
 0x2bb   :  { %19600 = vst [vmem:[#allocation150_spill] sm:$0xff] %v15614_v62  ;;  %v15627_v29 = vadd.f32 %v2758_v20, %v19602_v35  ;;  %v15630_v59 = vadd.f32 %v3093_v38, %v19604_v31  ;;  %4072 = vmatprep.mubr.bf16.mxu1 %v19126_v48  ;;  %12121 = vmatprep.mubr.msk.bf16.mxu0 %vm205_vm0, %v15160_v60  ;;  %v12320_v38 = vld [vmem:[%s19086_s4 + $0x270] ss:$8 sps:$4 sm:$0xff]   ;;  %v19607_v31 = vld [vmem:[#allocation71_spill] sm:$0xff] }
 0x2bc   :  { %v2760_v26 = vpop.f32.mrf.mxu0  ;;  %v3095_v49 = vpop.f32.mrf.mxu1  ;;  %5016 = vmatprep.subr.bf16.mxu1 %v12322_v7 }
 0x2bd   :  { %19603 = vst [vmem:[#allocation149_spill] sm:$0xff] %v15627_v29  ;;  %v15639_v17 = vadd.f32 %v2760_v26, %v14939_v57  ;;  %v15642_v20 = vadd.f32 %v3095_v49, %v14942_v9  ;;  %v12325_v9 = vld [vmem:[%s19086_s4 + $0x264] ss:$8 sps:$4 sm:$0xff]   ;;  %5017 = vmatpush2.bf16.msra.mxu1 %v12320_v38 }
 0x2be   :  { %v2762_v35 = vpop.f32.mrf.mxu0  ;;  %v3097_v60 = vpop.f32.mrf.mxu1  ;;  %5018 = vmatprep.subr.bf16.mxu1 %v12325_v9  ;;  %v19612_v9 = vld [vmem:[#allocation35_spill] sm:$0xff] }
 0x2bf   :  { %19605 = vst [vmem:[#allocation102_spill] sm:$0xff] %v15639_v17  ;;  %v15648_v27 = vadd.f32 %v2762_v35, %v14945_v43  ;;  %v15651_v29 = vadd.f32 %v3097_v60, %v19607_v31  ;;  %v19608_v43 = vld [vmem:[#allocation73_spill] sm:$0xff]  ;;  %v19609_v35 = vld [vmem:[#allocation34_spill] sm:$0xff] }
 0x2c0   :  { %v15653_v62 = vpop.f32.mrf.mxu0  ;;  %v15655_v57 = vpop.f32.mrf.mxu1  ;;  %v19610_v17 = vld [vmem:[#allocation17_spill] sm:$0xff] }
 0x2c1   :  { %19606 = vst [vmem:[#allocation103_spill] sm:$0xff] %v15648_v27  ;;  %5019 = vmatpush2.bf16.msra.mxu1 %v12323_v23 }
 0x2c2   :  { %v2768_v26 = vpop.f32.mrf.mxu0  ;;  %v3103_v49 = vpop.f32.mrf.mxu1  ;;  %10501 = vmatmul.mubr.msk.bf16.gmra.mxu1 %vm205_vm0, %v15238_v42  ;;  %12122 = vmatmul.mubr.msk.bf16.gmra.mxu0 %vm205_vm0, %v15193_v22  ;;  %v12328_v22 = vld [vmem:[%s19086_s4 + $0x254] ss:$8 sps:$4 sm:$0xff]  }
 0x2c3   :  { %v15668_v7 = vadd.f32 %v2768_v26, %v19608_v43  ;;  %v15671_v60 = vadd.f32 %v3103_v49, %v19609_v35  ;;  %4082 = vmatprep.mubr.bf16.mxu1 %v19126_v48  ;;  %12125 = vmatprep.mubr.msk.bf16.mxu0 %vm205_vm0, %v15205_v36  ;;  %v12326_v36 = vld [vmem:[%s19086_s4 + $0x250] ss:$8 sps:$4 sm:$0xff]   ;;  %v19611_v43 = vld [vmem:[#allocation75_spill] sm:$0xff] }
 0x2c4   :  { %v2770_v38 = vpop.f32.mrf.mxu0  ;;  %v3105_v31 = vpop.f32.mrf.mxu1  ;;  %5020 = vmatprep.subr.bf16.mxu1 %v12328_v22  ;;  %v12329_v22 = vld [vmem:[%s19086_s4 + $0x240] ss:$8 sps:$4 sm:$0xff]  }
 0x2c5   :  { %v15677_v27 = vadd.f32 %v2770_v38, %v14970_v54  ;;  %v15680_v58 = vadd.f32 %v3105_v31, %v19610_v17  ;;  %5021 = vmatpush2.bf16.msra.mxu1 %v12326_v36  ;;  %v12331_v38 = vld [vmem:[%s19086_s4 + $0x244] ss:$8 sps:$4 sm:$0xff]  }
 0x2c6   :  { %v2772_v26 = vpop.f32.mrf.mxu0  ;;  %v3107_v49 = vpop.f32.mrf.mxu1  ;;  %v19616_v36 = vld [vmem:[#allocation19_spill] sm:$0xff]  ;;  %5022 = vmatprep.subr.bf16.mxu1 %v12331_v38 }
 0x2c7   :  { %v15689_v35 = vadd.f32 %v2772_v26, %v19611_v43  ;;  %v15692_v54 = vadd.f32 %v3107_v49, %v19612_v9  ;;  %v19614_v26 = vld [vmem:[#allocation36_spill] sm:$0xff]  ;;  %v19624_v38 = vld [vmem:[#allocation39_spill] sm:$0xff] }
 0x2c8   :  { %v15694_v17 = vpop.f32.mrf.mxu0  ;;  %v15696_v23 = vpop.f32.mrf.mxu1 }
 0x2c9   :  { %19613 = vst [vmem:[#allocation151_spill] sm:$0xff] %v15692_v54  ;;  %5023 = vmatpush2.bf16.msra.mxu1 %v12329_v22  ;;  %v12337_v22 = vld [vmem:[%s19086_s4 + $0x224] ss:$8 sps:$4 sm:$0xff]  }
 0x2ca   :  { %v2778_v31 = vpop.f32.mrf.mxu0  ;;  %v3113_v30 = vpop.f32.mrf.mxu1  ;;  %10502 = vmatmul.mubr.msk.bf16.gmra.mxu1 %vm205_vm0, %v15250_v25  ;;  %12126 = vmatmul.mubr.msk.bf16.gmra.mxu0 %vm205_vm0, %v15238_v42  ;;  %v19648_v54 = vld [vmem:[#allocation54_spill] sm:$0xff] }
 0x2cb   :  { %v15709_v49 = vadd.f32 %v2778_v31, %v19614_v26  ;;  %v15712_v43 = vadd.f32 %v3113_v30, %v19616_v36  ;;  %4092 = vmatprep.mubr.bf16.mxu1 %v19126_v48  ;;  %12129 = vmatprep.mubr.msk.bf16.mxu0 %vm205_vm0, %v15250_v25  ;;  %v12334_v30 = vld [vmem:[%s19086_s4 + $0x234] ss:$8 sps:$4 sm:$0xff]   ;;  %v12332_v25 = vld [vmem:[%s19086_s4 + $0x230] ss:$8 sps:$4 sm:$0xff]   ;;  %v19622_v36 = vld [vmem:[#allocation38_spill] sm:$0xff] }
 0x2cc   :  { %v2780_v9 = vpop.f32.mrf.mxu0  ;;  %v3115_v45 = vpop.f32.mrf.mxu1  ;;  %5024 = vmatprep.subr.bf16.mxu1 %v12334_v30  ;;  %v12335_v30 = vld [vmem:[%s19086_s4 + $0x220] ss:$8 sps:$4 sm:$0xff]  }
 0x2cd   :  { %19615 = vst [vmem:[#allocation104_spill] sm:$0xff] %v15709_v49  ;;  %19617 = vst [vmem:[#allocation152_spill] sm:$0xff] %v15712_v43  ;;  %v15718_v42 = vadd.f32 %v2780_v9, %v19618_v47  ;;  %v15721_v14 = vadd.f32 %v3115_v45, %v19620_v37  ;;  %5025 = vmatpush2.bf16.msra.mxu1 %v12332_v25  ;;  %v19629_v25 = vld [vmem:[#allocation42_spill] sm:$0xff] }
 0x2ce   :  { %v2782_v31 = vpop.f32.mrf.mxu0  ;;  %v3117_v26 = vpop.f32.mrf.mxu1  ;;  %5026 = vmatprep.subr.bf16.mxu1 %v12337_v22  ;;  %v19633_v49 = vld [vmem:[#allocation106_spill] sm:$0xff]  ;;  %v19635_v22 = vld [vmem:[#allocation44_spill] sm:$0xff] }
 0x2cf   :  { %19619 = vst [vmem:[#allocation153_spill] sm:$0xff] %v15718_v42  ;;  %19621 = vst [vmem:[#allocation154_spill] sm:$0xff] %v15721_v14  ;;  %v15730_v43 = vadd.f32 %v2782_v31, %v19622_v36  ;;  %v15733_v47 = vadd.f32 %v3117_v26, %v19624_v38  ;;  %v19627_v31 = vld [vmem:[#allocation41_spill] sm:$0xff] }
 0x2d0   :  { %v15735_v45 = vpop.f32.mrf.mxu0  ;;  %v15737_v37 = vpop.f32.mrf.mxu1 }
 0x2d1   :  { %19623 = vst [vmem:[#allocation155_spill] sm:$0xff] %v15730_v43  ;;  %19625 = vst [vmem:[#allocation156_spill] sm:$0xff] %v15733_v47  ;;  %v19631_v43 = vld [vmem:[#allocation43_spill] sm:$0xff]  ;;  %5027 = vmatpush2.bf16.msra.mxu1 %v12335_v30  ;;  %v12338_v30 = vld [vmem:[%s19086_s4 + $0x2f0] ss:$8 sps:$4 sm:$0xff]  }
 0x2d2   :  { %19626 = vst [vmem:[#allocation2_spill] sm:$0xff] %v15737_v37  ;;  %v2788_v9 = vpop.f32.mrf.mxu0  ;;  %v3123_v14 = vpop.f32.mrf.mxu1  ;;  %10503 = vmatmul.mubr.msk.bf16.gmra.mxu1 %vm205_vm0, %v15283_v52  ;;  %12130 = vmatmul.mubr.msk.bf16.gmra.mxu0 %vm205_vm0, %v15283_v52 }
 0x2d3   :  { %v15750_v26 = vadd.f32 %v2788_v9, %v19627_v31  ;;  %v15753_v36 = vadd.f32 %v3123_v14, %v19629_v25  ;;  %5105 = vmatprep.mubr.bf16.mxu0 %v19126_v48  ;;  %v12343_v9 = vld [vmem:[%s19086_s4 + $0x214] ss:$8 sps:$4 sm:$0xff]   ;;  %v12341_v14 = vld [vmem:[%s19086_s4 + $0x210] ss:$8 sps:$4 sm:$0xff]   ;;  %v19637_v48 = vld [vmem:[#allocation46_spill] sm:$0xff] }
 0x2d4   :  { %v2790_v38 = vpop.f32.mrf.mxu0  ;;  %v3125_v47 = vpop.f32.mrf.mxu1  ;;  %5028 = vmatprep.subr.bf16.mxu1 %v12343_v9  ;;  %v12344_v9 = vld [vmem:[%s19086_s4 + $0x200] ss:$8 sps:$4 sm:$0xff]  }
 0x2d5   :  { %19628 = vst [vmem:[#allocation45_spill] sm:$0xff] %v15750_v26  ;;  %19630 = vst [vmem:[#allocation20_spill] sm:$0xff] %v15753_v36  ;;  %v15757_v42 = vadd.f32 %v2790_v38, %v19631_v43  ;;  %v15760_v52 = vadd.f32 %v3125_v47, %v19633_v49  ;;  %v12340_v38 = vld [vmem:[%s19086_s4 + $0x2f4] ss:$8 sps:$4 sm:$0xff]   ;;  %5029 = vmatpush2.bf16.msra.mxu1 %v12341_v14 }
 0x2d6   :  { %v2792_v31 = vpop.f32.mrf.mxu0  ;;  %v3127_v26 = vpop.f32.mrf.mxu1  ;;  %5073 = vmatprep.subr.bf16.mxu0 %v12340_v38 }
 0x2d7   :  { %19632 = vst [vmem:[#allocation3_spill] sm:$0xff] %v15757_v42  ;;  %19634 = vst [vmem:[#allocation47_spill] sm:$0xff] %v15760_v52  ;;  %v15769_v25 = vadd.f32 %v2792_v31, %v19635_v22  ;;  %v15772_v43 = vadd.f32 %v3127_v26, %v19637_v48  ;;  %v12346_v31 = vld [vmem:[%s19086_s4 + $0x204] ss:$8 sps:$4 sm:$0xff]   ;;  %5074 = vmatpush1.bf16.msra.mxu0 %v12338_v30 }
 0x2d8   :  { %v15774_v49 = vpop.f32.mrf.mxu0  ;;  %v15776_v47 = vpop.f32.mrf.mxu1  ;;  %v19641_v22 = vld [vmem:[#allocation50_spill] sm:$0xff]  ;;  %5030 = vmatprep.subr.bf16.mxu1 %v12346_v31 }
 0x2d9   :  { %19636 = vst [vmem:[#allocation21_spill] sm:$0xff] %v15769_v25  ;;  %19638 = vst [vmem:[#allocation4_spill] sm:$0xff] %v15772_v43  ;;  %v19643_v25 = vld [vmem:[#allocation108_spill] sm:$0xff]  ;;  %5031 = vmatpush2.bf16.msra.mxu1 %v12344_v9 }
 0x2da   :  { %19639 = vst [vmem:[#allocation49_spill] sm:$0xff] %v15774_v49  ;;  %19640 = vst [vmem:[#allocation22_spill] sm:$0xff] %v15776_v47  ;;  %v3133_v48 = vpop.f32.mrf.mxu1  ;;  %v12055_v26 = vpop.f32.mrf.mxu0 }
 0x2db   :  { %v15791_v43 = vadd.f32 %v3133_v48, %v19641_v22  ;;  %v15794_v52 = vadd.f32 %v12055_v26, %v19643_v25  ;;  %v19650_v22 = vld [vmem:[#allocation56_spill] sm:$0xff]  ;;  %v19653_v26 = vld [vmem:[#allocation110_spill] sm:$0xff] }
 0x2dc   :  { %v3135_v42 = vpop.f32.mrf.mxu1  ;;  %v3226_v14 = vpop.f32.mrf.mxu0 }
 0x2dd   :  { %19642 = vst [vmem:[#allocation5_spill] sm:$0xff] %v15791_v43  ;;  %19644 = vst [vmem:[#allocation51_spill] sm:$0xff] %v15794_v52  ;;  %v15797_v36 = vadd.f32 %v3135_v42, %v15096_v44  ;;  %v15800_v47 = vadd.f32 %v3226_v14, %v19646_v4  ;;  %v12347_v44 = vld [vmem:[%s19086_s4 + $0x2e0] ss:$8 sps:$4 sm:$0xff]   ;;  %v12349_v4 = vld [vmem:[%s19086_s4 + $0x2e4] ss:$8 sps:$4 sm:$0xff]  }
 0x2de   :  { %v3137_v49 = vpop.f32.mrf.mxu1  ;;  %v12056_v37 = vpop.f32.mrf.mxu0  ;;  %5075 = vmatprep.subr.bf16.mxu0 %v12349_v4  ;;  %v19661_v43 = vld [vmem:[#allocation64_spill] sm:$0xff] }
 0x2df   :  { %19645 = vst [vmem:[#allocation23_spill] sm:$0xff] %v15797_v36  ;;  %19647 = vst [vmem:[#allocation6_spill] sm:$0xff] %v15800_v47  ;;  %v15803_v48 = vadd.f32 %v3137_v49, %v19648_v54  ;;  %v15806_v25 = vadd.f32 %v12056_v37, %v19650_v22  ;;  %v19655_v49 = vld [vmem:[#allocation60_spill] sm:$0xff]  ;;  %5076 = vmatpush1.bf16.msra.mxu0 %v12347_v44  ;;  %v19657_v22 = vld [vmem:[#allocation62_spill] sm:$0xff] }
 0x2e0   :  { %v15808_v38 = vpop.f32.mrf.mxu1  ;;  %v15810_v31 = vpop.f32.mrf.mxu0  ;;  %v12350_v44 = vld [vmem:[%s19086_s4 + $0x2d0] ss:$8 sps:$4 sm:$0xff]  }
 0x2e1   :  { %19649 = vst [vmem:[#allocation53_spill] sm:$0xff] %v15803_v48  ;;  %19651 = vst [vmem:[#allocation24_spill] sm:$0xff] %v15806_v25  ;;  %v19659_v48 = vld [vmem:[#allocation111_spill] sm:$0xff] }
 0x2e2   :  { %19652 = vst [vmem:[#allocation7_spill] sm:$0xff] %v15810_v31  ;;  %v3143_v42 = vpop.f32.mrf.mxu1  ;;  %v12059_v30 = vpop.f32.mrf.mxu0 }
 0x2e3   :  { %v15819_v54 = vadd.f32 %v3143_v42, %v19653_v26  ;;  %v15822_v37 = vadd.f32 %v12059_v30, %v19655_v49  ;;  %v19663_v42 = vld [vmem:[#allocation112_spill] sm:$0xff] }
 0x2e4   :  { %v3145_v9 = vpop.f32.mrf.mxu1  ;;  %v3242_v14 = vpop.f32.mrf.mxu0 }
 0x2e5   :  { %19654 = vst [vmem:[#allocation55_spill] sm:$0xff] %v15819_v54  ;;  %19656 = vst [vmem:[#allocation25_spill] sm:$0xff] %v15822_v37  ;;  %v15825_v25 = vadd.f32 %v3145_v9, %v19657_v22  ;;  %v15828_v47 = vadd.f32 %v3242_v14, %v19659_v48  ;;  %v12352_v48 = vld [vmem:[%s19086_s4 + $0x2d4] ss:$8 sps:$4 sm:$0xff]  }
 0x2e6   :  { %v3147_v36 = vpop.f32.mrf.mxu1  ;;  %v12060_v52 = vpop.f32.mrf.mxu0  ;;  %v19667_v14 = vld [vmem:[#allocation68_spill] sm:$0xff]  ;;  %5077 = vmatprep.subr.bf16.mxu0 %v12352_v48  ;;  %v12355_v48 = vld [vmem:[%s19086_s4 + $0x2c4] ss:$8 sps:$4 sm:$0xff]  }
 0x2e7   :  { %19658 = vst [vmem:[#allocation8_spill] sm:$0xff] %v15825_v25  ;;  %19660 = vst [vmem:[#allocation57_spill] sm:$0xff] %v15828_v47  ;;  %v15831_v31 = vadd.f32 %v3147_v36, %v19661_v43  ;;  %v15834_v26 = vadd.f32 %v12060_v52, %v19663_v42  ;;  %v19669_v43 = vld [vmem:[#allocation114_spill] sm:$0xff]  ;;  %5078 = vmatpush1.bf16.msra.mxu0 %v12350_v44  ;;  %v19673_v47 = vld [vmem:[#allocation115_spill] sm:$0xff] }
 0x2e8   :  { %v15836_v30 = vpop.f32.mrf.mxu1  ;;  %v15838_v4 = vpop.f32.mrf.mxu0  ;;  %5079 = vmatprep.subr.bf16.mxu0 %v12355_v48  ;;  %v12364_v48 = vld [vmem:[%s19086_s4 + $0x174] ss:$8 sps:$4 sm:$0xff]  }
 0x2e9   :  { %19662 = vst [vmem:[#allocation26_spill] sm:$0xff] %v15831_v31  ;;  %19664 = vst [vmem:[#allocation9_spill] sm:$0xff] %v15834_v26  ;;  %v19671_v26 = vld [vmem:[#allocation70_spill] sm:$0xff]  ;;  %5483 = vmatprep.subr.bf16.mxu1 %v12364_v48 }
 0x2ea   :  { %19665 = vst [vmem:[#allocation59_spill] sm:$0xff] %v15836_v30  ;;  %19666 = vst [vmem:[#allocation27_spill] sm:$0xff] %v15838_v4  ;;  %v3153_v49 = vpop.f32.mrf.mxu1  ;;  %v12063_v9 = vpop.f32.mrf.mxu0  ;;  %v19675_v4 = vld [vmem:[#allocation72_spill] sm:$0xff] }
 0x2eb   :  { %v15847_v36 = vadd.f32 %v3153_v49, %v19667_v14  ;;  %v15850_v52 = vadd.f32 %v12063_v9, %v19669_v43  ;;  %v19677_v49 = vld [vmem:[#allocation116_spill] sm:$0xff] }
 0x2ec   :  { %v3155_v22 = vpop.f32.mrf.mxu1  ;;  %v3258_v42 = vpop.f32.mrf.mxu0 }
 0x2ed   :  { %19668 = vst [vmem:[#allocation10_spill] sm:$0xff] %v15847_v36  ;;  %19670 = vst [vmem:[#allocation61_spill] sm:$0xff] %v15850_v52  ;;  %v15853_v31 = vadd.f32 %v3155_v22, %v19671_v26  ;;  %v15856_v25 = vadd.f32 %v3258_v42, %v19673_v47  ;;  %v12353_v47 = vld [vmem:[%s19086_s4 + $0x2c0] ss:$8 sps:$4 sm:$0xff]   ;;  %v12356_v42 = vld [vmem:[%s19086_s4 + $0x2b0] ss:$8 sps:$4 sm:$0xff]  }
 0x2ee   :  { %v3157_v37 = vpop.f32.mrf.mxu1  ;;  %v12064_v54 = vpop.f32.mrf.mxu0  ;;  %5080 = vmatpush1.bf16.msra.mxu0 %v12353_v47  ;;  %v19683_v47 = vld [vmem:[#allocation78_spill] sm:$0xff] }
 0x2ef   :  { %19672 = vst [vmem:[#allocation28_spill] sm:$0xff] %v15853_v31  ;;  %19674 = vst [vmem:[#allocation11_spill] sm:$0xff] %v15856_v25  ;;  %v15859_v30 = vadd.f32 %v3157_v37, %v19675_v4  ;;  %v15862_v14 = vadd.f32 %v12064_v54, %v19677_v49  ;;  %v19679_v37 = vld [vmem:[#allocation76_spill] sm:$0xff]  ;;  %v19681_v54 = vld [vmem:[#allocation118_spill] sm:$0xff] }
 0x2f0   :  { %v15867_v9 = vpop.f32.mrf.mxu1  ;;  %v15869_v44 = vpop.f32.mrf.mxu0  ;;  %v12358_v49 = vld [vmem:[%s19086_s4 + $0x2b4] ss:$8 sps:$4 sm:$0xff]   ;;  %v12361_v36 = vld [vmem:[%s19086_s4 + $0x2a4] ss:$8 sps:$4 sm:$0xff]  }
 0x2f1   :  { %19676 = vst [vmem:[#allocation63_spill] sm:$0xff] %v15859_v30  ;;  %19678 = vst [vmem:[#allocation29_spill] sm:$0xff] %v15862_v14  ;;  %5081 = vmatprep.subr.bf16.mxu0 %v12358_v49  ;;  %v19689_v31 = vld [vmem:[#allocation121_spill] sm:$0xff] }
 0x2f2   :  { %v3163_v26 = vpop.f32.mrf.mxu1  ;;  %v12067_v43 = vpop.f32.mrf.mxu0  ;;  %5082 = vmatpush1.bf16.msra.mxu0 %v12356_v42 }
 0x2f3   :  { %v15875_v4 = vadd.f32 %v3163_v26, %v19679_v37  ;;  %v15878_v22 = vadd.f32 %v12067_v43, %v19681_v54  ;;  %v19685_v37 = vld [vmem:[#allocation119_spill] sm:$0xff]  ;;  %5083 = vmatprep.subr.bf16.mxu0 %v12361_v36  ;;  %v19696_v36 = vld [vmem:[#allocation122_spill] sm:$0xff] }
 0x2f4   :  { %v3165_v14 = vpop.f32.mrf.mxu1  ;;  %v3274_v30 = vpop.f32.mrf.mxu0 }
 0x2f5   :  { %19680 = vst [vmem:[#allocation12_spill] sm:$0xff] %v15875_v4  ;;  %19682 = vst [vmem:[#allocation65_spill] sm:$0xff] %v15878_v22  ;;  %v15890_v26 = vadd.f32 %v3165_v14, %v19683_v47  ;;  %v15893_v43 = vadd.f32 %v3274_v30, %v19685_v37  ;;  %v19687_v4 = vld [vmem:[#allocation81_spill] sm:$0xff]  ;;  %v12359_v30 = vld [vmem:[%s19086_s4 + $0x2a0] ss:$8 sps:$4 sm:$0xff]  }
 0x2f6   :  { %v3167_v54 = vpop.f32.mrf.mxu1  ;;  %v12068_v22 = vpop.f32.mrf.mxu0  ;;  %5084 = vmatpush1.bf16.msra.mxu0 %v12359_v30  ;;  %v12367_v37 = vld [vmem:[%s19086_s4 + $0x294] ss:$8 sps:$4 sm:$0xff]   ;;  %v19698_v30 = vld [vmem:[#allocation83_spill] sm:$0xff] }
 0x2f7   :  { %19684 = vst [vmem:[#allocation30_spill] sm:$0xff] %v15890_v26  ;;  %19686 = vst [vmem:[#allocation13_spill] sm:$0xff] %v15893_v43  ;;  %v15896_v25 = vadd.f32 %v3167_v54, %v19687_v4  ;;  %v15899_v52 = vadd.f32 %v12068_v22, %v19689_v31  ;;  %v19692_v4 = vld [vmem:[#allocation82_spill] sm:$0xff]  ;;  %v19694_v31 = vld [vmem:[#allocation123_spill] sm:$0xff]  ;;  %5085 = vmatprep.subr.bf16.mxu0 %v12367_v37 }
 0x2f8   :  { %v15904_v14 = vpop.f32.mrf.mxu1  ;;  %v15906_v47 = vpop.f32.mrf.mxu0 }
 0x2f9   :  { %19688 = vst [vmem:[#allocation67_spill] sm:$0xff] %v15896_v25  ;;  %19690 = vst [vmem:[#allocation31_spill] sm:$0xff] %v15899_v52  ;;  %v12365_v25 = vld [vmem:[%s19086_s4 + $0x290] ss:$8 sps:$4 sm:$0xff]  }
 0x2fa   :  { %19691 = vst [vmem:[#allocation14_spill] sm:$0xff] %v15906_v47  ;;  %v3173_v42 = vpop.f32.mrf.mxu1  ;;  %v12071_v49 = vpop.f32.mrf.mxu0  ;;  %5086 = vmatpush1.bf16.msra.mxu0 %v12365_v25 }
 0x2fb   :  { %v15912_v48 = vadd.f32 %v3173_v42, %v19692_v4  ;;  %v15915_v22 = vadd.f32 %v12071_v49, %v19694_v31 }
 0x2fc   :  { %v3175_v54 = vpop.f32.mrf.mxu1  ;;  %v3290_v52 = vpop.f32.mrf.mxu0 }
 0x2fd   :  { %19693 = vst [vmem:[#allocation69_spill] sm:$0xff] %v15912_v48  ;;  %19695 = vst [vmem:[#allocation32_spill] sm:$0xff] %v15915_v22  ;;  %v15924_v43 = vadd.f32 %v3175_v54, %v19696_v36  ;;  %v15927_v26 = vadd.f32 %v3290_v52, %v19698_v30  ;;  %v12376_v22 = vld [vmem:[%s19086_s4 + $0x284] ss:$8 sps:$4 sm:$0xff]   ;;  %v12374_v52 = vld [vmem:[%s19086_s4 + $0x280] ss:$8 sps:$4 sm:$0xff]  }
 0x2fe   :  { %v3177_v42 = vpop.f32.mrf.mxu1  ;;  %v12072_v49 = vpop.f32.mrf.mxu0  ;;  %5087 = vmatprep.subr.bf16.mxu0 %v12376_v22  ;;  %v12382_v30 = vld [vmem:[%s19086_s4 + $0x74] ss:$8 sps:$4 sm:$0xff]  }
 0x2ff   :  { %19697 = vst [vmem:[#allocation15_spill] sm:$0xff] %v15924_v43  ;;  %19699 = vst [vmem:[#allocation71_spill] sm:$0xff] %v15927_v26  ;;  %v15930_v4 = vadd.f32 %v3177_v42, %v15288_v10  ;;  %v15933_v31 = vadd.f32 %v12072_v49, %v15290_v51  ;;  %5088 = vmatpush1.bf16.msra.mxu0 %v12374_v52  ;;  %v19705_v51 = vld [vmem:[#allocation84_spill] sm:$0xff]  ;;  %v19723_v26 = vld [vmem:[#allocation130_spill] sm:$0xff] }
 0x300   :  { %v15938_v48 = vpop.f32.mrf.mxu1  ;;  %v15940_v54 = vpop.f32.mrf.mxu0  ;;  %5410 = vmatprep.subr.bf16.mxu0 %v12382_v30 }
 0x301   :  { %19700 = vst [vmem:[#allocation73_spill] sm:$0xff] %v15930_v4  ;;  %19701 = vst [vmem:[#allocation34_spill] sm:$0xff] %v15933_v31 }
 0x302   :  { %19702 = vst [vmem:[#allocation17_spill] sm:$0xff] %v15938_v48  ;;  %19703 = vst [vmem:[#allocation75_spill] sm:$0xff] %v15940_v54  ;;  %v3183_v25 = vpop.f32.mrf.mxu1  ;;  %v12075_v37 = vpop.f32.mrf.mxu0 }
 0x303   :  { %v15946_v10 = vadd.f32 %v3183_v25, %v15306_v2  ;;  %v15949_v36 = vadd.f32 %v12075_v37, %v19705_v51 }
 0x304   :  { %v3185_v42 = vpop.f32.mrf.mxu1  ;;  %v3306_v49 = vpop.f32.mrf.mxu0 }
 0x305   :  { %19704 = vst [vmem:[#allocation35_spill] sm:$0xff] %v15946_v10  ;;  %19706 = vst [vmem:[#allocation36_spill] sm:$0xff] %v15949_v36  ;;  %v15955_v31 = vadd.f32 %v3185_v42, %v15315_v5  ;;  %v15958_v22 = vadd.f32 %v3306_v49, %v15317_v33 }
 0x306   :  { %v3187_v52 = vpop.f32.mrf.mxu1  ;;  %v12076_v4 = vpop.f32.mrf.mxu0 }
 0x307   :  { %19707 = vst [vmem:[#allocation19_spill] sm:$0xff] %v15955_v31  ;;  %19708 = vst [vmem:[#allocation79_spill] sm:$0xff] %v15958_v22  ;;  %v15961_v2 = vadd.f32 %v3187_v52, %v15322_v39  ;;  %v15964_v25 = vadd.f32 %v12076_v4, %v15324_v8  ;;  %v19718_v22 = vld [vmem:[#allocation128_spill] sm:$0xff] }
 0x308   :  { %v15966_v37 = vpop.f32.mrf.mxu1  ;;  %v15968_v51 = vpop.f32.mrf.mxu0 }
 0x309   :  { %19709 = vst [vmem:[#allocation37_spill] sm:$0xff] %v15961_v2  ;;  %19710 = vst [vmem:[#allocation38_spill] sm:$0xff] %v15964_v25  ;;  %v19715_v25 = vld [vmem:[#allocation127_spill] sm:$0xff] }
 0x30a   :  { %19711 = vst [vmem:[#allocation39_spill] sm:$0xff] %v15966_v37  ;;  %19712 = vst [vmem:[#allocation41_spill] sm:$0xff] %v15968_v51  ;;  %v3589_v36 = vpop.f32.mrf.mxu0  ;;  %v12083_v10 = vpop.f32.mrf.mxu1 }
 0x30b   :  { %v15971_v5 = vadd.f32 %v3589_v36, %v15336_v3  ;;  %v15974_v33 = vadd.f32 %v12083_v10, %v15339_v32 }
 0x30c   :  { %v3591_v30 = vpop.f32.mrf.mxu0  ;;  %v3742_v42 = vpop.f32.mrf.mxu1 }
 0x30d   :  { %19713 = vst [vmem:[#allocation42_spill] sm:$0xff] %v15974_v33  ;;  %v15977_v39 = vadd.f32 %v3591_v30, %v15344_v61  ;;  %v15980_v8 = vadd.f32 %v3742_v42, %v15347_v50  ;;  %v19719_v30 = vld [vmem:[#allocation88_spill] sm:$0xff] }
 0x30e   :  { %v3593_v4 = vpop.f32.mrf.mxu0  ;;  %v12084_v49 = vpop.f32.mrf.mxu1 }
 0x30f   :  { %19714 = vst [vmem:[#allocation43_spill] sm:$0xff] %v15980_v8  ;;  %v15983_v52 = vadd.f32 %v3593_v4, %v15350_v53  ;;  %v15986_v2 = vadd.f32 %v12084_v49, %v19715_v25  ;;  %v19721_v53 = vld [vmem:[#allocation89_spill] sm:$0xff] }
 0x310   :  { %v15988_v3 = vpop.f32.mrf.mxu0  ;;  %v15990_v32 = vpop.f32.mrf.mxu1 }
 0x311   :  { %19716 = vst [vmem:[#allocation106_spill] sm:$0xff] %v15986_v2  ;;  %19717 = vst [vmem:[#allocation44_spill] sm:$0xff] %v15990_v32 }
 0x312   :  { %v3599_v10 = vpop.f32.mrf.mxu0  ;;  %v12087_v36 = vpop.f32.mrf.mxu1 }
 0x313   :  { %v15993_v61 = vadd.f32 %v3599_v10, %v19718_v22  ;;  %v15996_v50 = vadd.f32 %v12087_v36, %v19719_v30  ;;  %v19726_v36 = vld [vmem:[#allocation91_spill] sm:$0xff] }
 0x314   :  { %v15998_v42 = vpop.f32.mrf.mxu0  ;;  %v3758_v31 = vpop.f32.mrf.mxu1 }
 0x315   :  { %19720 = vst [vmem:[#allocation46_spill] sm:$0xff] %v15996_v50  ;;  %v16001_v4 = vadd.f32 %v3758_v31, %v19721_v53  ;;  %v19728_v53 = vld [vmem:[#allocation92_spill] sm:$0xff] }
 0x316   :  { %v16003_v25 = vpop.f32.mrf.mxu0  ;;  %v12088_v49 = vpop.f32.mrf.mxu1 }
 0x317   :  { %19722 = vst [vmem:[#allocation50_spill] sm:$0xff] %v16001_v4  ;;  %v16006_v43 = vadd.f32 %v12088_v49, %v19723_v26  ;;  %v19730_v49 = vld [vmem:[#allocation93_spill] sm:$0xff] }
 0x318   :  { %v16008_v2 = vpop.f32.mrf.mxu0  ;;  %v16010_v8 = vpop.f32.mrf.mxu1 }
 0x319   :  { %19724 = vst [vmem:[#allocation108_spill] sm:$0xff] %v16006_v43  ;;  %19725 = vst [vmem:[#allocation52_spill] sm:$0xff] %v16010_v8 }
 0x31a   :  { %v16012_v22 = vpop.f32.mrf.mxu0  ;;  %v12091_v10 = vpop.f32.mrf.mxu1 }
 0x31b   :  { %v16015_v30 = vadd.f32 %v12091_v10, %v19726_v36  ;;  %v19733_v10 = vld [vmem:[#allocation94_spill] sm:$0xff] }
 0x31c   :  { %v16017_v50 = vpop.f32.mrf.mxu0  ;;  %v3774_v31 = vpop.f32.mrf.mxu1 }
 0x31d   :  { %19727 = vst [vmem:[#allocation54_spill] sm:$0xff] %v16015_v30  ;;  %v16020_v4 = vadd.f32 %v3774_v31, %v19728_v53  ;;  %v19734_v30 = vld [vmem:[#allocation139_spill] sm:$0xff] }
 0x31e   :  { %v16022_v33 = vpop.f32.mrf.mxu0  ;;  %v12092_v26 = vpop.f32.mrf.mxu1 }
 0x31f   :  { %19729 = vst [vmem:[#allocation56_spill] sm:$0xff] %v16020_v4  ;;  %v16025_v43 = vadd.f32 %v12092_v26, %v19730_v49 }
 0x320   :  { %v16027_v32 = vpop.f32.mrf.mxu0  ;;  %v16029_v8 = vpop.f32.mrf.mxu1 }
 0x321   :  { %19731 = vst [vmem:[#allocation110_spill] sm:$0xff] %v16025_v43  ;;  %19732 = vst [vmem:[#allocation60_spill] sm:$0xff] %v16029_v8 }
 0x322   :  { %v3619_v51 = vpop.f32.mrf.mxu0  ;;  %v12095_v37 = vpop.f32.mrf.mxu1 }
 0x323   :  { %v16032_v36 = vadd.f32 %v3619_v51, %v19733_v10  ;;  %v16035_v54 = vadd.f32 %v12095_v37, %v19734_v30 }
 0x324   :  { %v16037_v31 = vpop.f32.mrf.mxu0  ;;  %v3790_v53 = vpop.f32.mrf.mxu1 }
 0x325   :  { %19735 = vst [vmem:[#allocation62_spill] sm:$0xff] %v16035_v54  ;;  %v16040_v4 = vadd.f32 %v3790_v53, %v15437_v11 }
 0x326   :  { %v16042_v26 = vpop.f32.mrf.mxu0  ;;  %v12096_v49 = vpop.f32.mrf.mxu1 }
 0x327   :  { %19736 = vst [vmem:[#allocation111_spill] sm:$0xff] %v16040_v4  ;;  %v16045_v43 = vadd.f32 %v12096_v49, %v15443_v6 }
 0x328   :  { %v16047_v8 = vpop.f32.mrf.mxu0  ;;  %v16049_v48 = vpop.f32.mrf.mxu1 }
 0x329   :  { %19737 = vst [vmem:[#allocation64_spill] sm:$0xff] %v16045_v43  ;;  %19738 = vst [vmem:[#allocation112_spill] sm:$0xff] %v16049_v48 }
 0x32a   :  { %v16051_v51 = vpop.f32.mrf.mxu0  ;;  %v12099_v37 = vpop.f32.mrf.mxu1 }
 0x32b   :  { %v16054_v30 = vadd.f32 %v12099_v37, %v15459_v21 }
 0x32c   :  { %v16056_v10 = vpop.f32.mrf.mxu0  ;;  %v3806_v11 = vpop.f32.mrf.mxu1 }
 0x32d   :  { %19739 = vst [vmem:[#allocation68_spill] sm:$0xff] %v16054_v30  ;;  %v16059_v53 = vadd.f32 %v3806_v11, %v15470_v63 }
 0x32e   :  { %v16061_v4 = vpop.f32.mrf.mxu0  ;;  %v12100_v6 = vpop.f32.mrf.mxu1 }
 0x32f   :  { %19740 = vst [vmem:[#allocation114_spill] sm:$0xff] %v16059_v53  ;;  %v16064_v49 = vadd.f32 %v12100_v6, %v15479_v16 }
 0x330   :  { %v16066_v43 = vpop.f32.mrf.mxu0  ;;  %v16068_v54 = vpop.f32.mrf.mxu1 }
 0x331   :  { %19741 = vst [vmem:[#allocation70_spill] sm:$0xff] %v16064_v49  ;;  %19742 = vst [vmem:[#allocation115_spill] sm:$0xff] %v16068_v54 }
 0x332   :  { %v3639_v48 = vpop.f32.mrf.mxu0  ;;  %v12103_v47 = vpop.f32.mrf.mxu1 }
 0x333   :  { %v16071_v21 = vadd.f32 %v3639_v48, %v15498_v40  ;;  %v16074_v37 = vadd.f32 %v12103_v47, %v15501_v34  ;;  %v19098_v47 = vlaneseq }
 0x334   :  { %v16076_v63 = vpop.f32.mrf.mxu0  ;;  %v3822_v11 = vpop.f32.mrf.mxu1 }
 0x335   :  { %19743 = vst [vmem:[#allocation72_spill] sm:$0xff] %v16074_v37  ;;  %v16079_v53 = vadd.f32 %v3822_v11, %v15513_v46 }
 0x336   :  { %v16081_v16 = vpop.f32.mrf.mxu0  ;;  %v12104_v6 = vpop.f32.mrf.mxu1 }
 0x337   :  { %19744 = vst [vmem:[#allocation116_spill] sm:$0xff] %v16079_v53  ;;  %19745 = vst [vmem:[#allocation76_spill] sm:$0xff] %v16081_v16  ;;  %v16084_v49 = vadd.f32 %v12104_v6, %v15522_v18  ;;  %v16100_v6 = vshrl.u32 %v19098_v47, 7 }
 0x338   :  { %v16086_v30 = vpop.f32.mrf.mxu0  ;;  %v16088_v54 = vpop.f32.mrf.mxu1 }
 0x339   :  { %19746 = vst [vmem:[#allocation118_spill] sm:$0xff] %v16084_v49  ;;  %19747 = vst [vmem:[#allocation78_spill] sm:$0xff] %v16088_v54 }
 0x33a   :  { %v16090_v40 = vpop.f32.mrf.mxu0  ;;  %v3984_v34 = vpop.f32.mrf.mxu1  ;;  %19751 = vst [vmem:[#allocation82_spill] sm:$0xff] %v16100_v6 }
 0x33b   :  { %19748 = vst [vmem:[#allocation119_spill] sm:$0xff] %v16090_v40  ;;  %v4232_v48 = vadd.f32 %v3984_v34, %v15544_v19  ;;  %v19752_v34 = vld [vmem:[#allocation126_spill] sm:$0xff] }
 0x33c   :  { %v16093_v37 = vpop.f32.mrf.mxu0  ;;  %v3986_v46 = vpop.f32.mrf.mxu1 }
 0x33d   :  { %19749 = vst [vmem:[#allocation81_spill] sm:$0xff] %v16093_v37  ;;  %v4304_v11 = vmax.f32 %v15971_v5, %v4232_v48  ;;  %v4233_v53 = vadd.f32 %v3986_v46, %v15556_v24  ;;  %v3841_v37 = vadd.f32 %v15988_v3, %v19752_v34 }
 0x33e   :  { %v16097_v16 = vpop.f32.mrf.mxu0  ;;  %v3988_v18 = vpop.f32.mrf.mxu1 }
 0x33f   :  { %19750 = vst [vmem:[#allocation121_spill] sm:$0xff] %v16097_v16  ;;  %v4305_v49 = vmax.f32 %v15977_v39, %v4233_v53  ;;  %v4235_v40 = vadd.f32 %v3988_v18, %v15565_v56  ;;  %v16114_v39 = vld [vmem:[%s19088_s3] sm:$0x7] }
 0x340   :  { %v16104_v54 = vpop.f32.mrf.mxu0  ;;  %v3990_v19 = vpop.f32.mrf.mxu1 }
 0x341   :  { %v4307_v5 = vmax.f32 %v15983_v52, %v4235_v40  ;;  %v4236_v24 = vadd.f32 %v3990_v19, %v15574_v15  ;;  %v19754_v19 = vld [vmem:[#allocation129_spill] sm:$0xff] }
 0x342   :  { %v3659_v46 = vpop.f32.mrf.mxu0  ;;  %v3994_v16 = vpop.f32.mrf.mxu1 }
 0x343   :  { %v4376_v47 = vmax.f32 %v4304_v11, %v4307_v5  ;;  %v4308_v56 = vmax.f32 %v3841_v37, %v4236_v24  ;;  %v16117_v53 = vadd.f32 %v3659_v46, %v15584_v1  ;;  %v4238_v3 = vadd.f32 %v3994_v16, %v15587_v13  ;;  %v19755_v1 = vld [vmem:[#allocation131_spill] sm:$0xff] }
 0x344   :  { %v16120_v18 = vpop.f32.mrf.mxu0  ;;  %v3996_v52 = vpop.f32.mrf.mxu1  ;;  %v3844_v11 = vadd.f32 %v15998_v42, %v19754_v19  ;;  %v3846_v24 = vadd.f32 %v16003_v25, %v19755_v1  ;;  %v19756_v13 = vsub.s32 0, %v16100_v6  ;;  %v19758_v19 = vld [vmem:[#allocation132_spill] sm:$0xff] }
 0x345   :  { %19753 = vst [vmem:[#allocation123_spill] sm:$0xff] %v16117_v53  ;;  %v4377_v15 = vmax.f32 %v4305_v49, %v4308_v56  ;;  %v4310_v40 = vmax.f32 %v15993_v61, %v4238_v3  ;;  %v4239_v34 = vadd.f32 %v3996_v52, %v15599_v0  ;;  %v19757_v0 = vld [vmem:[#allocation90_spill] sm:$0xff]  ;;  %v3849_v25 = vadd.f32 %v16012_v22, %v19758_v19 }
 0x346   :  { %v16126_v5 = vpop.f32.mrf.mxu0  ;;  %v3998_v48 = vpop.f32.mrf.mxu1  ;;  %v16134_v16 = vrot.slane %v16114_v39, %v19756_v13  ;;  %v3847_v56 = vadd.f32 %v16008_v2, %v19757_v0  ;;  %v19760_v13 = vsub.s32 1, %v16100_v6  ;;  %v19762_v53 = vld [vmem:[#allocation134_spill] sm:$0xff] }
 0x347   :  { %v4241_v61 = vadd.f32 %v3998_v48, %v15608_v41  ;;  %v4311_v49 = vmax.f32 %v3844_v11, %v4239_v34 }
 0x348   :  { %v16137_v46 = vpop.f32.mrf.mxu0  ;;  %v4000_v42 = vpop.f32.mrf.mxu1  ;;  %v16149_v41 = vrot.slane %v16114_v39, %v19760_v13  ;;  %v4429_v48 = vadd.f32 %v16134_v16, %v4376_v47  ;;  %v3850_v13 = vadd.f32 %v16017_v50, %v19762_v53  ;;  %v19764_v53 = vld [vmem:[#allocation137_spill] sm:$0xff] }
 0x349   :  { %v4313_v3 = vmax.f32 %v3846_v24, %v4241_v61  ;;  %v4242_v52 = vadd.f32 %v4000_v42, %v15617_v28  ;;  %v19761_v61 = vld [vmem:[#allocation16_spill] sm:$0xff] }
 0x34a   :  { %v16144_v1 = vpop.f32.mrf.mxu0  ;;  %v4004_v37 = vpop.f32.mrf.mxu1  ;;  %v3337_v22 = vadd.f32 %v15655_v57, %v19761_v61 }
 0x34b   :  { %19759 = vst [vmem:[#allocation122_spill] sm:$0xff] %v16144_v1  ;;  %v4379_v11 = vmax.f32 %v4310_v40, %v4313_v3  ;;  %v4314_v34 = vmax.f32 %v3847_v56, %v4242_v52  ;;  %v4244_v2 = vadd.f32 %v4004_v37, %v15630_v59  ;;  %v19763_v1 = vld [vmem:[#allocation135_spill] sm:$0xff]  ;;  %v4430_v37 = vadd.f32 %v16149_v41, %v4377_v15 }
 0x34c   :  { %v16153_v24 = vpop.f32.mrf.mxu0  ;;  %v4006_v28 = vpop.f32.mrf.mxu1  ;;  %v3852_v47 = vadd.f32 %v16022_v33, %v19763_v1  ;;  %v4465_v3 = vmax.f32 %v4429_v48, 0.0  ;;  %v3853_v33 = vadd.f32 %v16027_v32, %v19764_v53  ;;  %v19767_v32 = vld [vmem:[#allocation18_spill] sm:$0xff] }
 0x34d   :  { %v4432_v42 = vadd.f32 %v16134_v16, %v4379_v11  ;;  %v4380_v0 = vmax.f32 %v4311_v49, %v4314_v34  ;;  %v4316_v19 = vmax.f32 %v3849_v25, %v4244_v2  ;;  %v4245_v40 = vadd.f32 %v4006_v28, %v15642_v20 }
 0x34e   :  { %v16163_v56 = vpop.f32.mrf.mxu0  ;;  %v4008_v59 = vpop.f32.mrf.mxu1  ;;  %v4466_v28 = vmax.f32 %v4430_v37, 0.0 }
 0x34f   :  { %v4468_v52 = vmax.f32 %v4432_v42, 0.0  ;;  %v4247_v57 = vadd.f32 %v4008_v59, %v15651_v29  ;;  %v16168_v49 = vadd.f32 %v16149_v41, %v4380_v0  ;;  %v4317_v25 = vmax.f32 %v3850_v13, %v4245_v40  ;;  %v19766_v13 = vld [vmem:[#allocation33_spill] sm:$0xff] }
 0x350   :  { %v16170_v11 = vpop.f32.mrf.mxu0  ;;  %v4010_v50 = vpop.f32.mrf.mxu1  ;;  %v16183_v40 = vadd.f32 %v15653_v62, %v19766_v13  ;;  %v19778_v13 = vld [vmem:[#allocation138_spill] sm:$0xff] }
 0x351   :  { %v16174_v20 = vpack.c.bf16 %v4468_v52, %v4465_v3  ;;  %v4319_v1 = vmax.f32 %v3852_v47, %v4247_v57  ;;  %v4248_v34 = vadd.f32 %v4010_v50, %v3337_v22  ;;  %v4469_v48 = vmax.f32 %v16168_v49, 0.0  ;;  %v19768_v22 = vld [vmem:[#allocation77_spill] sm:$0xff] }
 0x352   :  { %v3679_v2 = vpop.f32.mrf.mxu0  ;;  %v4014_v15 = vpop.f32.mrf.mxu1  ;;  %v16187_v47 = vadd.f32 %v15694_v17, %v19767_v32  ;;  %v3343_v59 = vadd.f32 %v15696_v23, %v19768_v22  ;;  %v19770_v49 = vld [vmem:[#allocation105_spill] sm:$0xff]  ;;  %v3856_v23 = vadd.f32 %v16037_v31, %v15434_v55  ;;  %v3858_v50 = vadd.f32 %v16042_v26, %v15440_v12  ;;  %v19774_v31 = vld [vmem:[#allocation48_spill] sm:$0xff]  ;;  %v19777_v26 = vld [vmem:[#allocation22_spill] sm:$0xff] }
 0x353   :  { %19765 = vst [vmem:[#allocation83_spill] sm:$0xff] %v16174_v20  ;;  %v4382_v29 = vmax.f32 %v4316_v19, %v4319_v1  ;;  %v4320_v61 = vmax.f32 %v3853_v33, %v4248_v34  ;;  %v16178_v42 = vadd.f32 %v3679_v2, %v15668_v7  ;;  %v4250_v0 = vadd.f32 %v4014_v15, %v15671_v60  ;;  %v19772_v2 = vld [vmem:[#allocation40_spill] sm:$0xff]  ;;  %v19773_v15 = vld [vmem:[#allocation2_spill] sm:$0xff] }
 0x354   :  { %v3681_v3 = vpop.f32.mrf.mxu0  ;;  %v4016_v37 = vpop.f32.mrf.mxu1  ;;  %v16191_v19 = vpack.c.bf16 %v4469_v48, %v4466_v28  ;;  %v16202_v17 = vadd.f32 %v15735_v45, %v19770_v49  ;;  %v3349_v55 = vadd.f32 %v19773_v15, %v19772_v2  ;;  %v19775_v28 = vld [vmem:[#allocation49_spill] sm:$0xff]  ;;  %v3859_v32 = vadd.f32 %v16047_v8, %v19778_v13 }
 0x355   :  { %v16194_v7 = vadd.f32 %v16134_v16, %v4382_v29  ;;  %v4383_v57 = vmax.f32 %v4317_v25, %v4320_v61  ;;  %v4322_v60 = vmax.f32 %v16032_v36, %v4250_v0  ;;  %v16198_v62 = vadd.f32 %v3681_v3, %v15677_v27  ;;  %v19771_v27 = vld [vmem:[#allocation151_spill] sm:$0xff] }
 0x356   :  { %19769 = vst [vmem:[#allocation84_spill] sm:$0xff] %v16191_v19  ;;  %v4251_v53 = vadd.f32 %v4016_v37, %v15680_v58  ;;  %v3683_v33 = vpop.f32.mrf.mxu0  ;;  %v4018_v1 = vpop.f32.mrf.mxu1  ;;  %v16221_v12 = vadd.f32 %v19775_v28, %v19774_v31  ;;  %v19776_v58 = vld [vmem:[#allocation107_spill] sm:$0xff]  ;;  %v19784_v28 = vld [vmem:[#allocation104_spill] sm:$0xff] }
 0x357   :  { %v19099_v25 = vmax.f32 %v16194_v7, 0.0  ;;  %v16211_v36 = vadd.f32 %v3683_v33, %v15689_v35  ;;  %v4253_v34 = vadd.f32 %v4018_v1, %v19771_v27  ;;  %v16215_v45 = vadd.f32 %v16149_v41, %v4383_v57  ;;  %v19780_v57 = vld [vmem:[#allocation109_spill] sm:$0xff]  ;;  %v19781_v33 = vld [vmem:[#allocation58_spill] sm:$0xff]  ;;  %v19782_v1 = vld [vmem:[#allocation7_spill] sm:$0xff] }
 0x358   :  { %v16225_v29 = vadd.f32 %v19777_v26, %v19776_v58  ;;  %v4323_v61 = vmax.f32 %v3856_v23, %v4251_v53  ;;  %v16227_v0 = vpop.f32.mrf.mxu0  ;;  %v4020_v35 = vpop.f32.mrf.mxu1  ;;  %v16237_v49 = vadd.f32 %v15808_v38, %v19780_v57  ;;  %v16241_v27 = vadd.f32 %v19782_v1, %v19781_v33  ;;  %v19783_v23 = vld [vmem:[#allocation140_spill] sm:$0xff]  ;;  %v12370_v58 = vld [vmem:[%s19086_s4 + $0x164] ss:$8 sps:$4 sm:$0xff]  }
 0x359   :  { %v16233_v22 = vpack.c.bf16 %v19099_v25, %v4468_v52  ;;  %v4325_v3 = vmax.f32 %v3858_v50, %v4253_v34  ;;  %v4254_v37 = vadd.f32 %v4020_v35, %v3343_v59  ;;  %v3861_v53 = vadd.f32 %v16051_v51, %v19783_v23  ;;  %v19785_v59 = vld [vmem:[#allocation152_spill] sm:$0xff]  ;;  %v19786_v51 = vld [vmem:[#allocation66_spill] sm:$0xff]  ;;  %v19787_v26 = vld [vmem:[#allocation59_spill] sm:$0xff] }
 0x35a   :  { %v3689_v2 = vpop.f32.mrf.mxu0  ;;  %v4024_v15 = vpop.f32.mrf.mxu1  ;;  %v4472_v8 = vmax.f32 %v16215_v45, 0.0  ;;  %v12362_v38 = vld [vmem:[%s19086_s4 + $0x170] ss:$8 sps:$4 sm:$0xff]   ;;  %v16258_v35 = vadd.f32 %v19787_v26, %v19786_v51  ;;  %v4424_v57 = vsub.s32 2, %v16100_v6  ;;  %v19808_v6 = vld [vmem:[#allocation75_spill] sm:$0xff] }
 0x35b   :  { %19779 = vst [vmem:[#allocation127_spill] sm:$0xff] %v16233_v22  ;;  %v4385_v31 = vmax.f32 %v4322_v60, %v4325_v3  ;;  %v4326_v52 = vmax.f32 %v3859_v32, %v4254_v37  ;;  %v16247_v50 = vadd.f32 %v3689_v2, %v19784_v28  ;;  %v4256_v34 = vadd.f32 %v4024_v15, %v19785_v59  ;;  %v19788_v45 = vld [vmem:[#allocation113_spill] sm:$0xff]  ;;  %v19789_v60 = vld [vmem:[#allocation27_spill] sm:$0xff]  ;;  %v19792_v28 = vld [vmem:[#allocation74_spill] sm:$0xff] }
 0x35c   :  { %v16262_v13 = vadd.f32 %v19789_v60, %v19788_v45  ;;  %v3691_v32 = vpop.f32.mrf.mxu0  ;;  %v4026_v3 = vpop.f32.mrf.mxu1  ;;  %v16264_v37 = vpack.c.bf16 %v4472_v8, %v4469_v48  ;;  %v19791_v2 = vld [vmem:[#allocation153_spill] sm:$0xff]  ;;  %v16275_v59 = vadd.f32 %v15867_v9, %v19792_v28  ;;  %v19793_v51 = vld [vmem:[#allocation96_spill] sm:$0xff]  ;;  %v19794_v45 = vld [vmem:[#allocation142_spill] sm:$0xff] }
 0x35d   :  { %v16268_v33 = vadd.f32 %v16134_v16, %v4385_v31  ;;  %v4386_v1 = vmax.f32 %v4323_v61, %v4326_v52  ;;  %v4328_v23 = vmax.f32 %v3861_v53, %v4256_v34  ;;  %v16271_v15 = vadd.f32 %v3691_v32, %v19791_v2  ;;  %v19795_v60 = vld [vmem:[#allocation154_spill] sm:$0xff]  ;;  %v19796_v34 = vld [vmem:[#allocation155_spill] sm:$0xff]  ;;  %v19798_v32 = vld [vmem:[#allocation156_spill] sm:$0xff] }
 0x35e   :  { %19790 = vst [vmem:[#allocation128_spill] sm:$0xff] %v16264_v37  ;;  %v3862_v26 = vadd.f32 %v16056_v10, %v19793_v51  ;;  %v3864_v48 = vadd.f32 %v16061_v4, %v19794_v45  ;;  %v4257_v25 = vadd.f32 %v4026_v3, %v19795_v60  ;;  %5032 = vmatprep.mubr.bf16.mxu1 %v16264_v37  ;;  %v3693_v31 = vpop.f32.mrf.mxu0  ;;  %v4028_v61 = vpop.f32.mrf.mxu1  ;;  %v19799_v10 = vld [vmem:[#allocation117_spill] sm:$0xff]  ;;  %v19800_v3 = vld [vmem:[#allocation80_spill] sm:$0xff]  ;;  %v19826_v37 = vld [vmem:[#allocation3_spill] sm:$0xff] }
 0x35f   :  { %v16285_v52 = vadd.f32 %v16149_v41, %v4386_v1  ;;  %v16288_v9 = vadd.f32 %v3693_v31, %v19796_v34  ;;  %v4259_v2 = vadd.f32 %v4028_v61, %v19798_v32  ;;  %5033 = vmatmul.mubr.bf16.vlgmr.msra.gmra.mxu1 %v16233_v22  ;;  %v16294_v4 = vadd.f32 %v15869_v44, %v19799_v10  ;;  %v12368_v31 = vld [vmem:[%s19086_s4 + $0x160] ss:$8 sps:$4 sm:$0xff]   ;;  %v19801_v61 = vld [vmem:[#allocation141_spill] sm:$0xff]  ;;  %v19807_v53 = vld [vmem:[#allocation124_spill] sm:$0xff] }
 0x360   :  { %v16298_v28 = vadd.f32 %v15904_v14, %v19800_v3  ;;  %v4329_v51 = vmax.f32 %v3862_v26, %v4257_v25  ;;  %v16300_v45 = vpop.f32.mrf.mxu0  ;;  %v4030_v1 = vpop.f32.mrf.mxu1  ;;  %v16303_v60 = vrot.slane %v16114_v39, %v4424_v57  ;;  %5484 = vmatpush1.bf16.msra.mxu1 %v12362_v38  ;;  %v3865_v44 = vadd.f32 %v16066_v43, %v19801_v61  ;;  %v12373_v25 = vld [vmem:[%s19086_s4 + $0x154] ss:$8 sps:$4 sm:$0xff]   ;;  %v19803_v39 = vld [vmem:[#allocation14_spill] sm:$0xff] }
 0x361   :  { %19797 = vst [vmem:[#allocation88_spill] sm:$0xff] %v16288_v9  ;;  %v4331_v32 = vmax.f32 %v3864_v48, %v4259_v2  ;;  %v4260_v14 = vadd.f32 %v4030_v1, %v3349_v55  ;;  %5485 = vmatprep.subr.bf16.mxu1 %v12370_v58  ;;  %v19802_v26 = vld [vmem:[#allocation120_spill] sm:$0xff]  ;;  %v19804_v38 = vld [vmem:[#allocation125_spill] sm:$0xff]  ;;  %v16324_v43 = vadd.f32 %v19808_v6, %v19807_v53  ;;  %v19810_v55 = vmax.f32 %v16194_v7, 0.0  ;;  %v12379_v53 = vld [vmem:[%s19086_s4 + $0x144] ss:$8 sps:$4 sm:$0xff]  }
 0x362   :  { %v16316_v57 = vadd.f32 %v19803_v39, %v19802_v26  ;;  %v19805_v10 = vld [vmem:[#allocation17_spill] sm:$0xff]  ;;  %v3699_v61 = vpop.f32.mrf.mxu0  ;;  %v4034_v48 = vpop.f32.mrf.mxu1  ;;  %v19811_v58 = vmax.f32 %v16268_v33, 0.0  ;;  %v19815_v22 = vld [vmem:[#allocation20_spill] sm:$0xff]  ;;  %v19854_v9 = vld [vmem:[#allocation51_spill] sm:$0xff] }
 0x363   :  { %v16320_v3 = vadd.f32 %v19805_v10, %v19804_v38  ;;  %19809 = vst [vmem:[#allocation130_spill] sm:$0xff] %v16324_v43  ;;  %v4388_v1 = vmax.f32 %v4328_v23, %v4331_v32  ;;  %v4332_v34 = vmax.f32 %v3865_v44, %v4260_v14  ;;  %v19813_v26 = vld [vmem:[#allocation45_spill] sm:$0xff]  ;;  %v4262_v38 = vadd.f32 %v4034_v48, %v19815_v22  ;;  %v19817_v10 = vld [vmem:[#allocation39_spill] sm:$0xff]  ;;  %v19823_v14 = vld [vmem:[#allocation44_spill] sm:$0xff] }
 0x364   :  { %v16330_v2 = vpack.c.bf16 %v19811_v58, %v19810_v55  ;;  %v16333_v39 = vadd.f32 %v3699_v61, %v19813_v26  ;;  %v12371_v6 = vld [vmem:[%s19086_s4 + $0x150] ss:$8 sps:$4 sm:$0xff]   ;;  %v19819_v55 = vld [vmem:[#allocation86_spill] sm:$0xff]  ;;  %v19822_v32 = vld [vmem:[#allocation87_spill] sm:$0xff]  ;;  %v3701_v22 = vpop.f32.mrf.mxu0  ;;  %v4036_v48 = vpop.f32.mrf.mxu1  ;;  %5486 = vmatpush1.bf16.msra.mxu1 %v12368_v31  ;;  %v19824_v58 = vmax.f32 %v16285_v52, 0.0 }
 0x365   :  { %19806 = vst [vmem:[#allocation89_spill] sm:$0xff] %v16320_v3  ;;  %v19816_v7 = vld [vmem:[#allocation85_spill] sm:$0xff]  ;;  %v16352_v61 = vadd.f32 %v19823_v14, %v19822_v32  ;;  %5487 = vmatprep.subr.bf16.mxu1 %v12373_v25  ;;  %v19829_v32 = vld [vmem:[#allocation52_spill] sm:$0xff]  ;;  %v19864_v3 = vld [vmem:[#allocation6_spill] sm:$0xff] }
 0x366   :  { %19812 = vst [vmem:[#allocation91_spill] sm:$0xff] %v16330_v2  ;;  %19814 = vst [vmem:[#allocation92_spill] sm:$0xff] %v16333_v39  ;;  %v16344_v20 = vadd.f32 %v19817_v10, %v19816_v7  ;;  %v19820_v23 = vld [vmem:[#allocation41_spill] sm:$0xff]  ;;  %v16356_v26 = vpack.c.bf16 %v19824_v58, %v4472_v8  ;;  %v16359_v2 = vadd.f32 %v16134_v16, %v4388_v1  ;;  %v19830_v19 = vld [vmem:[#allocation144_spill] sm:$0xff] }
 0x367   :  { %v16348_v44 = vadd.f32 %v19820_v23, %v19819_v55  ;;  %v4389_v7 = vmax.f32 %v4329_v51, %v4332_v34  ;;  %v4334_v10 = vmax.f32 %v16071_v21, %v4262_v38  ;;  %v16363_v55 = vadd.f32 %v3701_v22, %v19826_v37  ;;  %v19828_v23 = vld [vmem:[#allocation133_spill] sm:$0xff]  ;;  %v19832_v8 = vld [vmem:[#allocation76_spill] sm:$0xff]  ;;  %v4038_v51 = vpop.f32.mrf.mxu1 }
 0x368   :  { %19818 = vst [vmem:[#allocation93_spill] sm:$0xff] %v16344_v20  ;;  %19825 = vst [vmem:[#allocation139_spill] sm:$0xff] %v16356_v26  ;;  %v16367_v14 = vadd.f32 %v19829_v32, %v19828_v23  ;;  %v3868_v31 = vadd.f32 %v16076_v63, %v19830_v19  ;;  %v19833_v26 = vld [vmem:[#allocation47_spill] sm:$0xff]  ;;  %v3703_v20 = vpop.f32.mrf.mxu0  ;;  %v4477_v21 = vmax.f32 %v16359_v2, 0.0  ;;  %v19834_v34 = vld [vmem:[#allocation21_spill] sm:$0xff]  ;;  %5488 = vmatpush1.bf16.msra.mxu1 %v12371_v6 }
 0x369   :  { %19821 = vst [vmem:[#allocation94_spill] sm:$0xff] %v16348_v44  ;;  %19827 = vst [vmem:[#allocation126_spill] sm:$0xff] %v16363_v55  ;;  %v19831_v44 = vld [vmem:[#allocation143_spill] sm:$0xff]  ;;  %v4263_v1 = vadd.f32 %v4036_v48, %v19833_v26  ;;  %v16376_v37 = vadd.f32 %v16149_v41, %v4389_v7  ;;  %v16379_v25 = vadd.f32 %v3703_v20, %v19834_v34  ;;  %v19836_v38 = vld [vmem:[#allocation4_spill] sm:$0xff]  ;;  %v4040_v39 = vpop.f32.mrf.mxu1  ;;  %5489 = vmatprep.subr.bf16.mxu1 %v12379_v53 }
 0x36a   :  { %v3870_v58 = vadd.f32 %v19832_v8, %v19831_v44  ;;  %v4265_v22 = vadd.f32 %v4038_v51, %v19836_v38  ;;  %v19837_v23 = vld [vmem:[#allocation136_spill] sm:$0xff]  ;;  %v19839_v19 = vld [vmem:[#allocation95_spill] sm:$0xff]  ;;  %v19841_v48 = vld [vmem:[#allocation97_spill] sm:$0xff]  ;;  %v16394_v7 = vpop.f32.mrf.mxu0 }
 0x36b   :  { %19835 = vst [vmem:[#allocation129_spill] sm:$0xff] %v16379_v25  ;;  %v19838_v32 = vld [vmem:[#allocation60_spill] sm:$0xff]  ;;  %v19842_v26 = vld [vmem:[#allocation115_spill] sm:$0xff]  ;;  %v4335_v2 = vmax.f32 %v3868_v31, %v4263_v1  ;;  %v19844_v51 = vld [vmem:[#allocation98_spill] sm:$0xff]  ;;  %v4478_v38 = vmax.f32 %v16376_v37, 0.0  ;;  %v4044_v37 = vpop.f32.mrf.mxu1 }
 0x36c   :  { %v16384_v63 = vadd.f32 %v19838_v32, %v19837_v23  ;;  %v19840_v44 = vld [vmem:[#allocation112_spill] sm:$0xff]  ;;  %v16392_v55 = vadd.f32 %v19842_v26, %v19841_v48  ;;  %v12377_v20 = vld [vmem:[%s19086_s4 + $0x140] ss:$8 sps:$4 sm:$0xff]   ;;  %v3871_v34 = vadd.f32 %v16086_v30, %v19844_v51  ;;  %v4337_v23 = vmax.f32 %v3870_v58, %v4265_v22  ;;  %v12111_v58 = vpop.f32.mrf.mxu0  ;;  %v19853_v51 = vld [vmem:[#allocation5_spill] sm:$0xff] }
 0x36d   :  { %v16388_v8 = vadd.f32 %v19840_v44, %v19839_v19  ;;  %v4266_v32 = vadd.f32 %v4040_v39, %v16225_v29  ;;  %v12385_v31 = vld [vmem:[%s19086_s4 + $0x134] ss:$8 sps:$4 sm:$0xff]   ;;  %v19845_v1 = vld [vmem:[#allocation146_spill] sm:$0xff]  ;;  %v19849_v48 = vld [vmem:[#allocation119_spill] sm:$0xff]  ;;  %v19852_v29 = vmax.f32 %v16268_v33, 0.0  ;;  %v4268_v43 = vadd.f32 %v4044_v37, %v19853_v51  ;;  %5490 = vmatpush1.bf16.msra.mxu1 %v12377_v20 }
 0x36e   :  { %19843 = vst [vmem:[#allocation131_spill] sm:$0xff] %v16392_v55  ;;  %v19846_v19 = vld [vmem:[#allocation78_spill] sm:$0xff]  ;;  %v19848_v44 = vld [vmem:[#allocation145_spill] sm:$0xff]  ;;  %v19850_v25 = vld [vmem:[#allocation99_spill] sm:$0xff]  ;;  %v4391_v53 = vmax.f32 %v4334_v10, %v4337_v23  ;;  %v4046_v23 = vpop.f32.mrf.mxu1  ;;  %5491 = vmatprep.subr.bf16.mxu1 %v12385_v31 }
 0x36f   :  { %v16408_v6 = vadd.f32 %v19846_v19, %v19845_v1  ;;  %v3873_v26 = vadd.f32 %v19849_v48, %v19848_v44  ;;  %v19851_v55 = vld [vmem:[#allocation81_spill] sm:$0xff]  ;;  %v16418_v39 = vpack.c.bf16 %v4477_v21, %v19852_v29  ;;  %v4338_v22 = vmax.f32 %v3871_v34, %v4266_v32  ;;  %v19857_v33 = vld [vmem:[#allocation148_spill] sm:$0xff]  ;;  %v19858_v10 = vld [vmem:[#allocation147_spill] sm:$0xff] }
 0x370   :  { %v16414_v30 = vadd.f32 %v19851_v55, %v19850_v25  ;;  %v4240_v1 = vadd.f32 %v12111_v58, %v19854_v9  ;;  %v12383_v19 = vld [vmem:[%s19086_s4 + $0x130] ss:$8 sps:$4 sm:$0xff]   ;;  %v12391_v55 = vld [vmem:[%s19086_s4 + $0x124] ss:$8 sps:$4 sm:$0xff]   ;;  %v3877_v29 = vadd.f32 %v16104_v54, %v19857_v33  ;;  %v16434_v34 = vadd.f32 %v16120_v18, %v19858_v10  ;;  %v4137_v9 = vpop.f32.mrf.mxu0 }
 0x371   :  { %19847 = vst [vmem:[#allocation90_spill] sm:$0xff] %v16408_v6  ;;  %v19855_v25 = vld [vmem:[#allocation100_spill] sm:$0xff]  ;;  %v19856_v44 = vld [vmem:[#allocation121_spill] sm:$0xff]  ;;  %v19859_v32 = vmax.f32 %v16285_v52, 0.0  ;;  %v16441_v58 = vadd.f32 %v16134_v16, %v4391_v53  ;;  %v4392_v51 = vmax.f32 %v4335_v2, %v4338_v22  ;;  %v4340_v6 = vmax.f32 %v3873_v26, %v4268_v43  ;;  %v19862_v18 = vld [vmem:[#allocation150_spill] sm:$0xff]  ;;  %v4048_v53 = vpop.f32.mrf.mxu1  ;;  %5492 = vmatpush1.bf16.msra.mxu1 %v12383_v19 }
 0x372   :  { %v3876_v48 = vadd.f32 %v19856_v44, %v19855_v25  ;;  %v19860_v25 = vld [vmem:[#allocation42_spill] sm:$0xff]  ;;  %v19861_v54 = vld [vmem:[#allocation101_spill] sm:$0xff]  ;;  %v16450_v10 = vadd.f32 %v16137_v46, %v19862_v18  ;;  %v19863_v52 = vld [vmem:[#allocation23_spill] sm:$0xff]  ;;  %v4234_v20 = vadd.f32 %v4137_v9, %v19864_v3  ;;  %v12112_v2 = vpop.f32.mrf.mxu0  ;;  %5493 = vmatprep.subr.bf16.mxu1 %v12391_v55 }
 0x373   :  { %v16438_v37 = vpack.c.bf16 %v4478_v38, %v19859_v32  ;;  %v4312_v44 = vmax.f32 %v19860_v25, %v4240_v1  ;;  %v16446_v33 = vadd.f32 %v16126_v5, %v19861_v54  ;;  %v4269_v32 = vadd.f32 %v4046_v23, %v19863_v52  ;;  %v19865_v26 = vld [vmem:[#allocation53_spill] sm:$0xff]  ;;  %v19866_v22 = vld [vmem:[#allocation24_spill] sm:$0xff]  ;;  %v19868_v25 = vld [vmem:[#allocation122_spill] sm:$0xff] }
 0x374   :  { %v16457_v31 = vadd.f32 %v16149_v41, %v4392_v51  ;;  %v4271_v5 = vadd.f32 %v4048_v53, %v19865_v26  ;;  %v4243_v1 = vadd.f32 %v12112_v2, %v19866_v22  ;;  %v19867_v46 = vld [vmem:[#allocation149_spill] sm:$0xff]  ;;  %v19869_v3 = vld [vmem:[#allocation102_spill] sm:$0xff]  ;;  %v19870_v18 = vld [vmem:[#allocation43_spill] sm:$0xff]  ;;  %v4050_v51 = vpop.f32.mrf.mxu1  ;;  %v4140_v43 = vpop.f32.mrf.mxu0  ;;  %v19871_v2 = vmax.f32 %v16441_v58, 0.0 }
 0x375   :  { %5042 = vmatprep.mubr.bf16.mxu1 %v16438_v37  ;;  %v16464_v23 = vadd.f32 %v19868_v25, %v19867_v46  ;;  %v16468_v9 = vadd.f32 %v16153_v24, %v19869_v3  ;;  %v4341_v54 = vmax.f32 %v16414_v30, %v4269_v32  ;;  %v4306_v52 = vmax.f32 %v19870_v18, %v4234_v20  ;;  %v12389_v53 = vld [vmem:[%s19086_s4 + $0x120] ss:$8 sps:$4 sm:$0xff]   ;;  %v12397_v30 = vld [vmem:[%s19086_s4 + $0x114] ss:$8 sps:$4 sm:$0xff]  }
 0x376   :  { %5043 = vmatmul.mubr.bf16.gmra.mxu1 %v16418_v39  ;;  %v16477_v26 = vpack.c.bf16 %v19871_v2, %v4477_v21  ;;  %v4481_v22 = vmax.f32 %v16457_v31, 0.0  ;;  %v4343_v46 = vmax.f32 %v3876_v48, %v4271_v5  ;;  %v19872_v24 = vld [vmem:[#allocation106_spill] sm:$0xff]  ;;  %v19873_v32 = vld [vmem:[#allocation103_spill] sm:$0xff]  ;;  %v16490_v20 = vadd.f32 %v16170_v11, %v16183_v40  ;;  %v4054_v48 = vpop.f32.mrf.mxu1  ;;  %v12115_v5 = vpop.f32.mrf.mxu0 }
 0x377   :  { %v4315_v25 = vmax.f32 %v19872_v24, %v4243_v1  ;;  %v16486_v19 = vadd.f32 %v16163_v56, %v19873_v32  ;;  %v4272_v21 = vadd.f32 %v4050_v51, %v16237_v49  ;;  %v4237_v3 = vadd.f32 %v4140_v43, %v16241_v27  ;;  %v19874_v2 = vld [vmem:[#allocation55_spill] sm:$0xff]  ;;  %v12395_v56 = vld [vmem:[%s19086_s4 + $0x110] ss:$8 sps:$4 sm:$0xff]   ;;  %5494 = vmatpush1.bf16.msra.mxu1 %v12389_v53 }
 0x378   :  { %v16496_v55 = vpack.c.bf16 %v4481_v22, %v4478_v38  ;;  %v4394_v1 = vmax.f32 %v4340_v6, %v4343_v46  ;;  %v4274_v24 = vadd.f32 %v4054_v48, %v19874_v2  ;;  %v12403_v11 = vld [vmem:[%s19086_s4 + $0x104] ss:$8 sps:$4 sm:$0xff]   ;;  %v16507_v40 = vadd.f32 %v16227_v0, %v16187_v47  ;;  %v19875_v38 = vld [vmem:[#allocation25_spill] sm:$0xff]  ;;  %v4153_v43 = vpop.f32.mrf.mxu0  ;;  %v19877_v48 = vld [vmem:[#allocation8_spill] sm:$0xff]  ;;  %5495 = vmatprep.subr.bf16.mxu1 %v12397_v30 }
 0x379   :  { %v4381_v18 = vmax.f32 %v4312_v44, %v4315_v25  ;;  %v4344_v49 = vmax.f32 %v3877_v29, %v4272_v21  ;;  %v4309_v27 = vmax.f32 %v16352_v61, %v4237_v3  ;;  %v4252_v6 = vadd.f32 %v12115_v5, %v19875_v38  ;;  %v4056_v44 = vpop.f32.mrf.mxu1  ;;  %v19876_v25 = vld [vmem:[#allocation123_spill] sm:$0xff]  ;;  %v19878_v29 = vld [vmem:[#allocation46_spill] sm:$0xff]  ;;  %v19879_v21 = vld [vmem:[#allocation57_spill] sm:$0xff] }
 0x37a   :  { %v16512_v51 = vadd.f32 %v16134_v16, %v4394_v1  ;;  %v4346_v32 = vmax.f32 %v19876_v25, %v4274_v24  ;;  %v4275_v2 = vadd.f32 %v4056_v44, %v19877_v48  ;;  %v4246_v3 = vadd.f32 %v4153_v43, %v19879_v21  ;;  %v12116_v38 = vpop.f32.mrf.mxu0  ;;  %v19880_v24 = vld [vmem:[#allocation26_spill] sm:$0xff]  ;;  %v19884_v21 = vld [vmem:[#allocation108_spill] sm:$0xff] }
 0x37b   :  { %v16515_v46 = vadd.f32 %v16303_v60, %v4381_v18  ;;  %v4395_v47 = vmax.f32 %v4341_v54, %v4344_v49  ;;  %v4378_v0 = vmax.f32 %v4306_v52, %v4309_v27  ;;  %v4324_v61 = vmax.f32 %v19878_v29, %v4252_v6  ;;  %v4058_v5 = vpop.f32.mrf.mxu1  ;;  %v19881_v52 = vld [vmem:[#allocation50_spill] sm:$0xff]  ;;  %v19882_v27 = vld [vmem:[#allocation9_spill] sm:$0xff]  ;;  %5496 = vmatpush1.bf16.msra.mxu1 %v12395_v56 }
 0x37c   :  { %v16523_v53 = vadd.f32 %v16300_v45, %v16202_v17  ;;  %v4483_v1 = vmax.f32 %v16512_v51, 0.0  ;;  %v4347_v18 = vmax.f32 %v16434_v34, %v4275_v2  ;;  %v4277_v25 = vadd.f32 %v4058_v5, %v19880_v24  ;;  %v4156_v43 = vpop.f32.mrf.mxu0  ;;  %v12401_v17 = vld [vmem:[%s19086_s4 + $0x100] ss:$8 sps:$4 sm:$0xff]   ;;  %5497 = vmatprep.subr.bf16.mxu1 %v12403_v11 }
 0x37d   :  { %v16529_v30 = vadd.f32 %v16149_v41, %v4395_v47  ;;  %v4431_v54 = vadd.f32 %v16303_v60, %v4378_v0  ;;  %v4318_v49 = vmax.f32 %v19881_v52, %v4246_v3  ;;  %v4255_v6 = vadd.f32 %v12116_v38, %v19882_v27  ;;  %v4060_v44 = vpop.f32.mrf.mxu1  ;;  %v12409_v47 = vld [vmem:[%s19087_s5 + $0x1f4] ss:$8 sps:$4 sm:$0xff]   ;;  %v19885_v38 = vld [vmem:[#allocation10_spill] sm:$0xff] }
 0x37e   :  { %v4349_v45 = vmax.f32 %v16446_v33, %v4277_v25  ;;  %v4278_v34 = vadd.f32 %v4060_v44, %v16258_v35  ;;  %v4249_v51 = vadd.f32 %v4156_v43, %v16262_v13  ;;  %v19883_v48 = vmax.f32 %v16441_v58, 0.0  ;;  %v12119_v35 = vpop.f32.mrf.mxu0  ;;  %v19886_v52 = vld [vmem:[#allocation61_spill] sm:$0xff] }
 0x37f   :  { %v4470_v56 = vmax.f32 %v16515_v46, 0.0  ;;  %v4484_v0 = vmax.f32 %v16529_v30, 0.0  ;;  %v4467_v29 = vmax.f32 %v4431_v54, 0.0  ;;  %v4327_v33 = vmax.f32 %v19884_v21, %v4255_v6  ;;  %v4064_v3 = vpop.f32.mrf.mxu1  ;;  %5498 = vmatpush1.bf16.msra.mxu1 %v12401_v17 }
 0x380   :  { %v16542_v2 = vpack.c.bf16 %v4483_v1, %v19883_v48  ;;  %v4397_v5 = vmax.f32 %v4346_v32, %v4349_v45  ;;  %v4350_v13 = vmax.f32 %v16450_v10, %v4278_v34  ;;  %v4321_v58 = vmax.f32 %v16367_v14, %v4249_v51  ;;  %v4169_v44 = vpop.f32.mrf.mxu0  ;;  %5845 = vmatprep.subr.bf16.mxu1 %v12409_v47  ;;  %v19888_v45 = vld [vmem:[#allocation28_spill] sm:$0xff]  ;;  %v19889_v51 = vld [vmem:[#allocation11_spill] sm:$0xff] }
 0x381   :  { %v4280_v11 = vadd.f32 %v4064_v3, %v19885_v38  ;;  %v16553_v24 = vpack.c.bf16 %v4470_v56, %v4467_v29  ;;  %v4387_v25 = vmax.f32 %v4324_v61, %v4327_v33  ;;  %v4264_v27 = vadd.f32 %v12119_v35, %v19886_v52  ;;  %v4066_v46 = vpop.f32.mrf.mxu1  ;;  %v19887_v61 = vld [vmem:[#allocation54_spill] sm:$0xff]  ;;  %v19891_v33 = vld [vmem:[#allocation56_spill] sm:$0xff]  ;;  %v19892_v35 = vld [vmem:[#allocation29_spill] sm:$0xff] }
 0x382   :  { %v16558_v30 = vpack.c.bf16 %v4484_v0, %v4481_v22  ;;  %v16561_v32 = vadd.f32 %v16134_v16, %v4397_v5  ;;  %v4398_v10 = vmax.f32 %v4347_v18, %v4350_v13  ;;  %v4384_v54 = vmax.f32 %v4318_v49, %v4321_v58  ;;  %v12120_v17 = vpop.f32.mrf.mxu0  ;;  %v19890_v49 = vld [vmem:[#allocation63_spill] sm:$0xff] }
 0x383   :  { %v4352_v14 = vmax.f32 %v16464_v23, %v4280_v11  ;;  %v16565_v6 = vadd.f32 %v16303_v60, %v4387_v25  ;;  %v4336_v43 = vmax.f32 %v19887_v61, %v4264_v27  ;;  %v4281_v34 = vadd.f32 %v4066_v46, %v19888_v45  ;;  %v4068_v22 = vpop.f32.mrf.mxu1  ;;  %v19894_v61 = vld [vmem:[#allocation12_spill] sm:$0xff] }
 0x384   :  { %v4258_v31 = vadd.f32 %v4169_v44, %v19889_v51  ;;  %5052 = vmatprep.mubr.bf16.mxu1 %v16558_v30  ;;  %v4486_v48 = vmax.f32 %v16561_v32, 0.0  ;;  %v16573_v18 = vadd.f32 %v16149_v41, %v4398_v10  ;;  %v16576_v23 = vadd.f32 %v16303_v60, %v4384_v54  ;;  %v4172_v58 = vpop.f32.mrf.mxu0 }
 0x385   :  { %v4283_v47 = vadd.f32 %v4068_v22, %v19890_v49  ;;  %5053 = vmatmul.mubr.bf16.gmra.mxu1 %v16542_v2  ;;  %v16582_v29 = vadd.f32 %v16394_v7, %v16221_v12  ;;  %v4353_v21 = vmax.f32 %v16468_v9, %v4281_v34  ;;  %v4267_v5 = vadd.f32 %v12120_v17, %v19892_v35  ;;  %v4070_v13 = vpop.f32.mrf.mxu1  ;;  %v12380_v12 = vld [vmem:[%s19086_s4 + $0x70] ss:$8 sps:$4 sm:$0xff]   ;;  %v19893_v9 = vld [vmem:[#allocation110_spill] sm:$0xff] }
 0x386   :  { %v4330_v3 = vmax.f32 %v19891_v33, %v4258_v31  ;;  %v16587_v38 = vpack.c.bf16 %v4486_v48, %v4483_v1  ;;  %v4487_v11 = vmax.f32 %v16573_v18, 0.0  ;;  %v4473_v25 = vmax.f32 %v16576_v23, 0.0  ;;  %v12123_v32 = vpop.f32.mrf.mxu0  ;;  %v12388_v34 = vld [vmem:[%s19086_s4 + $0x64] ss:$8 sps:$4 sm:$0xff]   ;;  %v19895_v31 = vld [vmem:[#allocation65_spill] sm:$0xff] }
 0x387   :  { %v4355_v52 = vmax.f32 %v16486_v19, %v4283_v47  ;;  %v4476_v7 = vmax.f32 %v16565_v6, 0.0  ;;  %v4339_v27 = vmax.f32 %v19893_v9, %v4267_v5  ;;  %v4284_v46 = vadd.f32 %v4070_v13, %v16275_v59  ;;  %v4074_v1 = vpop.f32.mrf.mxu1  ;;  %v19897_v47 = vld [vmem:[#allocation13_spill] sm:$0xff] }
 0x388   :  { %v4261_v44 = vadd.f32 %v4172_v58, %v16294_v4  ;;  %v16601_v10 = vpack.c.bf16 %v4487_v11, %v4484_v0  ;;  %v16603_v54 = vpack.c.bf16 %v4473_v25, %v4470_v56  ;;  %v4286_v45 = vadd.f32 %v4074_v1, %v19894_v61  ;;  %v4185_v23 = vpop.f32.mrf.mxu0  ;;  %v19900_v1 = vld [vmem:[#allocation67_spill] sm:$0xff]  ;;  %v12406_v6 = vld [vmem:[%s19086_s4 + $0x34] ss:$8 sps:$4 sm:$0xff]  }
 0x389   :  { %v4400_v19 = vmax.f32 %v4352_v14, %v4355_v52  ;;  %v4393_v51 = vmax.f32 %v4336_v43, %v4339_v27  ;;  %v4356_v59 = vmax.f32 %v16490_v20, %v4284_v46  ;;  %v4276_v22 = vadd.f32 %v12123_v32, %v19895_v31  ;;  %v4076_v17 = vpop.f32.mrf.mxu1  ;;  %v19896_v14 = vld [vmem:[#allocation30_spill] sm:$0xff]  ;;  %v19899_v46 = vld [vmem:[#allocation111_spill] sm:$0xff] }
 0x38a   :  { %v4333_v4 = vmax.f32 %v16384_v63, %v4261_v44  ;;  %v4358_v56 = vmax.f32 %v16178_v42, %v4286_v45  ;;  %v4287_v49 = vadd.f32 %v4076_v17, %v19896_v14  ;;  %v4270_v33 = vadd.f32 %v4185_v23, %v19897_v47  ;;  %5106 = vmatmul.mubr.bf16.vlgmr.msra.gmra.mxu0 %v16603_v54  ;;  %v12386_v20 = vld [vmem:[%s19086_s4 + $0x60] ss:$8 sps:$4 sm:$0xff]   ;;  %v12394_v63 = vld [vmem:[%s19086_s4 + $0x54] ss:$8 sps:$4 sm:$0xff]   ;;  %v12124_v52 = vpop.f32.mrf.mxu0 }
 0x38b   :  { %v16613_v0 = vadd.f32 %v16134_v16, %v4400_v19  ;;  %v16626_v43 = vadd.f32 %v16303_v60, %v4393_v51  ;;  %v4401_v35 = vmax.f32 %v4353_v21, %v4356_v59  ;;  %v19898_v42 = vld [vmem:[#allocation62_spill] sm:$0xff]  ;;  %5411 = vmatpush1.bf16.msra.mxu0 %v12380_v12  ;;  %v4078_v58 = vpop.f32.mrf.mxu1  ;;  %v19901_v19 = vmov 0   ;;  %v19902_v12 = vld [vmem:[#allocation31_spill] sm:$0xff]  ;;  %v19903_v23 = vld [vmem:[#allocation64_spill] sm:$0xff] }
 0x38c   :  { %v4390_v5 = vmax.f32 %v4330_v3, %v4333_v4  ;;  %v4348_v13 = vmax.f32 %v19898_v42, %v4276_v22  ;;  %v4359_v27 = vmax.f32 %v16198_v62, %v4287_v49  ;;  %v4342_v44 = vmax.f32 %v19899_v46, %v4270_v33  ;;  %5412 = vmatprep.subr.bf16.mxu0 %v12388_v34  ;;  %v4188_v59 = vpop.f32.mrf.mxu0  ;;  %v19905_v42 = vld [vmem:[#allocation32_spill] sm:$0xff] }
 0x38d   :  { %v4489_v9 = vmax.f32 %v16613_v0, 0.0  ;;  %v4289_v32 = vadd.f32 %v4078_v58, %v19900_v1  ;;  %5115 = vmatprep.mubr.bf16.mxu0 %v19901_v19  ;;  %v4482_v61 = vmax.f32 %v16626_v43, 0.0  ;;  %v16636_v21 = vadd.f32 %v16149_v41, %v4401_v35  ;;  %v4080_v51 = vpop.f32.mrf.mxu1  ;;  %v19904_v35 = vld [vmem:[#allocation69_spill] sm:$0xff] }
 0x38e   :  { %v4443_v3 = vadd.f32 %v16303_v60, %v4390_v5  ;;  %v4279_v45 = vadd.f32 %v12124_v52, %v19902_v12  ;;  %v4290_v4 = vadd.f32 %v4080_v51, %v16298_v28  ;;  %v4273_v31 = vadd.f32 %v4188_v59, %v16316_v57  ;;  %v12127_v47 = vpop.f32.mrf.mxu0  ;;  %v12392_v5 = vld [vmem:[%s19086_s4 + $0x50] ss:$8 sps:$4 sm:$0xff]   ;;  %v19908_v59 = vld [vmem:[#allocation71_spill] sm:$0xff] }
 0x38f   :  { %v4361_v62 = vmax.f32 %v16211_v36, %v4289_v32  ;;  %v16645_v34 = vpack.c.bf16 %v4489_v9, %v4486_v48  ;;  %v4490_v22 = vmax.f32 %v16636_v21, 0.0  ;;  %5413 = vmatpush1.bf16.msra.mxu0 %v12386_v20  ;;  %v4084_v49 = vpop.f32.mrf.mxu1  ;;  %v16651_v33 = vpack.c.bf16 %v4476_v7, %v4473_v25  ;;  %v12400_v20 = vld [vmem:[%s19086_s4 + $0x44] ss:$8 sps:$4 sm:$0xff]  }
 0x390   :  { %v4479_v17 = vmax.f32 %v4443_v3, 0.0  ;;  %v4351_v14 = vmax.f32 %v19903_v23, %v4279_v45  ;;  %v4362_v28 = vmax.f32 %v16507_v40, %v4290_v4  ;;  %v4345_v57 = vmax.f32 %v16388_v8, %v4273_v31  ;;  %5414 = vmatprep.subr.bf16.mxu0 %v12394_v63  ;;  %v4201_v8 = vpop.f32.mrf.mxu0  ;;  %v19907_v45 = vld [vmem:[#allocation15_spill] sm:$0xff] }
 0x391   :  { %v4403_v36 = vmax.f32 %v4358_v56, %v4361_v62  ;;  %v4292_v48 = vadd.f32 %v4084_v49, %v19904_v35  ;;  %v4288_v40 = vadd.f32 %v12127_v47, %v19905_v42  ;;  %v4086_v58 = vpop.f32.mrf.mxu1  ;;  %v16671_v52 = vpack.c.bf16 %v4490_v22, %v4487_v11  ;;  %v12398_v31 = vld [vmem:[%s19086_s4 + $0x40] ss:$8 sps:$4 sm:$0xff]   ;;  %v19910_v47 = vld [vmem:[#allocation73_spill] sm:$0xff]  ;;  %v19913_v42 = vld [vmem:[#allocation88_spill] sm:$0xff] }
 0x392   :  { %v16664_v25 = vpack.c.bf16 %v4482_v61, %v4479_v17  ;;  %v4399_v56 = vmax.f32 %v4348_v13, %v4351_v14  ;;  %v4404_v46 = vmax.f32 %v4359_v27, %v4362_v28  ;;  %v4396_v1 = vmax.f32 %v4342_v44, %v4345_v57  ;;  %v19906_v13 = vld [vmem:[#allocation68_spill] sm:$0xff]  ;;  %v12128_v62 = vpop.f32.mrf.mxu0  ;;  %v19909_v14 = vld [vmem:[#allocation114_spill] sm:$0xff] }
 0x393   :  { %v16674_v63 = vadd.f32 %v16134_v16, %v4403_v36  ;;  %v4364_v32 = vmax.f32 %v16247_v50, %v4292_v48  ;;  %v4360_v12 = vmax.f32 %v19906_v13, %v4288_v40  ;;  %v4293_v51 = vadd.f32 %v4086_v58, %v19907_v45  ;;  %5062 = vmatprep.mubr.bf16.mxu1 %v16671_v52  ;;  %v4088_v11 = vpop.f32.mrf.mxu1  ;;  %v19911_v35 = vld [vmem:[#allocation34_spill] sm:$0xff]  ;;  %v19912_v48 = vld [vmem:[#allocation89_spill] sm:$0xff] }
 0x394   :  { %v16678_v3 = vadd.f32 %v16303_v60, %v4399_v56  ;;  %v4282_v18 = vadd.f32 %v4201_v8, %v19908_v59  ;;  %v16686_v27 = vadd.f32 %v16149_v41, %v4404_v46  ;;  %v4449_v50 = vadd.f32 %v16303_v60, %v4396_v1  ;;  %5415 = vmatpush1.bf16.msra.mxu0 %v12392_v5  ;;  %v4204_v57 = vpop.f32.mrf.mxu0  ;;  %v19915_v45 = vld [vmem:[#allocation70_spill] sm:$0xff] }
 0x395   :  { %v4492_v4 = vmax.f32 %v16674_v63, 0.0  ;;  %v16691_v44 = vpack.c.bf16 %v4479_v17, %v4476_v7  ;;  %5063 = vmatmul.mubr.bf16.gmra.mxu1 %v16645_v34  ;;  %v4365_v23 = vmax.f32 %v16271_v15, %v4293_v51  ;;  %v4295_v36 = vadd.f32 %v4088_v11, %v19910_v47  ;;  %v4090_v28 = vpop.f32.mrf.mxu1  ;;  %5416 = vmatprep.subr.bf16.mxu0 %v12400_v20  ;;  %v19914_v20 = vld [vmem:[#allocation130_spill] sm:$0xff] }
 0x396   :  { %v4354_v49 = vmax.f32 %v19909_v14, %v4282_v18  ;;  %5515 = vmatprep.mubr.bf16.mxu1 %v19901_v19  ;;  %v4488_v7 = vmax.f32 %v16678_v3, 0.0  ;;  %v4485_v17 = vmax.f32 %v4449_v50, 0.0  ;;  %v4291_v15 = vadd.f32 %v12128_v62, %v19911_v35  ;;  %v12131_v46 = vpop.f32.mrf.mxu0  ;;  %v19916_v18 = vld [vmem:[#allocation35_spill] sm:$0xff]  ;;  %v12404_v62 = vld [vmem:[%s19086_s4 + $0x30] ss:$8 sps:$4 sm:$0xff]  }
 0x397   :  { %5116 = vmatmul.mubr.bf16.gmra.mxu0 %v16691_v44  ;;  %v4296_v5 = vadd.f32 %v4090_v28, %v19912_v48  ;;  %v4493_v56 = vmax.f32 %v16686_v27, 0.0  ;;  %v4367_v40 = vmax.f32 %v19913_v42, %v4295_v36  ;;  %v4285_v58 = vadd.f32 %v4204_v57, %v19914_v20  ;;  %v4094_v8 = vpop.f32.mrf.mxu1  ;;  %v19917_v50 = vld [vmem:[#allocation131_spill] sm:$0xff]  ;;  %v12407_v42 = vld [vmem:[%s19087_s5 + $0x1f0] ss:$8 sps:$4 sm:$0xff]  }
 0x398   :  { %5125 = vmatprep.mubr.bf16.mxu0 %v19901_v19  ;;  %v16716_v1 = vpack.c.bf16 %v4492_v4, %v4489_v9  ;;  %v16720_v13 = vpack.c.bf16 %v4488_v7, %v4485_v17  ;;  %v4363_v51 = vmax.f32 %v19915_v45, %v4291_v15  ;;  %5417 = vmatpush1.bf16.msra.mxu0 %v12398_v31  ;;  %v19918_v9 = vld [vmem:[#allocation36_spill] sm:$0xff]  ;;  %v4217_v28 = vpop.f32.mrf.mxu0  ;;  %v12424_v63 = vld [vmem:[%s19086_s4 + $0x4] ss:$8 sps:$4 sm:$0xff]   ;;  %v12425_v27 = vld [vmem:[%s19087_s5 + $0x1c0] ss:$8 sps:$4 sm:$0xff]  }
 0x399   :  { %v4368_v59 = vmax.f32 %v16523_v53, %v4296_v5  ;;  %v4298_v11 = vadd.f32 %v4094_v8, %v19916_v18  ;;  %v4406_v0 = vmax.f32 %v4364_v32, %v4367_v40  ;;  %v4357_v14 = vmax.f32 %v19917_v50, %v4285_v58  ;;  %v4096_v36 = vpop.f32.mrf.mxu1  ;;  %5418 = vmatprep.subr.bf16.mxu0 %v12406_v6  ;;  %v12412_v53 = vld [vmem:[%s19086_s4 + $0x24] ss:$8 sps:$4 sm:$0xff]   ;;  %v19919_v15 = vld [vmem:[#allocation92_spill] sm:$0xff] }
 0x39a   :  { %v4300_v47 = vadd.f32 %v12131_v46, %v19918_v9  ;;  %v16732_v57 = vpack.c.bf16 %v4485_v17, %v4482_v61  ;;  %v4405_v31 = vmax.f32 %v4360_v12, %v4363_v51  ;;  %v19920_v32 = vld [vmem:[#allocation19_spill] sm:$0xff]  ;;  %v19921_v61 = vld [vmem:[#allocation72_spill] sm:$0xff]  ;;  %v12132_v8 = vpop.f32.mrf.mxu0  ;;  %v19923_v46 = vld [vmem:[#allocation126_spill] sm:$0xff] }
 0x39b   :  { %v4407_v35 = vmax.f32 %v4365_v23, %v4368_v59  ;;  %v4370_v48 = vmax.f32 %v19919_v15, %v4298_v11  ;;  %v4299_v5 = vadd.f32 %v4096_v36, %v19920_v32  ;;  %v16743_v6 = vadd.f32 %v16134_v16, %v4406_v0  ;;  %v19922_v40 = vld [vmem:[#allocation79_spill] sm:$0xff]  ;;  %v4098_v58 = vpop.f32.mrf.mxu1  ;;  %v19924_v51 = vld [vmem:[#allocation37_spill] sm:$0xff]  ;;  %v19925_v18 = vld [vmem:[#allocation38_spill] sm:$0xff] }
 0x39c   :  { %v4402_v43 = vmax.f32 %v4354_v49, %v4357_v14  ;;  %v4372_v17 = vmax.f32 %v19921_v61, %v4300_v47  ;;  %v4294_v20 = vadd.f32 %v4217_v28, %v19922_v40  ;;  %v12415_v12 = vld [vmem:[%s19087_s5 + $0x1e4] ss:$8 sps:$4 sm:$0xff]   ;;  %v16751_v23 = vadd.f32 %v16303_v60, %v4405_v31  ;;  %5419 = vmatpush1.bf16.msra.mxu0 %v12404_v62  ;;  %v12410_v11 = vld [vmem:[%s19086_s4 + $0x20] ss:$8 sps:$4 sm:$0xff]   ;;  %v19926_v14 = vld [vmem:[#allocation116_spill] sm:$0xff]  ;;  %v4220_v36 = vpop.f32.mrf.mxu0 }
 0x39d   :  { %v4371_v45 = vmax.f32 %v19923_v46, %v4299_v5  ;;  %v4301_v59 = vadd.f32 %v4098_v58, %v19924_v51  ;;  %v4303_v49 = vadd.f32 %v12132_v8, %v19925_v18  ;;  %v4495_v0 = vmax.f32 %v16743_v6, 0.0  ;;  %5516 = vmatmul.mubr.bf16.vlgmr.msra.gmra.mxu1 %v16553_v24  ;;  %v4100_v47 = vpop.f32.mrf.mxu1  ;;  %5420 = vmatprep.subr.bf16.mxu0 %v12412_v53  ;;  %v12418_v62 = vld [vmem:[%s19086_s4 + $0x14] ss:$8 sps:$4 sm:$0xff]   ;;  %v19928_v5 = vld [vmem:[#allocation118_spill] sm:$0xff] }
 0x39e   :  { %v4455_v50 = vadd.f32 %v16303_v60, %v4402_v43  ;;  %v4366_v9 = vmax.f32 %v19926_v14, %v4294_v20  ;;  %v16770_v28 = vpack.c.bf16 %v4493_v56, %v4490_v22  ;;  %v4494_v31 = vmax.f32 %v16751_v23, 0.0  ;;  %v19927_v15 = vld [vmem:[#allocation129_spill] sm:$0xff]  ;;  %5846 = vmatpush1.bf16.msra.mxu1 %v12407_v42  ;;  %v12413_v61 = vld [vmem:[%s19087_s5 + $0x1e0] ss:$8 sps:$4 sm:$0xff]   ;;  %5525 = vmatprep.mubr.bf16.mxu1 %v19901_v19 }
 0x39f   :  { %5126 = vmatmul.mubr.bf16.gmra.mxu0 %v16732_v57  ;;  %v4373_v32 = vmax.f32 %v19927_v15, %v4301_v59  ;;  %v4375_v6 = vmax.f32 %v19928_v5, %v4303_v49  ;;  %v19929_v53 = vld [vmem:[#allocation93_spill] sm:$0xff]  ;;  %v19930_v40 = vld [vmem:[#allocation94_spill] sm:$0xff]  ;;  %5847 = vmatprep.subr.bf16.mxu1 %v12415_v12  ;;  %v4460_v58 = vadd.f32 %v16149_v41, %v4407_v35 }
 0x3a0   :  { %v4302_v43 = vadd.f32 %v4100_v47, %v19929_v53  ;;  %v4491_v21 = vmax.f32 %v4455_v50, 0.0  ;;  %v4297_v20 = vadd.f32 %v4220_v36, %v19930_v40  ;;  %5135 = vmatprep.mubr.bf16.mxu0 %v19901_v19  ;;  %v12421_v22 = vld [vmem:[%s19087_s5 + $0x1d4] ss:$8 sps:$4 sm:$0xff]   ;;  %v16788_v42 = vpack.c.bf16 %v4495_v0, %v4492_v4  ;;  %5421 = vmatpush1.bf16.msra.mxu0 %v12410_v11  ;;  %v12416_v12 = vld [vmem:[%s19086_s4 + $0x10] ss:$8 sps:$4 sm:$0xff]   ;;  %v19931_v51 = vld [vmem:[#allocation90_spill] sm:$0xff] }
 0x3a1   :  { %v4409_v8 = vmax.f32 %v4370_v48, %v4373_v32  ;;  %v4411_v23 = vmax.f32 %v4372_v17, %v4375_v6  ;;  %5422 = vmatprep.subr.bf16.mxu0 %v12418_v62  ;;  %v12419_v49 = vld [vmem:[%s19087_s5 + $0x1d0] ss:$8 sps:$4 sm:$0xff]   ;;  %v12433_v62 = vld [vmem:[%s19087_s5 + $0x1b4] ss:$8 sps:$4 sm:$0xff]  }
 0x3a2   :  { %v4374_v46 = vmax.f32 %v16582_v29, %v4302_v43  ;;  %v4369_v59 = vmax.f32 %v19931_v51, %v4297_v20  ;;  %v16798_v35 = vpack.c.bf16 %v4491_v21, %v4488_v7  ;;  %v16803_v4 = vpack.c.bf16 %v4494_v31, %v4491_v21  ;;  %5848 = vmatpush1.bf16.msra.mxu1 %v12413_v61  ;;  %v12427_v7 = vld [vmem:[%s19087_s5 + $0x1c4] ss:$8 sps:$4 sm:$0xff]   ;;  %v12428_v15 = vld [vmem:[%s19086_s4 + $0xf0] ss:$8 sps:$4 sm:$0xff]   ;;  %v12434_v61 = vld [vmem:[%s19086_s4 + $0xe0] ss:$8 sps:$4 sm:$0xff]  }
 0x3a3   :  { %v4496_v29 = vmax.f32 %v4460_v58, 0.0  ;;  %v4462_v48 = vadd.f32 %v16134_v16, %v4409_v8  ;;  %v4464_v17 = vadd.f32 %v16303_v60, %v4411_v23  ;;  %5849 = vmatprep.subr.bf16.mxu1 %v12421_v22  ;;  %v12422_v16 = vld [vmem:[%s19086_s4] ss:$8 sps:$4 sm:$0xff]   ;;  %v12431_v53 = vld [vmem:[%s19087_s5 + $0x1b0] ss:$8 sps:$4 sm:$0xff]  }
 0x3a4   :  { %v4410_v18 = vmax.f32 %v4371_v45, %v4374_v46  ;;  %v4408_v3 = vmax.f32 %v4366_v9, %v4369_v59  ;;  %5423 = vmatpush1.bf16.msra.mxu0 %v12416_v12  ;;  %v12430_v9 = vld [vmem:[%s19086_s4 + $0xf4] ss:$8 sps:$4 sm:$0xff]   ;;  %v12439_v43 = vld [vmem:[%s19087_s5 + $0x1a4] ss:$8 sps:$4 sm:$0xff]   ;;  %v12437_v21 = vld [vmem:[%s19087_s5 + $0x1a0] ss:$8 sps:$4 sm:$0xff]  }
 0x3a5   :  { %v16815_v11 = vpack.c.bf16 %v4496_v29, %v4493_v56  ;;  %v4498_v50 = vmax.f32 %v4462_v48, 0.0  ;;  %5526 = vmatmul.mubr.bf16.gmra.mxu1 %v16651_v33  ;;  %5424 = vmatprep.subr.bf16.mxu0 %v12424_v63  ;;  %v12445_v40 = vld [vmem:[%s19087_s5 + $0x194] ss:$8 sps:$4 sm:$0xff]   ;;  %v12440_v20 = vld [vmem:[%s19086_s4 + $0xd0] ss:$8 sps:$4 sm:$0xff]  }
 0x3a6   :  { %v4463_v45 = vadd.f32 %v16149_v41, %v4410_v18  ;;  %v4461_v14 = vadd.f32 %v16303_v60, %v4408_v3  ;;  %5850 = vmatpush1.bf16.msra.mxu1 %v12419_v49  ;;  %v4500_v41 = vmax.f32 %v4464_v17, 0.0  ;;  %v19932_v60 = vld [vmem:[#allocation84_spill] sm:$0xff]  ;;  %5535 = vmatprep.mubr.bf16.mxu1 %v19901_v19  ;;  %v12448_v22 = vld [vmem:[%s19086_s4 + $0xc4] ss:$8 sps:$4 sm:$0xff]   ;;  %v12446_v23 = vld [vmem:[%s19086_s4 + $0xc0] ss:$8 sps:$4 sm:$0xff]  }
 0x3a7   :  { %5136 = vmatmul.mubr.bf16.gmra.mxu0 %v16798_v35  ;;  %v16830_v47 = vpack.c.bf16 %v4498_v50, %v4495_v0  ;;  %5851 = vmatprep.subr.bf16.mxu1 %v12427_v7  ;;  %v12436_v0 = vld [vmem:[%s19086_s4 + $0xe4] ss:$8 sps:$4 sm:$0xff]   ;;  %v12443_v58 = vld [vmem:[%s19087_s5 + $0x190] ss:$8 sps:$4 sm:$0xff]   ;;  %v12454_v46 = vld [vmem:[%s19086_s4 + $0xb4] ss:$8 sps:$4 sm:$0xff]  }
 0x3a8   :  { %v4499_v56 = vmax.f32 %v4463_v45, 0.0  ;;  %v4497_v36 = vmax.f32 %v4461_v14, 0.0  ;;  %5442 = vmatprep.mubr.bf16.mxu0 %v19932_v60  ;;  %5425 = vmatpush1.bf16.msra.mxu0 %v12422_v16  ;;  %v12451_v8 = vld [vmem:[%s19087_s5 + $0x184] ss:$8 sps:$4 sm:$0xff]   ;;  %v19933_v12 = vld [vmem:[#allocation128_spill] sm:$0xff] }
 0x3a9   :  { %5426 = vmatprep.subr.bf16.mxu0 %v12430_v9  ;;  %v12449_v51 = vld [vmem:[%s19087_s5 + $0x180] ss:$8 sps:$4 sm:$0xff]   ;;  %v12457_v59 = vld [vmem:[%s19087_s5 + $0x274] ss:$8 sps:$4 sm:$0xff]   ;;  %v12452_v63 = vld [vmem:[%s19086_s4 + $0xb0] ss:$8 sps:$4 sm:$0xff]  }
 0x3aa   :  { %v16840_v32 = vpack.c.bf16 %v4499_v56, %v4496_v29  ;;  %v16845_v5 = vpack.c.bf16 %v4497_v36, %v4494_v31  ;;  %v16847_v6 = vpack.c.bf16 %v4500_v41, %v4497_v36  ;;  %5852 = vmatpush1.bf16.msra.mxu1 %v12425_v27  ;;  %v12442_v31 = vld [vmem:[%s19086_s4 + $0xd4] ss:$8 sps:$4 sm:$0xff]   ;;  %v12460_v29 = vld [vmem:[%s19086_s4 + $0xa4] ss:$8 sps:$4 sm:$0xff]   ;;  %v12455_v48 = vld [vmem:[%s19087_s5 + $0x270] ss:$8 sps:$4 sm:$0xff]  }
 0x3ab   :  { %5853 = vmatprep.subr.bf16.mxu1 %v12433_v62  ;;  %v12463_v17 = vld [vmem:[%s19087_s5 + $0x264] ss:$8 sps:$4 sm:$0xff]   ;;  %v12458_v18 = vld [vmem:[%s19086_s4 + $0xa0] ss:$8 sps:$4 sm:$0xff]   ;;  %v12466_v49 = vld [vmem:[%s19086_s4 + $0x94] ss:$8 sps:$4 sm:$0xff]  }
 0x3ac   :  { %5427 = vmatpush2.bf16.msra.mxu0 %v12428_v15  ;;  %v12461_v3 = vld [vmem:[%s19087_s5 + $0x260] ss:$8 sps:$4 sm:$0xff]   ;;  %v12469_v7 = vld [vmem:[%s19087_s5 + $0x254] ss:$8 sps:$4 sm:$0xff]   ;;  %v12464_v50 = vld [vmem:[%s19086_s4 + $0x90] ss:$8 sps:$4 sm:$0xff]  }
 0x3ad   :  { %5536 = vmatmul.mubr.bf16.gmra.mxu1 %v16664_v25  ;;  %5428 = vmatprep.subr.bf16.mxu0 %v12436_v0  ;;  %v12472_v16 = vld [vmem:[%s19086_s4 + $0x84] ss:$8 sps:$4 sm:$0xff]   ;;  %v12467_v45 = vld [vmem:[%s19087_s5 + $0x250] ss:$8 sps:$4 sm:$0xff]   ;;  %v12470_v9 = vld [vmem:[%s19086_s4 + $0x80] ss:$8 sps:$4 sm:$0xff]  }
 0x3ae   :  { %5854 = vmatpush1.bf16.msra.mxu1 %v12431_v53  ;;  %5545 = vmatprep.mubr.bf16.mxu1 %v19901_v19  ;;  %v12475_v14 = vld [vmem:[%s19087_s5 + $0x244] ss:$8 sps:$4 sm:$0xff]   ;;  %v12478_v27 = vld [vmem:[%s19087_s5 + $0x2f4] ss:$8 sps:$4 sm:$0xff]   ;;  %v12473_v56 = vld [vmem:[%s19087_s5 + $0x240] ss:$8 sps:$4 sm:$0xff]  }
 0x3af   :  { %5855 = vmatprep.subr.bf16.mxu1 %v12439_v43  ;;  %v12481_v41 = vld [vmem:[%s19087_s5 + $0x234] ss:$8 sps:$4 sm:$0xff]   ;;  %v12476_v36 = vld [vmem:[%s19087_s5 + $0x2f0] ss:$8 sps:$4 sm:$0xff]   ;;  %v12484_v62 = vld [vmem:[%s19087_s5 + $0x2e4] ss:$8 sps:$4 sm:$0xff]  }
 0x3b0   :  { %5429 = vmatpush2.bf16.msra.mxu0 %v12434_v61  ;;  %v12479_v15 = vld [vmem:[%s19087_s5 + $0x230] ss:$8 sps:$4 sm:$0xff]   ;;  %v19934_v0 = vld [vmem:[#allocation83_spill] sm:$0xff] }
 0x3b1   :  { %5430 = vmatprep.subr.bf16.mxu0 %v12442_v31  ;;  %v12487_v53 = vld [vmem:[%s19087_s5 + $0x224] ss:$8 sps:$4 sm:$0xff]   ;;  %v12482_v61 = vld [vmem:[%s19087_s5 + $0x2e0] ss:$8 sps:$4 sm:$0xff]   ;;  %v12490_v31 = vld [vmem:[%s19087_s5 + $0x2d4] ss:$8 sps:$4 sm:$0xff]  }
 0x3b2   :  { %5856 = vmatpush1.bf16.msra.mxu1 %v12437_v21  ;;  %v19935_v43 = vld [vmem:[#allocation139_spill] sm:$0xff] }
 0x3b3   :  { %5857 = vmatprep.subr.bf16.mxu1 %v12445_v40  ;;  %v12485_v21 = vld [vmem:[%s19087_s5 + $0x220] ss:$8 sps:$4 sm:$0xff]   ;;  %v12493_v40 = vld [vmem:[%s19087_s5 + $0x214] ss:$8 sps:$4 sm:$0xff]  }
 0x3b4   :  { %5431 = vmatpush2.bf16.msra.mxu0 %v12440_v20  ;;  %v12488_v20 = vld [vmem:[%s19087_s5 + $0x2d0] ss:$8 sps:$4 sm:$0xff]  }
 0x3b5   :  { %5546 = vmatmul.mubr.bf16.gmra.mxu1 %v16720_v13  ;;  %5432 = vmatprep.subr.bf16.mxu0 %v12448_v22  ;;  %v12496_v22 = vld [vmem:[%s19087_s5 + $0x2c4] ss:$8 sps:$4 sm:$0xff]  }
 0x3b6   :  { %5858 = vmatpush1.bf16.msra.mxu1 %v12443_v58  ;;  %5877 = vmatprep.mubr.bf16.mxu1 %v19933_v12  ;;  %v12491_v58 = vld [vmem:[%s19087_s5 + $0x210] ss:$8 sps:$4 sm:$0xff]   ;;  %v12502_v12 = vld [vmem:[%s19087_s5 + $0x2b4] ss:$8 sps:$4 sm:$0xff]  }
 0x3b7   :  { %5859 = vmatprep.subr.bf16.mxu1 %v12451_v8  ;;  %v19936_v8 = vld [vmem:[#allocation91_spill] sm:$0xff] }
 0x3b8   :  { %5433 = vmatpush2.bf16.msra.mxu0 %v12446_v23  ;;  %v12499_v23 = vld [vmem:[%s19087_s5 + $0x204] ss:$8 sps:$4 sm:$0xff]  }
 0x3b9   :  { %5434 = vmatprep.subr.bf16.mxu0 %v12454_v46  ;;  %v12494_v46 = vld [vmem:[%s19087_s5 + $0x2c0] ss:$8 sps:$4 sm:$0xff]  }
 0x3ba   :  { %5860 = vmatpush1.bf16.msra.mxu1 %v12449_v51  ;;  %v12497_v51 = vld [vmem:[%s19087_s5 + $0x200] ss:$8 sps:$4 sm:$0xff]  }
 0x3bb   :  { %5861 = vmatprep.subr.bf16.mxu1 %v12457_v59  ;;  %v12505_v59 = vld [vmem:[%s19087_s5 + $0x174] ss:$8 sps:$4 sm:$0xff]  }
 0x3bc   :  { %5435 = vmatpush2.bf16.msra.mxu0 %v12452_v63  ;;  %v12500_v63 = vld [vmem:[%s19087_s5 + $0x2b0] ss:$8 sps:$4 sm:$0xff]  }
 0x3bd   :  { %5436 = vmatprep.subr.bf16.mxu0 %v12460_v29  ;;  %v12508_v29 = vld [vmem:[%s19087_s5 + $0x2a4] ss:$8 sps:$4 sm:$0xff]  }
 0x3be   :  { %5862 = vmatpush2.bf16.msra.mxu1 %v12455_v48  ;;  %v12503_v48 = vld [vmem:[%s19087_s5 + $0x170] ss:$8 sps:$4 sm:$0xff]  }
 0x3bf   :  { %5863 = vmatprep.subr.bf16.mxu1 %v12463_v17  ;;  %v12511_v17 = vld [vmem:[%s19087_s5 + $0x164] ss:$8 sps:$4 sm:$0xff]  }
 0x3c0   :  { %5437 = vmatpush2.bf16.msra.mxu0 %v12458_v18  ;;  %v12506_v18 = vld [vmem:[%s19087_s5 + $0x2a0] ss:$8 sps:$4 sm:$0xff]  }
 0x3c1   :  { %5438 = vmatprep.subr.bf16.mxu0 %v12466_v49  ;;  %v19937_v49 = vld [vmem:[#allocation127_spill] sm:$0xff] }
 0x3c2   :  { %5864 = vmatpush2.bf16.msra.mxu1 %v12461_v3  ;;  %v12514_v3 = vld [vmem:[%s19087_s5 + $0x294] ss:$8 sps:$4 sm:$0xff]  }
 0x3c3   :  { %5865 = vmatprep.subr.bf16.mxu1 %v12469_v7  ;;  %v12509_v7 = vld [vmem:[%s19087_s5 + $0x160] ss:$8 sps:$4 sm:$0xff]  }
 0x3c4   :  { %5439 = vmatpush2.bf16.msra.mxu0 %v12464_v50  ;;  %v12517_v50 = vld [vmem:[%s19087_s5 + $0x154] ss:$8 sps:$4 sm:$0xff]  }
 0x3c5   :  { %5440 = vmatprep.subr.bf16.mxu0 %v12472_v16  ;;  %v12512_v16 = vld [vmem:[%s19087_s5 + $0x290] ss:$8 sps:$4 sm:$0xff]  }
 0x3c6   :  { %5866 = vmatpush2.bf16.msra.mxu1 %v12467_v45  ;;  %v12520_v45 = vld [vmem:[%s19087_s5 + $0x284] ss:$8 sps:$4 sm:$0xff]  }
 0x3c7   :  { %5867 = vmatprep.subr.bf16.mxu1 %v12475_v14  ;;  %v12515_v14 = vld [vmem:[%s19087_s5 + $0x150] ss:$8 sps:$4 sm:$0xff]  }
 0x3c8   :  { %5441 = vmatpush2.bf16.msra.mxu0 %v12470_v9  ;;  %v12523_v9 = vld [vmem:[%s19087_s5 + $0x144] ss:$8 sps:$4 sm:$0xff]  }
 0x3c9   :  { %5918 = vmatprep.subr.bf16.mxu0 %v12478_v27  ;;  %v12518_v27 = vld [vmem:[%s19087_s5 + $0x280] ss:$8 sps:$4 sm:$0xff]  }
 0x3ca   :  { %5868 = vmatpush2.bf16.msra.mxu1 %v12473_v56  ;;  %v12526_v56 = vld [vmem:[%s19087_s5 + $0x74] ss:$8 sps:$4 sm:$0xff]  }
 0x3cb   :  { %5443 = vmatmul.mubr.bf16.vlgmr.msra.gmra.mxu0 %v19934_v0  ;;  %5869 = vmatprep.subr.bf16.mxu1 %v12481_v41  ;;  %v12521_v41 = vld [vmem:[%s19087_s5 + $0x140] ss:$8 sps:$4 sm:$0xff]  }
 0x3cc   :  { %5452 = vmatprep.mubr.bf16.mxu0 %v19935_v43  ;;  %5919 = vmatpush1.bf16.msra.mxu0 %v12476_v36  ;;  %v12529_v36 = vld [vmem:[%s19087_s5 + $0x134] ss:$8 sps:$4 sm:$0xff]  }
 0x3cd   :  { %5920 = vmatprep.subr.bf16.mxu0 %v12484_v62  ;;  %v12524_v62 = vld [vmem:[%s19087_s5 + $0x70] ss:$8 sps:$4 sm:$0xff]  }
 0x3ce   :  { %5870 = vmatpush2.bf16.msra.mxu1 %v12479_v15  ;;  %v12532_v15 = vld [vmem:[%s19087_s5 + $0x64] ss:$8 sps:$4 sm:$0xff]  }
 0x3cf   :  { %5871 = vmatprep.subr.bf16.mxu1 %v12487_v53  ;;  %v12527_v53 = vld [vmem:[%s19087_s5 + $0x130] ss:$8 sps:$4 sm:$0xff]  }
 0x3d0   :  { %5921 = vmatpush1.bf16.msra.mxu0 %v12482_v61  ;;  %v12535_v61 = vld [vmem:[%s19087_s5 + $0x124] ss:$8 sps:$4 sm:$0xff]  }
 0x3d1   :  { %5922 = vmatprep.subr.bf16.mxu0 %v12490_v31  ;;  %v12530_v31 = vld [vmem:[%s19087_s5 + $0x60] ss:$8 sps:$4 sm:$0xff]  }
 0x3d2   :  { %5872 = vmatpush2.bf16.msra.mxu1 %v12485_v21  ;;  %v12538_v21 = vld [vmem:[%s19087_s5 + $0x54] ss:$8 sps:$4 sm:$0xff]  }
 0x3d3   :  { %5453 = vmatmul.mubr.bf16.gmra.mxu0 %v19936_v8  ;;  %5873 = vmatprep.subr.bf16.mxu1 %v12493_v40  ;;  %v12541_v40 = vld [vmem:[%s19087_s5 + $0x114] ss:$8 sps:$4 sm:$0xff]  }
 0x3d4   :  { %5462 = vmatprep.mubr.bf16.mxu0 %v16496_v55  ;;  %5923 = vmatpush1.bf16.msra.mxu0 %v12488_v20  ;;  %v12536_v20 = vld [vmem:[%s19087_s5 + $0x50] ss:$8 sps:$4 sm:$0xff]  }
 0x3d5   :  { %5924 = vmatprep.subr.bf16.mxu0 %v12496_v22  ;;  %v12544_v22 = vld [vmem:[%s19087_s5 + $0x44] ss:$8 sps:$4 sm:$0xff]  }
 0x3d6   :  { %5874 = vmatpush2.bf16.msra.mxu1 %v12491_v58  ;;  %v12539_v58 = vld [vmem:[%s19087_s5 + $0x110] ss:$8 sps:$4 sm:$0xff]  }
 0x3d7   :  { %5875 = vmatprep.subr.bf16.mxu1 %v12499_v23  ;;  %v12547_v23 = vld [vmem:[%s19087_s5 + $0x104] ss:$8 sps:$4 sm:$0xff]  }
 0x3d8   :  { %5925 = vmatpush1.bf16.msra.mxu0 %v12494_v46  ;;  %v12542_v46 = vld [vmem:[%s19087_s5 + $0x40] ss:$8 sps:$4 sm:$0xff]  }
 0x3d9   :  { %5926 = vmatprep.subr.bf16.mxu0 %v12502_v12  ;;  %v12550_v12 = vld [vmem:[%s19087_s5 + $0x34] ss:$8 sps:$4 sm:$0xff]  }
 0x3da   :  { %5876 = vmatpush2.bf16.msra.mxu1 %v12497_v51  ;;  %v12545_v51 = vld [vmem:[%s19087_s5 + $0x100] ss:$8 sps:$4 sm:$0xff]  }
 0x3db   :  { %5463 = vmatmul.mubr.bf16.gmra.mxu0 %v16477_v26  ;;  %6304 = vmatprep.subr.bf16.mxu1 %v12505_v59  ;;  %v12553_v59 = vld [vmem:[%s19086_s4 + $0x374] ss:$8 sps:$4 sm:$0xff]  }
 0x3dc   :  { %5472 = vmatprep.mubr.bf16.mxu0 %v16601_v10  ;;  %5927 = vmatpush1.bf16.msra.mxu0 %v12500_v63  ;;  %v12548_v63 = vld [vmem:[%s19087_s5 + $0x30] ss:$8 sps:$4 sm:$0xff]  }
 0x3dd   :  { %5878 = vmatmul.mubr.bf16.vlgmr.msra.gmra.mxu1 %v19937_v49  ;;  %5928 = vmatprep.subr.bf16.mxu0 %v12508_v29  ;;  %v12556_v29 = vld [vmem:[%s19087_s5 + $0x24] ss:$8 sps:$4 sm:$0xff]   ;;  %v12562_v49 = vld [vmem:[%s19087_s5 + $0x14] ss:$8 sps:$4 sm:$0xff]  }
 0x3de   :  { %5887 = vmatprep.mubr.bf16.mxu1 %v16438_v37  ;;  %6305 = vmatpush1.bf16.msra.mxu1 %v12503_v48  ;;  %v12551_v48 = vld [vmem:[%s19086_s4 + $0x370] ss:$8 sps:$4 sm:$0xff]  }
 0x3df   :  { %6306 = vmatprep.subr.bf16.mxu1 %v12511_v17  ;;  %v12559_v17 = vld [vmem:[%s19086_s4 + $0x364] ss:$8 sps:$4 sm:$0xff]  }
 0x3e0   :  { %5929 = vmatpush1.bf16.msra.mxu0 %v12506_v18  ;;  %v12554_v18 = vld [vmem:[%s19087_s5 + $0x20] ss:$8 sps:$4 sm:$0xff]  }
 0x3e1   :  { %5930 = vmatprep.subr.bf16.mxu0 %v12514_v3  ;;  %v12557_v3 = vld [vmem:[%s19086_s4 + $0x360] ss:$8 sps:$4 sm:$0xff]  }
 0x3e2   :  { %6307 = vmatpush1.bf16.msra.mxu1 %v12509_v7  ;;  %v12565_v7 = vld [vmem:[%s19086_s4 + $0x354] ss:$8 sps:$4 sm:$0xff]  }
 0x3e3   :  { %5473 = vmatmul.mubr.bf16.gmra.mxu0 %v16587_v38  ;;  %6308 = vmatprep.subr.bf16.mxu1 %v12517_v50  ;;  %v12568_v50 = vld [vmem:[%s19087_s5 + $0x4] ss:$8 sps:$4 sm:$0xff]  }
 0x3e4   :  { %5931 = vmatpush1.bf16.msra.mxu0 %v12512_v16  ;;  %5950 = vmatprep.mubr.bf16.mxu0 %v19901_v19  ;;  %v12563_v16 = vld [vmem:[%s19086_s4 + $0x350] ss:$8 sps:$4 sm:$0xff]  }
 0x3e5   :  { %5888 = vmatmul.mubr.bf16.gmra.mxu1 %v16418_v39  ;;  %5932 = vmatprep.subr.bf16.mxu0 %v12520_v45  ;;  %v12571_v45 = vld [vmem:[%s19086_s4 + $0x344] ss:$8 sps:$4 sm:$0xff]  }
 0x3e6   :  { %5897 = vmatprep.mubr.bf16.mxu1 %v16558_v30  ;;  %6309 = vmatpush1.bf16.msra.mxu1 %v12515_v14  ;;  %v12566_v14 = vld [vmem:[%s19087_s5] ss:$8 sps:$4 sm:$0xff]  }
 0x3e7   :  { %6310 = vmatprep.subr.bf16.mxu1 %v12523_v9  ;;  %v12574_v9 = vld [vmem:[%s19087_s5 + $0xf4] ss:$8 sps:$4 sm:$0xff]  }
 0x3e8   :  { %5933 = vmatpush1.bf16.msra.mxu0 %v12518_v27  ;;  %v12569_v27 = vld [vmem:[%s19086_s4 + $0x340] ss:$8 sps:$4 sm:$0xff]  }
 0x3e9   :  { %6231 = vmatprep.subr.bf16.mxu0 %v12526_v56  ;;  %v12572_v56 = vld [vmem:[%s19087_s5 + $0xf0] ss:$8 sps:$4 sm:$0xff]  }
 0x3ea   :  { %6311 = vmatpush1.bf16.msra.mxu1 %v12521_v41  ;;  %v12580_v41 = vld [vmem:[%s19087_s5 + $0xe4] ss:$8 sps:$4 sm:$0xff]  }
 0x3eb   :  { %5951 = vmatmul.mubr.bf16.vlgmr.msra.gmra.mxu0 %v16603_v54  ;;  %6312 = vmatprep.subr.bf16.mxu1 %v12529_v36  ;;  %v12533_v54 = vld [vmem:[%s19087_s5 + $0x120] ss:$8 sps:$4 sm:$0xff]   ;;  %v12575_v36 = vld [vmem:[%s19086_s4 + $0x330] ss:$8 sps:$4 sm:$0xff]  }
 0x3ec   :  { %6232 = vmatpush1.bf16.msra.mxu0 %v12524_v62  ;;  %5960 = vmatprep.mubr.bf16.mxu0 %v19901_v19  ;;  %v12583_v62 = vld [vmem:[%s19086_s4 + $0x324] ss:$8 sps:$4 sm:$0xff]  }
 0x3ed   :  { %5898 = vmatmul.mubr.bf16.gmra.mxu1 %v16542_v2  ;;  %6233 = vmatprep.subr.bf16.mxu0 %v12532_v15  ;;  %v12578_v15 = vld [vmem:[%s19087_s5 + $0xe0] ss:$8 sps:$4 sm:$0xff]  }
 0x3ee   :  { %5907 = vmatprep.mubr.bf16.mxu1 %v16671_v52  ;;  %6313 = vmatpush1.bf16.msra.mxu1 %v12527_v53  ;;  %v12586_v53 = vld [vmem:[%s19087_s5 + $0xd4] ss:$8 sps:$4 sm:$0xff]  }
 0x3ef   :  { %6314 = vmatprep.subr.bf16.mxu1 %v12535_v61  ;;  %v12581_v61 = vld [vmem:[%s19086_s4 + $0x320] ss:$8 sps:$4 sm:$0xff]  }
 0x3f0   :  { %6234 = vmatpush1.bf16.msra.mxu0 %v12530_v31  ;;  %v12589_v31 = vld [vmem:[%s19086_s4 + $0x314] ss:$8 sps:$4 sm:$0xff]  }
 0x3f1   :  { %6235 = vmatprep.subr.bf16.mxu0 %v12538_v21  ;;  %v12584_v21 = vld [vmem:[%s19087_s5 + $0xd0] ss:$8 sps:$4 sm:$0xff]  }
 0x3f2   :  { %6315 = vmatpush1.bf16.msra.mxu1 %v12533_v54  ;;  %v12592_v54 = vld [vmem:[%s19087_s5 + $0xc4] ss:$8 sps:$4 sm:$0xff]  }
 0x3f3   :  { %5961 = vmatmul.mubr.bf16.gmra.mxu0 %v16691_v44  ;;  %6316 = vmatprep.subr.bf16.mxu1 %v12541_v40  ;;  %v12587_v40 = vld [vmem:[%s19086_s4 + $0x310] ss:$8 sps:$4 sm:$0xff]  }
 0x3f4   :  { %6236 = vmatpush1.bf16.msra.mxu0 %v12536_v20  ;;  %5970 = vmatprep.mubr.bf16.mxu0 %v19901_v19  ;;  %v12595_v20 = vld [vmem:[%s19086_s4 + $0x304] ss:$8 sps:$4 sm:$0xff]  }
 0x3f5   :  { %5908 = vmatmul.mubr.bf16.gmra.mxu1 %v16645_v34  ;;  %6237 = vmatprep.subr.bf16.mxu0 %v12544_v22  ;;  %v12590_v22 = vld [vmem:[%s19087_s5 + $0xc0] ss:$8 sps:$4 sm:$0xff]  }
 0x3f6   :  { %6317 = vmatpush1.bf16.msra.mxu1 %v12539_v58  ;;  %6336 = vmatprep.mubr.bf16.mxu1 %v19901_v19  ;;  %v12598_v58 = vld [vmem:[%s19087_s5 + $0xb4] ss:$8 sps:$4 sm:$0xff]  }
 0x3f7   :  { %6318 = vmatprep.subr.bf16.mxu1 %v12547_v23  ;;  %v12593_v23 = vld [vmem:[%s19086_s4 + $0x300] ss:$8 sps:$4 sm:$0xff]  }
 0x3f8   :  { %6238 = vmatpush1.bf16.msra.mxu0 %v12542_v46  ;;  %v12601_v46 = vld [vmem:[%s19086_s4 + $0x3f4] ss:$8 sps:$4 sm:$0xff]  }
 0x3f9   :  { %6239 = vmatprep.subr.bf16.mxu0 %v12550_v12  ;;  %v12596_v12 = vld [vmem:[%s19087_s5 + $0xb0] ss:$8 sps:$4 sm:$0xff]  }
 0x3fa   :  { %6319 = vmatpush1.bf16.msra.mxu1 %v12545_v51  ;;  %v12604_v51 = vld [vmem:[%s19087_s5 + $0xa4] ss:$8 sps:$4 sm:$0xff]  }
 0x3fb   :  { %5971 = vmatmul.mubr.bf16.gmra.mxu0 %v16732_v57  ;;  %6678 = vmatprep.subr.bf16.mxu1 %v12553_v59  ;;  %v12599_v59 = vld [vmem:[%s19086_s4 + $0x3f0] ss:$8 sps:$4 sm:$0xff]  }
 0x3fc   :  { %6240 = vmatpush1.bf16.msra.mxu0 %v12548_v63  ;;  %5980 = vmatprep.mubr.bf16.mxu0 %v19901_v19  ;;  %v12607_v63 = vld [vmem:[%s19086_s4 + $0x3e4] ss:$8 sps:$4 sm:$0xff]  }
 0x3fd   :  { %6337 = vmatmul.mubr.bf16.vlgmr.msra.gmra.mxu1 %v16553_v24  ;;  %6241 = vmatprep.subr.bf16.mxu0 %v12556_v29  ;;  %v12560_v24 = vld [vmem:[%s19087_s5 + $0x10] ss:$8 sps:$4 sm:$0xff]   ;;  %v12602_v29 = vld [vmem:[%s19087_s5 + $0xa0] ss:$8 sps:$4 sm:$0xff]  }
 0x3fe   :  { %6679 = vmatpush1.bf16.msra.mxu1 %v12551_v48  ;;  %6346 = vmatprep.mubr.bf16.mxu1 %v19901_v19  ;;  %v12610_v48 = vld [vmem:[%s19087_s5 + $0x94] ss:$8 sps:$4 sm:$0xff]  }
 0x3ff   :  { %6680 = vmatprep.subr.bf16.mxu1 %v12559_v17  ;;  %v12605_v17 = vld [vmem:[%s19086_s4 + $0x3e0] ss:$8 sps:$4 sm:$0xff]  }
 0x400   :  { %6242 = vmatpush1.bf16.msra.mxu0 %v12554_v18  ;;  %v12613_v18 = vld [vmem:[%s19086_s4 + $0x3d4] ss:$8 sps:$4 sm:$0xff]  }
 0x401   :  { %6243 = vmatprep.subr.bf16.mxu0 %v12562_v49  ;;  %v12608_v49 = vld [vmem:[%s19087_s5 + $0x90] ss:$8 sps:$4 sm:$0xff]  }
 0x402   :  { %6681 = vmatpush1.bf16.msra.mxu1 %v12557_v3  ;;  %v12616_v3 = vld [vmem:[%s19087_s5 + $0x84] ss:$8 sps:$4 sm:$0xff]  }
 0x403   :  { %5981 = vmatmul.mubr.bf16.gmra.mxu0 %v16798_v35  ;;  %6682 = vmatprep.subr.bf16.mxu1 %v12565_v7  ;;  %v12611_v7 = vld [vmem:[%s19086_s4 + $0x3d0] ss:$8 sps:$4 sm:$0xff]  }
 0x404   :  { %6244 = vmatpush1.bf16.msra.mxu0 %v12560_v24  ;;  %6263 = vmatprep.mubr.bf16.mxu0 %v19932_v60  ;;  %v12577_v60 = vld [vmem:[%s19086_s4 + $0x334] ss:$8 sps:$4 sm:$0xff]   ;;  %v12619_v24 = vld [vmem:[%s19086_s4 + $0x3c4] ss:$8 sps:$4 sm:$0xff]  }
 0x405   :  { %6347 = vmatmul.mubr.bf16.gmra.mxu1 %v16651_v33  ;;  %6245 = vmatprep.subr.bf16.mxu0 %v12568_v50  ;;  %v12614_v50 = vld [vmem:[%s19087_s5 + $0x80] ss:$8 sps:$4 sm:$0xff]  }
 0x406   :  { %6683 = vmatpush1.bf16.msra.mxu1 %v12563_v16  ;;  %6356 = vmatprep.mubr.bf16.mxu1 %v19901_v19  ;;  %v12622_v16 = vld [vmem:[%s19086_s4 + $0x474] ss:$8 sps:$4 sm:$0xff]  }
 0x407   :  { %6684 = vmatprep.subr.bf16.mxu1 %v12571_v45  ;;  %v12617_v45 = vld [vmem:[%s19086_s4 + $0x3c0] ss:$8 sps:$4 sm:$0xff]  }
 0x408   :  { %6246 = vmatpush1.bf16.msra.mxu0 %v12566_v14  ;;  %v12625_v14 = vld [vmem:[%s19086_s4 + $0x3b4] ss:$8 sps:$4 sm:$0xff]  }
 0x409   :  { %6247 = vmatprep.subr.bf16.mxu0 %v12574_v9  ;;  %v12620_v9 = vld [vmem:[%s19086_s4 + $0x470] ss:$8 sps:$4 sm:$0xff]  }
 0x40a   :  { %6685 = vmatpush1.bf16.msra.mxu1 %v12569_v27  ;;  %v12628_v27 = vld [vmem:[%s19086_s4 + $0x464] ss:$8 sps:$4 sm:$0xff]  }
 0x40b   :  { %6686 = vmatprep.subr.bf16.mxu1 %v12577_v60 }
 0x40c   :  { %6248 = vmatpush2.bf16.msra.mxu0 %v12572_v56  ;;  %v12623_v56 = vld [vmem:[%s19086_s4 + $0x3b0] ss:$8 sps:$4 sm:$0xff]  }
 0x40d   :  { %6357 = vmatmul.mubr.bf16.gmra.mxu1 %v16664_v25  ;;  %6249 = vmatprep.subr.bf16.mxu0 %v12580_v41  ;;  %v12631_v41 = vld [vmem:[%s19086_s4 + $0x3a4] ss:$8 sps:$4 sm:$0xff]  }
 0x40e   :  { %6687 = vmatpush1.bf16.msra.mxu1 %v12575_v36  ;;  %6366 = vmatprep.mubr.bf16.mxu1 %v19901_v19  ;;  %v12626_v36 = vld [vmem:[%s19086_s4 + $0x460] ss:$8 sps:$4 sm:$0xff]  }
 0x40f   :  { %6688 = vmatprep.subr.bf16.mxu1 %v12583_v62  ;;  %v12634_v62 = vld [vmem:[%s19086_s4 + $0x454] ss:$8 sps:$4 sm:$0xff]  }
 0x410   :  { %6250 = vmatpush2.bf16.msra.mxu0 %v12578_v15 }
 0x411   :  { %6251 = vmatprep.subr.bf16.mxu0 %v12586_v53  ;;  %v12637_v53 = vld [vmem:[%s19086_s4 + $0x394] ss:$8 sps:$4 sm:$0xff]  }
 0x412   :  { %6689 = vmatpush1.bf16.msra.mxu1 %v12581_v61  ;;  %v12632_v61 = vld [vmem:[%s19086_s4 + $0x450] ss:$8 sps:$4 sm:$0xff]  }
 0x413   :  { %6690 = vmatprep.subr.bf16.mxu1 %v12589_v31  ;;  %v12640_v31 = vld [vmem:[%s19086_s4 + $0x444] ss:$8 sps:$4 sm:$0xff]  }
 0x414   :  { %6252 = vmatpush2.bf16.msra.mxu0 %v12584_v21 }
 0x415   :  { %6367 = vmatmul.mubr.bf16.gmra.mxu1 %v16720_v13  ;;  %6253 = vmatprep.subr.bf16.mxu0 %v12592_v54  ;;  %v12635_v54 = vld [vmem:[%s19086_s4 + $0x390] ss:$8 sps:$4 sm:$0xff]  }
 0x416   :  { %6691 = vmatpush1.bf16.msra.mxu1 %v12587_v40  ;;  %6710 = vmatprep.mubr.bf16.mxu1 %v19935_v43  ;;  %v12643_v40 = vld [vmem:[%s19086_s4 + $0x384] ss:$8 sps:$4 sm:$0xff]  }
 0x417   :  { %6692 = vmatprep.subr.bf16.mxu1 %v12595_v20  ;;  %v12638_v20 = vld [vmem:[%s19086_s4 + $0x440] ss:$8 sps:$4 sm:$0xff]  }
 0x418   :  { %6254 = vmatpush2.bf16.msra.mxu0 %v12590_v22  ;;  %v12646_v22 = vld [vmem:[%s19086_s4 + $0x434] ss:$8 sps:$4 sm:$0xff]  }
 0x419   :  { %6255 = vmatprep.subr.bf16.mxu0 %v12598_v58 }
 0x41a   :  { %6693 = vmatpush1.bf16.msra.mxu1 %v12593_v23  ;;  %v12641_v23 = vld [vmem:[%s19086_s4 + $0x380] ss:$8 sps:$4 sm:$0xff]  }
 0x41b   :  { %6694 = vmatprep.subr.bf16.mxu1 %v12601_v46  ;;  %v12649_v46 = vld [vmem:[%s19087_s5 + $0x474] ss:$8 sps:$4 sm:$0xff]  }
 0x41c   :  { %6256 = vmatpush2.bf16.msra.mxu0 %v12596_v12 }
 0x41d   :  { %6257 = vmatprep.subr.bf16.mxu0 %v12604_v51  ;;  %v12644_v51 = vld [vmem:[%s19086_s4 + $0x430] ss:$8 sps:$4 sm:$0xff]  }
 0x41e   :  { %6695 = vmatpush2.bf16.msra.mxu1 %v12599_v59  ;;  %v12652_v59 = vld [vmem:[%s19086_s4 + $0x424] ss:$8 sps:$4 sm:$0xff]  }
 0x41f   :  { %6696 = vmatprep.subr.bf16.mxu1 %v12607_v63  ;;  %v17269_v60 = vpop.f32.mrf.mxu1  ;;  %v12647_v63 = vld [vmem:[%s19087_s5 + $0x470] ss:$8 sps:$4 sm:$0xff]  }
 0x420   :  { %6258 = vmatpush2.bf16.msra.mxu0 %v12602_v29  ;;  %v12655_v29 = vld [vmem:[%s19087_s5 + $0x464] ss:$8 sps:$4 sm:$0xff]  }
 0x421   :  { %6259 = vmatprep.subr.bf16.mxu0 %v12610_v48  ;;  %v17285_v15 = vpop.f32.mrf.mxu1 }
 0x422   :  { %6697 = vmatpush2.bf16.msra.mxu1 %v12605_v17  ;;  %v12650_v17 = vld [vmem:[%s19086_s4 + $0x420] ss:$8 sps:$4 sm:$0xff]  }
 0x423   :  { %6698 = vmatprep.subr.bf16.mxu1 %v12613_v18  ;;  %v17299_v21 = vpop.f32.mrf.mxu1  ;;  %v12658_v18 = vld [vmem:[%s19086_s4 + $0x414] ss:$8 sps:$4 sm:$0xff]  }
 0x424   :  { %6260 = vmatpush2.bf16.msra.mxu0 %v12608_v49  ;;  %v12653_v49 = vld [vmem:[%s19087_s5 + $0x460] ss:$8 sps:$4 sm:$0xff]  }
 0x425   :  { %6261 = vmatprep.subr.bf16.mxu0 %v12616_v3  ;;  %v17315_v58 = vpop.f32.mrf.mxu1  ;;  %v12661_v3 = vld [vmem:[%s19087_s5 + $0x454] ss:$8 sps:$4 sm:$0xff]  }
 0x426   :  { %6699 = vmatpush2.bf16.msra.mxu1 %v12611_v7  ;;  %19938 = vst [vmem:[#allocation132_spill] sm:$0xff] %v17315_v58 }
 0x427   :  { %6700 = vmatprep.subr.bf16.mxu1 %v12619_v24  ;;  %v12656_v24 = vld [vmem:[%s19086_s4 + $0x410] ss:$8 sps:$4 sm:$0xff]  }
 0x428   :  { %6262 = vmatpush2.bf16.msra.mxu0 %v12614_v50  ;;  %v12664_v50 = vld [vmem:[%s19086_s4 + $0x404] ss:$8 sps:$4 sm:$0xff]  }
 0x429   :  { %6751 = vmatprep.subr.bf16.mxu0 %v12622_v16  ;;  %v12659_v16 = vld [vmem:[%s19087_s5 + $0x450] ss:$8 sps:$4 sm:$0xff]  }
 0x42a   :  { %6701 = vmatpush2.bf16.msra.mxu1 %v12617_v45  ;;  %v12667_v45 = vld [vmem:[%s19087_s5 + $0x444] ss:$8 sps:$4 sm:$0xff]  }
 0x42b   :  { %6264 = vmatmul.mubr.bf16.vlgmr.msra.gmra.mxu0 %v19934_v0  ;;  %6702 = vmatprep.subr.bf16.mxu1 %v12625_v14  ;;  %v12629_v0 = vld [vmem:[%s19086_s4 + $0x3a0] ss:$8 sps:$4 sm:$0xff]  }
 0x42c   :  { %6273 = vmatprep.mubr.bf16.mxu0 %v19935_v43  ;;  %6752 = vmatpush1.bf16.msra.mxu0 %v12620_v9  ;;  %v12662_v9 = vld [vmem:[%s19086_s4 + $0x400] ss:$8 sps:$4 sm:$0xff]  }
 0x42d   :  { %6753 = vmatprep.subr.bf16.mxu0 %v12628_v27  ;;  %v12670_v27 = vld [vmem:[%s19087_s5 + $0x374] ss:$8 sps:$4 sm:$0xff]  }
 0x42e   :  { %6703 = vmatpush2.bf16.msra.mxu1 %v12623_v56 }
 0x42f   :  { %6704 = vmatprep.subr.bf16.mxu1 %v12631_v41  ;;  %v12665_v41 = vld [vmem:[%s19087_s5 + $0x440] ss:$8 sps:$4 sm:$0xff]  }
 0x430   :  { %6754 = vmatpush1.bf16.msra.mxu0 %v12626_v36  ;;  %v12673_v36 = vld [vmem:[%s19087_s5 + $0x434] ss:$8 sps:$4 sm:$0xff]  }
 0x431   :  { %6755 = vmatprep.subr.bf16.mxu0 %v12634_v62  ;;  %v12668_v62 = vld [vmem:[%s19087_s5 + $0x370] ss:$8 sps:$4 sm:$0xff]  }
 0x432   :  { %6705 = vmatpush2.bf16.msra.mxu1 %v12629_v0  ;;  %v12676_v0 = vld [vmem:[%s19087_s5 + $0x364] ss:$8 sps:$4 sm:$0xff]  }
 0x433   :  { %6274 = vmatmul.mubr.bf16.gmra.mxu0 %v19936_v8  ;;  %6706 = vmatprep.subr.bf16.mxu1 %v12637_v53 }
 0x434   :  { %6283 = vmatprep.mubr.bf16.mxu0 %v16496_v55  ;;  %6756 = vmatpush1.bf16.msra.mxu0 %v12632_v61 }
 0x435   :  { %6757 = vmatprep.subr.bf16.mxu0 %v12640_v31  ;;  %v12671_v31 = vld [vmem:[%s19087_s5 + $0x430] ss:$8 sps:$4 sm:$0xff]  }
 0x436   :  { %6707 = vmatpush2.bf16.msra.mxu1 %v12635_v54  ;;  %v17323_v12 = vpop.f32.mrf.mxu1 }
 0x437   :  { %6708 = vmatprep.subr.bf16.mxu1 %v12643_v40  ;;  %v12679_v40 = vld [vmem:[%s19087_s5 + $0x424] ss:$8 sps:$4 sm:$0xff]  }
 0x438   :  { %6758 = vmatpush1.bf16.msra.mxu0 %v12638_v20  ;;  %v17338_v48 = vpop.f32.mrf.mxu1 }
 0x439   :  { %6759 = vmatprep.subr.bf16.mxu0 %v12646_v22  ;;  %v12674_v22 = vld [vmem:[%s19087_s5 + $0x360] ss:$8 sps:$4 sm:$0xff]  }
 0x43a   :  { %6709 = vmatpush2.bf16.msra.mxu1 %v12641_v23  ;;  %v17355_v7 = vpop.f32.mrf.mxu1 }
 0x43b   :  { %6284 = vmatmul.mubr.bf16.gmra.mxu0 %v16477_v26  ;;  %7202 = vmatprep.subr.bf16.mxu1 %v12649_v46 }
 0x43c   :  { %6293 = vmatprep.mubr.bf16.mxu0 %v16601_v10  ;;  %6760 = vmatpush1.bf16.msra.mxu0 %v12644_v51  ;;  %v17370_v14 = vpop.f32.mrf.mxu1 }
 0x43d   :  { %6711 = vmatmul.mubr.bf16.vlgmr.msra.gmra.mxu1 %v19936_v8  ;;  %6761 = vmatprep.subr.bf16.mxu0 %v12652_v59  ;;  %19939 = vst [vmem:[#allocation16_spill] sm:$0xff] %v17370_v14  ;;  %v12677_v59 = vld [vmem:[%s19087_s5 + $0x420] ss:$8 sps:$4 sm:$0xff]   ;;  %v12844_v14 = vld [vmem:[%s19087_s5 + $0x4a4] ss:$8 sps:$4 sm:$0xff]  }
 0x43e   :  { %6720 = vmatprep.mubr.bf16.mxu1 %v16496_v55  ;;  %7203 = vmatpush1.bf16.msra.mxu1 %v12647_v63 }
 0x43f   :  { %7204 = vmatprep.subr.bf16.mxu1 %v12655_v29  ;;  %v12680_v29 = vld [vmem:[%s19087_s5 + $0x350] ss:$8 sps:$4 sm:$0xff]  }
 0x440   :  { %6762 = vmatpush1.bf16.msra.mxu0 %v12650_v17  ;;  %v12688_v17 = vld [vmem:[%s19087_s5 + $0x344] ss:$8 sps:$4 sm:$0xff]  }
 0x441   :  { %6763 = vmatprep.subr.bf16.mxu0 %v12658_v18 }
 0x442   :  { %7205 = vmatpush1.bf16.msra.mxu1 %v12653_v49  ;;  %v12683_v49 = vld [vmem:[%s19087_s5 + $0x410] ss:$8 sps:$4 sm:$0xff]  }
 0x443   :  { %6294 = vmatmul.mubr.bf16.gmra.mxu0 %v16587_v38  ;;  %7206 = vmatprep.subr.bf16.mxu1 %v12661_v3  ;;  %v12691_v3 = vld [vmem:[%s19087_s5 + $0x404] ss:$8 sps:$4 sm:$0xff]  }
 0x444   :  { %6764 = vmatpush1.bf16.msra.mxu0 %v12656_v24  ;;  %6783 = vmatprep.mubr.bf16.mxu0 %v19901_v19 }
 0x445   :  { %6721 = vmatmul.mubr.bf16.gmra.mxu1 %v16477_v26  ;;  %6765 = vmatprep.subr.bf16.mxu0 %v12664_v50  ;;  %v17380_v56 = vpop.f32.mrf.mxu1  ;;  %v12686_v50 = vld [vmem:[%s19087_s5 + $0x340] ss:$8 sps:$4 sm:$0xff]  }
 0x446   :  { %6730 = vmatprep.mubr.bf16.mxu1 %v16601_v10  ;;  %7207 = vmatpush1.bf16.msra.mxu1 %v12659_v16  ;;  %v12694_v16 = vld [vmem:[%s19087_s5 + $0x334] ss:$8 sps:$4 sm:$0xff]  }
 0x447   :  { %7208 = vmatprep.subr.bf16.mxu1 %v12667_v45  ;;  %v17395_v53 = vpop.f32.mrf.mxu1 }
 0x448   :  { %6766 = vmatpush1.bf16.msra.mxu0 %v12662_v9 }
 0x449   :  { %7129 = vmatprep.subr.bf16.mxu0 %v12670_v27  ;;  %v17418_v46 = vpop.f32.mrf.mxu1  ;;  %v12689_v27 = vld [vmem:[%s19087_s5 + $0x400] ss:$8 sps:$4 sm:$0xff]  }
 0x44a   :  { %7209 = vmatpush1.bf16.msra.mxu1 %v12665_v41  ;;  %v5107_v61 = vpop.f32.mrf.mxu0 }
 0x44b   :  { %6784 = vmatmul.mubr.bf16.vlgmr.msra.gmra.mxu0 %v16651_v33  ;;  %v17402_v54 = vadd.f32 %v5107_v61, %v17269_v60  ;;  %7210 = vmatprep.subr.bf16.mxu1 %v12673_v36  ;;  %v12682_v60 = vld [vmem:[%s19087_s5 + $0x354] ss:$8 sps:$4 sm:$0xff]   ;;  %v17436_v18 = vpop.f32.mrf.mxu1  ;;  %v12692_v61 = vld [vmem:[%s19087_s5 + $0x330] ss:$8 sps:$4 sm:$0xff]  }
 0x44c   :  { %7130 = vmatpush1.bf16.msra.mxu0 %v12668_v62  ;;  %v5109_v20 = vpop.f32.mrf.mxu0  ;;  %6793 = vmatprep.mubr.bf16.mxu0 %v19901_v19  ;;  %19940 = vst [vmem:[#allocation134_spill] sm:$0xff] %v17436_v18  ;;  %v12697_v36 = vld [vmem:[%s19086_s4 + $0x4f4] ss:$8 sps:$4 sm:$0xff]  }
 0x44d   :  { %6731 = vmatmul.mubr.bf16.gmra.mxu1 %v16587_v38  ;;  %v17413_v23 = vadd.f32 %v5109_v20, %v17285_v15  ;;  %7131 = vmatprep.subr.bf16.mxu0 %v12676_v0  ;;  %v12685_v15 = vld [vmem:[%s19087_s5 + $0x414] ss:$8 sps:$4 sm:$0xff]   ;;  %v12695_v20 = vld [vmem:[%s19086_s4 + $0x4f0] ss:$8 sps:$4 sm:$0xff]  }
 0x44e   :  { %6740 = vmatprep.mubr.bf16.mxu1 %v16770_v28  ;;  %7211 = vmatpush1.bf16.msra.mxu1 %v12671_v31  ;;  %v5111_v51 = vpop.f32.mrf.mxu0 }
 0x44f   :  { %v17425_v63 = vadd.f32 %v5111_v51, %v17299_v21  ;;  %7212 = vmatprep.subr.bf16.mxu1 %v12679_v40 }
 0x450   :  { %7132 = vmatpush1.bf16.msra.mxu0 %v12674_v22  ;;  %v17438_v21 = vpop.f32.mrf.mxu0 }
 0x451   :  { %7133 = vmatprep.subr.bf16.mxu0 %v12682_v60  ;;  %19941 = vst [vmem:[#allocation135_spill] sm:$0xff] %v17438_v21 }
 0x452   :  { %7213 = vmatpush1.bf16.msra.mxu1 %v12677_v59  ;;  %v12698_v59 = vld [vmem:[%s19087_s5 + $0x320] ss:$8 sps:$4 sm:$0xff]  }
 0x453   :  { %6794 = vmatmul.mubr.bf16.gmra.mxu0 %v16664_v25  ;;  %7214 = vmatprep.subr.bf16.mxu1 %v12685_v15 }
 0x454   :  { %7134 = vmatpush1.bf16.msra.mxu0 %v12680_v29  ;;  %6803 = vmatprep.mubr.bf16.mxu0 %v19901_v19  ;;  %v12701_v29 = vld [vmem:[%s19086_s4 + $0x4e0] ss:$8 sps:$4 sm:$0xff]  }
 0x455   :  { %v17447_v24 = vpop.f32.mrf.mxu1  ;;  %6741 = vmatmul.mubr.bf16.gmra.mxu1 %v16716_v1  ;;  %7135 = vmatprep.subr.bf16.mxu0 %v12688_v17 }
 0x456   :  { %7215 = vmatpush1.bf16.msra.mxu1 %v12683_v49  ;;  %7234 = vmatprep.mubr.bf16.mxu1 %v19901_v19 }
 0x457   :  { %v5117_v45 = vpop.f32.mrf.mxu0  ;;  %v17457_v9 = vpop.f32.mrf.mxu1  ;;  %7216 = vmatprep.subr.bf16.mxu1 %v12691_v3 }
 0x458   :  { %v17464_v41 = vadd.f32 %v5117_v45, %v17323_v12  ;;  %7136 = vmatpush1.bf16.msra.mxu0 %v12686_v50  ;;  %v12700_v12 = vld [vmem:[%s19087_s5 + $0x324] ss:$8 sps:$4 sm:$0xff]   ;;  %v12704_v50 = vld [vmem:[%s19087_s5 + $0x310] ss:$8 sps:$4 sm:$0xff]  }
 0x459   :  { %v5119_v62 = vpop.f32.mrf.mxu0  ;;  %v17469_v0 = vpop.f32.mrf.mxu1  ;;  %7137 = vmatprep.subr.bf16.mxu0 %v12694_v16 }
 0x45a   :  { %v17475_v31 = vadd.f32 %v5119_v62, %v17338_v48  ;;  %7217 = vmatpush1.bf16.msra.mxu1 %v12689_v27  ;;  %v12703_v48 = vld [vmem:[%s19086_s4 + $0x4e4] ss:$8 sps:$4 sm:$0xff]   ;;  %v12707_v27 = vld [vmem:[%s19086_s4 + $0x4d0] ss:$8 sps:$4 sm:$0xff]  }
 0x45b   :  { %v5121_v40 = vpop.f32.mrf.mxu0  ;;  %v17486_v60 = vpop.f32.mrf.mxu1  ;;  %6804 = vmatmul.mubr.bf16.gmra.mxu0 %v16720_v13  ;;  %7592 = vmatprep.subr.bf16.mxu1 %v12697_v36 }
 0x45c   :  { %v17484_v22 = vadd.f32 %v5121_v40, %v17355_v7  ;;  %19942 = vst [vmem:[#allocation137_spill] sm:$0xff] %v17486_v60  ;;  %7138 = vmatpush1.bf16.msra.mxu0 %v12692_v61  ;;  %6813 = vmatprep.mubr.bf16.mxu0 %v19901_v19  ;;  %v12706_v7 = vld [vmem:[%s19087_s5 + $0x314] ss:$8 sps:$4 sm:$0xff]  }
 0x45d   :  { %v17492_v51 = vpop.f32.mrf.mxu0  ;;  %7235 = vmatmul.mubr.bf16.vlgmr.msra.gmra.mxu1 %v16651_v33  ;;  %7139 = vmatprep.subr.bf16.mxu0 %v12700_v12  ;;  %v17509_v49 = vpop.f32.mrf.mxu1  ;;  %v12709_v33 = vld [vmem:[%s19086_s4 + $0x4d4] ss:$8 sps:$4 sm:$0xff]   ;;  %v12710_v12 = vld [vmem:[%s19087_s5 + $0x300] ss:$8 sps:$4 sm:$0xff]  }
 0x45e   :  { %19943 = vst [vmem:[#allocation33_spill] sm:$0xff] %v17492_v51  ;;  %7593 = vmatpush1.bf16.msra.mxu1 %v12695_v20  ;;  %7244 = vmatprep.mubr.bf16.mxu1 %v19901_v19  ;;  %v12713_v20 = vld [vmem:[%s19086_s4 + $0x4c0] ss:$8 sps:$4 sm:$0xff]  }
 0x45f   :  { %v5127_v15 = vpop.f32.mrf.mxu0  ;;  %7594 = vmatprep.subr.bf16.mxu1 %v12703_v48  ;;  %v17526_v36 = vpop.f32.mrf.mxu1 }
 0x460   :  { %v17507_v17 = vadd.f32 %v5127_v15, %v17380_v56  ;;  %7140 = vmatpush1.bf16.msra.mxu0 %v12698_v59  ;;  %v12712_v56 = vld [vmem:[%s19087_s5 + $0x304] ss:$8 sps:$4 sm:$0xff]   ;;  %v12721_v59 = vld [vmem:[%s19086_s4 + $0x4b4] ss:$8 sps:$4 sm:$0xff]   ;;  %v12716_v15 = vld [vmem:[%s19087_s5 + $0x3f0] ss:$8 sps:$4 sm:$0xff]  }
 0x461   :  { %v5129_v3 = vpop.f32.mrf.mxu0  ;;  %7141 = vmatprep.subr.bf16.mxu0 %v12706_v7 }
 0x462   :  { %v17518_v16 = vadd.f32 %v5129_v3, %v17395_v53  ;;  %7595 = vmatpush1.bf16.msra.mxu1 %v12701_v29  ;;  %v12715_v53 = vld [vmem:[%s19086_s4 + $0x4c4] ss:$8 sps:$4 sm:$0xff]   ;;  %v12719_v3 = vld [vmem:[%s19086_s4 + $0x4b0] ss:$8 sps:$4 sm:$0xff]  }
 0x463   :  { %v5131_v45 = vpop.f32.mrf.mxu0  ;;  %6814 = vmatmul.mubr.bf16.gmra.mxu0 %v16803_v4  ;;  %7596 = vmatprep.subr.bf16.mxu1 %v12709_v33 }
 0x464   :  { %v17529_v62 = vadd.f32 %v5131_v45, %v17418_v46  ;;  %7142 = vmatpush1.bf16.msra.mxu0 %v12704_v50  ;;  %7161 = vmatprep.mubr.bf16.mxu0 %v19935_v43  ;;  %v12718_v46 = vld [vmem:[%s19087_s5 + $0x3f4] ss:$8 sps:$4 sm:$0xff]   ;;  %v17549_v43 = vpop.f32.mrf.mxu1  ;;  %v12722_v45 = vld [vmem:[%s19087_s5 + $0x3e0] ss:$8 sps:$4 sm:$0xff]  }
 0x465   :  { %v17535_v61 = vpop.f32.mrf.mxu0  ;;  %7245 = vmatmul.mubr.bf16.gmra.mxu1 %v16664_v25  ;;  %7143 = vmatprep.subr.bf16.mxu0 %v12712_v56 }
 0x466   :  { %19944 = vst [vmem:[#allocation18_spill] sm:$0xff] %v17535_v61  ;;  %7597 = vmatpush1.bf16.msra.mxu1 %v12707_v27  ;;  %7254 = vmatprep.mubr.bf16.mxu1 %v19901_v19  ;;  %v17569_v50 = vpop.f32.mrf.mxu1  ;;  %v12730_v27 = vld [vmem:[%s19087_s5 + $0x3d4] ss:$8 sps:$4 sm:$0xff]  }
 0x467   :  { %v5137_v40 = vpop.f32.mrf.mxu0  ;;  %7598 = vmatprep.subr.bf16.mxu1 %v12715_v53  ;;  %19945 = vst [vmem:[#allocation77_spill] sm:$0xff] %v17569_v50 }
 0x468   :  { %v17552_v48 = vadd.f32 %v5137_v40, %v17447_v24  ;;  %7144 = vmatpush1.bf16.msra.mxu0 %v12710_v12  ;;  %v12724_v24 = vld [vmem:[%s19087_s5 + $0x3e4] ss:$8 sps:$4 sm:$0xff]   ;;  %v17588_v53 = vpop.f32.mrf.mxu1  ;;  %v12733_v12 = vld [vmem:[%s19086_s4 + $0x494] ss:$8 sps:$4 sm:$0xff]  }
 0x469   :  { %v5139_v7 = vpop.f32.mrf.mxu0  ;;  %7145 = vmatprep.subr.bf16.mxu0 %v12718_v46  ;;  %v12728_v46 = vld [vmem:[%s19087_s5 + $0x3d0] ss:$8 sps:$4 sm:$0xff]   ;;  %v12736_v40 = vld [vmem:[%s19087_s5 + $0x3c4] ss:$8 sps:$4 sm:$0xff]  }
 0x46a   :  { %v17561_v29 = vadd.f32 %v5139_v7, %v17457_v9  ;;  %7599 = vmatpush1.bf16.msra.mxu1 %v12713_v20  ;;  %v12727_v9 = vld [vmem:[%s19086_s4 + $0x4a4] ss:$8 sps:$4 sm:$0xff]   ;;  %v12731_v20 = vld [vmem:[%s19086_s4 + $0x490] ss:$8 sps:$4 sm:$0xff]  }
 0x46b   :  { %v5141_v33 = vpop.f32.mrf.mxu0  ;;  %7600 = vmatprep.subr.bf16.mxu1 %v12721_v59  ;;  %v17602_v59 = vpop.f32.mrf.mxu1  ;;  %v12739_v7 = vld [vmem:[%s19086_s4 + $0x484] ss:$8 sps:$4 sm:$0xff]  }
 0x46c   :  { %v17572_v56 = vadd.f32 %v5141_v33, %v17469_v0  ;;  %7146 = vmatpush2.bf16.msra.mxu0 %v12716_v15  ;;  %v12725_v0 = vld [vmem:[%s19086_s4 + $0x4a0] ss:$8 sps:$4 sm:$0xff]  }
 0x46d   :  { %7255 = vmatmul.mubr.bf16.gmra.mxu1 %v16720_v13  ;;  %7147 = vmatprep.subr.bf16.mxu0 %v12724_v24  ;;  %v12734_v15 = vld [vmem:[%s19087_s5 + $0x3c0] ss:$8 sps:$4 sm:$0xff]   ;;  %v12742_v24 = vld [vmem:[%s19087_s5 + $0x3b4] ss:$8 sps:$4 sm:$0xff]  }
 0x46e   :  { %7601 = vmatpush1.bf16.msra.mxu1 %v12719_v3  ;;  %7264 = vmatprep.mubr.bf16.mxu1 %v19901_v19  ;;  %v12737_v33 = vld [vmem:[%s19086_s4 + $0x480] ss:$8 sps:$4 sm:$0xff]   ;;  %v17618_v3 = vpop.f32.mrf.mxu1 }
 0x46f   :  { %7602 = vmatprep.subr.bf16.mxu1 %v12727_v9  ;;  %v12745_v9 = vld [vmem:[%s19086_s4 + $0x574] ss:$8 sps:$4 sm:$0xff]  }
 0x470   :  { %7148 = vmatpush2.bf16.msra.mxu0 %v12722_v45  ;;  %v12740_v45 = vld [vmem:[%s19087_s5 + $0x3b0] ss:$8 sps:$4 sm:$0xff]  }
 0x471   :  { %7149 = vmatprep.subr.bf16.mxu0 %v12730_v27  ;;  %v12748_v27 = vld [vmem:[%s19087_s5 + $0x3a4] ss:$8 sps:$4 sm:$0xff]  }
 0x472   :  { %7603 = vmatpush1.bf16.msra.mxu1 %v12725_v0  ;;  %v12743_v0 = vld [vmem:[%s19086_s4 + $0x570] ss:$8 sps:$4 sm:$0xff]  }
 0x473   :  { %7604 = vmatprep.subr.bf16.mxu1 %v12733_v12  ;;  %v17632_v12 = vpop.f32.mrf.mxu1 }
 0x474   :  { %7150 = vmatpush2.bf16.msra.mxu0 %v12728_v46  ;;  %19946 = vst [vmem:[#allocation105_spill] sm:$0xff] %v17632_v12  ;;  %v12751_v46 = vld [vmem:[%s19086_s4 + $0x564] ss:$8 sps:$4 sm:$0xff]  }
 0x475   :  { %7265 = vmatmul.mubr.bf16.gmra.mxu1 %v16803_v4  ;;  %7151 = vmatprep.subr.bf16.mxu0 %v12736_v40  ;;  %v12746_v40 = vld [vmem:[%s19087_s5 + $0x3a0] ss:$8 sps:$4 sm:$0xff]  }
 0x476   :  { %7605 = vmatpush1.bf16.msra.mxu1 %v12731_v20  ;;  %7624 = vmatprep.mubr.bf16.mxu1 %v16438_v37  ;;  %v12754_v20 = vld [vmem:[%s19087_s5 + $0x394] ss:$8 sps:$4 sm:$0xff]  }
 0x477   :  { %7606 = vmatprep.subr.bf16.mxu1 %v12739_v7  ;;  %v12749_v7 = vld [vmem:[%s19086_s4 + $0x560] ss:$8 sps:$4 sm:$0xff]  }
 0x478   :  { %7152 = vmatpush2.bf16.msra.mxu0 %v12734_v15  ;;  %v17646_v15 = vpop.f32.mrf.mxu1 }
 0x479   :  { %7153 = vmatprep.subr.bf16.mxu0 %v12742_v24  ;;  %v12757_v24 = vld [vmem:[%s19086_s4 + $0x554] ss:$8 sps:$4 sm:$0xff]  }
 0x47a   :  { %7607 = vmatpush1.bf16.msra.mxu1 %v12737_v33  ;;  %v12752_v33 = vld [vmem:[%s19087_s5 + $0x390] ss:$8 sps:$4 sm:$0xff]  }
 0x47b   :  { %7608 = vmatprep.subr.bf16.mxu1 %v12745_v9  ;;  %v12760_v9 = vld [vmem:[%s19087_s5 + $0x384] ss:$8 sps:$4 sm:$0xff]  }
 0x47c   :  { %7154 = vmatpush2.bf16.msra.mxu0 %v12740_v45  ;;  %v12755_v45 = vld [vmem:[%s19086_s4 + $0x550] ss:$8 sps:$4 sm:$0xff]  }
 0x47d   :  { %7155 = vmatprep.subr.bf16.mxu0 %v12748_v27  ;;  %v17660_v27 = vpop.f32.mrf.mxu1 }
 0x47e   :  { %7609 = vmatpush2.bf16.msra.mxu1 %v12743_v0  ;;  %v12763_v0 = vld [vmem:[%s19086_s4 + $0x544] ss:$8 sps:$4 sm:$0xff]  }
 0x47f   :  { %7610 = vmatprep.subr.bf16.mxu1 %v12751_v46  ;;  %v12758_v46 = vld [vmem:[%s19087_s5 + $0x380] ss:$8 sps:$4 sm:$0xff]  }
 0x480   :  { %7156 = vmatpush2.bf16.msra.mxu0 %v12746_v40  ;;  %v12766_v40 = vld [vmem:[%s19086_s4 + $0x5f4] ss:$8 sps:$4 sm:$0xff]  }
 0x481   :  { %7157 = vmatprep.subr.bf16.mxu0 %v12754_v20  ;;  %v12761_v20 = vld [vmem:[%s19086_s4 + $0x540] ss:$8 sps:$4 sm:$0xff]  }
 0x482   :  { %7611 = vmatpush2.bf16.msra.mxu1 %v12749_v7  ;;  %v17674_v7 = vpop.f32.mrf.mxu1 }
 0x483   :  { %7612 = vmatprep.subr.bf16.mxu1 %v12757_v24  ;;  %v12769_v24 = vld [vmem:[%s19086_s4 + $0x534] ss:$8 sps:$4 sm:$0xff]  }
 0x484   :  { %7158 = vmatpush2.bf16.msra.mxu0 %v12752_v33  ;;  %v12764_v33 = vld [vmem:[%s19086_s4 + $0x5f0] ss:$8 sps:$4 sm:$0xff]   ;;  %v17690_v60 = vpop.f32.mrf.mxu1 }
 0x485   :  { %7159 = vmatprep.subr.bf16.mxu0 %v12760_v9  ;;  %v17682_v9 = vpop.f32.mrf.mxu0  ;;  %19948 = vst [vmem:[#allocation40_spill] sm:$0xff] %v17690_v60 }
 0x486   :  { %7613 = vmatpush2.bf16.msra.mxu1 %v12755_v45  ;;  %19947 = vst [vmem:[#allocation151_spill] sm:$0xff] %v17682_v9  ;;  %v12772_v45 = vld [vmem:[%s19086_s4 + $0x5e4] ss:$8 sps:$4 sm:$0xff]  }
 0x487   :  { %7614 = vmatprep.subr.bf16.mxu1 %v12763_v0  ;;  %v12767_v0 = vld [vmem:[%s19086_s4 + $0x530] ss:$8 sps:$4 sm:$0xff]  }
 0x488   :  { %7160 = vmatpush2.bf16.msra.mxu0 %v12758_v46  ;;  %v12775_v46 = vld [vmem:[%s19086_s4 + $0x524] ss:$8 sps:$4 sm:$0xff]  }
 0x489   :  { %7665 = vmatprep.subr.bf16.mxu0 %v12766_v40 }
 0x48a   :  { %7615 = vmatpush2.bf16.msra.mxu1 %v12761_v20  ;;  %v12770_v20 = vld [vmem:[%s19086_s4 + $0x5e0] ss:$8 sps:$4 sm:$0xff]  }
 0x48b   :  { %v5444_v61 = vpop.f32.mrf.mxu0  ;;  %7162 = vmatmul.mubr.bf16.vlgmr.msra.gmra.mxu0 %v19936_v8  ;;  %7616 = vmatprep.subr.bf16.mxu1 %v12769_v24  ;;  %v12778_v8 = vld [vmem:[%s19086_s4 + $0x5d4] ss:$8 sps:$4 sm:$0xff]  }
 0x48c   :  { %v5445_v40 = vadd.f32 %v5444_v61, %v17402_v54  ;;  %7171 = vmatprep.mubr.bf16.mxu0 %v16496_v55  ;;  %7666 = vmatpush1.bf16.msra.mxu0 %v12764_v33  ;;  %v12773_v54 = vld [vmem:[%s19086_s4 + $0x520] ss:$8 sps:$4 sm:$0xff]   ;;  %v17711_v61 = vpop.f32.mrf.mxu1 }
 0x48d   :  { %v5446_v9 = vpop.f32.mrf.mxu0  ;;  %7667 = vmatprep.subr.bf16.mxu0 %v12772_v45  ;;  %v12781_v45 = vld [vmem:[%s19086_s4 + $0x514] ss:$8 sps:$4 sm:$0xff]  }
 0x48e   :  { %v17705_v24 = vadd.f32 %v17509_v49, %v5445_v40  ;;  %v5447_v60 = vadd.f32 %v5446_v9, %v17413_v23  ;;  %7617 = vmatpush2.bf16.msra.mxu1 %v12767_v0  ;;  %v12776_v23 = vld [vmem:[%s19086_s4 + $0x5d0] ss:$8 sps:$4 sm:$0xff]   ;;  %v12784_v0 = vld [vmem:[%s19086_s4 + $0x5c4] ss:$8 sps:$4 sm:$0xff]  }
 0x48f   :  { %v5448_v33 = vpop.f32.mrf.mxu0  ;;  %7618 = vmatprep.subr.bf16.mxu1 %v12775_v46  ;;  %v12787_v40 = vld [vmem:[%s19086_s4 + $0x504] ss:$8 sps:$4 sm:$0xff]  }
 0x490   :  { %v17717_v18 = vadd.f32 %v17526_v36, %v5447_v60  ;;  %v5449_v49 = vadd.f32 %v5448_v33, %v17425_v63  ;;  %7668 = vmatpush1.bf16.msra.mxu0 %v12770_v20  ;;  %v12779_v63 = vld [vmem:[%s19086_s4 + $0x510] ss:$8 sps:$4 sm:$0xff]   ;;  %v17734_v60 = vpop.f32.mrf.mxu1 }
 0x491   :  { %v17723_v9 = vpop.f32.mrf.mxu0  ;;  %7669 = vmatprep.subr.bf16.mxu0 %v12778_v8 }
 0x492   :  { %19949 = vst [vmem:[#allocation2_spill] sm:$0xff] %v17723_v9  ;;  %v17729_v46 = vadd.f32 %v17549_v43, %v5449_v49  ;;  %7619 = vmatpush2.bf16.msra.mxu1 %v12773_v54  ;;  %v12782_v43 = vld [vmem:[%s19086_s4 + $0x5c0] ss:$8 sps:$4 sm:$0xff]   ;;  %v12790_v54 = vld [vmem:[%s19086_s4 + $0x5b4] ss:$8 sps:$4 sm:$0xff]   ;;  %v17755_v49 = vpop.f32.mrf.mxu1 }
 0x493   :  { %v5454_v36 = vpop.f32.mrf.mxu0  ;;  %7172 = vmatmul.mubr.bf16.gmra.mxu0 %v16477_v26  ;;  %7620 = vmatprep.subr.bf16.mxu1 %v12781_v45 }
 0x494   :  { %v5455_v20 = vadd.f32 %v5454_v36, %v17464_v41  ;;  %7181 = vmatprep.mubr.bf16.mxu0 %v16601_v10  ;;  %7670 = vmatpush1.bf16.msra.mxu0 %v12776_v23  ;;  %v12785_v41 = vld [vmem:[%s19086_s4 + $0x500] ss:$8 sps:$4 sm:$0xff]  }
 0x495   :  { %v5456_v8 = vpop.f32.mrf.mxu0  ;;  %7671 = vmatprep.subr.bf16.mxu0 %v12784_v0  ;;  %v12793_v0 = vld [vmem:[%s19087_s5 + $0x5f4] ss:$8 sps:$4 sm:$0xff]  }
 0x496   :  { %v17749_v33 = vadd.f32 %v17588_v53, %v5455_v20  ;;  %v5457_v45 = vadd.f32 %v5456_v8, %v17475_v31  ;;  %7621 = vmatpush2.bf16.msra.mxu1 %v12779_v63  ;;  %v12788_v31 = vld [vmem:[%s19086_s4 + $0x5b0] ss:$8 sps:$4 sm:$0xff]   ;;  %v12799_v8 = vld [vmem:[%s19087_s5 + $0x5e4] ss:$8 sps:$4 sm:$0xff]  }
 0x497   :  { %v5458_v23 = vpop.f32.mrf.mxu0  ;;  %7622 = vmatprep.subr.bf16.mxu1 %v12787_v40  ;;  %v12796_v40 = vld [vmem:[%s19086_s4 + $0x5a4] ss:$8 sps:$4 sm:$0xff]  }
 0x498   :  { %v17761_v36 = vadd.f32 %v17602_v59, %v5457_v45  ;;  %v5459_v53 = vadd.f32 %v5458_v23, %v17484_v22  ;;  %7672 = vmatpush1.bf16.msra.mxu0 %v12782_v43  ;;  %v12791_v22 = vld [vmem:[%s19087_s5 + $0x5f0] ss:$8 sps:$4 sm:$0xff]   ;;  %v17778_v59 = vpop.f32.mrf.mxu1  ;;  %v12802_v23 = vld [vmem:[%s19086_s4 + $0x594] ss:$8 sps:$4 sm:$0xff]  }
 0x499   :  { %v17767_v63 = vpop.f32.mrf.mxu0  ;;  %7673 = vmatprep.subr.bf16.mxu0 %v12790_v54  ;;  %19951 = vst [vmem:[#allocation49_spill] sm:$0xff] %v17778_v59 }
 0x49a   :  { %19950 = vst [vmem:[#allocation48_spill] sm:$0xff] %v17767_v63  ;;  %v17773_v20 = vadd.f32 %v17618_v3, %v5459_v53  ;;  %7623 = vmatpush2.bf16.msra.mxu1 %v12785_v41  ;;  %v12794_v3 = vld [vmem:[%s19086_s4 + $0x5a0] ss:$8 sps:$4 sm:$0xff]  }
 0x49b   :  { %v5464_v43 = vpop.f32.mrf.mxu0  ;;  %7182 = vmatmul.mubr.bf16.gmra.mxu0 %v16587_v38  ;;  %8116 = vmatprep.subr.bf16.mxu1 %v12793_v0  ;;  %v12797_v53 = vld [vmem:[%s19087_s5 + $0x5e0] ss:$8 sps:$4 sm:$0xff]  }
 0x49c   :  { %v5465_v54 = vadd.f32 %v5464_v43, %v17507_v17  ;;  %7191 = vmatprep.mubr.bf16.mxu0 %v16770_v28  ;;  %7674 = vmatpush1.bf16.msra.mxu0 %v12788_v31 }
 0x49d   :  { %v17789_v45 = vpop.f32.mrf.mxu1  ;;  %7625 = vmatmul.mubr.bf16.vlgmr.msra.gmra.mxu1 %v16418_v39  ;;  %v5466_v41 = vpop.f32.mrf.mxu0  ;;  %7675 = vmatprep.subr.bf16.mxu0 %v12796_v40  ;;  %v12805_v40 = vld [vmem:[%s19087_s5 + $0x5d4] ss:$8 sps:$4 sm:$0xff]  }
 0x49e   :  { %v17796_v0 = vadd.f32 %v17646_v15, %v5465_v54  ;;  %v5467_v17 = vadd.f32 %v5466_v41, %v17518_v16  ;;  %7634 = vmatprep.mubr.bf16.mxu1 %v16558_v30  ;;  %8117 = vmatpush1.bf16.msra.mxu1 %v12791_v22  ;;  %v12800_v22 = vld [vmem:[%s19086_s4 + $0x590] ss:$8 sps:$4 sm:$0xff]  }
 0x49f   :  { %v17803_v31 = vpop.f32.mrf.mxu1  ;;  %v5468_v43 = vpop.f32.mrf.mxu0  ;;  %8118 = vmatprep.subr.bf16.mxu1 %v12799_v8  ;;  %v12808_v8 = vld [vmem:[%s19086_s4 + $0x584] ss:$8 sps:$4 sm:$0xff]  }
 0x4a0   :  { %v17809_v15 = vadd.f32 %v17660_v27, %v5467_v17  ;;  %v5469_v16 = vadd.f32 %v5468_v43, %v17529_v62  ;;  %7676 = vmatpush1.bf16.msra.mxu0 %v12794_v3  ;;  %v12803_v62 = vld [vmem:[%s19087_s5 + $0x5d0] ss:$8 sps:$4 sm:$0xff]  }
 0x4a1   :  { %v17815_v54 = vpop.f32.mrf.mxu1  ;;  %v17817_v41 = vpop.f32.mrf.mxu0  ;;  %7677 = vmatprep.subr.bf16.mxu0 %v12802_v23  ;;  %v12811_v23 = vld [vmem:[%s19087_s5 + $0x5c4] ss:$8 sps:$4 sm:$0xff]  }
 0x4a2   :  { %19952 = vst [vmem:[#allocation107_spill] sm:$0xff] %v17817_v41  ;;  %v17823_v59 = vadd.f32 %v17674_v7, %v5469_v16  ;;  %8119 = vmatpush1.bf16.msra.mxu1 %v12797_v53  ;;  %v12806_v7 = vld [vmem:[%s19086_s4 + $0x580] ss:$8 sps:$4 sm:$0xff]  }
 0x4a3   :  { %v17828_v27 = vpop.f32.mrf.mxu1  ;;  %v5474_v3 = vpop.f32.mrf.mxu0  ;;  %7192 = vmatmul.mubr.bf16.gmra.mxu0 %v16716_v1  ;;  %8120 = vmatprep.subr.bf16.mxu1 %v12805_v40  ;;  %v12814_v40 = vld [vmem:[%s19087_s5 + $0x4f4] ss:$8 sps:$4 sm:$0xff]  }
 0x4a4   :  { %19953 = vst [vmem:[#allocation22_spill] sm:$0xff] %v17828_v27  ;;  %v5475_v17 = vadd.f32 %v5474_v3, %v17552_v48  ;;  %7678 = vmatpush1.bf16.msra.mxu0 %v12800_v22  ;;  %7697 = vmatprep.mubr.bf16.mxu0 %v19901_v19  ;;  %v12809_v22 = vld [vmem:[%s19087_s5 + $0x5c0] ss:$8 sps:$4 sm:$0xff]  }
 0x4a5   :  { %v5889_v53 = vpop.f32.mrf.mxu1  ;;  %7635 = vmatmul.mubr.bf16.gmra.mxu1 %v16542_v2  ;;  %v5476_v43 = vpop.f32.mrf.mxu0  ;;  %7679 = vmatprep.subr.bf16.mxu0 %v12808_v8  ;;  %v12817_v8 = vld [vmem:[%s19087_s5 + $0x5b4] ss:$8 sps:$4 sm:$0xff]  }
 0x4a6   :  { %v17844_v16 = vadd.f32 %v17711_v61, %v5475_v17  ;;  %v5477_v48 = vadd.f32 %v5476_v43, %v17561_v29  ;;  %7644 = vmatprep.mubr.bf16.mxu1 %v16671_v52  ;;  %8121 = vmatpush1.bf16.msra.mxu1 %v12803_v62  ;;  %v12812_v29 = vld [vmem:[%s19087_s5 + $0x4f0] ss:$8 sps:$4 sm:$0xff]  }
 0x4a7   :  { %v5891_v3 = vpop.f32.mrf.mxu1  ;;  %v5478_v27 = vpop.f32.mrf.mxu0  ;;  %8122 = vmatprep.subr.bf16.mxu1 %v12811_v23  ;;  %v12820_v23 = vld [vmem:[%s19087_s5 + $0x4e4] ss:$8 sps:$4 sm:$0xff]  }
 0x4a8   :  { %v17855_v41 = vadd.f32 %v17734_v60, %v5477_v48  ;;  %v5479_v61 = vadd.f32 %v5478_v27, %v17572_v56  ;;  %7680 = vmatpush1.bf16.msra.mxu0 %v12806_v7  ;;  %v12815_v56 = vld [vmem:[%s19087_s5 + $0x5b0] ss:$8 sps:$4 sm:$0xff]   ;;  %v12823_v7 = vld [vmem:[%s19087_s5 + $0x5a4] ss:$8 sps:$4 sm:$0xff]  }
 0x4a9   :  { %v5893_v62 = vpop.f32.mrf.mxu1  ;;  %v17861_v17 = vpop.f32.mrf.mxu0  ;;  %8043 = vmatprep.subr.bf16.mxu0 %v12814_v40 }
 0x4aa   :  { %19954 = vst [vmem:[#allocation138_spill] sm:$0xff] %v17861_v17  ;;  %v17867_v43 = vadd.f32 %v17755_v49, %v5479_v61  ;;  %8123 = vmatpush1.bf16.msra.mxu1 %v12809_v22  ;;  %v12818_v49 = vld [vmem:[%s19087_s5 + $0x4e0] ss:$8 sps:$4 sm:$0xff]   ;;  %v12827_v17 = vld [vmem:[%s19087_s5 + $0x590] ss:$8 sps:$4 sm:$0xff]  }
 0x4ab   :  { %v17872_v60 = vpop.f32.mrf.mxu1  ;;  %v5952_v27 = vpop.f32.mrf.mxu0  ;;  %7698 = vmatmul.mubr.bf16.vlgmr.msra.gmra.mxu0 %v16691_v44  ;;  %8124 = vmatprep.subr.bf16.mxu1 %v12817_v8  ;;  %v12826_v8 = vld [vmem:[%s19087_s5 + $0x4d4] ss:$8 sps:$4 sm:$0xff]  }
 0x4ac   :  { %19955 = vst [vmem:[#allocation109_spill] sm:$0xff] %v17867_v43  ;;  %19956 = vst [vmem:[#allocation58_spill] sm:$0xff] %v17872_v60  ;;  %v17879_v40 = vadd.f32 %v5952_v27, %v17789_v45  ;;  %8044 = vmatpush1.bf16.msra.mxu0 %v12812_v29  ;;  %7707 = vmatprep.mubr.bf16.mxu0 %v19901_v19  ;;  %v12821_v45 = vld [vmem:[%s19087_s5 + $0x5a0] ss:$8 sps:$4 sm:$0xff]  }
 0x4ad   :  { %v5899_v48 = vpop.f32.mrf.mxu1  ;;  %7645 = vmatmul.mubr.bf16.gmra.mxu1 %v16645_v34  ;;  %v5954_v22 = vpop.f32.mrf.mxu0  ;;  %8045 = vmatprep.subr.bf16.mxu0 %v12820_v23  ;;  %v12829_v23 = vld [vmem:[%s19087_s5 + $0x594] ss:$8 sps:$4 sm:$0xff]  }
 0x4ae   :  { %v17890_v61 = vadd.f32 %v5954_v22, %v17803_v31  ;;  %7654 = vmatprep.mubr.bf16.mxu1 %v16815_v11  ;;  %8125 = vmatpush1.bf16.msra.mxu1 %v12815_v56  ;;  %v12824_v31 = vld [vmem:[%s19087_s5 + $0x4d0] ss:$8 sps:$4 sm:$0xff]  }
 0x4af   :  { %v5901_v29 = vpop.f32.mrf.mxu1  ;;  %v5956_v27 = vpop.f32.mrf.mxu0  ;;  %8126 = vmatprep.subr.bf16.mxu1 %v12823_v7  ;;  %v12832_v7 = vld [vmem:[%s19087_s5 + $0x4c4] ss:$8 sps:$4 sm:$0xff]  }
 0x4b0   :  { %v17900_v60 = vadd.f32 %v5956_v27, %v17815_v54  ;;  %8046 = vmatpush1.bf16.msra.mxu0 %v12818_v49  ;;  %v12835_v27 = vld [vmem:[%s19087_s5 + $0x584] ss:$8 sps:$4 sm:$0xff]  }
 0x4b1   :  { %v5903_v56 = vpop.f32.mrf.mxu1  ;;  %v17905_v22 = vpop.f32.mrf.mxu0  ;;  %8047 = vmatprep.subr.bf16.mxu0 %v12826_v8 }
 0x4b2   :  { %19957 = vst [vmem:[#allocation7_spill] sm:$0xff] %v17905_v22  ;;  %8127 = vmatpush1.bf16.msra.mxu1 %v12821_v45  ;;  %v12830_v45 = vld [vmem:[%s19087_s5 + $0x4c0] ss:$8 sps:$4 sm:$0xff]  }
 0x4b3   :  { %v17913_v54 = vpop.f32.mrf.mxu1  ;;  %v5962_v49 = vpop.f32.mrf.mxu0  ;;  %7708 = vmatmul.mubr.bf16.gmra.mxu0 %v16732_v57  ;;  %8128 = vmatprep.subr.bf16.mxu1 %v12829_v23  ;;  %v12838_v23 = vld [vmem:[%s19087_s5 + $0x4b4] ss:$8 sps:$4 sm:$0xff]  }
 0x4b4   :  { %19958 = vst [vmem:[#allocation140_spill] sm:$0xff] %v17913_v54  ;;  %v17919_v8 = vadd.f32 %v5962_v49, %v5889_v53  ;;  %8048 = vmatpush1.bf16.msra.mxu0 %v12824_v31  ;;  %7717 = vmatprep.mubr.bf16.mxu0 %v19901_v19  ;;  %v12833_v53 = vld [vmem:[%s19087_s5 + $0x580] ss:$8 sps:$4 sm:$0xff]  }
 0x4b5   :  { %v5909_v22 = vpop.f32.mrf.mxu1  ;;  %7655 = vmatmul.mubr.bf16.gmra.mxu1 %v16788_v42  ;;  %v5964_v12 = vpop.f32.mrf.mxu0  ;;  %8049 = vmatprep.subr.bf16.mxu0 %v12832_v7  ;;  %v12841_v7 = vld [vmem:[%s19086_s4 + $0x674] ss:$8 sps:$4 sm:$0xff]  }
 0x4b6   :  { %v17929_v63 = vadd.f32 %v5964_v12, %v5891_v3  ;;  %8129 = vmatpush1.bf16.msra.mxu1 %v12827_v17  ;;  %8148 = vmatprep.mubr.bf16.mxu1 %v19901_v19  ;;  %v12836_v12 = vld [vmem:[%s19087_s5 + $0x4b0] ss:$8 sps:$4 sm:$0xff]  }
 0x4b7   :  { %v5911_v31 = vpop.f32.mrf.mxu1  ;;  %v5966_v49 = vpop.f32.mrf.mxu0  ;;  %8130 = vmatprep.subr.bf16.mxu1 %v12835_v27  ;;  %v12839_v27 = vld [vmem:[%s19086_s4 + $0x670] ss:$8 sps:$4 sm:$0xff]  }
 0x4b8   :  { %v17938_v51 = vadd.f32 %v5966_v49, %v5893_v62  ;;  %8050 = vmatpush1.bf16.msra.mxu0 %v12830_v45  ;;  %v12847_v49 = vld [vmem:[%s19086_s4 + $0x664] ss:$8 sps:$4 sm:$0xff]  }
 0x4b9   :  { %v5913_v3 = vpop.f32.mrf.mxu1  ;;  %v17943_v17 = vpop.f32.mrf.mxu0  ;;  %8051 = vmatprep.subr.bf16.mxu0 %v12838_v23 }
 0x4ba   :  { %19959 = vst [vmem:[#allocation104_spill] sm:$0xff] %v17943_v17  ;;  %8131 = vmatpush1.bf16.msra.mxu1 %v12833_v53  ;;  %v12842_v53 = vld [vmem:[%s19087_s5 + $0x4a0] ss:$8 sps:$4 sm:$0xff]  }
 0x4bb   :  { %v17951_v62 = vpop.f32.mrf.mxu1  ;;  %v5972_v45 = vpop.f32.mrf.mxu0  ;;  %7718 = vmatmul.mubr.bf16.gmra.mxu0 %v16798_v35  ;;  %8506 = vmatprep.subr.bf16.mxu1 %v12841_v7  ;;  %v12850_v7 = vld [vmem:[%s19087_s5 + $0x494] ss:$8 sps:$4 sm:$0xff]  }
 0x4bc   :  { %v17957_v23 = vadd.f32 %v5972_v45, %v5899_v48  ;;  %8052 = vmatpush1.bf16.msra.mxu0 %v12836_v12  ;;  %7727 = vmatprep.mubr.bf16.mxu0 %v19901_v19  ;;  %v12845_v48 = vld [vmem:[%s19086_s4 + $0x660] ss:$8 sps:$4 sm:$0xff]  }
 0x4bd   :  { %8149 = vmatmul.mubr.bf16.vlgmr.msra.gmra.mxu1 %v16691_v44  ;;  %v5974_v17 = vpop.f32.mrf.mxu0  ;;  %8053 = vmatprep.subr.bf16.mxu0 %v12844_v14  ;;  %v17973_v12 = vpop.f32.mrf.mxu1  ;;  %v12853_v44 = vld [vmem:[%s19086_s4 + $0x654] ss:$8 sps:$4 sm:$0xff]  }
 0x4be   :  { %v17967_v50 = vadd.f32 %v5974_v17, %v5901_v29  ;;  %8507 = vmatpush1.bf16.msra.mxu1 %v12839_v27  ;;  %8158 = vmatprep.mubr.bf16.mxu1 %v19901_v19  ;;  %v12848_v29 = vld [vmem:[%s19087_s5 + $0x490] ss:$8 sps:$4 sm:$0xff]   ;;  %v12856_v27 = vld [vmem:[%s19087_s5 + $0x484] ss:$8 sps:$4 sm:$0xff]  }
 0x4bf   :  { %v5976_v45 = vpop.f32.mrf.mxu0  ;;  %8508 = vmatprep.subr.bf16.mxu1 %v12847_v49  ;;  %v12851_v49 = vld [vmem:[%s19086_s4 + $0x650] ss:$8 sps:$4 sm:$0xff]   ;;  %v17991_v9 = vpop.f32.mrf.mxu1 }
 0x4c0   :  { %v17978_v14 = vadd.f32 %v5976_v45, %v5903_v56  ;;  %8054 = vmatpush1.bf16.msra.mxu0 %v12842_v53  ;;  %v12859_v53 = vld [vmem:[%s19086_s4 + $0x644] ss:$8 sps:$4 sm:$0xff]  }
 0x4c1   :  { %v17983_v17 = vpop.f32.mrf.mxu0  ;;  %8055 = vmatprep.subr.bf16.mxu0 %v12850_v7 }
 0x4c2   :  { %19960 = vst [vmem:[#allocation152_spill] sm:$0xff] %v17983_v17  ;;  %8509 = vmatpush1.bf16.msra.mxu1 %v12845_v48  ;;  %v12854_v48 = vld [vmem:[%s19087_s5 + $0x480] ss:$8 sps:$4 sm:$0xff]  }
 0x4c3   :  { %v5982_v56 = vpop.f32.mrf.mxu0  ;;  %7728 = vmatmul.mubr.bf16.gmra.mxu0 %v16845_v5  ;;  %8510 = vmatprep.subr.bf16.mxu1 %v12853_v44  ;;  %v12862_v44 = vld [vmem:[%s19087_s5 + $0x574] ss:$8 sps:$4 sm:$0xff]  }
 0x4c4   :  { %v17997_v7 = vadd.f32 %v5982_v56, %v5909_v22  ;;  %8056 = vmatpush1.bf16.msra.mxu0 %v12848_v29  ;;  %8075 = vmatprep.mubr.bf16.mxu0 %v16438_v37  ;;  %v12857_v22 = vld [vmem:[%s19086_s4 + $0x640] ss:$8 sps:$4 sm:$0xff]   ;;  %v18013_v37 = vpop.f32.mrf.mxu1  ;;  %v12863_v56 = vld [vmem:[%s19086_s4 + $0x630] ss:$8 sps:$4 sm:$0xff]  }
 0x4c5   :  { %8159 = vmatmul.mubr.bf16.gmra.mxu1 %v16732_v57  ;;  %v5984_v45 = vpop.f32.mrf.mxu0  ;;  %8057 = vmatprep.subr.bf16.mxu0 %v12856_v27  ;;  %v12865_v57 = vld [vmem:[%s19086_s4 + $0x634] ss:$8 sps:$4 sm:$0xff]  }
 0x4c6   :  { %v18007_v21 = vadd.f32 %v5984_v45, %v5911_v31  ;;  %8511 = vmatpush1.bf16.msra.mxu1 %v12851_v49  ;;  %8168 = vmatprep.mubr.bf16.mxu1 %v19901_v19  ;;  %v12860_v31 = vld [vmem:[%s19087_s5 + $0x570] ss:$8 sps:$4 sm:$0xff]   ;;  %v12868_v49 = vld [vmem:[%s19087_s5 + $0x564] ss:$8 sps:$4 sm:$0xff]   ;;  %v12874_v45 = vld [vmem:[%s19087_s5 + $0x554] ss:$8 sps:$4 sm:$0xff]  }
 0x4c7   :  { %v5986_v29 = vpop.f32.mrf.mxu0  ;;  %8512 = vmatprep.subr.bf16.mxu1 %v12859_v53  ;;  %v18029_v53 = vpop.f32.mrf.mxu1 }
 0x4c8   :  { %v18018_v27 = vadd.f32 %v5986_v29, %v5913_v3  ;;  %8058 = vmatpush1.bf16.msra.mxu0 %v12854_v48  ;;  %19961 = vst [vmem:[#allocation66_spill] sm:$0xff] %v18029_v53  ;;  %v12871_v3 = vld [vmem:[%s19086_s4 + $0x624] ss:$8 sps:$4 sm:$0xff]   ;;  %v12866_v48 = vld [vmem:[%s19087_s5 + $0x560] ss:$8 sps:$4 sm:$0xff]  }
 0x4c9   :  { %8059 = vmatprep.subr.bf16.mxu0 %v12862_v44  ;;  %v12869_v44 = vld [vmem:[%s19086_s4 + $0x620] ss:$8 sps:$4 sm:$0xff]   ;;  %v12877_v29 = vld [vmem:[%s19086_s4 + $0x614] ss:$8 sps:$4 sm:$0xff]   ;;  %v18139_v58 = vpop.f32.mrf.mxu0 }
 0x4ca   :  { %8513 = vmatpush1.bf16.msra.mxu1 %v12857_v22  ;;  %v18045_v22 = vpop.f32.mrf.mxu1  ;;  %v12905_v53 = vld [vmem:[%s19086_s4 + $0x6c0] ss:$8 sps:$4 sm:$0xff]  }
 0x4cb   :  { %8514 = vmatprep.subr.bf16.mxu1 %v12865_v57  ;;  %v12880_v57 = vld [vmem:[%s19087_s5 + $0x544] ss:$8 sps:$4 sm:$0xff]  }
 0x4cc   :  { %8060 = vmatpush2.bf16.msra.mxu0 %v12860_v31  ;;  %v12875_v31 = vld [vmem:[%s19086_s4 + $0x610] ss:$8 sps:$4 sm:$0xff]  }
 0x4cd   :  { %8169 = vmatmul.mubr.bf16.gmra.mxu1 %v16798_v35  ;;  %8061 = vmatprep.subr.bf16.mxu0 %v12868_v49  ;;  %v12872_v35 = vld [vmem:[%s19087_s5 + $0x550] ss:$8 sps:$4 sm:$0xff]   ;;  %v18059_v49 = vpop.f32.mrf.mxu1 }
 0x4ce   :  { %8515 = vmatpush1.bf16.msra.mxu1 %v12863_v56  ;;  %8178 = vmatprep.mubr.bf16.mxu1 %v19901_v19  ;;  %v12883_v56 = vld [vmem:[%s19086_s4 + $0x604] ss:$8 sps:$4 sm:$0xff]  }
 0x4cf   :  { %8516 = vmatprep.subr.bf16.mxu1 %v12871_v3  ;;  %v12878_v3 = vld [vmem:[%s19087_s5 + $0x540] ss:$8 sps:$4 sm:$0xff]  }
 0x4d0   :  { %8062 = vmatpush2.bf16.msra.mxu0 %v12866_v48  ;;  %v12886_v48 = vld [vmem:[%s19087_s5 + $0x534] ss:$8 sps:$4 sm:$0xff]  }
 0x4d1   :  { %8063 = vmatprep.subr.bf16.mxu0 %v12874_v45  ;;  %v12881_v45 = vld [vmem:[%s19086_s4 + $0x600] ss:$8 sps:$4 sm:$0xff]  }
 0x4d2   :  { %8517 = vmatpush1.bf16.msra.mxu1 %v12869_v44  ;;  %v18075_v44 = vpop.f32.mrf.mxu1 }
 0x4d3   :  { %8518 = vmatprep.subr.bf16.mxu1 %v12877_v29  ;;  %v12889_v29 = vld [vmem:[%s19086_s4 + $0x6f4] ss:$8 sps:$4 sm:$0xff]  }
 0x4d4   :  { %8064 = vmatpush2.bf16.msra.mxu0 %v12872_v35  ;;  %v12892_v35 = vld [vmem:[%s19087_s5 + $0x524] ss:$8 sps:$4 sm:$0xff]  }
 0x4d5   :  { %8179 = vmatmul.mubr.bf16.gmra.mxu1 %v16845_v5  ;;  %8065 = vmatprep.subr.bf16.mxu0 %v12880_v57  ;;  %v12884_v5 = vld [vmem:[%s19087_s5 + $0x530] ss:$8 sps:$4 sm:$0xff]  }
 0x4d6   :  { %8519 = vmatpush1.bf16.msra.mxu1 %v12875_v31  ;;  %8538 = vmatprep.mubr.bf16.mxu1 %v16496_v55  ;;  %v12887_v57 = vld [vmem:[%s19086_s4 + $0x6f0] ss:$8 sps:$4 sm:$0xff]   ;;  %v18089_v31 = vpop.f32.mrf.mxu1 }
 0x4d7   :  { %8520 = vmatprep.subr.bf16.mxu1 %v12883_v56  ;;  %19962 = vst [vmem:[#allocation59_spill] sm:$0xff] %v18089_v31  ;;  %v12895_v56 = vld [vmem:[%s19086_s4 + $0x6e4] ss:$8 sps:$4 sm:$0xff]   ;;  %v12899_v31 = vld [vmem:[%s19086_s4 + $0x6d0] ss:$8 sps:$4 sm:$0xff]  }
 0x4d8   :  { %8066 = vmatpush2.bf16.msra.mxu0 %v12878_v3  ;;  %v12890_v3 = vld [vmem:[%s19087_s5 + $0x520] ss:$8 sps:$4 sm:$0xff]  }
 0x4d9   :  { %8067 = vmatprep.subr.bf16.mxu0 %v12886_v48  ;;  %v12898_v48 = vld [vmem:[%s19087_s5 + $0x514] ss:$8 sps:$4 sm:$0xff]  }
 0x4da   :  { %8521 = vmatpush1.bf16.msra.mxu1 %v12881_v45  ;;  %v12893_v45 = vld [vmem:[%s19086_s4 + $0x6e0] ss:$8 sps:$4 sm:$0xff]  }
 0x4db   :  { %8522 = vmatprep.subr.bf16.mxu1 %v12889_v29  ;;  %v18103_v29 = vpop.f32.mrf.mxu1 }
 0x4dc   :  { %8068 = vmatpush2.bf16.msra.mxu0 %v12884_v5  ;;  %v12901_v5 = vld [vmem:[%s19086_s4 + $0x6d4] ss:$8 sps:$4 sm:$0xff]  }
 0x4dd   :  { %8069 = vmatprep.subr.bf16.mxu0 %v12892_v35  ;;  %v12896_v35 = vld [vmem:[%s19087_s5 + $0x510] ss:$8 sps:$4 sm:$0xff]  }
 0x4de   :  { %8523 = vmatpush2.bf16.msra.mxu1 %v12887_v57  ;;  %v12904_v57 = vld [vmem:[%s19087_s5 + $0x504] ss:$8 sps:$4 sm:$0xff]  }
 0x4df   :  { %8524 = vmatprep.subr.bf16.mxu1 %v12895_v56  ;;  %v18117_v56 = vpop.f32.mrf.mxu1 }
 0x4e0   :  { %8070 = vmatpush2.bf16.msra.mxu0 %v12890_v3  ;;  %v12907_v3 = vld [vmem:[%s19086_s4 + $0x6c4] ss:$8 sps:$4 sm:$0xff]  }
 0x4e1   :  { %8071 = vmatprep.subr.bf16.mxu0 %v12898_v48  ;;  %v12902_v48 = vld [vmem:[%s19087_s5 + $0x500] ss:$8 sps:$4 sm:$0xff]  }
 0x4e2   :  { %8525 = vmatpush2.bf16.msra.mxu1 %v12893_v45  ;;  %v12910_v45 = vld [vmem:[%s19086_s4 + $0x774] ss:$8 sps:$4 sm:$0xff]  }
 0x4e3   :  { %8526 = vmatprep.subr.bf16.mxu1 %v12901_v5  ;;  %v18131_v5 = vpop.f32.mrf.mxu1 }
 0x4e4   :  { %8072 = vmatpush2.bf16.msra.mxu0 %v12896_v35  ;;  %v12913_v35 = vld [vmem:[%s19086_s4 + $0x6b4] ss:$8 sps:$4 sm:$0xff]  }
 0x4e5   :  { %8073 = vmatprep.subr.bf16.mxu0 %v12904_v57  ;;  %v12908_v57 = vld [vmem:[%s19086_s4 + $0x770] ss:$8 sps:$4 sm:$0xff]   ;;  %v18147_v17 = vpop.f32.mrf.mxu1 }
 0x4e6   :  { %8527 = vmatpush2.bf16.msra.mxu1 %v12899_v31  ;;  %v12916_v31 = vld [vmem:[%s19086_s4 + $0x764] ss:$8 sps:$4 sm:$0xff]   ;;  %19963 = vst [vmem:[#allocation113_spill] sm:$0xff] %v18147_v17 }
 0x4e7   :  { %8528 = vmatprep.subr.bf16.mxu1 %v12907_v3  ;;  %v12911_v3 = vld [vmem:[%s19086_s4 + $0x6b0] ss:$8 sps:$4 sm:$0xff]  }
 0x4e8   :  { %8074 = vmatpush2.bf16.msra.mxu0 %v12902_v48  ;;  %v12919_v48 = vld [vmem:[%s19086_s4 + $0x6a4] ss:$8 sps:$4 sm:$0xff]  }
 0x4e9   :  { %8579 = vmatprep.subr.bf16.mxu0 %v12910_v45 }
 0x4ea   :  { %8529 = vmatpush2.bf16.msra.mxu1 %v12905_v53  ;;  %v12914_v53 = vld [vmem:[%s19086_s4 + $0x760] ss:$8 sps:$4 sm:$0xff]  }
 0x4eb   :  { %v6265_v54 = vpop.f32.mrf.mxu0  ;;  %8076 = vmatmul.mubr.bf16.vlgmr.msra.gmra.mxu0 %v16418_v39  ;;  %8530 = vmatprep.subr.bf16.mxu1 %v12913_v35  ;;  %v12922_v39 = vld [vmem:[%s19086_s4 + $0x754] ss:$8 sps:$4 sm:$0xff]  }
 0x4ec   :  { %v6266_v45 = vadd.f32 %v6265_v54, %v17879_v40  ;;  %8085 = vmatprep.mubr.bf16.mxu0 %v16558_v30  ;;  %8580 = vmatpush1.bf16.msra.mxu0 %v12908_v57  ;;  %v12917_v30 = vld [vmem:[%s19086_s4 + $0x6a0] ss:$8 sps:$4 sm:$0xff]   ;;  %v18168_v40 = vpop.f32.mrf.mxu1  ;;  %v12925_v57 = vld [vmem:[%s19086_s4 + $0x694] ss:$8 sps:$4 sm:$0xff]  }
 0x4ed   :  { %v6267_v43 = vpop.f32.mrf.mxu0  ;;  %8581 = vmatprep.subr.bf16.mxu0 %v12916_v31 }
 0x4ee   :  { %v18162_v35 = vadd.f32 %v17973_v12, %v6266_v45  ;;  %v6268_v17 = vadd.f32 %v6267_v43, %v17890_v61  ;;  %8531 = vmatpush2.bf16.msra.mxu1 %v12911_v3  ;;  %v12920_v43 = vld [vmem:[%s19086_s4 + $0x750] ss:$8 sps:$4 sm:$0xff]   ;;  %v12928_v3 = vld [vmem:[%s19086_s4 + $0x744] ss:$8 sps:$4 sm:$0xff]  }
 0x4ef   :  { %v6269_v54 = vpop.f32.mrf.mxu0  ;;  %8532 = vmatprep.subr.bf16.mxu1 %v12919_v48  ;;  %v12931_v45 = vld [vmem:[%s19086_s4 + $0x684] ss:$8 sps:$4 sm:$0xff]  }
 0x4f0   :  { %v18174_v31 = vadd.f32 %v17991_v9, %v6268_v17  ;;  %v6270_v12 = vadd.f32 %v6269_v54, %v17900_v60  ;;  %8582 = vmatpush1.bf16.msra.mxu0 %v12914_v53  ;;  %v12923_v9 = vld [vmem:[%s19086_s4 + $0x690] ss:$8 sps:$4 sm:$0xff]   ;;  %v18191_v60 = vpop.f32.mrf.mxu1 }
 0x4f1   :  { %v18180_v61 = vpop.f32.mrf.mxu0  ;;  %8583 = vmatprep.subr.bf16.mxu0 %v12922_v39 }
 0x4f2   :  { %v18186_v48 = vadd.f32 %v18013_v37, %v6270_v12  ;;  %8533 = vmatpush2.bf16.msra.mxu1 %v12917_v30  ;;  %v12926_v37 = vld [vmem:[%s19086_s4 + $0x740] ss:$8 sps:$4 sm:$0xff]   ;;  %v12937_v12 = vld [vmem:[%s19087_s5 + $0x774] ss:$8 sps:$4 sm:$0xff]  }
 0x4f3   :  { %v6275_v17 = vpop.f32.mrf.mxu0  ;;  %8086 = vmatmul.mubr.bf16.gmra.mxu0 %v16542_v2  ;;  %8534 = vmatprep.subr.bf16.mxu1 %v12925_v57  ;;  %v12934_v2 = vld [vmem:[%s19086_s4 + $0x734] ss:$8 sps:$4 sm:$0xff]  }
 0x4f4   :  { %v6276_v53 = vadd.f32 %v6275_v17, %v17919_v8  ;;  %8095 = vmatprep.mubr.bf16.mxu0 %v16671_v52  ;;  %8584 = vmatpush1.bf16.msra.mxu0 %v12920_v43  ;;  %v12929_v52 = vld [vmem:[%s19086_s4 + $0x680] ss:$8 sps:$4 sm:$0xff]   ;;  %v18212_v8 = vpop.f32.mrf.mxu1 }
 0x4f5   :  { %v6277_v39 = vpop.f32.mrf.mxu0  ;;  %8585 = vmatprep.subr.bf16.mxu0 %v12928_v3 }
 0x4f6   :  { %v18206_v30 = vadd.f32 %v18045_v22, %v6276_v53  ;;  %v6278_v54 = vadd.f32 %v6277_v39, %v17929_v63  ;;  %8535 = vmatpush2.bf16.msra.mxu1 %v12923_v9  ;;  %v12932_v63 = vld [vmem:[%s19086_s4 + $0x730] ss:$8 sps:$4 sm:$0xff]   ;;  %v12940_v9 = vld [vmem:[%s19086_s4 + $0x724] ss:$8 sps:$4 sm:$0xff]  }
 0x4f7   :  { %v6279_v57 = vpop.f32.mrf.mxu0  ;;  %8536 = vmatprep.subr.bf16.mxu1 %v12931_v45  ;;  %v12943_v53 = vld [vmem:[%s19087_s5 + $0x764] ss:$8 sps:$4 sm:$0xff]  }
 0x4f8   :  { %v18218_v43 = vadd.f32 %v18059_v49, %v6278_v54  ;;  %v6280_v22 = vadd.f32 %v6279_v57, %v17938_v51  ;;  %8586 = vmatpush1.bf16.msra.mxu0 %v12926_v37  ;;  %v12935_v51 = vld [vmem:[%s19087_s5 + $0x770] ss:$8 sps:$4 sm:$0xff]   ;;  %v18235_v49 = vpop.f32.mrf.mxu1 }
 0x4f9   :  { %v18224_v3 = vpop.f32.mrf.mxu0  ;;  %8587 = vmatprep.subr.bf16.mxu0 %v12934_v2 }
 0x4fa   :  { %v18230_v17 = vadd.f32 %v18075_v44, %v6280_v22  ;;  %8537 = vmatpush2.bf16.msra.mxu1 %v12929_v52  ;;  %v12938_v44 = vld [vmem:[%s19086_s4 + $0x720] ss:$8 sps:$4 sm:$0xff]   ;;  %v12944_v22 = vld [vmem:[%s19086_s4 + $0x710] ss:$8 sps:$4 sm:$0xff]  }
 0x4fb   :  { %v6285_v45 = vpop.f32.mrf.mxu0  ;;  %8096 = vmatmul.mubr.bf16.gmra.mxu0 %v16645_v34  ;;  %9030 = vmatprep.subr.bf16.mxu1 %v12937_v12  ;;  %v12946_v34 = vld [vmem:[%s19086_s4 + $0x714] ss:$8 sps:$4 sm:$0xff]  }
 0x4fc   :  { %v6286_v37 = vadd.f32 %v6285_v45, %v17957_v23  ;;  %8105 = vmatprep.mubr.bf16.mxu0 %v16815_v11  ;;  %8588 = vmatpush1.bf16.msra.mxu0 %v12932_v63  ;;  %v12941_v23 = vld [vmem:[%s19087_s5 + $0x760] ss:$8 sps:$4 sm:$0xff]   ;;  %v12949_v12 = vld [vmem:[%s19087_s5 + $0x754] ss:$8 sps:$4 sm:$0xff]  }
 0x4fd   :  { %v18246_v39 = vpop.f32.mrf.mxu1  ;;  %8539 = vmatmul.mubr.bf16.vlgmr.msra.gmra.mxu1 %v16477_v26  ;;  %v6287_v2 = vpop.f32.mrf.mxu0  ;;  %8589 = vmatprep.subr.bf16.mxu0 %v12940_v9 }
 0x4fe   :  { %v18253_v54 = vadd.f32 %v18103_v29, %v6286_v37  ;;  %v6288_v11 = vadd.f32 %v6287_v2, %v17967_v50  ;;  %8548 = vmatprep.mubr.bf16.mxu1 %v16601_v10  ;;  %9031 = vmatpush1.bf16.msra.mxu1 %v12935_v51  ;;  %v12952_v51 = vld [vmem:[%s19086_s4 + $0x704] ss:$8 sps:$4 sm:$0xff]  }
 0x4ff   :  { %v18260_v52 = vpop.f32.mrf.mxu1  ;;  %v6289_v57 = vpop.f32.mrf.mxu0  ;;  %9032 = vmatprep.subr.bf16.mxu1 %v12943_v53  ;;  %v12955_v37 = vld [vmem:[%s19087_s5 + $0x744] ss:$8 sps:$4 sm:$0xff]  }
 0x500   :  { %v18266_v29 = vadd.f32 %v18117_v56, %v6288_v11  ;;  %v6290_v50 = vadd.f32 %v6289_v57, %v17978_v14  ;;  %8590 = vmatpush1.bf16.msra.mxu0 %v12938_v44  ;;  %v12947_v14 = vld [vmem:[%s19087_s5 + $0x750] ss:$8 sps:$4 sm:$0xff]  }
 0x501   :  { %v18272_v63 = vpop.f32.mrf.mxu1  ;;  %v18274_v9 = vpop.f32.mrf.mxu0  ;;  %8591 = vmatprep.subr.bf16.mxu0 %v12946_v34 }
 0x502   :  { %v18280_v45 = vadd.f32 %v18131_v5, %v6290_v50  ;;  %9033 = vmatpush1.bf16.msra.mxu1 %v12941_v23  ;;  %v12950_v5 = vld [vmem:[%s19086_s4 + $0x700] ss:$8 sps:$4 sm:$0xff]   ;;  %v12961_v50 = vld [vmem:[%s19087_s5 + $0x734] ss:$8 sps:$4 sm:$0xff]  }
 0x503   :  { %v18285_v56 = vpop.f32.mrf.mxu1  ;;  %v6295_v53 = vpop.f32.mrf.mxu0  ;;  %8106 = vmatmul.mubr.bf16.gmra.mxu0 %v16788_v42  ;;  %9034 = vmatprep.subr.bf16.mxu1 %v12949_v12  ;;  %v12958_v42 = vld [vmem:[%s19087_s5 + $0x674] ss:$8 sps:$4 sm:$0xff]   ;;  %v12953_v23 = vld [vmem:[%s19087_s5 + $0x740] ss:$8 sps:$4 sm:$0xff]  }
 0x504   :  { %v6296_v44 = vadd.f32 %v6295_v53, %v17997_v7  ;;  %8592 = vmatpush1.bf16.msra.mxu0 %v12944_v22  ;;  %8611 = vmatprep.mubr.bf16.mxu0 %v19901_v19 }
 0x505   :  { %v18296_v2 = vpop.f32.mrf.mxu1  ;;  %8549 = vmatmul.mubr.bf16.gmra.mxu1 %v16587_v38  ;;  %v6297_v34 = vpop.f32.mrf.mxu0  ;;  %8593 = vmatprep.subr.bf16.mxu0 %v12952_v51  ;;  %v12956_v51 = vld [vmem:[%s19087_s5 + $0x670] ss:$8 sps:$4 sm:$0xff]  }
 0x506   :  { %v18303_v11 = vadd.f32 %v18168_v40, %v6296_v44  ;;  %v6298_v7 = vadd.f32 %v6297_v34, %v18007_v21  ;;  %8558 = vmatprep.mubr.bf16.mxu1 %v16770_v28  ;;  %9035 = vmatpush1.bf16.msra.mxu1 %v12947_v14  ;;  %v5989_v40 = vadd.f32 %v18139_v58, %v17951_v62 }
 0x507   :  { %v18310_v57 = vpop.f32.mrf.mxu1  ;;  %v6299_v12 = vpop.f32.mrf.mxu0  ;;  %9036 = vmatprep.subr.bf16.mxu1 %v12955_v37  ;;  %v12964_v37 = vld [vmem:[%s19087_s5 + $0x664] ss:$8 sps:$4 sm:$0xff]  }
 0x508   :  { %v18318_v21 = vadd.f32 %v18191_v60, %v6298_v7  ;;  %v6300_v22 = vadd.f32 %v6299_v12, %v18018_v27  ;;  %8594 = vmatpush1.bf16.msra.mxu0 %v12950_v5  ;;  %v12959_v27 = vld [vmem:[%s19087_s5 + $0x730] ss:$8 sps:$4 sm:$0xff]   ;;  %v12967_v5 = vld [vmem:[%s19087_s5 + $0x724] ss:$8 sps:$4 sm:$0xff]   ;;  %v12970_v12 = vld [vmem:[%s19087_s5 + $0x654] ss:$8 sps:$4 sm:$0xff]  }
 0x509   :  { %v18324_v14 = vpop.f32.mrf.mxu1  ;;  %v6301_v53 = vpop.f32.mrf.mxu0  ;;  %8957 = vmatprep.subr.bf16.mxu0 %v12958_v42  ;;  %v12962_v42 = vld [vmem:[%s19087_s5 + $0x660] ss:$8 sps:$4 sm:$0xff]  }
 0x50a   :  { %v18330_v58 = vadd.f32 %v18212_v8, %v6300_v22  ;;  %v6302_v62 = vadd.f32 %v6301_v53, %v5989_v40  ;;  %9037 = vmatpush1.bf16.msra.mxu1 %v12953_v23 }
 0x50b   :  { %v18335_v60 = vpop.f32.mrf.mxu1  ;;  %v6785_v44 = vpop.f32.mrf.mxu0  ;;  %8612 = vmatmul.mubr.bf16.vlgmr.msra.gmra.mxu0 %v16664_v25  ;;  %9038 = vmatprep.subr.bf16.mxu1 %v12961_v50  ;;  %v12965_v50 = vld [vmem:[%s19087_s5 + $0x720] ss:$8 sps:$4 sm:$0xff]  }
 0x50c   :  { %v18342_v34 = vadd.f32 %v18235_v49, %v6302_v62  ;;  %v6786_v8 = vadd.f32 %v6785_v44, %v18246_v39  ;;  %8958 = vmatpush1.bf16.msra.mxu0 %v12956_v51  ;;  %8621 = vmatprep.mubr.bf16.mxu0 %v19901_v19  ;;  %v12973_v51 = vld [vmem:[%s19087_s5 + $0x714] ss:$8 sps:$4 sm:$0xff]  }
 0x50d   :  { %v6732_v7 = vpop.f32.mrf.mxu1  ;;  %8559 = vmatmul.mubr.bf16.gmra.mxu1 %v16716_v1  ;;  %v6787_v23 = vpop.f32.mrf.mxu0  ;;  %8959 = vmatprep.subr.bf16.mxu0 %v12964_v37 }
 0x50e   :  { %v18354_v49 = vadd.f32 %v6786_v8, %v17705_v24  ;;  %v6788_v39 = vadd.f32 %v6787_v23, %v18260_v52  ;;  %8568 = vmatprep.mubr.bf16.mxu1 %v16840_v32  ;;  %9039 = vmatpush1.bf16.msra.mxu1 %v12959_v27  ;;  %v12968_v52 = vld [vmem:[%s19087_s5 + $0x650] ss:$8 sps:$4 sm:$0xff]   ;;  %v12976_v27 = vld [vmem:[%s19087_s5 + $0x644] ss:$8 sps:$4 sm:$0xff]  }
 0x50f   :  { %v6734_v40 = vpop.f32.mrf.mxu1  ;;  %v6789_v22 = vpop.f32.mrf.mxu0  ;;  %9040 = vmatprep.subr.bf16.mxu1 %v12967_v5 }
 0x510   :  { %v18365_v53 = vadd.f32 %v6788_v39, %v17717_v18  ;;  %v6790_v24 = vadd.f32 %v6789_v22, %v18272_v63  ;;  %8960 = vmatpush1.bf16.msra.mxu0 %v12962_v42  ;;  %v12971_v63 = vld [vmem:[%s19087_s5 + $0x710] ss:$8 sps:$4 sm:$0xff]   ;;  %v12979_v42 = vld [vmem:[%s19087_s5 + $0x704] ss:$8 sps:$4 sm:$0xff]   ;;  %v12982_v39 = vld [vmem:[%s19087_s5 + $0x634] ss:$8 sps:$4 sm:$0xff]  }
 0x511   :  { %v6736_v37 = vpop.f32.mrf.mxu1  ;;  %v6791_v62 = vpop.f32.mrf.mxu0  ;;  %8961 = vmatprep.subr.bf16.mxu0 %v12970_v12  ;;  %v12977_v22 = vld [vmem:[%s19087_s5 + $0x700] ss:$8 sps:$4 sm:$0xff]  }
 0x512   :  { %v18375_v44 = vadd.f32 %v6790_v24, %v17729_v46  ;;  %v18378_v18 = vadd.f32 %v6791_v62, %v18285_v56  ;;  %9041 = vmatpush1.bf16.msra.mxu1 %v12965_v50  ;;  %v12974_v56 = vld [vmem:[%s19087_s5 + $0x640] ss:$8 sps:$4 sm:$0xff]  }
 0x513   :  { %v6738_v5 = vpop.f32.mrf.mxu1  ;;  %v6795_v8 = vpop.f32.mrf.mxu0  ;;  %8622 = vmatmul.mubr.bf16.gmra.mxu0 %v16720_v13  ;;  %9042 = vmatprep.subr.bf16.mxu1 %v12973_v51 }
 0x514   :  { %v6796_v46 = vadd.f32 %v6795_v8, %v18296_v2  ;;  %8962 = vmatpush1.bf16.msra.mxu0 %v12968_v52  ;;  %8631 = vmatprep.mubr.bf16.mxu0 %v19901_v19 }
 0x515   :  { %v6742_v23 = vpop.f32.mrf.mxu1  ;;  %8569 = vmatmul.mubr.bf16.gmra.mxu1 %v16830_v47  ;;  %v6797_v12 = vpop.f32.mrf.mxu0  ;;  %8963 = vmatprep.subr.bf16.mxu0 %v12976_v27 }
 0x516   :  { %v18397_v50 = vadd.f32 %v6796_v46, %v17749_v33  ;;  %v6798_v2 = vadd.f32 %v6797_v12, %v18310_v57  ;;  %9043 = vmatpush1.bf16.msra.mxu1 %v12971_v63  ;;  %9062 = vmatprep.mubr.bf16.mxu1 %v19901_v19  ;;  %v12980_v33 = vld [vmem:[%s19087_s5 + $0x630] ss:$8 sps:$4 sm:$0xff]   ;;  %v12985_v63 = vld [vmem:[%s19087_s5 + $0x624] ss:$8 sps:$4 sm:$0xff]  }
 0x517   :  { %v6744_v51 = vpop.f32.mrf.mxu1  ;;  %v6799_v24 = vpop.f32.mrf.mxu0  ;;  %9044 = vmatprep.subr.bf16.mxu1 %v12979_v42 }
 0x518   :  { %v18405_v52 = vadd.f32 %v6798_v2, %v17761_v36  ;;  %v6800_v62 = vadd.f32 %v6799_v24, %v18324_v14  ;;  %8964 = vmatpush1.bf16.msra.mxu0 %v12974_v56  ;;  %v12983_v56 = vld [vmem:[%s19087_s5 + $0x620] ss:$8 sps:$4 sm:$0xff]  }
 0x519   :  { %v6746_v57 = vpop.f32.mrf.mxu1  ;;  %v6801_v27 = vpop.f32.mrf.mxu0  ;;  %8965 = vmatprep.subr.bf16.mxu0 %v12982_v39 }
 0x51a   :  { %v18415_v8 = vadd.f32 %v6800_v62, %v17773_v20  ;;  %v18418_v36 = vadd.f32 %v6801_v27, %v18335_v60  ;;  %9045 = vmatpush1.bf16.msra.mxu1 %v12977_v22  ;;  %v12988_v60 = vld [vmem:[%s19087_s5 + $0x614] ss:$8 sps:$4 sm:$0xff]  }
 0x51b   :  { %v6748_v14 = vpop.f32.mrf.mxu1  ;;  %v6805_v42 = vpop.f32.mrf.mxu0  ;;  %8632 = vmatmul.mubr.bf16.gmra.mxu0 %v16803_v4 }
 0x51c   :  { %v6806_v46 = vadd.f32 %v6805_v42, %v6732_v7  ;;  %8966 = vmatpush1.bf16.msra.mxu0 %v12980_v33  ;;  %8641 = vmatprep.mubr.bf16.mxu0 %v19901_v19 }
 0x51d   :  { %9063 = vmatmul.mubr.bf16.vlgmr.msra.gmra.mxu1 %v16664_v25  ;;  %v6807_v20 = vpop.f32.mrf.mxu0  ;;  %8967 = vmatprep.subr.bf16.mxu0 %v12985_v63  ;;  %v18433_v7 = vpop.f32.mrf.mxu1  ;;  %v12986_v25 = vld [vmem:[%s19087_s5 + $0x610] ss:$8 sps:$4 sm:$0xff]   ;;  %v12989_v63 = vld [vmem:[%s19087_s5 + $0x600] ss:$8 sps:$4 sm:$0xff]  }
 0x51e   :  { %v18430_v12 = vadd.f32 %v6806_v46, %v17796_v0  ;;  %v6808_v39 = vadd.f32 %v6807_v20, %v6734_v40  ;;  %9072 = vmatprep.mubr.bf16.mxu1 %v19901_v19  ;;  %v12991_v0 = vld [vmem:[%s19087_s5 + $0x604] ss:$8 sps:$4 sm:$0xff]  }
 0x51f   :  { %v6809_v2 = vpop.f32.mrf.mxu0  ;;  %v18449_v27 = vpop.f32.mrf.mxu1 }
 0x520   :  { %v18436_v22 = vadd.f32 %v6808_v39, %v17809_v15  ;;  %v6810_v24 = vadd.f32 %v6809_v2, %v6736_v37  ;;  %8968 = vmatpush1.bf16.msra.mxu0 %v12983_v56 }
 0x521   :  { %v6811_v62 = vpop.f32.mrf.mxu0  ;;  %8969 = vmatprep.subr.bf16.mxu0 %v12988_v60 }
 0x522   :  { %v18445_v40 = vadd.f32 %v6810_v24, %v17823_v59  ;;  %v18447_v33 = vadd.f32 %v6811_v62, %v6738_v5  ;;  %v12994_v59 = vld [vmem:[%s19087_s5 + $0x6f4] ss:$8 sps:$4 sm:$0xff]   ;;  %v13003_v62 = vld [vmem:[%s19087_s5 + $0x6c4] ss:$8 sps:$4 sm:$0xff]  }
 0x523   :  { %v6815_v15 = vpop.f32.mrf.mxu0  ;;  %8642 = vmatmul.mubr.bf16.gmra.mxu0 %v16847_v6 }
 0x524   :  { %v6816_v37 = vadd.f32 %v6815_v15, %v6742_v23  ;;  %8970 = vmatpush1.bf16.msra.mxu0 %v12986_v25  ;;  %8989 = vmatprep.mubr.bf16.mxu0 %v16496_v55  ;;  %v7240_v23 = vpop.f32.mrf.mxu1 }
 0x525   :  { %9073 = vmatmul.mubr.bf16.gmra.mxu1 %v16720_v13  ;;  %v6817_v42 = vpop.f32.mrf.mxu0  ;;  %8971 = vmatprep.subr.bf16.mxu0 %v12991_v0  ;;  %v12992_v13 = vld [vmem:[%s19087_s5 + $0x6f0] ss:$8 sps:$4 sm:$0xff]  }
 0x526   :  { %v18461_v5 = vadd.f32 %v6816_v37, %v17844_v16  ;;  %v6818_v46 = vadd.f32 %v6817_v42, %v6744_v51  ;;  %9082 = vmatprep.mubr.bf16.mxu1 %v19901_v19  ;;  %v12997_v16 = vld [vmem:[%s19087_s5 + $0x6e4] ss:$8 sps:$4 sm:$0xff]   ;;  %v19964_v51 = vld [vmem:[#allocation109_spill] sm:$0xff]  ;;  %v7242_v24 = vpop.f32.mrf.mxu1 }
 0x527   :  { %v6819_v55 = vpop.f32.mrf.mxu0  ;;  %v13004_v37 = vld [vmem:[%s19087_s5 + $0x6b0] ss:$8 sps:$4 sm:$0xff]  }
 0x528   :  { %v18465_v56 = vadd.f32 %v6818_v46, %v17855_v41  ;;  %v6820_v20 = vadd.f32 %v6819_v55, %v6746_v57  ;;  %8972 = vmatpush1.bf16.msra.mxu0 %v12989_v63  ;;  %v12995_v41 = vld [vmem:[%s19087_s5 + $0x6e0] ss:$8 sps:$4 sm:$0xff]   ;;  %v13000_v57 = vld [vmem:[%s19087_s5 + $0x6d4] ss:$8 sps:$4 sm:$0xff]   ;;  %v7246_v25 = vpop.f32.mrf.mxu1  ;;  %v13009_v63 = vld [vmem:[%s19087_s5 + $0x6a4] ss:$8 sps:$4 sm:$0xff]  }
 0x529   :  { %v6821_v60 = vpop.f32.mrf.mxu0  ;;  %8973 = vmatprep.subr.bf16.mxu0 %v12994_v59  ;;  %v13012_v59 = vld [vmem:[%s19087_s5 + $0x694] ss:$8 sps:$4 sm:$0xff]   ;;  %v13010_v55 = vld [vmem:[%s19087_s5 + $0x690] ss:$8 sps:$4 sm:$0xff]  }
 0x52a   :  { %v18474_v39 = vadd.f32 %v6820_v20, %v19964_v51  ;;  %v18476_v2 = vadd.f32 %v6821_v60, %v6748_v14  ;;  %v12998_v14 = vld [vmem:[%s19087_s5 + $0x6d0] ss:$8 sps:$4 sm:$0xff]   ;;  %v7248_v0 = vpop.f32.mrf.mxu1  ;;  %v13015_v20 = vld [vmem:[%s19087_s5 + $0x684] ss:$8 sps:$4 sm:$0xff]   ;;  %v13013_v60 = vld [vmem:[%s19087_s5 + $0x680] ss:$8 sps:$4 sm:$0xff]  }
 0x52c   :  { %8974 = vmatpush2.bf16.msra.mxu0 %v12992_v13  ;;  %v7250_v15 = vpop.f32.mrf.mxu1 }
 0x52d   :  { %9083 = vmatmul.mubr.bf16.gmra.mxu1 %v16803_v4  ;;  %8975 = vmatprep.subr.bf16.mxu0 %v12997_v16  ;;  %v13001_v4 = vld [vmem:[%s19087_s5 + $0x6c0] ss:$8 sps:$4 sm:$0xff]  }
 0x52e   :  { %9092 = vmatprep.mubr.bf16.mxu1 %v19901_v19  ;;  %v13006_v19 = vld [vmem:[%s19087_s5 + $0x6b4] ss:$8 sps:$4 sm:$0xff]   ;;  %v7252_v42 = vpop.f32.mrf.mxu1 }
 0x530   :  { %8976 = vmatpush2.bf16.msra.mxu0 %v12995_v41  ;;  %v7256_v46 = vpop.f32.mrf.mxu1 }
 0x531   :  { %8977 = vmatprep.subr.bf16.mxu0 %v13000_v57 }
 0x532   :  { %v7258_v13 = vpop.f32.mrf.mxu1 }
 0x534   :  { %8978 = vmatpush2.bf16.msra.mxu0 %v12998_v14  ;;  %v7260_v16 = vpop.f32.mrf.mxu1 }
 0x535   :  { %9093 = vmatmul.mubr.bf16.gmra.mxu1 %v16847_v6  ;;  %8979 = vmatprep.subr.bf16.mxu0 %v13003_v62  ;;  %v13007_v6 = vld [vmem:[%s19087_s5 + $0x6a0] ss:$8 sps:$4 sm:$0xff]  }
 0x536   :  { %v7262_v51 = vpop.f32.mrf.mxu1 }
 0x538   :  { %8980 = vmatpush2.bf16.msra.mxu0 %v13001_v4 }
 0x539   :  { %8981 = vmatprep.subr.bf16.mxu0 %v13006_v19  ;;  %v7266_v19 = vpop.f32.mrf.mxu1 }
 0x53c   :  { %8982 = vmatpush2.bf16.msra.mxu0 %v13004_v37 }
 0x53d   :  { %8983 = vmatprep.subr.bf16.mxu0 %v13009_v63 }
 0x540   :  { %8984 = vmatpush2.bf16.msra.mxu0 %v13007_v6 }
 0x541   :  { %8985 = vmatprep.subr.bf16.mxu0 %v13012_v59 }
 0x544   :  { %8986 = vmatpush2.bf16.msra.mxu0 %v13010_v55 }
 0x545   :  { %8987 = vmatprep.subr.bf16.mxu0 %v13015_v20 }
 0x548   :  { %8988 = vmatpush2.bf16.msra.mxu0 %v13013_v60 }
 0x54b   :  { %v7163_v41 = vpop.f32.mrf.mxu0  ;;  %8990 = vmatmul.mubr.bf16.vlgmr.msra.gmra.mxu0 %v16477_v26 }
 0x54c   :  { %v7237_v57 = vadd.f32 %v18433_v7, %v7163_v41  ;;  %8999 = vmatprep.mubr.bf16.mxu0 %v16601_v10  ;;  %v7268_v7 = vpop.f32.mrf.mxu1 }
 0x54d   :  { %v7165_v14 = vpop.f32.mrf.mxu0 }
 0x54e   :  { %v18524_v62 = vadd.f32 %v7237_v57, %v18162_v35  ;;  %v7239_v4 = vadd.f32 %v18449_v27, %v7165_v14  ;;  %v7270_v60 = vpop.f32.mrf.mxu1 }
 0x54f   :  { %v7167_v37 = vpop.f32.mrf.mxu0 }
 0x550   :  { %v18528_v63 = vadd.f32 %v7239_v4, %v18174_v31  ;;  %v7241_v6 = vadd.f32 %v7240_v23, %v7167_v37 }
 0x551   :  { %v7169_v59 = vpop.f32.mrf.mxu0 }
 0x552   :  { %v18531_v55 = vadd.f32 %v7241_v6, %v18186_v48  ;;  %v18533_v26 = vadd.f32 %v7242_v24, %v7169_v59 }
 0x553   :  { %v7173_v10 = vpop.f32.mrf.mxu0  ;;  %9000 = vmatmul.mubr.bf16.gmra.mxu0 %v16587_v38  ;;  %v7272_v38 = vpop.f32.mrf.mxu1 }
 0x554   :  { %v7247_v35 = vadd.f32 %v7246_v25, %v7173_v10  ;;  %9009 = vmatprep.mubr.bf16.mxu0 %v16770_v28  ;;  %v19965_v28 = vld [vmem:[#allocation140_spill] sm:$0xff] }
 0x555   :  { %v7175_v27 = vpop.f32.mrf.mxu0 }
 0x556   :  { %v18538_v20 = vadd.f32 %v7247_v35, %v18206_v30  ;;  %v7249_v31 = vadd.f32 %v7248_v0, %v7175_v27  ;;  %v19966_v30 = vld [vmem:[#allocation152_spill] sm:$0xff] }
 0x557   :  { %v7177_v23 = vpop.f32.mrf.mxu0  ;;  %v5979_v4 = vadd.f32 %v19966_v30, %v19965_v28 }
 0x558   :  { %v18541_v41 = vadd.f32 %v7249_v31, %v18218_v43  ;;  %v7251_v48 = vadd.f32 %v7250_v15, %v7177_v23  ;;  %v19967_v31 = vld [vmem:[#allocation113_spill] sm:$0xff] }
 0x559   :  { %v7179_v24 = vpop.f32.mrf.mxu0  ;;  %v6292_v15 = vadd.f32 %v18274_v9, %v5979_v4 }
 0x55a   :  { %v18544_v57 = vadd.f32 %v7251_v48, %v18230_v17  ;;  %v18546_v14 = vadd.f32 %v7252_v42, %v7179_v24 }
 0x55b   :  { %v7183_v25 = vpop.f32.mrf.mxu0  ;;  %9010 = vmatmul.mubr.bf16.gmra.mxu0 %v16716_v1 }
 0x55c   :  { %v7257_v0 = vadd.f32 %v7256_v46, %v7183_v25  ;;  %9019 = vmatprep.mubr.bf16.mxu0 %v16840_v32  ;;  %v6365_v46 = vadd.f32 %v19967_v31, %v6292_v15  ;;  %v19970_v15 = vld [vmem:[#allocation135_spill] sm:$0xff] }
 0x55d   :  { %v7626_v37 = vpop.f32.mrf.mxu1  ;;  %v7185_v43 = vpop.f32.mrf.mxu0 }
 0x55e   :  { %v18554_v6 = vadd.f32 %v7257_v0, %v18253_v54  ;;  %v7259_v17 = vadd.f32 %v7258_v13, %v7185_v43  ;;  %v19969_v43 = vld [vmem:[#allocation132_spill] sm:$0xff] }
 0x55f   :  { %v7628_v42 = vpop.f32.mrf.mxu1  ;;  %v7187_v59 = vpop.f32.mrf.mxu0 }
 0x560   :  { %v18557_v10 = vadd.f32 %v7259_v17, %v18266_v29  ;;  %v7261_v1 = vadd.f32 %v7260_v16, %v7187_v59 }
 0x561   :  { %v7630_v35 = vpop.f32.mrf.mxu1  ;;  %v7189_v27 = vpop.f32.mrf.mxu0 }
 0x562   :  { %v18561_v32 = vadd.f32 %v7261_v1, %v18280_v45  ;;  %v7263_v23 = vadd.f32 %v7262_v51, %v7189_v27 }
 0x563   :  { %v7632_v48 = vpop.f32.mrf.mxu1  ;;  %v7193_v9 = vpop.f32.mrf.mxu0  ;;  %9020 = vmatmul.mubr.bf16.gmra.mxu0 %v16830_v47  ;;  %v5114_v47 = vadd.f32 %v19970_v15, %v19969_v43 }
 0x564   :  { %v18564_v54 = vadd.f32 %v7263_v23, %v6365_v46  ;;  %v7267_v13 = vadd.f32 %v7266_v19, %v7193_v9 }
 0x565   :  { %v7636_v24 = vpop.f32.mrf.mxu1  ;;  %v7195_v25 = vpop.f32.mrf.mxu0 }
 0x566   :  { %19968 = vst [vmem:[#allocation27_spill] sm:$0xff] %v18564_v54  ;;  %v18567_v29 = vadd.f32 %v7267_v13, %v18303_v11  ;;  %v7269_v16 = vadd.f32 %v7268_v7, %v7195_v25  ;;  %v19971_v11 = vld [vmem:[#allocation2_spill] sm:$0xff]  ;;  %v19973_v25 = vld [vmem:[#allocation77_spill] sm:$0xff] }
 0x567   :  { %v7638_v28 = vpop.f32.mrf.mxu1  ;;  %v7197_v30 = vpop.f32.mrf.mxu0  ;;  %v5451_v27 = vadd.f32 %v19971_v11, %v5114_v47 }
 0x568   :  { %v18570_v4 = vadd.f32 %v7269_v16, %v18318_v21  ;;  %v7271_v45 = vadd.f32 %v7270_v60, %v7197_v30 }
 0x569   :  { %v7640_v51 = vpop.f32.mrf.mxu1  ;;  %v7199_v0 = vpop.f32.mrf.mxu0 }
 0x56a   :  { %v18575_v17 = vadd.f32 %v7271_v45, %v18330_v58  ;;  %v7273_v19 = vadd.f32 %v7272_v38, %v7199_v0  ;;  %v5524_v58 = vadd.f32 %v19973_v25, %v5451_v27  ;;  %v19974_v0 = vld [vmem:[#allocation16_spill] sm:$0xff] }
 0x56b   :  { %v7642_v59 = vpop.f32.mrf.mxu1  ;;  %v7699_v1 = vpop.f32.mrf.mxu0 }
 0x56c   :  { %v18579_v7 = vadd.f32 %v7273_v19, %v18342_v34  ;;  %v7700_v31 = vadd.f32 %v7699_v1, %v7626_v37  ;;  %v19975_v34 = vld [vmem:[#allocation33_spill] sm:$0xff]  ;;  %v6827_v37 = vadd.f32 %v18378_v18, %v5524_v58  ;;  %v19976_v19 = vld [vmem:[#allocation48_spill] sm:$0xff] }
 0x56d   :  { %v7646_v21 = vpop.f32.mrf.mxu1  ;;  %v7701_v46 = vpop.f32.mrf.mxu0  ;;  %v5124_v43 = vadd.f32 %v19975_v34, %v19974_v0  ;;  %v19977_v18 = vld [vmem:[#allocation105_spill] sm:$0xff]  ;;  %v19979_v0 = vld [vmem:[#allocation18_spill] sm:$0xff] }
 0x56e   :  { %19972 = vst [vmem:[#allocation153_spill] sm:$0xff] %v18579_v7  ;;  %v18582_v60 = vadd.f32 %v7700_v31, %v18354_v49  ;;  %v7702_v23 = vadd.f32 %v7701_v46, %v7628_v42 }
 0x56f   :  { %v7648_v9 = vpop.f32.mrf.mxu1  ;;  %v7703_v13 = vpop.f32.mrf.mxu0  ;;  %v5461_v1 = vadd.f32 %v19976_v19, %v5124_v43 }
 0x570   :  { %v18586_v38 = vadd.f32 %v7702_v23, %v18365_v53  ;;  %v7704_v16 = vadd.f32 %v7703_v13, %v7630_v35 }
 0x571   :  { %v7650_v30 = vpop.f32.mrf.mxu1  ;;  %v7705_v45 = vpop.f32.mrf.mxu0  ;;  %v5534_v25 = vadd.f32 %v19977_v18, %v5461_v1 }
 0x572   :  { %v18592_v15 = vadd.f32 %v7704_v16, %v18375_v44  ;;  %v7706_v49 = vadd.f32 %v7705_v45, %v7632_v48  ;;  %v19978_v45 = vld [vmem:[#allocation134_spill] sm:$0xff] }
 0x573   :  { %v7652_v42 = vpop.f32.mrf.mxu1  ;;  %v7709_v47 = vpop.f32.mrf.mxu0  ;;  %v5134_v34 = vadd.f32 %v19979_v0, %v19978_v45  ;;  %v19983_v45 = vld [vmem:[#allocation137_spill] sm:$0xff]  ;;  %v19984_v0 = vld [vmem:[#allocation151_spill] sm:$0xff] }
 0x574   :  { %v18595_v11 = vadd.f32 %v7706_v49, %v6827_v37  ;;  %v7710_v53 = vadd.f32 %v7709_v47, %v7636_v24  ;;  %v6831_v24 = vadd.f32 %v18418_v36, %v5534_v25  ;;  %v19980_v49 = vld [vmem:[#allocation107_spill] sm:$0xff]  ;;  %v13017_v36 = vld [vmem:[%s19089_s7 + $0x38] sm:$0xff]  }
 0x575   :  { %v7656_v27 = vpop.f32.mrf.mxu1  ;;  %v7711_v35 = vpop.f32.mrf.mxu0  ;;  %v5471_v47 = vadd.f32 %v19980_v49, %v5134_v34  ;;  %v5144_v34 = vadd.f32 %v19984_v0, %v19983_v45  ;;  %v13024_v45 = vld [vmem:[%s19089_s7 + $0xf0] sm:$0xff]   ;;  %v13029_v0 = vld [vmem:[%s19089_s7 + $0x58] sm:$0xff]  }
 0x576   :  { %v18598_v31 = vadd.f32 %v7710_v53, %v18397_v50  ;;  %v7712_v46 = vadd.f32 %v7711_v35, %v7638_v28  ;;  %v13018_v53 = vld [vmem:[%s19089_s7 + $0x70] sm:$0xff]  }
 0x577   :  { %v7658_v23 = vpop.f32.mrf.mxu1  ;;  %v7713_v13 = vpop.f32.mrf.mxu0 }
 0x578   :  { %v18602_v44 = vadd.f32 %v7712_v46, %v18405_v52  ;;  %v7714_v48 = vadd.f32 %v7713_v13, %v7640_v51  ;;  %v13016_v51 = vld [vmem:[%s19089_s7 + $0x78] sm:$0xff]   ;;  %v13019_v46 = vld [vmem:[%s19089_s7 + $0x30] sm:$0xff]  }
 0x579   :  { %v7660_v58 = vpop.f32.mrf.mxu1  ;;  %v7715_v16 = vpop.f32.mrf.mxu0  ;;  %11778 = vmatprep.subr.bf16.mxu0 %v13016_v51  ;;  %v19981_v13 = vld [vmem:[#allocation40_spill] sm:$0xff] }
 0x57a   :  { %v18608_v43 = vadd.f32 %v7714_v48, %v18415_v8  ;;  %v7716_v50 = vadd.f32 %v7715_v16, %v7642_v59  ;;  %11779 = vmatpush3.bf16.msra.mxu0 %v13017_v36  ;;  %v5544_v18 = vadd.f32 %v19981_v13, %v5471_v47  ;;  %v13021_v16 = vld [vmem:[%s19089_s7 + $0x68] sm:$0xff]  }
 0x57b   :  { %v7662_v28 = vpop.f32.mrf.mxu1  ;;  %v7719_v37 = vpop.f32.mrf.mxu0  ;;  %11780 = vmatprep.subr.bf16.mxu0 %v13018_v53  ;;  %v13023_v47 = vld [vmem:[%s19089_s7 + $0x28] sm:$0xff]  }
 0x57c   :  { %v18611_v19 = vadd.f32 %v7716_v50, %v6831_v24  ;;  %v7720_v52 = vadd.f32 %v7719_v37, %v7646_v21  ;;  %v6835_v24 = vadd.f32 %v18447_v33, %v5544_v18 }
 0x57d   :  { %v7721_v1 = vpop.f32.mrf.mxu0  ;;  %v18625_v35 = vpop.f32.mrf.mxu1 }
 0x57e   :  { %v18620_v8 = vadd.f32 %v7720_v52, %v18430_v12  ;;  %v7722_v59 = vadd.f32 %v7721_v1, %v7648_v9  ;;  %v13020_v9 = vld [vmem:[%s19089_s7 + $0xf8] sm:$0xff]   ;;  %11781 = vmatpush3.bf16.msra.mxu0 %v13019_v46  ;;  %v19986_v52 = vld [vmem:[#allocation138_spill] sm:$0xff] }
 0x57f   :  { %v7723_v21 = vpop.f32.mrf.mxu0  ;;  %11756 = vmatprep.subr.bf16.mxu1 %v13020_v9  ;;  %v18649_v37 = vpop.f32.mrf.mxu1  ;;  %v5481_v51 = vadd.f32 %v19986_v52, %v5144_v34  ;;  %11782 = vmatprep.subr.bf16.mxu0 %v13021_v16  ;;  %v13030_v34 = vld [vmem:[%s19089_s7 + $0xa8] sm:$0xff]   ;;  %v13035_v52 = vld [vmem:[%s19089_s7 + $0x10] sm:$0xff]  }
 0x580   :  { %v18632_v25 = vadd.f32 %v7722_v59, %v18436_v22  ;;  %v7724_v12 = vadd.f32 %v7723_v21, %v7650_v30  ;;  %v13022_v30 = vld [vmem:[%s19089_s7 + $0xb8] sm:$0xff]  }
 0x581   :  { %v7725_v48 = vpop.f32.mrf.mxu0  ;;  %11757 = vmatpush3.bf16.msra.mxu1 %v13022_v30  ;;  %v18660_v59 = vpop.f32.mrf.mxu1  ;;  %v19989_v21 = vld [vmem:[#allocation49_spill] sm:$0xff]  ;;  %v13032_v30 = vld [vmem:[%s19089_s7 + $0xe0] sm:$0xff]  }
 0x582   :  { %19982 = vst [vmem:[#allocation74_spill] sm:$0xff] %v18632_v25  ;;  %v18644_v50 = vadd.f32 %v7724_v12, %v18445_v40  ;;  %v7726_v22 = vadd.f32 %v7725_v48, %v7652_v42  ;;  %11783 = vmatpush3.bf16.msra.mxu0 %v13023_v47  ;;  %v5554_v46 = vadd.f32 %v19989_v21, %v5481_v51  ;;  %v13034_v47 = vld [vmem:[%s19089_s7 + $0xa0] sm:$0xff]  }
 0x583   :  { %v7729_v49 = vpop.f32.mrf.mxu0  ;;  %11758 = vmatprep.subr.bf16.mxu1 %v13024_v45  ;;  %v13044_v45 = vld [vmem:[%s19089_s7 + $0xc8] sm:$0xff]  }
 0x584   :  { %19985 = vst [vmem:[#allocation96_spill] sm:$0xff] %v18644_v50  ;;  %v18655_v33 = vadd.f32 %v7726_v22, %v6835_v24  ;;  %v7730_v40 = vadd.f32 %v7729_v49, %v7656_v27  ;;  %v6839_v27 = vadd.f32 %v18476_v2, %v5554_v46  ;;  %v13027_v2 = vld [vmem:[%s19089_s7 + $0x20] sm:$0xff]   ;;  %v13031_v24 = vld [vmem:[%s19089_s7 + $0x18] sm:$0xff]   ;;  %v13033_v49 = vld [vmem:[%s19089_s7 + $0x50] sm:$0xff]  }
 0x585   :  { %v7731_v42 = vpop.f32.mrf.mxu0  ;;  %v13040_v46 = vld [vmem:[%s19089_s7 + $0xd0] sm:$0xff]  }
 0x586   :  { %19987 = vst [vmem:[#allocation142_spill] sm:$0xff] %v18655_v33  ;;  %v18658_v1 = vadd.f32 %v7730_v40, %v18461_v5  ;;  %v7732_v36 = vadd.f32 %v7731_v42, %v7658_v23  ;;  %v18670_v5 = vpop.f32.mrf.mxu1  ;;  %v13036_v40 = vld [vmem:[%s19089_s7 + $0xd8] sm:$0xff]   ;;  %v13037_v42 = vld [vmem:[%s19089_s7 + $0x48] sm:$0xff]  }
 0x587   :  { %v7733_v53 = vpop.f32.mrf.mxu0 }
 0x588   :  { %19988 = vst [vmem:[#allocation154_spill] sm:$0xff] %v18658_v1  ;;  %v18664_v13 = vadd.f32 %v7732_v36, %v18465_v56  ;;  %v7734_v18 = vadd.f32 %v7733_v53, %v7660_v58  ;;  %v18674_v16 = vpop.f32.mrf.mxu1  ;;  %v13025_v56 = vld [vmem:[%s19089_s7 + $0x60] sm:$0xff]   ;;  %v13038_v36 = vld [vmem:[%s19089_s7 + $0x98] sm:$0xff]   ;;  %v13039_v53 = vld [vmem:[%s19089_s7 + $0x8] sm:$0xff]  }
 0x589   :  { %v7735_v12 = vpop.f32.mrf.mxu0  ;;  %11784 = vmatprep.subr.bf16.mxu0 %v13025_v56  ;;  %v13045_v56 = vld [vmem:[%s19089_s7 + $0x1f8] sm:$0xff]  }
 0x58a   :  { %19990 = vst [vmem:[#allocation155_spill] sm:$0xff] %v18664_v13  ;;  %v18668_v9 = vadd.f32 %v7734_v18, %v18474_v39  ;;  %v7736_v48 = vadd.f32 %v7735_v12, %v7662_v28  ;;  %v13026_v39 = vld [vmem:[%s19089_s7 + $0xb0] sm:$0xff]   ;;  %11785 = vmatpush3.bf16.msra.mxu0 %v13027_v2  ;;  %v18688_v58 = vpop.f32.mrf.mxu1  ;;  %v13028_v28 = vld [vmem:[%s19089_s7 + $0xe8] sm:$0xff]   ;;  %v13041_v18 = vld [vmem:[%s19089_s7 + $0x40] sm:$0xff]  }
 0x58b   :  { %11759 = vmatpush3.bf16.msra.mxu1 %v13026_v39  ;;  %11786 = vmatprep.subr.bf16.mxu0 %v13029_v0  ;;  %v13042_v12 = vld [vmem:[%s19089_s7 + $0x90] sm:$0xff]   ;;  %v13046_v39 = vld [vmem:[%s19089_s7 + $0x88] sm:$0xff]   ;;  %v13050_v0 = vld [vmem:[%s19089_s7 + $0x80] sm:$0xff]  }
 0x58c   :  { %19991 = vst [vmem:[#allocation156_spill] sm:$0xff] %v18668_v9  ;;  %v18672_v23 = vadd.f32 %v7736_v48, %v6839_v27  ;;  %11760 = vmatprep.subr.bf16.mxu1 %v13028_v28  ;;  %v8164_v22 = vpop.f32.mrf.mxu1  ;;  %v13043_v27 = vld [vmem:[%s19089_s7] sm:$0xff]  }
 0x58d   :  { %v13048_v28 = vld [vmem:[%s19089_s7 + $0xc0] sm:$0xff]  }
 0x58e   :  { %19992 = vst [vmem:[#allocation117_spill] sm:$0xff] %v18672_v23  ;;  %11787 = vmatpush3.bf16.msra.mxu0 %v13031_v24  ;;  %v18714_v51 = vpop.f32.mrf.mxu1 }
 0x58f   :  { %11761 = vmatpush3.bf16.msra.mxu1 %v13030_v34  ;;  %11788 = vmatprep.subr.bf16.mxu0 %v13033_v49 }
 0x590   :  { %11762 = vmatprep.subr.bf16.mxu1 %v13032_v30  ;;  %v8170_v21 = vpop.f32.mrf.mxu1  ;;  %v13052_v30 = vld [vmem:[%s19089_s7 + $0x178] sm:$0xff]  }
 0x592   :  { %11789 = vmatpush3.bf16.msra.mxu0 %v13035_v52  ;;  %v8172_v48 = vpop.f32.mrf.mxu1 }
 0x593   :  { %11763 = vmatpush3.bf16.msra.mxu1 %v13034_v47  ;;  %11790 = vmatprep.subr.bf16.mxu0 %v13037_v42 }
 0x594   :  { %11764 = vmatprep.subr.bf16.mxu1 %v13036_v40  ;;  %v8174_v2 = vpop.f32.mrf.mxu1 }
 0x596   :  { %11791 = vmatpush3.bf16.msra.mxu0 %v13039_v53  ;;  %v18755_v34 = vpop.f32.mrf.mxu1 }
 0x597   :  { %11765 = vmatpush3.bf16.msra.mxu1 %v13038_v36  ;;  %11792 = vmatprep.subr.bf16.mxu0 %v13041_v18 }
 0x598   :  { %11766 = vmatprep.subr.bf16.mxu1 %v13040_v46  ;;  %v8180_v42 = vpop.f32.mrf.mxu1 }
 0x59a   :  { %11793 = vmatpush3.bf16.msra.mxu0 %v13043_v27 }
 0x59b   :  { %11767 = vmatpush3.bf16.msra.mxu1 %v13042_v12  ;;  %11822 = vmatprep.subr.bf16.mxu0 %v13045_v56 }
 0x59c   :  { %11768 = vmatprep.subr.bf16.mxu1 %v13044_v45 }
 0x59f   :  { %11769 = vmatpush3.bf16.msra.mxu1 %v13046_v39 }
 0x5a0   :  { %11770 = vmatprep.subr.bf16.mxu1 %v13048_v28 }
 0x5a3   :  { %11771 = vmatpush3.bf16.msra.mxu1 %v13050_v0 }
 0x5a4   :  { %11800 = vmatprep.subr.bf16.mxu1 %v13052_v30 }
 0x5ab   :  { %v8077_v24 = vpop.f32.mrf.mxu0 }
 0x5ac   :  { %v8151_v49 = vadd.f32 %v18625_v35, %v8077_v24  ;;  %v8182_v35 = vpop.f32.mrf.mxu1 }
 0x5ad   :  { %v8079_v47 = vpop.f32.mrf.mxu0 }
 0x5ae   :  { %v18762_v52 = vadd.f32 %v8151_v49, %v18524_v62  ;;  %v8153_v40 = vadd.f32 %v18649_v37, %v8079_v47  ;;  %v8184_v39 = vpop.f32.mrf.mxu1 }
 0x5af   :  { %v8081_v36 = vpop.f32.mrf.mxu0 }
 0x5b0   :  { %v18766_v53 = vadd.f32 %v8153_v40, %v18528_v63  ;;  %v8155_v46 = vadd.f32 %v18660_v59, %v8081_v36  ;;  %v18787_v24 = vpop.f32.mrf.mxu1 }
 0x5b1   :  { %v18769_v18 = vpop.f32.mrf.mxu0  ;;  %19993 = vst [vmem:[#allocation80_spill] sm:$0xff] %v18787_v24 }
 0x5b2   :  { %v18772_v12 = vadd.f32 %v8155_v46, %v18531_v55 }
 0x5b3   :  { %v8087_v27 = vpop.f32.mrf.mxu0 }
 0x5b4   :  { %v8161_v45 = vadd.f32 %v18674_v16, %v8087_v27 }
 0x5b5   :  { %v8089_v62 = vpop.f32.mrf.mxu0 }
 0x5b6   :  { %v18776_v56 = vadd.f32 %v8161_v45, %v18538_v20  ;;  %v8163_v37 = vadd.f32 %v18688_v58, %v8089_v62 }
 0x5b7   :  { %v8091_v63 = vpop.f32.mrf.mxu0 }
 0x5b8   :  { %v18780_v28 = vadd.f32 %v8163_v37, %v18541_v41  ;;  %v8165_v59 = vadd.f32 %v8164_v22, %v8091_v63 }
 0x5b9   :  { %v18782_v0 = vpop.f32.mrf.mxu0 }
 0x5ba   :  { %v18785_v55 = vadd.f32 %v8165_v59, %v18544_v57 }
 0x5bb   :  { %v8097_v16 = vpop.f32.mrf.mxu0 }
 0x5bc   :  { %v8171_v30 = vadd.f32 %v8170_v21, %v8097_v16 }
 0x5bd   :  { %v8540_v49 = vpop.f32.mrf.mxu1  ;;  %v8099_v20 = vpop.f32.mrf.mxu0 }
 0x5be   :  { %v18790_v47 = vadd.f32 %v8171_v30, %v18554_v6  ;;  %v8173_v58 = vadd.f32 %v8172_v48, %v8099_v20 }
 0x5bf   :  { %v8542_v40 = vpop.f32.mrf.mxu1  ;;  %v8101_v36 = vpop.f32.mrf.mxu0 }
 0x5c0   :  { %19994 = vst [vmem:[#allocation141_spill] sm:$0xff] %v18790_v47  ;;  %v18793_v41 = vadd.f32 %v8173_v58, %v18557_v10  ;;  %v8175_v22 = vadd.f32 %v8174_v2, %v8101_v36  ;;  %v20016_v47 = vld [vmem:[#allocation66_spill] sm:$0xff] }
 0x5c1   :  { %v18795_v46 = vpop.f32.mrf.mxu1  ;;  %v18797_v57 = vpop.f32.mrf.mxu0 }
 0x5c2   :  { %19995 = vst [vmem:[#allocation120_spill] sm:$0xff] %v18793_v41  ;;  %v18800_v27 = vadd.f32 %v8175_v22, %v18561_v32 }
 0x5c3   :  { %v18802_v21 = vpop.f32.mrf.mxu1  ;;  %v8107_v45 = vpop.f32.mrf.mxu0 }
 0x5c4   :  { %19996 = vst [vmem:[#allocation14_spill] sm:$0xff] %v18800_v27  ;;  %v8181_v62 = vadd.f32 %v8180_v42, %v8107_v45 }
 0x5c5   :  { %v18804_v6 = vpop.f32.mrf.mxu1  ;;  %v8109_v48 = vpop.f32.mrf.mxu0 }
 0x5c6   :  { %v18807_v37 = vadd.f32 %v8181_v62, %v18567_v29  ;;  %v8183_v10 = vadd.f32 %v8182_v35, %v8109_v48 }
 0x5c7   :  { %v18809_v63 = vpop.f32.mrf.mxu1  ;;  %v8111_v2 = vpop.f32.mrf.mxu0 }
 0x5c8   :  { %19997 = vst [vmem:[#allocation125_spill] sm:$0xff] %v18807_v37  ;;  %v18812_v59 = vadd.f32 %v8183_v10, %v18570_v4  ;;  %v8185_v16 = vadd.f32 %v8184_v39, %v8111_v2 }
 0x5c9   :  { %v18814_v32 = vpop.f32.mrf.mxu1  ;;  %v18816_v30 = vpop.f32.mrf.mxu0 }
 0x5ca   :  { %19998 = vst [vmem:[#allocation17_spill] sm:$0xff] %v18812_v59  ;;  %19999 = vst [vmem:[#allocation124_spill] sm:$0xff] %v18816_v30  ;;  %v18819_v42 = vadd.f32 %v8185_v16, %v18575_v17 }
 0x5cb   :  { %v18821_v20 = vpop.f32.mrf.mxu1  ;;  %v8613_v58 = vpop.f32.mrf.mxu0 }
 0x5cc   :  { %20000 = vst [vmem:[#allocation75_spill] sm:$0xff] %v18819_v42 }
 0x5cd   :  { %v8560_v29 = vpop.f32.mrf.mxu1  ;;  %v8615_v36 = vpop.f32.mrf.mxu0 }
 0x5cf   :  { %v8617_v35 = vpop.f32.mrf.mxu0  ;;  %v18823_v22 = vpop.f32.mrf.mxu1 }
 0x5d1   :  { %v8619_v45 = vpop.f32.mrf.mxu0  ;;  %v18825_v4 = vpop.f32.mrf.mxu1 }
 0x5d2   :  { %20001 = vst [vmem:[#allocation45_spill] sm:$0xff] %v18825_v4 }
 0x5d3   :  { %v8623_v62 = vpop.f32.mrf.mxu0  ;;  %v18829_v10 = vpop.f32.mrf.mxu1 }
 0x5d4   :  { %20002 = vst [vmem:[#allocation20_spill] sm:$0xff] %v18829_v10  ;;  %v8616_v10 = vadd.f32 %v8615_v36, %v8542_v40 }
 0x5d5   :  { %v8625_v39 = vpop.f32.mrf.mxu0  ;;  %v18833_v23 = vpop.f32.mrf.mxu1 }
 0x5d6   :  { %20003 = vst [vmem:[#allocation85_spill] sm:$0xff] %v18833_v23  ;;  %v20014_v23 = vld [vmem:[#allocation7_spill] sm:$0xff] }
 0x5d7   :  { %v18827_v48 = vpop.f32.mrf.mxu0  ;;  %v18838_v9 = vpop.f32.mrf.mxu1 }
 0x5d8   :  { %20005 = vst [vmem:[#allocation86_spill] sm:$0xff] %v18838_v9 }
 0x5d9   :  { %v18831_v2 = vpop.f32.mrf.mxu0  ;;  %v18840_v7 = vpop.f32.mrf.mxu1 }
 0x5da   :  { %20006 = vst [vmem:[#allocation41_spill] sm:$0xff] %v18840_v7 }
 0x5db   :  { %v8633_v17 = vpop.f32.mrf.mxu0  ;;  %v18842_v59 = vpop.f32.mrf.mxu1 }
 0x5dc   :  { %v8634_v16 = vadd.f32 %v8633_v17, %v8560_v29  ;;  %20007 = vst [vmem:[#allocation87_spill] sm:$0xff] %v18842_v59  ;;  %v20013_v59 = vld [vmem:[#allocation22_spill] sm:$0xff] }
 0x5dd   :  { %v9064_v13 = vpop.f32.mrf.mxu1  ;;  %v18844_v37 = vpop.f32.mrf.mxu0  ;;  %v5959_v50 = vadd.f32 %v20014_v23, %v20013_v59 }
 0x5de   :  { %v18836_v42 = vadd.f32 %v8634_v16, %v18620_v8 }
 0x5df   :  { %v9066_v1 = vpop.f32.mrf.mxu1  ;;  %v18846_v24 = vpop.f32.mrf.mxu0  ;;  %v6272_v54 = vadd.f32 %v18180_v61, %v5959_v50  ;;  %v8618_v61 = vadd.f32 %v8617_v35, %v18795_v46 }
 0x5e0   :  { %20004 = vst [vmem:[#allocation39_spill] sm:$0xff] %v18836_v42  ;;  %20008 = vst [vmem:[#allocation44_spill] sm:$0xff] %v18846_v24 }
 0x5e1   :  { %v9068_v30 = vpop.f32.mrf.mxu1  ;;  %v18848_v33 = vpop.f32.mrf.mxu0 }
 0x5e2   :  { %20009 = vst [vmem:[#allocation3_spill] sm:$0xff] %v18848_v33  ;;  %v8614_v33 = vadd.f32 %v8613_v58, %v8540_v49  ;;  %v20018_v49 = vld [vmem:[#allocation104_spill] sm:$0xff] }
 0x5e3   :  { %v9070_v29 = vpop.f32.mrf.mxu1  ;;  %v18850_v17 = vpop.f32.mrf.mxu0 }
 0x5e4   :  { %20010 = vst [vmem:[#allocation133_spill] sm:$0xff] %v18850_v17  ;;  %v8652_v23 = vadd.f32 %v8614_v33, %v18582_v60  ;;  %v9143_v60 = vld [vmem:[%s19090_s6] sm:$0x3] }
 0x5e5   :  { %v9074_v8 = vpop.f32.mrf.mxu1  ;;  %v18852_v16 = vpop.f32.mrf.mxu0 }
 0x5e6   :  { %20011 = vst [vmem:[#allocation52_spill] sm:$0xff] %v18852_v16  ;;  %v6345_v16 = vadd.f32 %v20016_v47, %v6272_v54  ;;  %v8653_v54 = vadd.f32 %v8616_v10, %v18586_v38  ;;  %v8654_v38 = vadd.f32 %v8618_v61, %v18592_v15  ;;  %v8167_v15 = vadd.f32 %v18714_v51, %v18782_v0 }
 0x5e7   :  { %v9076_v9 = vpop.f32.mrf.mxu1  ;;  %v18854_v27 = vpop.f32.mrf.mxu0  ;;  %v8628_v51 = vadd.f32 %v18827_v48, %v18814_v32 }
 0x5e8   :  { %20012 = vst [vmem:[#allocation144_spill] sm:$0xff] %v18854_v27  ;;  %v8157_v27 = vadd.f32 %v18670_v5, %v18769_v18  ;;  %v8620_v5 = vadd.f32 %v8619_v45, %v18802_v21 }
 0x5e9   :  { %v18856_v7 = vpop.f32.mrf.mxu1  ;;  %v18861_v41 = vpop.f32.mrf.mxu0  ;;  %v8658_v48 = vadd.f32 %v8628_v51, %v18608_v43 }
 0x5ea   :  { %20015 = vst [vmem:[#allocation143_spill] sm:$0xff] %v18861_v41  ;;  %v20017_v41 = vld [vmem:[#allocation58_spill] sm:$0xff] }
 0x5eb   :  { %v18863_v42 = vpop.f32.mrf.mxu1  ;;  %v5969_v40 = vadd.f32 %v20018_v49, %v20017_v41 }
 0x5ed   :  { %v18868_v24 = vpop.f32.mrf.mxu1 }
 0x60b   :  { %v8991_v17 = vpop.f32.mrf.mxu0 }
 0x60c   :  { %v9065_v25 = vadd.f32 %v9064_v13, %v8991_v17  ;;  %v7278_v13 = vadd.f32 %v18533_v26, %v6345_v16 }
 0x60d   :  { %v8993_v4 = vpop.f32.mrf.mxu0 }
 0x60e   :  { %v9103_v50 = vadd.f32 %v9065_v25, %v18762_v52  ;;  %v9067_v59 = vadd.f32 %v9066_v1, %v8993_v4  ;;  %v6282_v25 = vadd.f32 %v18224_v3, %v5969_v40  ;;  %v8192_v33 = vadd.f32 %v8157_v27, %v7278_v13  ;;  %v9086_v52 = vpop.f32.mrf.mxu1 }
 0x60f   :  { %v8995_v47 = vpop.f32.mrf.mxu0  ;;  %v8624_v1 = vadd.f32 %v8623_v62, %v18804_v6  ;;  %v8655_v3 = vadd.f32 %v8620_v5, %v18595_v11  ;;  %v20021_v62 = vld [vmem:[#allocation59_spill] sm:$0xff] }
 0x610   :  { %v9119_v18 = vmax.f32 %v8652_v23, %v9103_v50  ;;  %v9104_v58 = vadd.f32 %v9067_v59, %v18766_v53  ;;  %v9069_v36 = vadd.f32 %v9068_v30, %v8995_v47  ;;  %v8626_v53 = vadd.f32 %v8625_v39, %v18809_v63  ;;  %v20019_v30 = vld [vmem:[#allocation82_spill] sm:$0xff] }
 0x611   :  { %v8997_v26 = vpop.f32.mrf.mxu0  ;;  %v20020_v35 = vsub.s32 0, %v20019_v30  ;;  %v6355_v17 = vadd.f32 %v20021_v62, %v6282_v25  ;;  %v20022_v63 = vsub.s32 1, %v20019_v30  ;;  %v20023_v25 = vld [vmem:[#allocation45_spill] sm:$0xff]  ;;  %v20028_v30 = vld [vmem:[#allocation3_spill] sm:$0xff] }
 0x612   :  { %v9120_v41 = vmax.f32 %v8653_v54, %v9104_v58  ;;  %v9105_v46 = vadd.f32 %v9069_v36, %v18772_v12  ;;  %v9071_v21 = vadd.f32 %v9070_v29, %v8997_v26  ;;  %v8656_v12 = vadd.f32 %v8624_v1, %v18598_v31  ;;  %v9088_v29 = vpop.f32.mrf.mxu1 }
 0x613   :  { %v18889_v45 = vrot.slane %v9143_v60, %v20020_v35  ;;  %v9001_v4 = vpop.f32.mrf.mxu0  ;;  %v18898_v39 = vrot.slane %v9143_v60, %v20022_v63  ;;  %v8657_v59 = vadd.f32 %v8626_v53, %v18602_v44  ;;  %v8630_v31 = vadd.f32 %v18831_v2, %v18821_v20  ;;  %v20027_v53 = vld [vmem:[#allocation20_spill] sm:$0xff] }
 0x614   :  { %v9121_v27 = vmax.f32 %v8654_v38, %v9105_v46  ;;  %v9106_v10 = vadd.f32 %v9071_v21, %v8192_v33  ;;  %v9075_v6 = vadd.f32 %v9074_v8, %v9001_v4  ;;  %v7282_v8 = vadd.f32 %v18546_v14, %v6355_v17  ;;  %v9090_v47 = vpop.f32.mrf.mxu1  ;;  %v20024_v33 = vld [vmem:[#allocation44_spill] sm:$0xff] }
 0x615   :  { %v9003_v16 = vpop.f32.mrf.mxu0  ;;  %v8636_v20 = vadd.f32 %v18844_v37, %v18823_v22  ;;  %v8638_v1 = vadd.f32 %v20024_v33, %v20023_v25  ;;  %v20025_v22 = vld [vmem:[#allocation141_spill] sm:$0xff] }
 0x616   :  { %v9135_v23 = vmax.f32 %v9119_v18, %v9121_v27  ;;  %v9122_v61 = vmax.f32 %v8655_v3, %v9106_v10  ;;  %v9107_v11 = vadd.f32 %v9075_v6, %v18776_v56  ;;  %v9077_v50 = vadd.f32 %v9076_v9, %v9003_v16  ;;  %v9094_v43 = vpop.f32.mrf.mxu1  ;;  %v13049_v3 = vld [vmem:[%s19089_s7 + $0x1f0] sm:$0xff]   ;;  %v20029_v10 = vld [vmem:[#allocation39_spill] sm:$0xff] }
 0x617   :  { %v9005_v0 = vpop.f32.mrf.mxu0  ;;  %v8196_v14 = vadd.f32 %v8167_v15, %v7282_v8  ;;  %v20030_v6 = vld [vmem:[#allocation120_spill] sm:$0xff]  ;;  %v20031_v15 = vld [vmem:[#allocation27_spill] sm:$0xff] }
 0x618   :  { %v9155_v49 = vadd.f32 %v18889_v45, %v9135_v23  ;;  %v9136_v40 = vmax.f32 %v9120_v41, %v9122_v61  ;;  %v9123_v13 = vmax.f32 %v8656_v12, %v9107_v11  ;;  %v9108_v54 = vadd.f32 %v9077_v50, %v18780_v28  ;;  %v20032_v16 = vld [vmem:[#allocation96_spill] sm:$0xff]  ;;  %v20033_v23 = vld [vmem:[#allocation85_spill] sm:$0xff]  ;;  %v9096_v50 = vpop.f32.mrf.mxu1 }
 0x619   :  { %v9079_v9 = vadd.f32 %v18856_v7, %v9005_v0  ;;  %v9007_v56 = vpop.f32.mrf.mxu0  ;;  %v8659_v28 = vadd.f32 %v8630_v31, %v18611_v19  ;;  %v13047_v19 = vld [vmem:[%s19089_s7 + $0x1b8] sm:$0xff]   ;;  %v8662_v63 = vadd.f32 %v8638_v1, %v20032_v16  ;;  %v20035_v31 = vld [vmem:[#allocation14_spill] sm:$0xff] }
 0x61a   :  { %v9124_v5 = vmax.f32 %v8657_v59, %v9108_v54  ;;  %v9081_v44 = vadd.f32 %v18863_v42, %v9007_v56  ;;  %v9156_v32 = vadd.f32 %v18898_v39, %v9136_v40  ;;  %v9163_v2 = vmax.f32 %v9155_v49, 0.0  ;;  %v20034_v61 = vld [vmem:[#allocation133_spill] sm:$0xff]  ;;  %v20038_v56 = vld [vmem:[#allocation52_spill] sm:$0xff] }
 0x61b   :  { %v9109_v18 = vadd.f32 %v9079_v9, %v18785_v55  ;;  %v9011_v58 = vpop.f32.mrf.mxu0  ;;  %v8177_v42 = vadd.f32 %v18755_v34, %v18797_v57  ;;  %v8640_v34 = vadd.f32 %v20028_v30, %v20027_v53  ;;  %v8644_v11 = vadd.f32 %v20034_v61, %v20033_v23  ;;  %v20037_v9 = vld [vmem:[#allocation86_spill] sm:$0xff]  ;;  %v20042_v1 = vld [vmem:[#allocation125_spill] sm:$0xff] }
 0x61c   :  { %v9110_v36 = vadd.f32 %v9081_v44, %v8196_v14  ;;  %v9085_v7 = vadd.f32 %v18868_v24, %v9011_v58  ;;  %v9164_v60 = vmax.f32 %v9156_v32, 0.0  ;;  %v20026_v24 = vld [vmem:[#allocation74_spill] sm:$0xff]  ;;  %v9171_v57 = vpack.c.bf16 %v9163_v2, %v9163_v2  ;;  %v13053_v32 = vld [vmem:[%s19089_s7 + $0x1e8] sm:$0xff]   ;;  %v20040_v58 = vld [vmem:[#allocation80_spill] sm:$0xff] }
 0x61d   :  { %v9125_v26 = vmax.f32 %v8658_v48, %v9109_v18  ;;  %v9013_v38 = vpop.f32.mrf.mxu0  ;;  %v8661_v21 = vadd.f32 %v8636_v20, %v20026_v24  ;;  %v8200_v12 = vadd.f32 %v8177_v42, %v20031_v15  ;;  %v8646_v14 = vadd.f32 %v20038_v56, %v20037_v9  ;;  %v20039_v18 = vld [vmem:[#allocation124_spill] sm:$0xff]  ;;  %v20047_v24 = vld [vmem:[#allocation143_spill] sm:$0xff]  ;;  %v13059_v23 = vld [vmem:[%s19089_s7 + $0x1a0] sm:$0xff]  }
 0x61e   :  { %v9126_v37 = vmax.f32 %v8659_v28, %v9110_v36  ;;  %v9111_v41 = vadd.f32 %v9085_v7, %v20025_v22  ;;  %v9087_v55 = vadd.f32 %v9086_v52, %v9013_v38  ;;  %v9172_v46 = vpack.c.bf16 %v9164_v60, %v9164_v60  ;;  %v20041_v36 = vld [vmem:[#allocation154_spill] sm:$0xff]  ;;  %v9098_v60 = vpop.f32.mrf.mxu1 }
 0x61f   :  { %v9137_v35 = vmax.f32 %v9123_v13, %v9125_v26  ;;  %v9015_v4 = vpop.f32.mrf.mxu0  ;;  %v20036_v13 = vld [vmem:[#allocation142_spill] sm:$0xff]  ;;  %v8187_v28 = vadd.f32 %v20040_v58, %v20039_v18  ;;  %v8664_v7 = vadd.f32 %v8644_v11, %v20041_v36  ;;  %v20050_v11 = vld [vmem:[#allocation156_spill] sm:$0xff]  ;;  %v13069_v58 = vld [vmem:[%s19089_s7 + $0x1c8] sm:$0xff]  }
 0x620   :  { %v9138_v27 = vmax.f32 %v9124_v5, %v9126_v37  ;;  %v9127_v52 = vmax.f32 %v20029_v10, %v9111_v41  ;;  %v9112_v62 = vadd.f32 %v9087_v55, %v20030_v6  ;;  %v9089_v17 = vadd.f32 %v9088_v29, %v9015_v4  ;;  %9508 = vmatprep.mubr.bf16.mxu0 %v9172_v46  ;;  %v13051_v29 = vld [vmem:[%s19089_s7 + $0x1b0] sm:$0xff]   ;;  %v13055_v37 = vld [vmem:[%s19089_s7 + $0x1a8] sm:$0xff]   ;;  %v20044_v41 = vld [vmem:[#allocation41_spill] sm:$0xff] }
 0x621   :  { %v9157_v8 = vadd.f32 %v18889_v45, %v9137_v35  ;;  %v9017_v59 = vpop.f32.mrf.mxu0  ;;  %9509 = vmatmul.mubr.bf16.vlgmr.msra.gmra.mxu0 %v9171_v57  ;;  %v8663_v54 = vadd.f32 %v8640_v34, %v20036_v13  ;;  %v20045_v55 = vld [vmem:[#allocation144_spill] sm:$0xff]  ;;  %v13054_v34 = vld [vmem:[%s19089_s7 + $0x138] sm:$0xff]   ;;  %v13057_v57 = vld [vmem:[%s19089_s7 + $0x1e0] sm:$0xff]  }
 0x622   :  { %v9128_v51 = vmax.f32 %v8661_v21, %v9112_v62  ;;  %v9113_v0 = vadd.f32 %v9089_v17, %v20035_v31  ;;  %v9091_v49 = vadd.f32 %v9090_v47, %v9017_v59  ;;  %11823 = vmatpush3.bf16.msra.mxu0 %v13047_v19  ;;  %v9158_v40 = vadd.f32 %v18898_v39, %v9138_v27  ;;  %v20046_v19 = vld [vmem:[#allocation87_spill] sm:$0xff]  ;;  %v20048_v27 = vld [vmem:[#allocation17_spill] sm:$0xff]  ;;  %v9100_v17 = vpop.f32.mrf.mxu1  ;;  %v13066_v18 = vld [vmem:[%s19089_s7 + $0x120] sm:$0xff]  }
 0x623   :  { %v9165_v5 = vmax.f32 %v9157_v8, 0.0  ;;  %v9021_v44 = vpop.f32.mrf.mxu0  ;;  %11824 = vmatprep.subr.bf16.mxu0 %v13049_v3  ;;  %v8648_v46 = vadd.f32 %v20045_v55, %v20044_v41  ;;  %v8650_v21 = vadd.f32 %v20047_v24, %v20046_v19  ;;  %v20049_v6 = vld [vmem:[#allocation153_spill] sm:$0xff]  ;;  %v20051_v8 = vld [vmem:[#allocation75_spill] sm:$0xff]  ;;  %v13079_v19 = vld [vmem:[%s19089_s7 + $0x100] sm:$0xff]  }
 0x624   :  { %v9129_v47 = vmax.f32 %v8662_v63, %v9113_v0  ;;  %v9114_v48 = vadd.f32 %v9091_v49, %v8200_v12  ;;  %v9095_v20 = vadd.f32 %v9094_v43, %v9021_v44  ;;  %v9166_v2 = vmax.f32 %v9158_v40, 0.0  ;;  %v20043_v43 = vld [vmem:[#allocation155_spill] sm:$0xff]  ;;  %v13061_v31 = vld [vmem:[%s19089_s7 + $0x1d8] sm:$0xff]  }
 0x625   :  { %v9023_v42 = vpop.f32.mrf.mxu0  ;;  %v8665_v22 = vadd.f32 %v8646_v14, %v20043_v43  ;;  %v9173_v35 = vpack.c.bf16 %v9165_v5, %v9165_v5  ;;  %v8204_v62 = vadd.f32 %v8187_v28, %v20049_v6  ;;  %v20052_v0 = vld [vmem:[#allocation117_spill] sm:$0xff]  ;;  %v13060_v40 = vld [vmem:[%s19089_s7 + $0x168] sm:$0xff]  }
 0x626   :  { %v18953_v25 = vmax.f32 %v9127_v52, %v9129_v47  ;;  %v9130_v33 = vmax.f32 %v8663_v54, %v9114_v48  ;;  %v9115_v26 = vadd.f32 %v9095_v20, %v20042_v1  ;;  %v9097_v38 = vadd.f32 %v9096_v50, %v9023_v42  ;;  %11825 = vmatpush3.bf16.msra.mxu0 %v13051_v29  ;;  %v13056_v52 = vld [vmem:[%s19089_s7 + $0x170] sm:$0xff]   ;;  %v13063_v14 = vld [vmem:[%s19089_s7 + $0x198] sm:$0xff]   ;;  %v13062_v44 = vld [vmem:[%s19089_s7 + $0x128] sm:$0xff]  }
 0x627   :  { %v9025_v53 = vpop.f32.mrf.mxu0  ;;  %v9174_v30 = vpack.c.bf16 %v9166_v2, %v9166_v2  ;;  %11826 = vmatprep.subr.bf16.mxu0 %v13053_v32  ;;  %v8666_v50 = vadd.f32 %v8648_v46, %v20050_v11  ;;  %v8667_v49 = vadd.f32 %v8650_v21, %v20052_v0  ;;  %v13065_v32 = vld [vmem:[%s19089_s7 + $0x1d0] sm:$0xff]   ;;  %v13064_v48 = vld [vmem:[%s19089_s7 + $0x160] sm:$0xff]   ;;  %v13068_v28 = vld [vmem:[%s19089_s7 + $0x158] sm:$0xff]  }
 0x628   :  { %v9140_v4 = vmax.f32 %v9128_v51, %v9130_v33  ;;  %v9131_v3 = vmax.f32 %v8664_v7, %v9115_v26  ;;  %v9116_v10 = vadd.f32 %v9097_v38, %v20048_v27  ;;  %v9099_v15 = vadd.f32 %v9098_v60, %v9025_v53  ;;  %v13058_v51 = vld [vmem:[%s19089_s7 + $0x130] sm:$0xff]   ;;  %v13070_v42 = vld [vmem:[%s19089_s7 + $0x118] sm:$0xff]   ;;  %v13073_v33 = vld [vmem:[%s19089_s7 + $0x1c0] sm:$0xff]  }
 0x629   :  { %9372 = vmatprep.mubr.bf16.mxu1 %v9174_v30  ;;  %v9027_v12 = vpop.f32.mrf.mxu0  ;;  %v13067_v20 = vld [vmem:[%s19089_s7 + $0x190] sm:$0xff]   ;;  %v13075_v26 = vld [vmem:[%s19089_s7 + $0x180] sm:$0xff]   ;;  %v13076_v43 = vld [vmem:[%s19089_s7 + $0x148] sm:$0xff]   ;;  %v9159_v55 = vadd.f32 %v18889_v45, %v18953_v25  ;;  %v13093_v53 = vmov 0.0  }
 0x62a   :  { %v9132_v16 = vmax.f32 %v8665_v22, %v9116_v10  ;;  %v9101_v63 = vadd.f32 %v9100_v17, %v9027_v12  ;;  %9373 = vmatmul.mubr.bf16.vlgmr.msra.gmra.mxu1 %v9173_v35  ;;  %11827 = vmatpush3.bf16.msra.mxu0 %v13055_v37  ;;  %v9160_v61 = vadd.f32 %v18898_v39, %v9140_v4  ;;  %v13072_v1 = vld [vmem:[%s19089_s7 + $0x150] sm:$0xff]   ;;  %v13077_v41 = vld [vmem:[%s19089_s7 + $0x108] sm:$0xff]   ;;  %v13078_v46 = vld [vmem:[%s19089_s7 + $0x140] sm:$0xff]  }
 0x62b   :  { %v9117_v59 = vadd.f32 %v9099_v15, %v20051_v8  ;;  %11801 = vmatpush3.bf16.msra.mxu1 %v13054_v34  ;;  %11828 = vmatprep.subr.bf16.mxu0 %v13057_v57  ;;  %v13074_v37 = vld [vmem:[%s19089_s7 + $0x110] sm:$0xff]   ;;  %v9167_v24 = vmax.f32 %v9159_v55, 0.0  ;;  %v13082_v30 = vld [vmem:[%s19091_s9 + $0x28] sm:$0xff]   ;;  %v13083_v34 = vld [vmem:[%s19091_s9 + $0x20] sm:$0xff]  }
 0x62c   :  { %v9118_v29 = vadd.f32 %v9101_v63, %v8204_v62  ;;  %11802 = vmatprep.subr.bf16.mxu1 %v13056_v52  ;;  %v9168_v13 = vmax.f32 %v9160_v61, 0.0  ;;  %v13081_v25 = vld [vmem:[%s19091_s9 + $0x30] sm:$0xff]   ;;  %v13084_v57 = vld [vmem:[%s19091_s9 + $0x18] sm:$0xff]   ;;  %v13086_v4 = vld [vmem:[%s19091_s9 + $0x8] sm:$0xff]  }
 0x62d   :  { %v9133_v54 = vmax.f32 %v8666_v50, %v9117_v59  ;;  %v9175_v21 = vpack.c.bf16 %v9167_v24, %v9167_v24  ;;  %v13085_v35 = vld [vmem:[%s19091_s9 + $0x10] sm:$0xff]  }
 0x62e   :  { %v9134_v9 = vmax.f32 %v8667_v49, %v9118_v29  ;;  %11829 = vmatpush3.bf16.msra.mxu0 %v13059_v23  ;;  %v9176_v56 = vpack.c.bf16 %v9168_v13, %v9168_v13 }
 0x62f   :  { %v9141_v5 = vmax.f32 %v9131_v3, %v9133_v54  ;;  %11803 = vmatpush3.bf16.msra.mxu1 %v13058_v51  ;;  %11830 = vmatprep.subr.bf16.mxu0 %v13061_v31  ;;  %v13087_v3 = vld [vmem:[%s19091_s9] sm:$0xff]  }
 0x630   :  { %v9142_v47 = vmax.f32 %v9132_v16, %v9134_v9  ;;  %11804 = vmatprep.subr.bf16.mxu1 %v13060_v40  ;;  %9677 = vmatprep.mubr.bf16.mxu1 %v9176_v56  ;;  %v11573_v40 = vld [vmem:[%s19092_s8] ss:$0 sm:$0xff] }
 0x631   :  { %v9161_v60 = vadd.f32 %v18889_v45, %v9141_v5  ;;  %v13080_v45 = vld [vmem:[%s19091_s9 + $0x38] sm:$0xff]   ;;  %v20053_v5 = vlaneseq }
 0x632   :  { %11831 = vmatpush3.bf16.msra.mxu0 %v13063_v14  ;;  %v9162_v2 = vadd.f32 %v18898_v39, %v9142_v47  ;;  %v13071_v39 = vld [vmem:[%s19089_s7 + $0x188] sm:$0xff]  }
 0x633   :  { %11805 = vmatpush3.bf16.msra.mxu1 %v13062_v44  ;;  %11832 = vmatprep.subr.bf16.mxu0 %v13065_v32  ;;  %v9169_v38 = vmax.f32 %v9161_v60, 0.0  ;;  %v9978_v44 = vand.u32 127, %v20053_v5  ;;  %v11574_v32 = vld [vmem:[%s19093_s10] ss:$0 sm:$0xff] }
 0x634   :  { %11806 = vmatprep.subr.bf16.mxu1 %v13064_v48  ;;  %v9170_v36 = vmax.f32 %v9162_v2, 0.0 }
 0x635   :  { %v9177_v22 = vpack.c.bf16 %v9169_v38, %v9169_v38  ;;  %vm9979_vm2 = vcmp.lt.s32.totalorder %v9978_v44, 10 }
 0x636   :  { %11833 = vmatpush3.bf16.msra.mxu0 %v13067_v20  ;;  %v9178_v7 = vpack.c.bf16 %v9170_v36, %v9170_v36 }
 0x637   :  { %11807 = vmatpush3.bf16.msra.mxu1 %v13066_v18  ;;  %11834 = vmatprep.subr.bf16.mxu0 %v13069_v58 }
 0x638   :  { %11808 = vmatprep.subr.bf16.mxu1 %v13068_v28  ;;  %9847 = vmatprep.mubr.bf16.mxu0 %v9178_v7 }
 0x63a   :  { %11835 = vmatpush3.bf16.msra.mxu0 %v13071_v39 }
 0x63b   :  { %11809 = vmatpush3.bf16.msra.mxu1 %v13070_v42  ;;  %11836 = vmatprep.subr.bf16.mxu0 %v13073_v33 }
 0x63c   :  { %11810 = vmatprep.subr.bf16.mxu1 %v13072_v1 }
 0x63e   :  { %11837 = vmatpush3.bf16.msra.mxu0 %v13075_v26 }
 0x63f   :  { %11811 = vmatpush3.bf16.msra.mxu1 %v13074_v37 }
 0x640   :  { %11812 = vmatprep.subr.bf16.mxu1 %v13076_v43 }
 0x641   :  { %9848 = vmatmul.mubr.bf16.vlgmr.msra.gmra.mxu0 %v9177_v22 }
 0x643   :  { %11813 = vmatpush3.bf16.msra.mxu1 %v13077_v41 }
 0x644   :  { %11814 = vmatprep.subr.bf16.mxu1 %v13078_v46 }
 0x647   :  { %11815 = vmatpush3.bf16.msra.mxu1 %v13079_v19 }
 0x648   :  { %12133 = vmatprep.subr.bf16.mxu1 %v13093_v53 }
 0x64a   :  { %9678 = vmatmul.mubr.bf16.vlgmr.msra.gmra.mxu1 %v9175_v21 }
 0x64b   :  { %12134 = vmatpush3.bf16.msra.mxu1 %v13080_v45  ;;  %12149 = vmatprep.mubr.msk.bf16.mxu1 %vm13094_vm1, %v13093_v53 }
 0x64c   :  { %12135 = vmatprep.subr.bf16.mxu1 %v13093_v53 }
 0x64f   :  { %12136 = vmatpush3.bf16.msra.mxu1 %v13081_v25 }
 0x650   :  { %12137 = vmatprep.subr.bf16.mxu1 %v13093_v53 }
 0x653   :  { %12138 = vmatpush3.bf16.msra.mxu1 %v13082_v30 }
 0x654   :  { %12139 = vmatprep.subr.bf16.mxu1 %v13093_v53 }
 0x657   :  { %12140 = vmatpush3.bf16.msra.mxu1 %v13083_v34 }
 0x658   :  { %12141 = vmatprep.subr.bf16.mxu1 %v13093_v53 }
 0x65b   :  { %12142 = vmatpush3.bf16.msra.mxu1 %v13084_v57 }
 0x65c   :  { %12143 = vmatprep.subr.bf16.mxu1 %v13093_v53 }
 0x65f   :  { %12144 = vmatpush3.bf16.msra.mxu1 %v13085_v35 }
 0x660   :  { %12145 = vmatprep.subr.bf16.mxu1 %v13093_v53 }
 0x663   :  { %12146 = vmatpush3.bf16.msra.mxu1 %v13086_v4 }
 0x664   :  { %12147 = vmatprep.subr.bf16.mxu1 %v13093_v53 }
 0x667   :  { %12148 = vmatpush3.bf16.msra.mxu1 %v13087_v3 }
 0x6e1   :  { %v11794_v27 = vpop.f32.mrf.mxu0 }
 0x6e3   :  { %v11795_v10 = vpop.f32.mrf.mxu0 }
 0x6e4   :  { %v11796_v8 = vadd.f32 %v11795_v10, %v11794_v27 }
 0x6e5   :  { %v11797_v52 = vpop.f32.mrf.mxu0 }
 0x6e7   :  { %v11798_v6 = vpop.f32.mrf.mxu0 }
 0x6ea   :  { %v11772_v62 = vpop.f32.mrf.mxu1 }
 0x6ec   :  { %v11773_v17 = vpop.f32.mrf.mxu1 }
 0x6ed   :  { %v11774_v11 = vadd.f32 %v11773_v17, %v11772_v62 }
 0x6ee   :  { %v11775_v15 = vpop.f32.mrf.mxu1 }
 0x6ef   :  { %v9511_v51 = vadd.f32 %v11796_v8, %v11774_v11 }
 0x6f0   :  { %v11776_v12 = vpop.f32.mrf.mxu1 }
 0x701   :  { %v11838_v16 = vpop.f32.mrf.mxu0 }
 0x703   :  { %v11839_v63 = vpop.f32.mrf.mxu0 }
 0x704   :  { %v11840_v49 = vadd.f32 %v11839_v63, %v11838_v16 }
 0x705   :  { %v11841_v23 = vpop.f32.mrf.mxu0 }
 0x707   :  { %v11842_v61 = vpop.f32.mrf.mxu0 }
 0x70a   :  { %v11816_v50 = vpop.f32.mrf.mxu1 }
 0x70c   :  { %v11817_v59 = vpop.f32.mrf.mxu1 }
 0x70d   :  { %v11818_v31 = vadd.f32 %v11817_v59, %v11816_v50 }
 0x70e   :  { %v11819_v0 = vpop.f32.mrf.mxu1 }
 0x70f   :  { %v9685_v29 = vadd.f32 %v11818_v31, %v9511_v51 }
 0x710   :  { %v11820_v13 = vpop.f32.mrf.mxu1 }
 0x711   :  { %v9855_v54 = vadd.f32 %v11840_v49, %v9685_v29 }
 0x713   :  { %v9863_v9 = vadd.f32 %v11573_v40, %v9855_v54 }
 0x715   :  { %v9864_v56 = vmax.f32 %v9863_v9, 0.0 }
 0x717   :  { %v9865_v14 = vpack.c.bf16 %v9864_v56, %v9864_v56 }
 0x719   :  { %12150 = vmatmul.mubr.bf16.vlgmr.msra.gmra.mxu1 %v9865_v14 }
 0x7d9   :  { %v9971_v47 = vpop.f32.mrf.mxu1 }
 0x7da   :  { %v9972_v48 = vadd.f32 %v11574_v32, %v9971_v47 }
 0x7db   :  { %v12151_v20 = vpop.f32.mrf.mxu1 }
 0x7dc   :  { %v9980_v2 = vsel %vm9979_vm2, %v9972_v48, -1e+30 }
 0x7dd   :  { %9981 = vmax.xlane.f32.xlu0 %v9980_v2  ;;  %v9974_v18 = vpop.f32.mrf.mxu1 }
 0x7df   :  { %v12152_v58 = vpop.f32.mrf.mxu1 }
 0x866   :  { %v9982_v28 = vpop.xlane.xlu0 %9981 }
 0x867   :  { %v9983_v36 = vsub.f32 %v9980_v2, %v9982_v28 }
 0x869   :  { %v9984_v7 = vmul.f32 1.442695, %v9983_v36 }
 0x86b   :  { %13088 = vpow2.f32 %v9984_v7 }
 0x878   :  { %v13089_v39 = vpop.eup %13088 }
 0x879   :  { %9986 = vadd.xlane.f32.xlu0 %v13089_v39 }
 0x902   :  { %v9987_v60 = vpop.xlane.xlu0 %9986 }
 0x903   :  { %13090 = vlog2.f32 %v9987_v60 }
 0x910   :  { %v13091_v42 = vpop.eup %13090 }
 0x911   :  { %v9989_v33 = vmul.f32 0.6931472, %v13091_v42 }
 0x913   :  { %v9990_v1 = vsub.f32 %v9983_v36, %v9989_v33 }
 0x915   :  { %9991 = vst [vmem:[%s19094_s11] sm:$0xff] %v9990_v1 }

</bundles_post_ra>
